<compile_context>
chip_gen: v7x
topology: tpu7x:2x2x1
jax: 0.10.0
libtpu: 0.0.40
codegen_flags: <defaults>
</compile_context>

<pallas_src>
import numpy as np
import jax
import jax.numpy as jnp
from jax import lax
from jax.experimental import pallas as pl
from jax.experimental.pallas import tpu as pltpu

GROUPS = 4
EPS = 1e-5  # nn.GroupNorm default eps


# ---------------------------------------------------------------------------
# In-kernel building blocks (lane-dense layout: rows = (b, h), lanes = (w, c)).
# ---------------------------------------------------------------------------
def _gn_relu_pool(z, B, H, sel2_ref, selT_ref):
    """GroupNorm(4, C, affine=False) + ReLU + 2x2 max-pool on a conv-output slab.

    z        : (B*H, n2) f32 conv output (+bias); columns = [even W | odd W] blocks,
               channel of column j is (j % Cout).
    sel2_ref : (2*n2, 2*GROUPS) f32 block-diagonal 0/1 selector ([sum | sum-of-squares]).
    selT_ref : (GROUPS, n2) f32 group -> column broadcast selector.
    Returns  : (B*(H//2), n2//2) f32 pooled activations.
    """
    n2 = z.shape[1]
    ncol = n2 // 2
    z3 = z.reshape(B, H, n2)

    # Per-(sample, group) statistics via one selector matmul (rides the MXU, stays f32).
    col_sum = jnp.sum(z3, axis=1)                                   # (B, n2)
    col_sq = jnp.sum(z3 * z3, axis=1)                               # (B, n2)
    stacked = jnp.concatenate([col_sum, col_sq], axis=-1)           # (B, 2*n2), 128-aligned
    stats = jnp.dot(stacked, sel2_ref[...], preferred_element_type=jnp.float32)  # (B, 2G)
    inv_cnt = float(GROUPS) / float(H * n2)                         # 1 / (H * W * C/G)
    g_mean = stats[:, :GROUPS] * inv_cnt
    g_sq = stats[:, GROUPS:] * inv_cnt
    # single-pass biased variance (f32) -- matches GroupNorm's biased var
    g_inv = lax.rsqrt(g_sq - g_mean * g_mean + EPS)
    g_shift = -g_mean * g_inv

    # Broadcast group scale/shift back to columns (tiny K=4 matmuls).
    scale = jnp.dot(g_inv, selT_ref[...], preferred_element_type=jnp.float32)    # (B, n2)
    shift = jnp.dot(g_shift, selT_ref[...], preferred_element_type=jnp.float32)

    # normalize (+ReLU) as a single f32 FMA.
    y = jnp.maximum(z3 * scale[:, None, :] + shift[:, None, :], 0.0)

    # MaxPool 2x2 stride 2: W direction == even/odd column-block max, H direction == pairs.
    m = jnp.maximum(y[:, :, :ncol], y[:, :, ncol:])                 # (B, H, ncol)
    m = m.reshape(B * (H // 2), 2, ncol)
    return jnp.max(m, axis=1)                                       # (B*(H//2), ncol)


def _conv_stage(pad_ref, H, m_ref, b_ref):
    """3x3 conv (W zero-padding folded into the banded slabs) as 3 row-shifted matmuls.

    pad_ref : (B, H+2, K) f32 scratch; rows 1..H hold the input, rows 0 and H+1 are zero.
    m_ref   : (3, K, n2) bf16 banded weights, even|odd W-parity fused along n2.
    b_ref   : (1, n2) f32 tiled bias.
    Returns : (B*H, n2) f32 conv output + bias.
    """
    B, _, K = pad_ref.shape
    acc = None
    for dy in range(3):
        a = pad_ref[:, dy:dy + H, :].reshape(B * H, K).astype(jnp.bfloat16)
        t = jnp.dot(a, m_ref[dy], preferred_element_type=jnp.float32)
        acc = t if acc is None else acc + t
    return acc + b_ref[...]


# ---------------------------------------------------------------------------
# Fused whole-network kernel (one batch tile per grid step).
# ---------------------------------------------------------------------------
def _simple_nn_norm_kernel(x_ref, m1, b1, s1, t1, m2, b2, s2, t2,
                           m3, b3, s3, t3, wh1, bh1, wh2, bh2,
                           o_ref, pad2, pad3):
    B, H1, K1 = x_ref.shape

    # Zero the H-padding boundary rows of the conv scratches.  Done every step (tiny)
    # rather than only at program_id==0 so megacore-split grids stay correct.
    zrow = jnp.zeros((B, 1, 256), jnp.float32)
    pad2[:, 0:1, :] = zrow
    pad2[:, 17:18, :] = zrow
    pad3[:, 0:1, :] = zrow
    pad3[:, 9:10, :] = zrow

    # ---- stage 1: conv1 as ONE (B*32, 128) @ (128, 512) bf16 matmul.  The 3 dy taps were
    #      im2col'ed into the input lanes on the host; even/odd W-parity fused along N.
    lhs1 = x_ref[...].reshape(B * H1, K1)                            # bf16
    z = jnp.dot(lhs1, m1[...], preferred_element_type=jnp.float32) + b1[...]
    y = _gn_relu_pool(z, B, H1, s1, t1)                              # (B*16, 256) f32

    # ---- stage 2: conv2 (16 -> 32 ch, 16x16) -> GN -> ReLU -> pool
    pad2[:, 1:17, :] = y.reshape(B, 16, 256)
    z = _conv_stage(pad2, 16, m2, b2)                                # (B*16, 512)
    y = _gn_relu_pool(z, B, 16, s2, t2)                              # (B*8, 256)

    # ---- stage 3: conv3 (32 -> 32 ch, 8x8) -> GN -> ReLU -> pool
    pad3[:, 1:9, :] = y.reshape(B, 8, 256)
    z = _conv_stage(pad3, 8, m3, b3)                                 # (B*8, 256)
    y = _gn_relu_pool(z, B, 8, s3, t3)                               # (B*4, 128)

    # ---- MLP head.  torch.flatten(x, 1)'s NCHW order is folded into wh1; the four 128-lane
    #      slices are written into a (B, 512) value at 128-aligned lane offsets so fc1 is a
    #      single K=512 matmul.  fc outputs are lane-padded (384 / 128) -> unmasked stores.
    act = y.reshape(B, 4, 128)
    act512 = jnp.concatenate([act[:, 0, :], act[:, 1, :], act[:, 2, :], act[:, 3, :]],
                             axis=-1)                                # (B, 512)
    h = jnp.dot(act512.astype(jnp.bfloat16), wh1[...],
                preferred_element_type=jnp.float32) + bh1[...]
    h = jnp.maximum(h, 0.0)
    out = jnp.dot(h.astype(jnp.bfloat16), wh2[...],
                  preferred_element_type=jnp.float32) + bh2[...]
    o_ref[...] = out.astype(o_ref.dtype)


_WEIGHT_NAMES = ("m1", "b1", "s1", "t1", "m2", "b2", "s2", "t2",
                 "m3", "b3", "s3", "t3", "wh1", "bh1", "wh2", "bh2")


def _whole_spec(shape):
    nd = len(shape)
    return pl.BlockSpec(shape, lambda n, _nd=nd: (0,) * _nd)


def forward(x_nchw, kp, *, block_batch=64):
    """x_nchw: (N, C, 32, 32) like the PyTorch module.  Returns (N, 10) f32 logits."""
    N, _, H, W = x_nchw.shape
    # NCHW -> lane-dense (N, H, W*C), then host-side H-im2col (pure layout plumbing) so
    # stage 1 runs as a single full-K matmul inside the kernel.
    x = jnp.transpose(x_nchw, (0, 2, 3, 1)).reshape(N, H, -1).astype(jnp.float32)
    K = x.shape[-1]
    zrow = jnp.zeros((N, 1, K), jnp.float32)
    xm = jnp.concatenate([zrow, x[:, :-1, :]], axis=1)               # row h -> input row h-1
    xp = jnp.concatenate([x[:, 1:, :], zrow], axis=1)                # row h -> input row h+1
    k1p = kp["m1"].shape[0]                                          # lane-padded stage-1 K
    parts = [xm, x, xp]
    if k1p > 3 * K:
        parts.append(jnp.zeros((N, H, k1p - 3 * K), jnp.float32))
    xi = jnp.concatenate(parts, axis=-1).astype(jnp.bfloat16)        # (N, 32, 128) operand

    # Batch tiling: big tiles amortize the ~0.35us/step overhead and fill the matmul M dim;
    # keep >= 2 tiles when possible so the 'parallel' axis can split across v7x's two cores.
    if N <= 8:
        bt = N
    else:
        bt = min(block_batch, (((N + 1) // 2 + 7) // 8) * 8)
    n_tiles = (N + bt - 1) // bt
    n_pad = n_tiles * bt - N
    if n_pad:
        xi = jnp.concatenate([xi, jnp.zeros((n_pad,) + xi.shape[1:], xi.dtype)], axis=0)

    in_specs = [pl.BlockSpec((bt, H, k1p), lambda n: (n, 0, 0))]
    in_specs += [_whole_spec(kp[k].shape) for k in _WEIGHT_NAMES]
    out = pl.pallas_call(
        _simple_nn_norm_kernel,
        out_shape=jax.ShapeDtypeStruct((n_tiles * bt, 128), jnp.float32),
        grid=(n_tiles,),
        in_specs=in_specs,
        out_specs=pl.BlockSpec((bt, 128), lambda n: (n, 0)),
        scratch_shapes=[
            pltpu.VMEM((bt, 18, 256), jnp.float32),   # conv2 H-padded input (16 + 2 rows)
            pltpu.VMEM((bt, 10, 256), jnp.float32),   # conv3 H-padded input (8 + 2 rows)
        ],
        # Weights (~1.8 MB bf16) are grid-invariant; double-buffering them is cheap enough
        # that pipeline_mode=pl.Buffered(1) is unnecessary even under v7x's 64 MiB VMEM.
        compiler_params=pltpu.CompilerParams(
            dimension_semantics=("parallel",),
            vmem_limit_bytes=48 * 1024 * 1024),
    )(xi, *[kp[k] for k in _WEIGHT_NAMES])
    return out[:N, :10]


# ---------------------------------------------------------------------------
# Parameters: PyTorch-layout init + one-time conversion to the kernel layouts.
# ---------------------------------------------------------------------------
def init_params(key, in_channel=1):
    """Deterministic synthetic params with the same shapes as the nn.Module state_dict."""
    ks = jax.random.split(key, 10)

    def conv_w(k, cout, cin):
        return jax.random.normal(k, (cout, cin, 3, 3), jnp.float32) / np.sqrt(cin * 9.0)

    def lin_w(k, fout, fin):
        return jax.random.normal(k, (fout, fin), jnp.float32) / np.sqrt(float(fin))

    return {
        "conv1_w": conv_w(ks[0], 16, in_channel),
        "conv1_b": 0.01 * jax.random.normal(ks[1], (16,), jnp.float32),
        "conv2_w": conv_w(ks[2], 32, 16),
        "conv2_b": 0.01 * jax.random.normal(ks[3], (32,), jnp.float32),
        "conv3_w": conv_w(ks[4], 32, 32),
        "conv3_b": 0.01 * jax.random.normal(ks[5], (32,), jnp.float32),
        "h1_w": lin_w(ks[6], 300, 32 * 4 * 4),
        "h1_b": 0.01 * jax.random.normal(ks[7], (300,), jnp.float32),
        "h2_w": lin_w(ks[8], 10, 300),
        "h2_b": 0.01 * jax.random.normal(ks[9], (10,), jnp.float32),
    }


def prepare_kernel_params(p):
    """Host-side (init-time) conversion of PyTorch-layout params into the kernel layouts:
    banded bf16 conv slabs (even|odd fused along N, stage-1 dy taps stacked along K),
    column-tiled biases, block-diagonal GroupNorm selectors, permuted + lane-padded FC."""

    def banded(w, w_in):
        w = np.asarray(w, np.float32)                    # (Cout, Cin, 3, 3)
        cout, cin = w.shape[0], w.shape[1]
        wh = w_in // 2
        ncol = wh * cout
        m = np.zeros((3, w_in * cin, 2 * ncol), np.float32)
        for dy in range(3):
            for par in range(2):
                for w2 in range(wh):
                    for dx in range(3):
                        wi = 2 * w2 + par + dx - 1       # input w index (pad=1 folded in)
                        if 0 <= wi < w_in:
                            m[dy, wi * cin:(wi + 1) * cin,
                              par * ncol + w2 * cout: par * ncol + (w2 + 1) * cout] \
                                = w[:, :, dy, dx].T
        return m

    def bias_cols(b, wh):
        return jnp.asarray(np.tile(np.asarray(b, np.float32), 2 * wh)[None, :])

    def selectors(cout, wh):
        n2 = 2 * wh * cout
        grp = (np.arange(n2) % cout) // (cout // GROUPS)
        selT = (grp[None, :] == np.arange(GROUPS)[:, None]).astype(np.float32)  # (G, n2)
        sel2 = np.zeros((2 * n2, 2 * GROUPS), np.float32)   # block-diag: [sum | sum-of-sq]
        sel2[:n2, :GROUPS] = selT.T
        sel2[n2:, GROUPS:] = selT.T
        return jnp.asarray(sel2), jnp.asarray(selT)

    # stage 1: stack the 3 dy slabs along K (matches the host H-im2col) + pad K to 128.
    m1 = banded(p["conv1_w"], 32).reshape(-1, 512)
    k1p = ((m1.shape[0] + 127) // 128) * 128
    m1p = np.zeros((k1p, 512), np.float32)
    m1p[:m1.shape[0]] = m1
    s1, t1 = selectors(16, 16)
    s2, t2 = selectors(32, 8)
    s3, t3 = selectors(32, 4)

    # fc1: torch.flatten index = c*16 + h*4 + w  ->  kernel lane h*128 + w*32 + c;
    # output lane-padded 300 -> 384.
    w1 = np.asarray(p["h1_w"], np.float32).reshape(300, 32, 4, 4)
    w1 = np.transpose(w1, (2, 3, 1, 0)).reshape(512, 300)
    wh1 = np.zeros((512, 384), np.float32)
    wh1[:, :300] = w1
    bh1 = np.zeros((1, 384), np.float32)
    bh1[0, :300] = np.asarray(p["h1_b"], np.float32)
    # fc2: K padded 300 -> 384, N padded 10 -> 128 so the output store is lane-dense.
    wh2 = np.zeros((384, 128), np.float32)
    wh2[:300, :10] = np.asarray(p["h2_w"], np.float32).T
    bh2 = np.zeros((1, 128), np.float32)
    bh2[0, :10] = np.asarray(p["h2_b"], np.float32)

    bf = jnp.bfloat16
    return {
        "m1": jnp.asarray(m1p, bf), "b1": bias_cols(p["conv1_b"], 16), "s1": s1, "t1": t1,
        "m2": jnp.asarray(banded(p["conv2_w"], 16), bf), "b2": bias_cols(p["conv2_b"], 8),
        "s2": s2, "t2": t2,
        "m3": jnp.asarray(banded(p["conv3_w"], 8), bf), "b3": bias_cols(p["conv3_b"], 4),
        "s3": s3, "t3": t3,
        "wh1": jnp.asarray(wh1, bf), "bh1": jnp.asarray(bh1),
        "wh2": jnp.asarray(wh2, bf), "bh2": jnp.asarray(bh2),
    }


# ---------------------------------------------------------------------------
# Plain-JAX reference (mirrors the PyTorch module, NCHW, f32) - used only to verify.
# ---------------------------------------------------------------------------
def reference_forward(x_nchw, p):
    def conv(x, w, b):
        y = lax.conv_general_dilated(
            x, w, window_strides=(1, 1), padding=((1, 1), (1, 1)),
            dimension_numbers=("NCHW", "OIHW", "NCHW"))
        return y + b[None, :, None, None]

    def gn(x):
        n, c, h, w = x.shape
        xg = x.reshape(n, GROUPS, (c // GROUPS) * h * w)
        mean = xg.mean(axis=2, keepdims=True)
        var = xg.var(axis=2, keepdims=True)
        return ((xg - mean) / jnp.sqrt(var + EPS)).reshape(n, c, h, w)

    def pool(x):
        return lax.reduce_window(x, -jnp.inf, lax.max,
                                 (1, 1, 2, 2), (1, 1, 2, 2), "VALID")

    a = pool(jnp.maximum(gn(conv(x_nchw, p["conv1_w"], p["conv1_b"])), 0.0))
    a = pool(jnp.maximum(gn(conv(a, p["conv2_w"], p["conv2_b"])), 0.0))
    a = pool(jnp.maximum(gn(conv(a, p["conv3_w"], p["conv3_b"])), 0.0))
    a = a.reshape(a.shape[0], -1)                        # torch.flatten(x, 1) on NCHW
    h = jnp.maximum(a @ p["h1_w"].T + p["h1_b"], 0.0)
    return h @ p["h2_w"].T + p["h2_b"]


if __name__ == "__main__":
    key = jax.random.PRNGKey(0)
    pkey, xkey = jax.random.split(key)
    params = init_params(pkey, in_channel=1)
    kparams = prepare_kernel_params(params)

    x = jax.random.normal(xkey, (2, 1, 32, 32), jnp.float32)   # NCHW, like PyTorch
    out = jax.jit(forward)(x, kparams)
    out = jax.block_until_ready(out)

    ref = reference_forward(x, params)
    err = float(jnp.max(jnp.abs(out - ref)))
    ok = (out.shape == (2, 10)
          and bool(jnp.all(jnp.isfinite(out)))
          and err < 1e-1)                 # bf16 matmul operands vs f32 reference
    if not ok:
        raise RuntimeError(f"kernel/reference mismatch: shape={out.shape} max_abs_err={err}")
    print("KERNEL_OK")
</pallas_src>

<mosaic_0001>
module attributes {stable_mosaic.version = 11 : i64} {
  func.func @_simple_nn_norm_kernel(%arg0: i32, %arg1: memref<2x32x128xbf16, #tpu.memory_space<vmem>>, %arg2: memref<128x512xbf16, #tpu.memory_space<vmem>>, %arg3: memref<1x512xf32, #tpu.memory_space<vmem>>, %arg4: memref<1024x8xf32, #tpu.memory_space<vmem>>, %arg5: memref<4x512xf32, #tpu.memory_space<vmem>>, %arg6: memref<3x256x512xbf16, #tpu.memory_space<vmem>>, %arg7: memref<1x512xf32, #tpu.memory_space<vmem>>, %arg8: memref<1024x8xf32, #tpu.memory_space<vmem>>, %arg9: memref<4x512xf32, #tpu.memory_space<vmem>>, %arg10: memref<3x256x256xbf16, #tpu.memory_space<vmem>>, %arg11: memref<1x256xf32, #tpu.memory_space<vmem>>, %arg12: memref<512x8xf32, #tpu.memory_space<vmem>>, %arg13: memref<4x256xf32, #tpu.memory_space<vmem>>, %arg14: memref<512x384xbf16, #tpu.memory_space<vmem>>, %arg15: memref<1x384xf32, #tpu.memory_space<vmem>>, %arg16: memref<384x128xbf16, #tpu.memory_space<vmem>>, %arg17: memref<1x128xf32, #tpu.memory_space<vmem>>, %arg18: memref<2x128xf32, #tpu.memory_space<vmem>>, %arg19: memref<2x18x256xf32, #tpu.memory_space<vmem>>, %arg20: memref<2x10x256xf32, #tpu.memory_space<vmem>>) attributes {dimension_semantics = [#tpu.dimension_semantics<parallel>], iteration_bounds = array<i64: 1>, scalar_prefetch = 0 : i64, scratch_operands = 2 : i64, tpu.core_type = #tpu.core_type<tc>, window_params = [{transform_indices = @transform_0, window_bounds = array<i64: 2, 32, 128>}, {pipeline_mode = #tpu.pipeline_mode<synchronous>, transform_indices = @transform_1, window_bounds = array<i64: 128, 512>}, {pipeline_mode = #tpu.pipeline_mode<synchronous>, transform_indices = @transform_2, window_bounds = array<i64: 1, 512>}, {pipeline_mode = #tpu.pipeline_mode<synchronous>, transform_indices = @transform_3, window_bounds = array<i64: 1024, 8>}, {pipeline_mode = #tpu.pipeline_mode<synchronous>, transform_indices = @transform_4, window_bounds = array<i64: 4, 512>}, {pipeline_mode = #tpu.pipeline_mode<synchronous>, transform_indices = @transform_5, window_bounds = array<i64: 3, 256, 512>}, {pipeline_mode = #tpu.pipeline_mode<synchronous>, transform_indices = @transform_6, window_bounds = array<i64: 1, 512>}, {pipeline_mode = #tpu.pipeline_mode<synchronous>, transform_indices = @transform_7, window_bounds = array<i64: 1024, 8>}, {pipeline_mode = #tpu.pipeline_mode<synchronous>, transform_indices = @transform_8, window_bounds = array<i64: 4, 512>}, {pipeline_mode = #tpu.pipeline_mode<synchronous>, transform_indices = @transform_9, window_bounds = array<i64: 3, 256, 256>}, {pipeline_mode = #tpu.pipeline_mode<synchronous>, transform_indices = @transform_10, window_bounds = array<i64: 1, 256>}, {pipeline_mode = #tpu.pipeline_mode<synchronous>, transform_indices = @transform_11, window_bounds = array<i64: 512, 8>}, {pipeline_mode = #tpu.pipeline_mode<synchronous>, transform_indices = @transform_12, window_bounds = array<i64: 4, 256>}, {pipeline_mode = #tpu.pipeline_mode<synchronous>, transform_indices = @transform_13, window_bounds = array<i64: 512, 384>}, {pipeline_mode = #tpu.pipeline_mode<synchronous>, transform_indices = @transform_14, window_bounds = array<i64: 1, 384>}, {pipeline_mode = #tpu.pipeline_mode<synchronous>, transform_indices = @transform_15, window_bounds = array<i64: 384, 128>}, {pipeline_mode = #tpu.pipeline_mode<synchronous>, transform_indices = @transform_16, window_bounds = array<i64: 1, 128>}, {transform_indices = @transform_17, window_bounds = array<i64: 2, 128>}]} {
    %cst = arith.constant 0.000000e+00 : f32
    %0 = vector.broadcast %cst : f32 to vector<2x1x256xf32>
    %c0 = arith.constant 0 : index
    %c0_0 = arith.constant 0 : index
    %c0_1 = arith.constant 0 : index
    %1 = vector.load %arg19[%c0, %c0_0, %c0_1] : memref<2x18x256xf32, #tpu.memory_space<vmem>>, vector<2x1x256xf32>
    tpu.vector_store %arg19[%c0, %c0_0, %c0_1], %0 {strides = array<i32>} : memref<2x18x256xf32, #tpu.memory_space<vmem>>, vector<2x1x256xf32>,
    %c0_2 = arith.constant 0 : index
    %c17 = arith.constant 17 : index
    %c0_3 = arith.constant 0 : index
    %2 = vector.load %arg19[%c0_2, %c17, %c0_3] : memref<2x18x256xf32, #tpu.memory_space<vmem>>, vector<2x1x256xf32>
    tpu.vector_store %arg19[%c0_2, %c17, %c0_3], %0 {strides = array<i32>} : memref<2x18x256xf32, #tpu.memory_space<vmem>>, vector<2x1x256xf32>,
    %c0_4 = arith.constant 0 : index
    %c0_5 = arith.constant 0 : index
    %c0_6 = arith.constant 0 : index
    %3 = vector.load %arg20[%c0_4, %c0_5, %c0_6] : memref<2x10x256xf32, #tpu.memory_space<vmem>>, vector<2x1x256xf32>
    tpu.vector_store %arg20[%c0_4, %c0_5, %c0_6], %0 {strides = array<i32>} : memref<2x10x256xf32, #tpu.memory_space<vmem>>, vector<2x1x256xf32>,
    %c0_7 = arith.constant 0 : index
    %c9 = arith.constant 9 : index
    %c0_8 = arith.constant 0 : index
    %4 = vector.load %arg20[%c0_7, %c9, %c0_8] : memref<2x10x256xf32, #tpu.memory_space<vmem>>, vector<2x1x256xf32>
    tpu.vector_store %arg20[%c0_7, %c9, %c0_8], %0 {strides = array<i32>} : memref<2x10x256xf32, #tpu.memory_space<vmem>>, vector<2x1x256xf32>,
    %c0_9 = arith.constant 0 : index
    %c0_10 = arith.constant 0 : index
    %c0_11 = arith.constant 0 : index
    %5 = vector.load %arg1[%c0_9, %c0_10, %c0_11] : memref<2x32x128xbf16, #tpu.memory_space<vmem>>, vector<2x32x128xbf16>
    %6 = vector.shape_cast %5 : vector<2x32x128xbf16> to vector<64x128xbf16>
    %c0_12 = arith.constant 0 : index
    %c0_13 = arith.constant 0 : index
    %7 = vector.load %arg2[%c0_12, %c0_13] : memref<128x512xbf16, #tpu.memory_space<vmem>>, vector<128x512xbf16>
    %cst_14 = arith.constant dense<0.000000e+00> : vector<64x512xf32>
    %8 = tpu.matmul %6, %7, %cst_14 {dimension_numbers = #tpu.dot_dimension_numbers<[1], [0], [0], [1], [0, 0, 1, 1], [], []>} : vector<64x128xbf16>, vector<128x512xbf16>, vector<64x512xf32> -> vector<64x512xf32>
    %c0_15 = arith.constant 0 : index
    %c0_16 = arith.constant 0 : index
    %9 = vector.load %arg3[%c0_15, %c0_16] : memref<1x512xf32, #tpu.memory_space<vmem>>, vector<1x512xf32>
    %10 = vector.broadcast %9 : vector<1x512xf32> to vector<64x512xf32>
    %11 = arith.addf %8, %10 : vector<64x512xf32>
    %12 = vector.shape_cast %11 : vector<64x512xf32> to vector<2x32x512xf32>
    %cst_17 = arith.constant dense<0.000000e+00> : vector<2x512xf32>
    %13 = vector.multi_reduction <add>, %12, %cst_17 [1] : vector<2x32x512xf32> to vector<2x512xf32>
    %14 = arith.mulf %12, %12 : vector<2x32x512xf32>
    %cst_18 = arith.constant dense<0.000000e+00> : vector<2x512xf32>
    %15 = vector.multi_reduction <add>, %14, %cst_18 [1] : vector<2x32x512xf32> to vector<2x512xf32>
    %16 = tpu.concatenate %13, %15 in 1 : vector<2x512xf32>, vector<2x512xf32> -> vector<2x1024xf32>
    %c0_19 = arith.constant 0 : index
    %c0_20 = arith.constant 0 : index
    %17 = vector.load %arg4[%c0_19, %c0_20] : memref<1024x8xf32, #tpu.memory_space<vmem>>, vector<1024x8xf32>
    %cst_21 = arith.constant dense<0.000000e+00> : vector<2x8xf32>
    %18 = tpu.matmul %16, %17, %cst_21 {dimension_numbers = #tpu.dot_dimension_numbers<[1], [0], [0], [1], [0, 0, 1, 1], [], []>} : vector<2x1024xf32>, vector<1024x8xf32>, vector<2x8xf32> -> vector<2x8xf32>
    %19 = vector.extract_strided_slice %18 {offsets = [0, 0], sizes = [2, 4], strides = [1, 1]} : vector<2x8xf32> to vector<2x4xf32>
    %cst_22 = arith.constant 2.44140625E-4 : f32
    %20 = vector.broadcast %cst_22 : f32 to vector<2x4xf32>
    %21 = arith.mulf %19, %20 : vector<2x4xf32>
    %22 = vector.extract_strided_slice %18 {offsets = [0, 4], sizes = [2, 4], strides = [1, 1]} : vector<2x8xf32> to vector<2x4xf32>
    %cst_23 = arith.constant 2.44140625E-4 : f32
    %23 = vector.broadcast %cst_23 : f32 to vector<2x4xf32>
    %24 = arith.mulf %22, %23 : vector<2x4xf32>
    %25 = arith.mulf %21, %21 : vector<2x4xf32>
    %26 = arith.subf %24, %25 : vector<2x4xf32>
    %cst_24 = arith.constant 9.99999974E-6 : f32
    %27 = vector.broadcast %cst_24 : f32 to vector<2x4xf32>
    %28 = arith.addf %26, %27 : vector<2x4xf32>
    %29 = math.rsqrt %28 : vector<2x4xf32>
    %cst_25 = arith.constant 0.000000e+00 : f32
    %30 = vector.broadcast %cst_25 : f32 to vector<2x4xf32>
    %31 = arith.subf %30, %21 : vector<2x4xf32>
    %32 = arith.mulf %31, %29 : vector<2x4xf32>
    %c0_26 = arith.constant 0 : index
    %c0_27 = arith.constant 0 : index
    %33 = vector.load %arg5[%c0_26, %c0_27] : memref<4x512xf32, #tpu.memory_space<vmem>>, vector<4x512xf32>
    %cst_28 = arith.constant dense<0.000000e+00> : vector<2x512xf32>
    %34 = tpu.matmul %29, %33, %cst_28 {dimension_numbers = #tpu.dot_dimension_numbers<[1], [0], [0], [1], [0, 0, 1, 1], [], []>} : vector<2x4xf32>, vector<4x512xf32>, vector<2x512xf32> -> vector<2x512xf32>
    %c0_29 = arith.constant 0 : index
    %c0_30 = arith.constant 0 : index
    %35 = vector.load %arg5[%c0_29, %c0_30] : memref<4x512xf32, #tpu.memory_space<vmem>>, vector<4x512xf32>
    %cst_31 = arith.constant dense<0.000000e+00> : vector<2x512xf32>
    %36 = tpu.matmul %32, %35, %cst_31 {dimension_numbers = #tpu.dot_dimension_numbers<[1], [0], [0], [1], [0, 0, 1, 1], [], []>} : vector<2x4xf32>, vector<4x512xf32>, vector<2x512xf32> -> vector<2x512xf32>
    %37 = vector.shape_cast %34 : vector<2x512xf32> to vector<2x1x512xf32>
    %38 = vector.broadcast %37 : vector<2x1x512xf32> to vector<2x32x512xf32>
    %39 = arith.mulf %12, %38 : vector<2x32x512xf32>
    %40 = vector.shape_cast %36 : vector<2x512xf32> to vector<2x1x512xf32>
    %41 = vector.broadcast %40 : vector<2x1x512xf32> to vector<2x32x512xf32>
    %42 = arith.addf %39, %41 : vector<2x32x512xf32>
    %cst_32 = arith.constant 0.000000e+00 : f32
    %43 = vector.broadcast %cst_32 : f32 to vector<2x32x512xf32>
    %44 = arith.maximumf %42, %43 : vector<2x32x512xf32>
    %45 = vector.extract_strided_slice %44 {offsets = [0, 0, 0], sizes = [2, 32, 256], strides = [1, 1, 1]} : vector<2x32x512xf32> to vector<2x32x256xf32>
    %46 = vector.extract_strided_slice %44 {offsets = [0, 0, 256], sizes = [2, 32, 256], strides = [1, 1, 1]} : vector<2x32x512xf32> to vector<2x32x256xf32>
    %47 = arith.maximumf %45, %46 : vector<2x32x256xf32>
    %48 = vector.shape_cast %47 : vector<2x32x256xf32> to vector<32x2x256xf32>
    %cst_33 = arith.constant dense<0xFF800000> : vector<32x256xf32>
    %49 = vector.multi_reduction <maximumf>, %48, %cst_33 [1] : vector<32x2x256xf32> to vector<32x256xf32>
    %50 = vector.shape_cast %49 : vector<32x256xf32> to vector<2x16x256xf32>
    %c0_34 = arith.constant 0 : index
    %c1 = arith.constant 1 : index
    %c0_35 = arith.constant 0 : index
    %51 = vector.load %arg19[%c0_34, %c1, %c0_35] : memref<2x18x256xf32, #tpu.memory_space<vmem>>, vector<2x16x256xf32>
    tpu.vector_store %arg19[%c0_34, %c1, %c0_35], %50 {strides = array<i32>} : memref<2x18x256xf32, #tpu.memory_space<vmem>>, vector<2x16x256xf32>,
    %c0_36 = arith.constant 0 : index
    %c0_37 = arith.constant 0 : index
    %c0_38 = arith.constant 0 : index
    %52 = vector.load %arg19[%c0_36, %c0_37, %c0_38] : memref<2x18x256xf32, #tpu.memory_space<vmem>>, vector<2x16x256xf32>
    %53 = vector.shape_cast %52 : vector<2x16x256xf32> to vector<32x256xf32>
    %54 = arith.truncf %53 : vector<32x256xf32> to vector<32x256xbf16>
    %c0_39 = arith.constant 0 : index
    %c0_40 = arith.constant 0 : index
    %c0_41 = arith.constant 0 : index
    %55 = vector.load %arg6[%c0_39, %c0_40, %c0_41] : memref<3x256x512xbf16, #tpu.memory_space<vmem>>, vector<1x256x512xbf16>
    %56 = vector.shape_cast %55 : vector<1x256x512xbf16> to vector<256x512xbf16>
    %cst_42 = arith.constant dense<0.000000e+00> : vector<32x512xf32>
    %57 = tpu.matmul %54, %56, %cst_42 {dimension_numbers = #tpu.dot_dimension_numbers<[1], [0], [0], [1], [0, 0, 1, 1], [], []>} : vector<32x256xbf16>, vector<256x512xbf16>, vector<32x512xf32> -> vector<32x512xf32>
    %c0_43 = arith.constant 0 : index
    %c1_44 = arith.constant 1 : index
    %c0_45 = arith.constant 0 : index
    %58 = vector.load %arg19[%c0_43, %c1_44, %c0_45] : memref<2x18x256xf32, #tpu.memory_space<vmem>>, vector<2x16x256xf32>
    %59 = vector.shape_cast %58 : vector<2x16x256xf32> to vector<32x256xf32>
    %60 = arith.truncf %59 : vector<32x256xf32> to vector<32x256xbf16>
    %c1_46 = arith.constant 1 : index
    %c0_47 = arith.constant 0 : index
    %c0_48 = arith.constant 0 : index
    %61 = vector.load %arg6[%c1_46, %c0_47, %c0_48] : memref<3x256x512xbf16, #tpu.memory_space<vmem>>, vector<1x256x512xbf16>
    %62 = vector.shape_cast %61 : vector<1x256x512xbf16> to vector<256x512xbf16>
    %cst_49 = arith.constant dense<0.000000e+00> : vector<32x512xf32>
    %63 = tpu.matmul %60, %62, %cst_49 {dimension_numbers = #tpu.dot_dimension_numbers<[1], [0], [0], [1], [0, 0, 1, 1], [], []>} : vector<32x256xbf16>, vector<256x512xbf16>, vector<32x512xf32> -> vector<32x512xf32>
    %64 = arith.addf %57, %63 : vector<32x512xf32>
    %c0_50 = arith.constant 0 : index
    %c2 = arith.constant 2 : index
    %c0_51 = arith.constant 0 : index
    %65 = vector.load %arg19[%c0_50, %c2, %c0_51] : memref<2x18x256xf32, #tpu.memory_space<vmem>>, vector<2x16x256xf32>
    %66 = vector.shape_cast %65 : vector<2x16x256xf32> to vector<32x256xf32>
    %67 = arith.truncf %66 : vector<32x256xf32> to vector<32x256xbf16>
    %c2_52 = arith.constant 2 : index
    %c0_53 = arith.constant 0 : index
    %c0_54 = arith.constant 0 : index
    %68 = vector.load %arg6[%c2_52, %c0_53, %c0_54] : memref<3x256x512xbf16, #tpu.memory_space<vmem>>, vector<1x256x512xbf16>
    %69 = vector.shape_cast %68 : vector<1x256x512xbf16> to vector<256x512xbf16>
    %cst_55 = arith.constant dense<0.000000e+00> : vector<32x512xf32>
    %70 = tpu.matmul %67, %69, %cst_55 {dimension_numbers = #tpu.dot_dimension_numbers<[1], [0], [0], [1], [0, 0, 1, 1], [], []>} : vector<32x256xbf16>, vector<256x512xbf16>, vector<32x512xf32> -> vector<32x512xf32>
    %71 = arith.addf %64, %70 : vector<32x512xf32>
    %c0_56 = arith.constant 0 : index
    %c0_57 = arith.constant 0 : index
    %72 = vector.load %arg7[%c0_56, %c0_57] : memref<1x512xf32, #tpu.memory_space<vmem>>, vector<1x512xf32>
    %73 = vector.broadcast %72 : vector<1x512xf32> to vector<32x512xf32>
    %74 = arith.addf %71, %73 : vector<32x512xf32>
    %75 = vector.shape_cast %74 : vector<32x512xf32> to vector<2x16x512xf32>
    %cst_58 = arith.constant dense<0.000000e+00> : vector<2x512xf32>
    %76 = vector.multi_reduction <add>, %75, %cst_58 [1] : vector<2x16x512xf32> to vector<2x512xf32>
    %77 = arith.mulf %75, %75 : vector<2x16x512xf32>
    %cst_59 = arith.constant dense<0.000000e+00> : vector<2x512xf32>
    %78 = vector.multi_reduction <add>, %77, %cst_59 [1] : vector<2x16x512xf32> to vector<2x512xf32>
    %79 = tpu.concatenate %76, %78 in 1 : vector<2x512xf32>, vector<2x512xf32> -> vector<2x1024xf32>
    %c0_60 = arith.constant 0 : index
    %c0_61 = arith.constant 0 : index
    %80 = vector.load %arg8[%c0_60, %c0_61] : memref<1024x8xf32, #tpu.memory_space<vmem>>, vector<1024x8xf32>
    %cst_62 = arith.constant dense<0.000000e+00> : vector<2x8xf32>
    %81 = tpu.matmul %79, %80, %cst_62 {dimension_numbers = #tpu.dot_dimension_numbers<[1], [0], [0], [1], [0, 0, 1, 1], [], []>} : vector<2x1024xf32>, vector<1024x8xf32>, vector<2x8xf32> -> vector<2x8xf32>
    %82 = vector.extract_strided_slice %81 {offsets = [0, 0], sizes = [2, 4], strides = [1, 1]} : vector<2x8xf32> to vector<2x4xf32>
    %cst_63 = arith.constant 4.8828125E-4 : f32
    %83 = vector.broadcast %cst_63 : f32 to vector<2x4xf32>
    %84 = arith.mulf %82, %83 : vector<2x4xf32>
    %85 = vector.extract_strided_slice %81 {offsets = [0, 4], sizes = [2, 4], strides = [1, 1]} : vector<2x8xf32> to vector<2x4xf32>
    %cst_64 = arith.constant 4.8828125E-4 : f32
    %86 = vector.broadcast %cst_64 : f32 to vector<2x4xf32>
    %87 = arith.mulf %85, %86 : vector<2x4xf32>
    %88 = arith.mulf %84, %84 : vector<2x4xf32>
    %89 = arith.subf %87, %88 : vector<2x4xf32>
    %cst_65 = arith.constant 9.99999974E-6 : f32
    %90 = vector.broadcast %cst_65 : f32 to vector<2x4xf32>
    %91 = arith.addf %89, %90 : vector<2x4xf32>
    %92 = math.rsqrt %91 : vector<2x4xf32>
    %cst_66 = arith.constant 0.000000e+00 : f32
    %93 = vector.broadcast %cst_66 : f32 to vector<2x4xf32>
    %94 = arith.subf %93, %84 : vector<2x4xf32>
    %95 = arith.mulf %94, %92 : vector<2x4xf32>
    %c0_67 = arith.constant 0 : index
    %c0_68 = arith.constant 0 : index
    %96 = vector.load %arg9[%c0_67, %c0_68] : memref<4x512xf32, #tpu.memory_space<vmem>>, vector<4x512xf32>
    %cst_69 = arith.constant dense<0.000000e+00> : vector<2x512xf32>
    %97 = tpu.matmul %92, %96, %cst_69 {dimension_numbers = #tpu.dot_dimension_numbers<[1], [0], [0], [1], [0, 0, 1, 1], [], []>} : vector<2x4xf32>, vector<4x512xf32>, vector<2x512xf32> -> vector<2x512xf32>
    %c0_70 = arith.constant 0 : index
    %c0_71 = arith.constant 0 : index
    %98 = vector.load %arg9[%c0_70, %c0_71] : memref<4x512xf32, #tpu.memory_space<vmem>>, vector<4x512xf32>
    %cst_72 = arith.constant dense<0.000000e+00> : vector<2x512xf32>
    %99 = tpu.matmul %95, %98, %cst_72 {dimension_numbers = #tpu.dot_dimension_numbers<[1], [0], [0], [1], [0, 0, 1, 1], [], []>} : vector<2x4xf32>, vector<4x512xf32>, vector<2x512xf32> -> vector<2x512xf32>
    %100 = vector.shape_cast %97 : vector<2x512xf32> to vector<2x1x512xf32>
    %101 = vector.broadcast %100 : vector<2x1x512xf32> to vector<2x16x512xf32>
    %102 = arith.mulf %75, %101 : vector<2x16x512xf32>
    %103 = vector.shape_cast %99 : vector<2x512xf32> to vector<2x1x512xf32>
    %104 = vector.broadcast %103 : vector<2x1x512xf32> to vector<2x16x512xf32>
    %105 = arith.addf %102, %104 : vector<2x16x512xf32>
    %cst_73 = arith.constant 0.000000e+00 : f32
    %106 = vector.broadcast %cst_73 : f32 to vector<2x16x512xf32>
    %107 = arith.maximumf %105, %106 : vector<2x16x512xf32>
    %108 = vector.extract_strided_slice %107 {offsets = [0, 0, 0], sizes = [2, 16, 256], strides = [1, 1, 1]} : vector<2x16x512xf32> to vector<2x16x256xf32>
    %109 = vector.extract_strided_slice %107 {offsets = [0, 0, 256], sizes = [2, 16, 256], strides = [1, 1, 1]} : vector<2x16x512xf32> to vector<2x16x256xf32>
    %110 = arith.maximumf %108, %109 : vector<2x16x256xf32>
    %111 = vector.shape_cast %110 : vector<2x16x256xf32> to vector<16x2x256xf32>
    %cst_74 = arith.constant dense<0xFF800000> : vector<16x256xf32>
    %112 = vector.multi_reduction <maximumf>, %111, %cst_74 [1] : vector<16x2x256xf32> to vector<16x256xf32>
    %113 = vector.shape_cast %112 : vector<16x256xf32> to vector<2x8x256xf32>
    %c0_75 = arith.constant 0 : index
    %c1_76 = arith.constant 1 : index
    %c0_77 = arith.constant 0 : index
    %114 = vector.load %arg20[%c0_75, %c1_76, %c0_77] : memref<2x10x256xf32, #tpu.memory_space<vmem>>, vector<2x8x256xf32>
    tpu.vector_store %arg20[%c0_75, %c1_76, %c0_77], %113 {strides = array<i32>} : memref<2x10x256xf32, #tpu.memory_space<vmem>>, vector<2x8x256xf32>,
    %c0_78 = arith.constant 0 : index
    %c0_79 = arith.constant 0 : index
    %c0_80 = arith.constant 0 : index
    %115 = vector.load %arg20[%c0_78, %c0_79, %c0_80] : memref<2x10x256xf32, #tpu.memory_space<vmem>>, vector<2x8x256xf32>
    %116 = vector.shape_cast %115 : vector<2x8x256xf32> to vector<16x256xf32>
    %117 = arith.truncf %116 : vector<16x256xf32> to vector<16x256xbf16>
    %c0_81 = arith.constant 0 : index
    %c0_82 = arith.constant 0 : index
    %c0_83 = arith.constant 0 : index
    %118 = vector.load %arg10[%c0_81, %c0_82, %c0_83] : memref<3x256x256xbf16, #tpu.memory_space<vmem>>, vector<1x256x256xbf16>
    %119 = vector.shape_cast %118 : vector<1x256x256xbf16> to vector<256x256xbf16>
    %cst_84 = arith.constant dense<0.000000e+00> : vector<16x256xf32>
    %120 = tpu.matmul %117, %119, %cst_84 {dimension_numbers = #tpu.dot_dimension_numbers<[1], [0], [0], [1], [0, 0, 1, 1], [], []>} : vector<16x256xbf16>, vector<256x256xbf16>, vector<16x256xf32> -> vector<16x256xf32>
    %c0_85 = arith.constant 0 : index
    %c1_86 = arith.constant 1 : index
    %c0_87 = arith.constant 0 : index
    %121 = vector.load %arg20[%c0_85, %c1_86, %c0_87] : memref<2x10x256xf32, #tpu.memory_space<vmem>>, vector<2x8x256xf32>
    %122 = vector.shape_cast %121 : vector<2x8x256xf32> to vector<16x256xf32>
    %123 = arith.truncf %122 : vector<16x256xf32> to vector<16x256xbf16>
    %c1_88 = arith.constant 1 : index
    %c0_89 = arith.constant 0 : index
    %c0_90 = arith.constant 0 : index
    %124 = vector.load %arg10[%c1_88, %c0_89, %c0_90] : memref<3x256x256xbf16, #tpu.memory_space<vmem>>, vector<1x256x256xbf16>
    %125 = vector.shape_cast %124 : vector<1x256x256xbf16> to vector<256x256xbf16>
    %cst_91 = arith.constant dense<0.000000e+00> : vector<16x256xf32>
    %126 = tpu.matmul %123, %125, %cst_91 {dimension_numbers = #tpu.dot_dimension_numbers<[1], [0], [0], [1], [0, 0, 1, 1], [], []>} : vector<16x256xbf16>, vector<256x256xbf16>, vector<16x256xf32> -> vector<16x256xf32>
    %127 = arith.addf %120, %126 : vector<16x256xf32>
    %c0_92 = arith.constant 0 : index
    %c2_93 = arith.constant 2 : index
    %c0_94 = arith.constant 0 : index
    %128 = vector.load %arg20[%c0_92, %c2_93, %c0_94] : memref<2x10x256xf32, #tpu.memory_space<vmem>>, vector<2x8x256xf32>
    %129 = vector.shape_cast %128 : vector<2x8x256xf32> to vector<16x256xf32>
    %130 = arith.truncf %129 : vector<16x256xf32> to vector<16x256xbf16>
    %c2_95 = arith.constant 2 : index
    %c0_96 = arith.constant 0 : index
    %c0_97 = arith.constant 0 : index
    %131 = vector.load %arg10[%c2_95, %c0_96, %c0_97] : memref<3x256x256xbf16, #tpu.memory_space<vmem>>, vector<1x256x256xbf16>
    %132 = vector.shape_cast %131 : vector<1x256x256xbf16> to vector<256x256xbf16>
    %cst_98 = arith.constant dense<0.000000e+00> : vector<16x256xf32>
    %133 = tpu.matmul %130, %132, %cst_98 {dimension_numbers = #tpu.dot_dimension_numbers<[1], [0], [0], [1], [0, 0, 1, 1], [], []>} : vector<16x256xbf16>, vector<256x256xbf16>, vector<16x256xf32> -> vector<16x256xf32>
    %134 = arith.addf %127, %133 : vector<16x256xf32>
    %c0_99 = arith.constant 0 : index
    %c0_100 = arith.constant 0 : index
    %135 = vector.load %arg11[%c0_99, %c0_100] : memref<1x256xf32, #tpu.memory_space<vmem>>, vector<1x256xf32>
    %136 = vector.broadcast %135 : vector<1x256xf32> to vector<16x256xf32>
    %137 = arith.addf %134, %136 : vector<16x256xf32>
    %138 = vector.shape_cast %137 : vector<16x256xf32> to vector<2x8x256xf32>
    %cst_101 = arith.constant dense<0.000000e+00> : vector<2x256xf32>
    %139 = vector.multi_reduction <add>, %138, %cst_101 [1] : vector<2x8x256xf32> to vector<2x256xf32>
    %140 = arith.mulf %138, %138 : vector<2x8x256xf32>
    %cst_102 = arith.constant dense<0.000000e+00> : vector<2x256xf32>
    %141 = vector.multi_reduction <add>, %140, %cst_102 [1] : vector<2x8x256xf32> to vector<2x256xf32>
    %142 = tpu.concatenate %139, %141 in 1 : vector<2x256xf32>, vector<2x256xf32> -> vector<2x512xf32>
    %c0_103 = arith.constant 0 : index
    %c0_104 = arith.constant 0 : index
    %143 = vector.load %arg12[%c0_103, %c0_104] : memref<512x8xf32, #tpu.memory_space<vmem>>, vector<512x8xf32>
    %cst_105 = arith.constant dense<0.000000e+00> : vector<2x8xf32>
    %144 = tpu.matmul %142, %143, %cst_105 {dimension_numbers = #tpu.dot_dimension_numbers<[1], [0], [0], [1], [0, 0, 1, 1], [], []>} : vector<2x512xf32>, vector<512x8xf32>, vector<2x8xf32> -> vector<2x8xf32>
    %145 = vector.extract_strided_slice %144 {offsets = [0, 0], sizes = [2, 4], strides = [1, 1]} : vector<2x8xf32> to vector<2x4xf32>
    %cst_106 = arith.constant 0.001953125 : f32
    %146 = vector.broadcast %cst_106 : f32 to vector<2x4xf32>
    %147 = arith.mulf %145, %146 : vector<2x4xf32>
    %148 = vector.extract_strided_slice %144 {offsets = [0, 4], sizes = [2, 4], strides = [1, 1]} : vector<2x8xf32> to vector<2x4xf32>
    %cst_107 = arith.constant 0.001953125 : f32
    %149 = vector.broadcast %cst_107 : f32 to vector<2x4xf32>
    %150 = arith.mulf %148, %149 : vector<2x4xf32>
    %151 = arith.mulf %147, %147 : vector<2x4xf32>
    %152 = arith.subf %150, %151 : vector<2x4xf32>
    %cst_108 = arith.constant 9.99999974E-6 : f32
    %153 = vector.broadcast %cst_108 : f32 to vector<2x4xf32>
    %154 = arith.addf %152, %153 : vector<2x4xf32>
    %155 = math.rsqrt %154 : vector<2x4xf32>
    %cst_109 = arith.constant 0.000000e+00 : f32
    %156 = vector.broadcast %cst_109 : f32 to vector<2x4xf32>
    %157 = arith.subf %156, %147 : vector<2x4xf32>
    %158 = arith.mulf %157, %155 : vector<2x4xf32>
    %c0_110 = arith.constant 0 : index
    %c0_111 = arith.constant 0 : index
    %159 = vector.load %arg13[%c0_110, %c0_111] : memref<4x256xf32, #tpu.memory_space<vmem>>, vector<4x256xf32>
    %cst_112 = arith.constant dense<0.000000e+00> : vector<2x256xf32>
    %160 = tpu.matmul %155, %159, %cst_112 {dimension_numbers = #tpu.dot_dimension_numbers<[1], [0], [0], [1], [0, 0, 1, 1], [], []>} : vector<2x4xf32>, vector<4x256xf32>, vector<2x256xf32> -> vector<2x256xf32>
    %c0_113 = arith.constant 0 : index
    %c0_114 = arith.constant 0 : index
    %161 = vector.load %arg13[%c0_113, %c0_114] : memref<4x256xf32, #tpu.memory_space<vmem>>, vector<4x256xf32>
    %cst_115 = arith.constant dense<0.000000e+00> : vector<2x256xf32>
    %162 = tpu.matmul %158, %161, %cst_115 {dimension_numbers = #tpu.dot_dimension_numbers<[1], [0], [0], [1], [0, 0, 1, 1], [], []>} : vector<2x4xf32>, vector<4x256xf32>, vector<2x256xf32> -> vector<2x256xf32>
    %163 = vector.shape_cast %160 : vector<2x256xf32> to vector<2x1x256xf32>
    %164 = vector.broadcast %163 : vector<2x1x256xf32> to vector<2x8x256xf32>
    %165 = arith.mulf %138, %164 : vector<2x8x256xf32>
    %166 = vector.shape_cast %162 : vector<2x256xf32> to vector<2x1x256xf32>
    %167 = vector.broadcast %166 : vector<2x1x256xf32> to vector<2x8x256xf32>
    %168 = arith.addf %165, %167 : vector<2x8x256xf32>
    %cst_116 = arith.constant 0.000000e+00 : f32
    %169 = vector.broadcast %cst_116 : f32 to vector<2x8x256xf32>
    %170 = arith.maximumf %168, %169 : vector<2x8x256xf32>
    %171 = vector.extract_strided_slice %170 {offsets = [0, 0, 0], sizes = [2, 8, 128], strides = [1, 1, 1]} : vector<2x8x256xf32> to vector<2x8x128xf32>
    %172 = vector.extract_strided_slice %170 {offsets = [0, 0, 128], sizes = [2, 8, 128], strides = [1, 1, 1]} : vector<2x8x256xf32> to vector<2x8x128xf32>
    %173 = arith.maximumf %171, %172 : vector<2x8x128xf32>
    %174 = vector.shape_cast %173 : vector<2x8x128xf32> to vector<8x2x128xf32>
    %cst_117 = arith.constant dense<0xFF800000> : vector<8x128xf32>
    %175 = vector.multi_reduction <maximumf>, %174, %cst_117 [1] : vector<8x2x128xf32> to vector<8x128xf32>
    %176 = vector.shape_cast %175 : vector<8x128xf32> to vector<2x4x128xf32>
    %177 = vector.extract_strided_slice %176 {offsets = [0, 0, 0], sizes = [2, 1, 128], strides = [1, 1, 1]} : vector<2x4x128xf32> to vector<2x1x128xf32>
    %178 = vector.shape_cast %177 : vector<2x1x128xf32> to vector<2x128xf32>
    %179 = vector.extract_strided_slice %176 {offsets = [0, 1, 0], sizes = [2, 1, 128], strides = [1, 1, 1]} : vector<2x4x128xf32> to vector<2x1x128xf32>
    %180 = vector.shape_cast %179 : vector<2x1x128xf32> to vector<2x128xf32>
    %181 = vector.extract_strided_slice %176 {offsets = [0, 2, 0], sizes = [2, 1, 128], strides = [1, 1, 1]} : vector<2x4x128xf32> to vector<2x1x128xf32>
    %182 = vector.shape_cast %181 : vector<2x1x128xf32> to vector<2x128xf32>
    %183 = vector.extract_strided_slice %176 {offsets = [0, 3, 0], sizes = [2, 1, 128], strides = [1, 1, 1]} : vector<2x4x128xf32> to vector<2x1x128xf32>
    %184 = vector.shape_cast %183 : vector<2x1x128xf32> to vector<2x128xf32>
    %185 = tpu.concatenate %178, %180, %182, %184 in 1 : vector<2x128xf32>, vector<2x128xf32>, vector<2x128xf32>, vector<2x128xf32> -> vector<2x512xf32>
    %186 = arith.truncf %185 : vector<2x512xf32> to vector<2x512xbf16>
    %c0_118 = arith.constant 0 : index
    %c0_119 = arith.constant 0 : index
    %187 = vector.load %arg14[%c0_118, %c0_119] : memref<512x384xbf16, #tpu.memory_space<vmem>>, vector<512x384xbf16>
    %cst_120 = arith.constant dense<0.000000e+00> : vector<2x384xf32>
    %188 = tpu.matmul %186, %187, %cst_120 {dimension_numbers = #tpu.dot_dimension_numbers<[1], [0], [0], [1], [0, 0, 1, 1], [], []>} : vector<2x512xbf16>, vector<512x384xbf16>, vector<2x384xf32> -> vector<2x384xf32>
    %c0_121 = arith.constant 0 : index
    %c0_122 = arith.constant 0 : index
    %189 = vector.load %arg15[%c0_121, %c0_122] : memref<1x384xf32, #tpu.memory_space<vmem>>, vector<1x384xf32>
    %190 = vector.broadcast %189 : vector<1x384xf32> to vector<2x384xf32>
    %191 = arith.addf %188, %190 : vector<2x384xf32>
    %cst_123 = arith.constant 0.000000e+00 : f32
    %192 = vector.broadcast %cst_123 : f32 to vector<2x384xf32>
    %193 = arith.maximumf %191, %192 : vector<2x384xf32>
    %194 = arith.truncf %193 : vector<2x384xf32> to vector<2x384xbf16>
    %c0_124 = arith.constant 0 : index
    %c0_125 = arith.constant 0 : index
    %195 = vector.load %arg16[%c0_124, %c0_125] : memref<384x128xbf16, #tpu.memory_space<vmem>>, vector<384x128xbf16>
    %cst_126 = arith.constant dense<0.000000e+00> : vector<2x128xf32>
    %196 = tpu.matmul %194, %195, %cst_126 {dimension_numbers = #tpu.dot_dimension_numbers<[1], [0], [0], [1], [0, 0, 1, 1], [], []>} : vector<2x384xbf16>, vector<384x128xbf16>, vector<2x128xf32> -> vector<2x128xf32>
    %c0_127 = arith.constant 0 : index
    %c0_128 = arith.constant 0 : index
    %197 = vector.load %arg17[%c0_127, %c0_128] : memref<1x128xf32, #tpu.memory_space<vmem>>, vector<1x128xf32>
    %198 = vector.broadcast %197 : vector<1x128xf32> to vector<2x128xf32>
    %199 = arith.addf %196, %198 : vector<2x128xf32>
    %c0_129 = arith.constant 0 : index
    %c0_130 = arith.constant 0 : index
    %200 = vector.load %arg18[%c0_129, %c0_130] : memref<2x128xf32, #tpu.memory_space<vmem>>, vector<2x128xf32>
    tpu.vector_store %arg18[%c0_129, %c0_130], %199 {strides = array<i32>} : memref<2x128xf32, #tpu.memory_space<vmem>>, vector<2x128xf32>,
    return
  }
  func.func @transform_0(%arg0: i32) -> (i32, i32, i32) {
    %c0_i32 = arith.constant 0 : i32
    %c0_i32_0 = arith.constant 0 : i32
    %c0_i32_1 = arith.constant 0 : i32
    return %arg0, %c0_i32, %c0_i32_0 : i32, i32, i32
  }
  func.func @transform_1(%arg0: i32) -> (i32, i32) {
    %c0_i32 = arith.constant 0 : i32
    %c0_i32_0 = arith.constant 0 : i32
    %c0_i32_1 = arith.constant 0 : i32
    return %c0_i32, %c0_i32_0 : i32, i32
  }
  func.func @transform_2(%arg0: i32) -> (i32, i32) {
    %c0_i32 = arith.constant 0 : i32
    %c0_i32_0 = arith.constant 0 : i32
    %c0_i32_1 = arith.constant 0 : i32
    return %c0_i32, %c0_i32_0 : i32, i32
  }
  func.func @transform_3(%arg0: i32) -> (i32, i32) {
    %c0_i32 = arith.constant 0 : i32
    %c0_i32_0 = arith.constant 0 : i32
    %c0_i32_1 = arith.constant 0 : i32
    return %c0_i32, %c0_i32_0 : i32, i32
  }
  func.func @transform_4(%arg0: i32) -> (i32, i32) {
    %c0_i32 = arith.constant 0 : i32
    %c0_i32_0 = arith.constant 0 : i32
    %c0_i32_1 = arith.constant 0 : i32
    return %c0_i32, %c0_i32_0 : i32, i32
  }
  func.func @transform_5(%arg0: i32) -> (i32, i32, i32) {
    %c0_i32 = arith.constant 0 : i32
    %c0_i32_0 = arith.constant 0 : i32
    %c0_i32_1 = arith.constant 0 : i32
    %c0_i32_2 = arith.constant 0 : i32
    return %c0_i32, %c0_i32_0, %c0_i32_1 : i32, i32, i32
  }
  func.func @transform_6(%arg0: i32) -> (i32, i32) {
    %c0_i32 = arith.constant 0 : i32
    %c0_i32_0 = arith.constant 0 : i32
    %c0_i32_1 = arith.constant 0 : i32
    return %c0_i32, %c0_i32_0 : i32, i32
  }
  func.func @transform_7(%arg0: i32) -> (i32, i32) {
    %c0_i32 = arith.constant 0 : i32
    %c0_i32_0 = arith.constant 0 : i32
    %c0_i32_1 = arith.constant 0 : i32
    return %c0_i32, %c0_i32_0 : i32, i32
  }
  func.func @transform_8(%arg0: i32) -> (i32, i32) {
    %c0_i32 = arith.constant 0 : i32
    %c0_i32_0 = arith.constant 0 : i32
    %c0_i32_1 = arith.constant 0 : i32
    return %c0_i32, %c0_i32_0 : i32, i32
  }
  func.func @transform_9(%arg0: i32) -> (i32, i32, i32) {
    %c0_i32 = arith.constant 0 : i32
    %c0_i32_0 = arith.constant 0 : i32
    %c0_i32_1 = arith.constant 0 : i32
    %c0_i32_2 = arith.constant 0 : i32
    return %c0_i32, %c0_i32_0, %c0_i32_1 : i32, i32, i32
  }
  func.func @transform_10(%arg0: i32) -> (i32, i32) {
    %c0_i32 = arith.constant 0 : i32
    %c0_i32_0 = arith.constant 0 : i32
    %c0_i32_1 = arith.constant 0 : i32
    return %c0_i32, %c0_i32_0 : i32, i32
  }
  func.func @transform_11(%arg0: i32) -> (i32, i32) {
    %c0_i32 = arith.constant 0 : i32
    %c0_i32_0 = arith.constant 0 : i32
    %c0_i32_1 = arith.constant 0 : i32
    return %c0_i32, %c0_i32_0 : i32, i32
  }
  func.func @transform_12(%arg0: i32) -> (i32, i32) {
    %c0_i32 = arith.constant 0 : i32
    %c0_i32_0 = arith.constant 0 : i32
    %c0_i32_1 = arith.constant 0 : i32
    return %c0_i32, %c0_i32_0 : i32, i32
  }
  func.func @transform_13(%arg0: i32) -> (i32, i32) {
    %c0_i32 = arith.constant 0 : i32
    %c0_i32_0 = arith.constant 0 : i32
    %c0_i32_1 = arith.constant 0 : i32
    return %c0_i32, %c0_i32_0 : i32, i32
  }
  func.func @transform_14(%arg0: i32) -> (i32, i32) {
    %c0_i32 = arith.constant 0 : i32
    %c0_i32_0 = arith.constant 0 : i32
    %c0_i32_1 = arith.constant 0 : i32
    return %c0_i32, %c0_i32_0 : i32, i32
  }
  func.func @transform_15(%arg0: i32) -> (i32, i32) {
    %c0_i32 = arith.constant 0 : i32
    %c0_i32_0 = arith.constant 0 : i32
    %c0_i32_1 = arith.constant 0 : i32
    return %c0_i32, %c0_i32_0 : i32, i32
  }
  func.func @transform_16(%arg0: i32) -> (i32, i32) {
    %c0_i32 = arith.constant 0 : i32
    %c0_i32_0 = arith.constant 0 : i32
    %c0_i32_1 = arith.constant 0 : i32
    return %c0_i32, %c0_i32_0 : i32, i32
  }
  func.func @transform_17(%arg0: i32) -> (i32, i32) {
    %c0_i32 = arith.constant 0 : i32
    %c0_i32_0 = arith.constant 0 : i32
    return %arg0, %c0_i32 : i32, i32
  }
}

</mosaic_0001>

<bundles_post_ra>
// kernel: forward.1
= control target key start
LH: loop header
LB: loop body
LE: loop exit
PB: predicated region body
PF: predicated region fallthrough
CT: control target
= control target key end

     0   :  { %s15299_s0 = inlined_call_operand.vmem [shape: bf16[2,32,128], index: 0, kind: input, shape index: {}]   ;;  %s15300_s1 = inlined_call_operand.hbm [shape: bf16[128,512], index: 1, kind: input, shape index: {}]   ;;  %s15301_s2 = inlined_call_operand.hbm [shape: f32[1,512], index: 2, kind: input, shape index: {}]   ;;  %s15302_s3 = inlined_call_operand.vmem [shape: f32[1024,8], index: 3, kind: input, shape index: {}]   ;;  %s15303_s4 = inlined_call_operand.hbm [shape: f32[4,512], index: 4, kind: input, shape index: {}]   ;;  %s15304_s5 = inlined_call_operand.vmem [shape: bf16[3,256,512], index: 5, kind: input, shape index: {}]   ;;  %s15305_s6 = inlined_call_operand.hbm [shape: f32[1,512], index: 6, kind: input, shape index: {}]   ;;  %s15306_s7 = inlined_call_operand.vmem [shape: f32[1024,8], index: 7, kind: input, shape index: {}]   ;;  %s15307_s8 = inlined_call_operand.hbm [shape: f32[4,512], index: 8, kind: input, shape index: {}]   ;;  %s15308_s9 = inlined_call_operand.vmem [shape: bf16[3,256,256], index: 9, kind: input, shape index: {}]   ;;  %s15309_s10 = inlined_call_operand.vmem [shape: f32[1,256], index: 10, kind: input, shape index: {}]   ;;  %s15310_s11 = inlined_call_operand.vmem [shape: f32[512,8], index: 11, kind: input, shape index: {}]   ;;  %s15311_s12 = inlined_call_operand.vmem [shape: f32[4,256], index: 12, kind: input, shape index: {}]   ;;  %s15312_s13 = inlined_call_operand.vmem [shape: bf16[512,384], index: 13, kind: input, shape index: {}]   ;;  %s15313_s14 = inlined_call_operand.hbm [shape: f32[1,384], index: 14, kind: input, shape index: {}]   ;;  %s15314_s15 = inlined_call_operand.hbm [shape: bf16[384,128], index: 15, kind: input, shape index: {}]   ;;  %s15315_s16 = inlined_call_operand.hbm [shape: f32[1,128], index: 16, kind: input, shape index: {}]   ;;  %s15316_s17 = inlined_call_operand.hbm [shape: f32[2,128], index: 17, kind: output, shape index: {}]  }
   0x1   :  { %15385 = sst [smem:[#allocation61_spill]] %s15299_s0 }
   0x2   :  { %15386 = sst [smem:[#allocation62_spill]] %s15300_s1 }
   0x3   :  { %22 = vsyncpa [#allocation5], 0 }
   0x4   :  { %23 = vsyncpa [#allocation8], 0 }
   0x5   :  { %24 = vsyncpa [#allocation11], 0 }
   0x6   :  { %25 = vsyncpa [#allocation14], 0 }
   0x7   :  { %26 = vsyncpa [#allocation17], 0 }
   0x8   :  { %27 = vsyncpa [#allocation6], 0  ;;  %s11063_s24 = smov [#allocation7]   ;;  %s11064_s26 = smov [#allocation10]  }
   0x9   :  { %s48_s25 = sshll.u32 %s11063_s24, 4  ;;  %s72_s27 = sshll.u32 %s11064_s26, 4  ;;  %s49_s25 = int_to_ptr.vmem [resolvable:$true] %s48_s25  ;;  %s73_s27 = int_to_ptr.vmem [resolvable:$true] %s72_s27 }
   0xa   :  { %s10853_s0 = scalar_lea.hbm %s15301_s2, 64 }
   0xb   :  { %p10854_p0 = scmp.ne.s32.totalorder %s15301_s2, %s10853_s0  ;;  %p10857_p1 = scmp.lt.u32.totalorder %s10853_s0, %s15301_s2 }
   0xd   :  { %p10859_p2 = pnand %p10857_p1, %p10854_p0 }
   0xf   :  { %10862 = shalt.err (!%p10859_p2)
}
  0x10   :  { %s10863_s20 = scalar_lea.vmem %s49_s25, 64  ;;  %p10868_p4 = scmp.lt.s32.totalorder %s49_s25, %s49_s25 }
  0x11   :  { %p10864_p3 = scmp.ne.s32.totalorder %s49_s25, %s10863_s20  ;;  %p10869_p5 = scmp.lt.s32.totalorder %s10863_s20, %s10863_s20 }
  0x13   :  { %p10870_p6 = por %p10869_p5, %p10868_p4 }
  0x15   :  { %p10871_p7 = pnand %p10870_p6, %p10864_p3 }
  0x17   :  { %10874 = shalt.err (!%p10871_p7)
}
  0x18   :  { %51 = dma.hbm_to_vmem [thread:$0]  %s15301_s2, 64, %s49_s25, [#allocation8]  }
  0x19   :  { %s10875_s26 = scalar_lea.hbm %s15305_s6, 64 }
  0x1a   :  { %p10876_p8 = scmp.ne.s32.totalorder %s15305_s6, %s10875_s26  ;;  %p10879_p9 = scmp.lt.u32.totalorder %s10875_s26, %s15305_s6 }
  0x1c   :  { %p10881_p10 = pnand %p10879_p9, %p10876_p8 }
  0x1e   :  { %10884 = shalt.err (!%p10881_p10)
}
  0x1f   :  { %s10885_s18 = scalar_lea.vmem %s73_s27, 64  ;;  %p10890_p12 = scmp.lt.s32.totalorder %s73_s27, %s73_s27 }
  0x20   :  { %p10886_p11 = scmp.ne.s32.totalorder %s73_s27, %s10885_s18  ;;  %p10891_p13 = scmp.lt.s32.totalorder %s10885_s18, %s10885_s18 }
  0x22   :  { %p10892_p0 = por %p10891_p13, %p10890_p12 }
  0x24   :  { %p10893_p1 = pnand %p10892_p0, %p10886_p11 }
  0x26   :  { %10896 = shalt.err (!%p10893_p1)
}
  0x27   :  { %75 = dma.hbm_to_vmem [thread:$0]  %s15305_s6, 64, %s73_s27, [#allocation11]  }
  0x28   :  { %s11065_s19 = smov [#allocation13]   ;;  %s11066_s20 = smov [#allocation4]  }
  0x29   :  { %s104_s1 = sshll.u32 %s11065_s19, 4  ;;  %s35_s21 = sshll.u32 %s11066_s20, 4  ;;  %s105_s1 = int_to_ptr.vmem [resolvable:$true] %s104_s1  ;;  %s11196_s21 = int_to_ptr.vmem [resolvable:$true] %s35_s21 }
  0x2a   :  { %s10897_s24 = scalar_lea.hbm %s15313_s14, 48 }
  0x2b   :  { %p10898_p2 = scmp.ne.s32.totalorder %s15313_s14, %s10897_s24  ;;  %p10901_p3 = scmp.lt.u32.totalorder %s10897_s24, %s15313_s14 }
  0x2d   :  { %p10903_p4 = pnand %p10901_p3, %p10898_p2 }
  0x2f   :  { %10906 = shalt.err (!%p10903_p4)
}
  0x30   :  { %s10907_s6 = scalar_lea.vmem %s105_s1, 48  ;;  %s10911_s27 = scalar_lea.vmem %s105_s1, 64 }
  0x31   :  { %p10908_p5 = scmp.ne.s32.totalorder %s105_s1, %s10907_s6  ;;  %p10912_p6 = scmp.lt.s32.totalorder %s105_s1, %s105_s1 }
  0x32   :  { %p10913_p7 = scmp.lt.s32.totalorder %s10911_s27, %s10907_s6 }
  0x34   :  { %p10914_p8 = por %p10913_p7, %p10912_p6 }
  0x36   :  { %p10915_p9 = pnand %p10914_p8, %p10908_p5 }
  0x38   :  { %10918 = shalt.err (!%p10915_p9)
}
  0x39   :  { %107 = dma.hbm_to_vmem [thread:$0]  %s15313_s14, 48, %s105_s1, [#allocation14]  }
  0x3a   :  { %s15387_s19 = sld [smem:[#allocation62_spill]] }
  0x40   :  { %s10919_s20 = scalar_lea.hbm %s15387_s19, 4096 }
  0x41   :  { %p10920_p10 = scmp.ne.s32.totalorder %s15387_s19, %s10919_s20  ;;  %p10923_p11 = scmp.lt.u32.totalorder %s10919_s20, %s15387_s19 }
  0x43   :  { %p10925_p12 = pnand %p10923_p11, %p10920_p10 }
  0x45   :  { %10928 = shalt.err (!%p10925_p12)
}
  0x46   :  { %s10929_s28 = scalar_lea.vmem %s11196_s21, 4096  ;;  %p10934_p0 = scmp.lt.s32.totalorder %s11196_s21, %s11196_s21 }
  0x47   :  { %p10930_p13 = scmp.ne.s32.totalorder %s11196_s21, %s10929_s28  ;;  %p10935_p1 = scmp.lt.s32.totalorder %s10929_s28, %s10929_s28 }
  0x49   :  { %p10936_p2 = por %p10935_p1, %p10934_p0 }
  0x4b   :  { %p10937_p3 = pnand %p10936_p2, %p10930_p13 }
  0x4d   :  { %10940 = shalt.err (!%p10937_p3)
}
  0x4e   :  { %s11067_s14 = smov 256   ;;  %s11068_s1 = smov 16  }
  0x4f   :  { %41 = dma.hbm_to_vmem [thread:$0]  %s15387_s19, 4096, %s11196_s21, [#allocation5], %s11067_s14, %s11067_s14, %s11068_s1  }
  0x50   :  { %s11069_s6 = smov [#allocation9]   ;;  %s11070_s30 = smov [#allocation12]  }
  0x51   :  { %s60_s27 = sshll.u32 %s11069_s6, 4  ;;  %s84_s18 = sshll.u32 %s11070_s30, 4  ;;  %s61_s27 = int_to_ptr.vmem [resolvable:$true] %s60_s27  ;;  %s85_s18 = int_to_ptr.vmem [resolvable:$true] %s84_s18 }
  0x52   :  { %s10941_s20 = scalar_lea.hbm %s15303_s4, 256 }
  0x53   :  { %p10942_p4 = scmp.ne.s32.totalorder %s15303_s4, %s10941_s20  ;;  %p10945_p5 = scmp.lt.u32.totalorder %s10941_s20, %s15303_s4 }
  0x55   :  { %p10947_p6 = pnand %p10945_p5, %p10942_p4 }
  0x57   :  { %10950 = shalt.err (!%p10947_p6)
}
  0x58   :  { %s10951_s21 = scalar_lea.vmem %s61_s27, 256  ;;  %p10956_p8 = scmp.lt.s32.totalorder %s61_s27, %s61_s27 }
  0x59   :  { %p10952_p7 = scmp.ne.s32.totalorder %s61_s27, %s10951_s21  ;;  %p10957_p9 = scmp.lt.s32.totalorder %s10951_s21, %s10951_s21 }
  0x5b   :  { %p10958_p10 = por %p10957_p9, %p10956_p8 }
  0x5d   :  { %p10959_p11 = pnand %p10958_p10, %p10952_p7 }
  0x5f   :  { %10962 = shalt.err (!%p10959_p11)
}
  0x60   :  { %63 = dma.hbm_to_vmem [thread:$0]  %s15303_s4, 256, %s61_s27, [#allocation8]  }
  0x61   :  { %s10963_s29 = scalar_lea.hbm %s15307_s8, 256 }
  0x62   :  { %p10964_p12 = scmp.ne.s32.totalorder %s15307_s8, %s10963_s29  ;;  %p10967_p13 = scmp.lt.u32.totalorder %s10963_s29, %s15307_s8 }
  0x64   :  { %p10969_p0 = pnand %p10967_p13, %p10964_p12 }
  0x66   :  { %10972 = shalt.err (!%p10969_p0)
}
  0x67   :  { %s10973_s25 = scalar_lea.vmem %s85_s18, 256  ;;  %p10978_p2 = scmp.lt.s32.totalorder %s85_s18, %s85_s18 }
  0x68   :  { %p10974_p1 = scmp.ne.s32.totalorder %s85_s18, %s10973_s25  ;;  %p10979_p3 = scmp.lt.s32.totalorder %s10973_s25, %s10973_s25 }
  0x6a   :  { %p10980_p4 = por %p10979_p3, %p10978_p2 }
  0x6c   :  { %p10981_p5 = pnand %p10980_p4, %p10974_p1 }
  0x6e   :  { %10984 = shalt.err (!%p10981_p5)
}
  0x6f   :  { %87 = dma.hbm_to_vmem [thread:$0]  %s15307_s8, 256, %s85_s18, [#allocation11]  }
  0x70   :  { %s11071_s20 = smov [#allocation15]   ;;  %s10985_s26 = scalar_lea.hbm %s15314_s15, 3072 }
  0x71   :  { %s113_s22 = sshll.u32 %s11071_s20, 4  ;;  %p10986_p6 = scmp.ne.s32.totalorder %s15314_s15, %s10985_s26  ;;  %s114_s22 = int_to_ptr.vmem [resolvable:$true] %s113_s22 }
  0x72   :  { %p10989_p7 = scmp.lt.u32.totalorder %s10985_s26, %s15314_s15 }
  0x74   :  { %p10991_p8 = pnand %p10989_p7, %p10986_p6 }
  0x76   :  { %10994 = shalt.err (!%p10991_p8)
}
  0x77   :  { %s10995_s1 = scalar_lea.vmem %s114_s22, 3072  ;;  %p11000_p10 = scmp.lt.s32.totalorder %s114_s22, %s114_s22 }
  0x78   :  { %p10996_p9 = scmp.ne.s32.totalorder %s114_s22, %s10995_s1  ;;  %p11001_p11 = scmp.lt.s32.totalorder %s10995_s1, %s10995_s1 }
  0x7a   :  { %p11002_p12 = por %p11001_p11, %p11000_p10 }
  0x7c   :  { %p11003_p13 = pnand %p11002_p12, %p10996_p9 }
  0x7e   :  { %11006 = shalt.err (!%p11003_p13)
}
  0x7f   :  { %s11072_s8 = smov 64   ;;  %s11073_s18 = smov 4  }
  0x80   :  { %119 = dma.hbm_to_vmem [thread:$0]  %s15314_s15, 3072, %s114_s22, [#allocation14], %s11072_s8, %s11072_s8, %s11073_s18  }
  0x81   :  { %s11074_s6 = smov [#allocation16]   ;;  %s11007_s4 = scalar_lea.hbm %s15315_s16, 16 }
  0x82   :  { %s126_s30 = sshll.u32 %s11074_s6, 4  ;;  %p11008_p0 = scmp.ne.s32.totalorder %s15315_s16, %s11007_s4  ;;  %s127_s30 = int_to_ptr.vmem [resolvable:$true] %s126_s30 }
  0x83   :  { %p11011_p1 = scmp.lt.u32.totalorder %s11007_s4, %s15315_s16 }
  0x85   :  { %p11013_p2 = pnand %p11011_p1, %p11008_p0 }
  0x87   :  { %11016 = shalt.err (!%p11013_p2)
}
  0x88   :  { %s11017_s26 = scalar_lea.vmem %s127_s30, 16  ;;  %s11021_s15 = scalar_lea.vmem %s127_s30, 32 }
  0x89   :  { %p11018_p3 = scmp.ne.s32.totalorder %s127_s30, %s11017_s26  ;;  %p11022_p4 = scmp.lt.s32.totalorder %s127_s30, %s127_s30 }
  0x8a   :  { %p11023_p5 = scmp.lt.s32.totalorder %s11021_s15, %s11017_s26 }
  0x8c   :  { %p11024_p6 = por %p11023_p5, %p11022_p4 }
  0x8e   :  { %p11025_p7 = pnand %p11024_p6, %p11018_p3 }
  0x90   :  { %11028 = shalt.err (!%p11025_p7)
}
  0x91   :  { %129 = dma.hbm_to_vmem [thread:$0]  %s15315_s16, 16, %s127_s30, [#allocation17]  }
  0x92   :  { %11051 = dma.done.wait [#allocation5], 4096  }
  0x93   :  { %11052 = vsyncadd [#allocation5], 4294963200 }
  0x94   :  { %11053 = dma.done.wait [#allocation8], 320  }
  0x95   :  { %11054 = vsyncadd [#allocation8], 4294966976 }
  0x96   :  { %11055 = dma.done.wait [#allocation11], 320  }
  0x97   :  { %11056 = vsyncadd [#allocation11], 4294966976 }
  0x98   :  { %11057 = dma.done.wait [#allocation14], 3120  }
  0x99   :  { %11058 = vsyncadd [#allocation14], 4294964176 }
  0x9a   :  { %11059 = dma.done.wait [#allocation17], 16  }
  0x9b   :  { %11060 = vsyncadd [#allocation17], 4294967280  ;;  %v11075_v0 = vmov 0   ;;  %v10206_v1 = vld [vmem:[#allocation4 + $0x4] ss:$16 sps:$4 sm:$0xff]   ;;  %s15388_s28 = sld [smem:[#allocation61_spill]] }
  0x9c   :  { %459 = vmatprep.mubr.bf16.mxu0 %v11075_v0  ;;  %532 = vmatprep.mubr.bf16.mxu1 %v11075_v0  ;;  %v10208_v2 = vld [vmem:[#allocation4 + $0xc] ss:$16 sps:$4 sm:$0xff]   ;;  %v10210_v3 = vld [vmem:[#allocation4] ss:$16 sps:$4 sm:$0xff]   ;;  %v10211_v4 = vld [vmem:[#allocation4 + $0x8] ss:$16 sps:$4 sm:$0xff]  }
  0x9d   :  { %427 = vmatprep.subr.bf16.mxu0 %v10206_v1  ;;  %500 = vmatprep.subr.bf16.mxu1 %v10208_v2  ;;  %v10212_v5 = vld [vmem:[#allocation4 + $0x24] ss:$16 sps:$4 sm:$0xff]   ;;  %v10214_v6 = vld [vmem:[#allocation4 + $0x2c] ss:$16 sps:$4 sm:$0xff]   ;;  %v10216_v7 = vld [vmem:[#allocation4 + $0x20] ss:$16 sps:$4 sm:$0xff]  }
  0x9e   :  { %428 = vmatpush1.bf16.msra.mxu0 %v10210_v3  ;;  %501 = vmatpush1.bf16.msra.mxu1 %v10211_v4  ;;  %v10217_v8 = vld [vmem:[#allocation4 + $0x28] ss:$16 sps:$4 sm:$0xff]   ;;  %v10218_v9 = vld [vmem:[#allocation4 + $0x44] ss:$16 sps:$4 sm:$0xff]   ;;  %v10220_v10 = vld [vmem:[#allocation4 + $0x4c] ss:$16 sps:$4 sm:$0xff]  }
  0x9f   :  { %429 = vmatprep.subr.bf16.mxu0 %v10212_v5  ;;  %502 = vmatprep.subr.bf16.mxu1 %v10214_v6  ;;  %v10222_v11 = vld [vmem:[#allocation4 + $0x40] ss:$16 sps:$4 sm:$0xff]   ;;  %v10223_v12 = vld [vmem:[#allocation4 + $0x48] ss:$16 sps:$4 sm:$0xff]   ;;  %v10224_v13 = vld [vmem:[#allocation4 + $0x64] ss:$16 sps:$4 sm:$0xff]  }
  0xa0   :  { %v10226_v14 = vld [vmem:[#allocation4 + $0x6c] ss:$16 sps:$4 sm:$0xff]   ;;  %v10228_v15 = vld [vmem:[#allocation4 + $0x60] ss:$16 sps:$4 sm:$0xff]   ;;  %v10229_v16 = vld [vmem:[#allocation4 + $0x68] ss:$16 sps:$4 sm:$0xff]  }
  0xa1   :  { %v10230_v17 = vld [vmem:[#allocation4 + $0x84] ss:$16 sps:$4 sm:$0xff]   ;;  %v10232_v18 = vld [vmem:[#allocation4 + $0x8c] ss:$16 sps:$4 sm:$0xff]   ;;  %v10234_v19 = vld [vmem:[#allocation4 + $0x80] ss:$16 sps:$4 sm:$0xff]  }
  0xa2   :  { %430 = vmatpush1.bf16.msra.mxu0 %v10216_v7  ;;  %503 = vmatpush1.bf16.msra.mxu1 %v10217_v8  ;;  %v10235_v20 = vld [vmem:[#allocation4 + $0x88] ss:$16 sps:$4 sm:$0xff]   ;;  %v10236_v21 = vld [vmem:[#allocation4 + $0xa4] ss:$16 sps:$4 sm:$0xff]   ;;  %v10238_v22 = vld [vmem:[#allocation4 + $0xac] ss:$16 sps:$4 sm:$0xff]  }
  0xa3   :  { %431 = vmatprep.subr.bf16.mxu0 %v10218_v9  ;;  %504 = vmatprep.subr.bf16.mxu1 %v10220_v10  ;;  %v10240_v23 = vld [vmem:[#allocation4 + $0xa0] ss:$16 sps:$4 sm:$0xff]   ;;  %v10241_v24 = vld [vmem:[#allocation4 + $0xa8] ss:$16 sps:$4 sm:$0xff]   ;;  %v10242_v25 = vld [vmem:[#allocation4 + $0xc4] ss:$16 sps:$4 sm:$0xff]  }
  0xa4   :  { %v10244_v26 = vld [vmem:[#allocation4 + $0xcc] ss:$16 sps:$4 sm:$0xff]   ;;  %v10246_v27 = vld [vmem:[#allocation4 + $0xc0] ss:$16 sps:$4 sm:$0xff]   ;;  %v10247_v28 = vld [vmem:[#allocation4 + $0xc8] ss:$16 sps:$4 sm:$0xff]  }
  0xa5   :  { %v10248_v29 = vld [vmem:[#allocation4 + $0xe4] ss:$16 sps:$4 sm:$0xff]   ;;  %v10250_v30 = vld [vmem:[#allocation4 + $0xec] ss:$16 sps:$4 sm:$0xff]   ;;  %v10252_v31 = vld [vmem:[#allocation4 + $0xe0] ss:$16 sps:$4 sm:$0xff]  }
  0xa6   :  { %432 = vmatpush1.bf16.msra.mxu0 %v10222_v11  ;;  %505 = vmatpush1.bf16.msra.mxu1 %v10223_v12  ;;  %v10253_v32 = vld [vmem:[#allocation4 + $0xe8] ss:$16 sps:$4 sm:$0xff]   ;;  %v10254_v33 = vld [vmem:[%s15388_s28] sm:$0xff]   ;;  %v10256_v35 = vld [vmem:[%s15388_s28 + $0x10] sm:$0xff]   ;;  %vm757_vm0 = vcmask 1041409   ;;  %vm1214_vm1 = vcmask 1043456  }
  0xa7   :  { %433 = vmatprep.subr.bf16.mxu0 %v10224_v13  ;;  %506 = vmatprep.subr.bf16.mxu1 %v10226_v14  ;;  %v10255_v34 = vld [vmem:[%s15388_s28 + $0x8] sm:$0xff]   ;;  %v10257_v36 = vld [vmem:[%s15388_s28 + $0x18] sm:$0xff]   ;;  %v798_v37 = vld [vmem:[%s15302_s3 + $0x80] sm:$0xff]  ;;  %vm1211_vm2 = vcmask 31744   ;;  %vm2254_vm3 = vcmask 1041408   ;;  %vm2767_vm4 = vcmask 1042434  }
  0xa8   :  { %v799_v38 = vld [vmem:[%s15302_s3 + $0x88] sm:$0xff]  ;;  %v830_v39 = vld [vmem:[%s15302_s3 + $0x180] sm:$0xff]  ;;  %v800_v49 = vld [vmem:[%s15302_s3 + $0x90] sm:$0xff]  ;;  %vm2769_vm5 = vcmask 1043459   ;;  %vm2771_vm6 = vcmask 1044484   ;;  %vm2773_vm7 = vcmask 1045509  }
  0xa9   :  { %v9821_v40 = vpack.c.bf16 %v799_v38, %v798_v37  ;;  %v831_v41 = vld [vmem:[%s15302_s3 + $0x188] sm:$0xff]  ;;  %v782_v42 = vld [vmem:[%s15302_s3] sm:$0xff]  ;;  %v801_v50 = vld [vmem:[%s15302_s3 + $0x98] sm:$0xff]  ;;  %vm2775_vm8 = vcmask 1046534   ;;  %vm2777_vm9 = vcmask 1047559   ;;  %vm2945_vm11 = vcmask 1046528  }
  0xaa   :  { %434 = vmatpush1.bf16.msra.mxu0 %v10228_v15  ;;  %507 = vmatpush1.bf16.msra.mxu1 %v10229_v16  ;;  %v783_v43 = vld [vmem:[%s15302_s3 + $0x8] sm:$0xff]  ;;  %v9853_v44 = vpack.c.bf16 %v831_v41, %v830_v39  ;;  %v814_v46 = vld [vmem:[%s15302_s3 + $0x100] sm:$0xff]  ;;  %v832_v51 = vld [vmem:[%s15302_s3 + $0x190] sm:$0xff]  ;;  %v9825_v52 = vpack.c.bf16 %v801_v50, %v800_v49  ;;  %vm3911_vm12 = vcmask 1045504   ;;  %vm11080_vm13 = vmmov 0  }
  0xab   :  { %435 = vmatprep.subr.bf16.mxu0 %v10230_v17  ;;  %508 = vmatprep.subr.bf16.mxu1 %v10232_v18  ;;  %v9823_v45 = vpack.c.bf16 %v783_v43, %v782_v42  ;;  %v815_v47 = vld [vmem:[%s15302_s3 + $0x108] sm:$0xff]  ;;  %v833_v53 = vld [vmem:[%s15302_s3 + $0x198] sm:$0xff]  ;;  %v784_v54 = vld [vmem:[%s15302_s3 + $0x10] sm:$0xff] }
  0xac   :  { %v9855_v48 = vpack.c.bf16 %v815_v47, %v814_v46  ;;  %v785_v55 = vld [vmem:[%s15302_s3 + $0x18] sm:$0xff]  ;;  %v9857_v56 = vpack.c.bf16 %v833_v53, %v832_v51  ;;  %v816_v58 = vld [vmem:[%s15302_s3 + $0x110] sm:$0xff]  ;;  %v802_v61 = vld [vmem:[%s15302_s3 + $0xa0] sm:$0xff] }
  0xad   :  { %v9827_v57 = vpack.c.bf16 %v785_v55, %v784_v54  ;;  %v817_v59 = vld [vmem:[%s15302_s3 + $0x118] sm:$0xff]  ;;  %v803_v62 = vld [vmem:[%s15302_s3 + $0xa8] sm:$0xff]  ;;  %v834_v63 = vld [vmem:[%s15302_s3 + $0x1a0] sm:$0xff] }
  0xae   :  { %436 = vmatpush1.bf16.msra.mxu0 %v10234_v19  ;;  %509 = vmatpush1.bf16.msra.mxu1 %v10235_v20  ;;  %v9859_v60 = vpack.c.bf16 %v817_v59, %v816_v58  ;;  %v835_v1 = vld [vmem:[%s15302_s3 + $0x1a8] sm:$0xff]  ;;  %v786_v2 = vld [vmem:[%s15302_s3 + $0x20] sm:$0xff]  ;;  %v804_v9 = vld [vmem:[%s15302_s3 + $0xb0] sm:$0xff] }
  0xaf   :  { %437 = vmatprep.subr.bf16.mxu0 %v10236_v21  ;;  %510 = vmatprep.subr.bf16.mxu1 %v10238_v22  ;;  %v787_v3 = vld [vmem:[%s15302_s3 + $0x28] sm:$0xff]  ;;  %v9861_v4 = vpack.c.bf16 %v835_v1, %v834_v63  ;;  %v818_v6 = vld [vmem:[%s15302_s3 + $0x120] sm:$0xff]  ;;  %v805_v10 = vld [vmem:[%s15302_s3 + $0xb8] sm:$0xff] }
  0xb0   :  { %v9831_v5 = vpack.c.bf16 %v787_v3, %v786_v2  ;;  %v819_v7 = vld [vmem:[%s15302_s3 + $0x128] sm:$0xff]  ;;  %v836_v11 = vld [vmem:[%s15302_s3 + $0x1b0] sm:$0xff]  ;;  %v9833_v12 = vpack.c.bf16 %v805_v10, %v804_v9  ;;  %v837_v13 = vld [vmem:[%s15302_s3 + $0x1b8] sm:$0xff] }
  0xb1   :  { %v9863_v8 = vpack.c.bf16 %v819_v7, %v818_v6  ;;  %v788_v14 = vld [vmem:[%s15302_s3 + $0x30] sm:$0xff]  ;;  %v789_v15 = vld [vmem:[%s15302_s3 + $0x38] sm:$0xff]  ;;  %v9865_v16 = vpack.c.bf16 %v837_v13, %v836_v11  ;;  %v806_v21 = vld [vmem:[%s15302_s3 + $0xc0] sm:$0xff]  ;;  %v15319_v11 = vlaneseq }
  0xb2   :  { %438 = vmatpush1.bf16.msra.mxu0 %v10240_v23  ;;  %511 = vmatpush1.bf16.msra.mxu1 %v10241_v24  ;;  %v9835_v17 = vpack.c.bf16 %v789_v15, %v788_v14  ;;  %v820_v18 = vld [vmem:[%s15302_s3 + $0x130] sm:$0xff]  ;;  %v821_v19 = vld [vmem:[%s15302_s3 + $0x138] sm:$0xff]  ;;  %v807_v22 = vld [vmem:[%s15302_s3 + $0xc8] sm:$0xff] }
  0xb3   :  { %439 = vmatprep.subr.bf16.mxu0 %v10242_v25  ;;  %512 = vmatprep.subr.bf16.mxu1 %v10244_v26  ;;  %v9867_v20 = vpack.c.bf16 %v821_v19, %v820_v18  ;;  %v838_v23 = vld [vmem:[%s15302_s3 + $0x1c0] sm:$0xff]  ;;  %v9837_v24 = vpack.c.bf16 %v807_v22, %v806_v21  ;;  %v839_v25 = vld [vmem:[%s15302_s3 + $0x1c8] sm:$0xff]  ;;  %v841_v37 = vld [vmem:[%s15302_s3 + $0x1d8] sm:$0xff] }
  0xb4   :  { %v790_v26 = vld [vmem:[%s15302_s3 + $0x40] sm:$0xff]  ;;  %v792_v38 = vld [vmem:[%s15302_s3 + $0x50] sm:$0xff]  ;;  %v793_v39 = vld [vmem:[%s15302_s3 + $0x58] sm:$0xff] }
  0xb5   :  { %v9843_v41 = vpack.c.bf16 %v793_v39, %v792_v38  ;;  %v824_v42 = vld [vmem:[%s15302_s3 + $0x150] sm:$0xff]  ;;  %v825_v43 = vld [vmem:[%s15302_s3 + $0x158] sm:$0xff]  ;;  %v811_v46 = vld [vmem:[%s15302_s3 + $0xe8] sm:$0xff] }
  0xb6   :  { %440 = vmatpush1.bf16.msra.mxu0 %v10246_v27  ;;  %513 = vmatpush1.bf16.msra.mxu1 %v10247_v28  ;;  %v791_v27 = vld [vmem:[%s15302_s3 + $0x48] sm:$0xff]  ;;  %v9869_v28 = vpack.c.bf16 %v839_v25, %v838_v23  ;;  %v842_v47 = vld [vmem:[%s15302_s3 + $0x1e0] sm:$0xff]  ;;  %v813_v58 = vld [vmem:[%s15302_s3 + $0xf8] sm:$0xff] }
  0xb7   :  { %441 = vmatprep.subr.bf16.mxu0 %v10248_v29  ;;  %514 = vmatprep.subr.bf16.mxu1 %v10250_v30  ;;  %v9839_v29 = vpack.c.bf16 %v791_v27, %v790_v26  ;;  %v822_v30 = vld [vmem:[%s15302_s3 + $0x140] sm:$0xff]  ;;  %v843_v49 = vld [vmem:[%s15302_s3 + $0x1e8] sm:$0xff]  ;;  %v844_v59 = vld [vmem:[%s15302_s3 + $0x1f0] sm:$0xff] }
  0xb8   :  { %v794_v50 = vld [vmem:[%s15302_s3 + $0x60] sm:$0xff]  ;;  %v795_v51 = vld [vmem:[%s15302_s3 + $0x68] sm:$0xff]  ;;  %v797_v63 = vld [vmem:[%s15302_s3 + $0x78] sm:$0xff] }
  0xb9   :  { %v9847_v53 = vpack.c.bf16 %v795_v51, %v794_v50  ;;  %v826_v54 = vld [vmem:[%s15302_s3 + $0x160] sm:$0xff]  ;;  %v827_v55 = vld [vmem:[%s15302_s3 + $0x168] sm:$0xff]  ;;  %v828_v2 = vld [vmem:[%s15302_s3 + $0x170] sm:$0xff] }
  0xba   :  { %442 = vmatpush1.bf16.msra.mxu0 %v10252_v31  ;;  %515 = vmatpush1.bf16.msra.mxu1 %v10253_v32  ;;  %v823_v31 = vld [vmem:[%s15302_s3 + $0x148] sm:$0xff]  ;;  %v829_v3 = vld [vmem:[%s15302_s3 + $0x178] sm:$0xff]  ;;  %v894_v7 = vld [vmem:[%s15302_s3 + $0x380] sm:$0xff] }
  0xbb   :  { %9822 = vmatprep.subr.bf16.mxu0 %v9821_v40  ;;  %9854 = vmatprep.subr.bf16.mxu1 %v9853_v44  ;;  %v9871_v32 = vpack.c.bf16 %v823_v31, %v822_v30  ;;  %v9875_v44 = vpack.c.bf16 %v825_v43, %v824_v42  ;;  %v863_v6 = vld [vmem:[%s15302_s3 + $0x288] sm:$0xff]  ;;  %v221_v14 = vld [vmem:[#allocation7] sm:$0xf] }
  0xbc   :  { %v895_v9 = vld [vmem:[%s15302_s3 + $0x388] sm:$0xff] }
  0xbd   :  { %460 = vmatmul.mubr.bf16.vlgmr.msra.gmra.mrb[0].mxu0 %v10254_v33  ;;  %533 = vmatmul.mubr.bf16.vlgmr.msra.gmra.mrb[0].mxu1 %v10254_v33  ;;  %v808_v33 = vld [vmem:[%s15302_s3 + $0xd0] sm:$0xff]  ;;  %v9917_v10 = vpack.c.bf16 %v895_v9, %v894_v7 }
  0xbe   :  { %469 = vmatprep.mubr.bf16.mxu0 %v11075_v0  ;;  %542 = vmatprep.mubr.bf16.mxu1 %v11075_v0 }
  0xbf   :  { %9824 = vmatpush3.bf16.msra.mxu0 %v9823_v45  ;;  %9856 = vmatpush3.bf16.msra.mxu1 %v9855_v48  ;;  %v810_v45 = vld [vmem:[%s15302_s3 + $0xe0] sm:$0xff] }
  0xc0   :  { %9826 = vmatprep.subr.bf16.mxu0 %v9825_v52  ;;  %9858 = vmatprep.subr.bf16.mxu1 %v9857_v56  ;;  %v9845_v48 = vpack.c.bf16 %v811_v46, %v810_v45  ;;  %v9877_v52 = vpack.c.bf16 %v843_v49, %v842_v47  ;;  %v9879_v56 = vpack.c.bf16 %v827_v55, %v826_v54 }
  0xc3   :  { %9828 = vmatpush3.bf16.msra.mxu0 %v9827_v57  ;;  %9860 = vmatpush3.bf16.msra.mxu1 %v9859_v60  ;;  %v812_v57 = vld [vmem:[%s15302_s3 + $0xf0] sm:$0xff] }
  0xc4   :  { %9862 = vmatprep.subr.bf16.mxu1 %v9861_v4  ;;  %v9849_v60 = vpack.c.bf16 %v813_v58, %v812_v57  ;;  %v9883_v4 = vpack.c.bf16 %v829_v3, %v828_v2 }
  0xc5   :  { %470 = vmatmul.mubr.bf16.gmra.mrb[4].mxu0 %v10255_v34  ;;  %543 = vmatmul.mubr.bf16.gmra.mrb[4].mxu1 %v10255_v34  ;;  %v809_v34 = vld [vmem:[%s15302_s3 + $0xd8] sm:$0xff] }
  0xc6   :  { %479 = vmatprep.mubr.bf16.mxu0 %v11075_v0  ;;  %552 = vmatprep.mubr.bf16.mxu1 %v11075_v0 }
  0xc7   :  { %9864 = vmatpush3.bf16.msra.mxu1 %v9863_v8 }
  0xc8   :  { %9866 = vmatprep.subr.bf16.mxu1 %v9865_v16 }
  0xcb   :  { %9868 = vmatpush3.bf16.msra.mxu1 %v9867_v20 }
  0xcc   :  { %9870 = vmatprep.subr.bf16.mxu1 %v9869_v28 }
  0xcd   :  { %480 = vmatmul.mubr.bf16.gmra.mrb[8].mxu0 %v10256_v35  ;;  %553 = vmatmul.mubr.bf16.gmra.mrb[8].mxu1 %v10256_v35  ;;  %v840_v35 = vld [vmem:[%s15302_s3 + $0x1d0] sm:$0xff] }
  0xce   :  { %489 = vmatprep.mubr.bf16.mxu0 %v11075_v0  ;;  %562 = vmatprep.mubr.bf16.mxu1 %v11075_v0  ;;  %v9829_v0 = vpack.c.bf16 %v803_v62, %v802_v61  ;;  %v9873_v40 = vpack.c.bf16 %v841_v37, %v840_v35  ;;  %v845_v61 = vld [vmem:[%s15302_s3 + $0x1f8] sm:$0xff]  ;;  %v796_v62 = vld [vmem:[%s15302_s3 + $0x70] sm:$0xff] }
  0xcf   :  { %9872 = vmatpush3.bf16.msra.mxu1 %v9871_v32  ;;  %v9851_v1 = vpack.c.bf16 %v797_v63, %v796_v62 }
  0xd0   :  { %9830 = vmatprep.subr.bf16.mxu0 %v9829_v0  ;;  %9874 = vmatprep.subr.bf16.mxu1 %v9873_v40  ;;  %v9881_v0 = vpack.c.bf16 %v845_v61, %v844_v59 }
  0xd1   :  { %9832 = vmatpush3.bf16.msra.mxu0 %v9831_v5  ;;  %v862_v5 = vld [vmem:[%s15302_s3 + $0x280] sm:$0xff] }
  0xd2   :  { %9834 = vmatprep.subr.bf16.mxu0 %v9833_v12  ;;  %v9885_v8 = vpack.c.bf16 %v863_v6, %v862_v5  ;;  %v11501_v12 = vshrl.u32 %v15319_v11, 7 }
  0xd3   :  { %9876 = vmatpush3.bf16.msra.mxu1 %v9875_v44 }
  0xd4   :  { %9878 = vmatprep.subr.bf16.mxu1 %v9877_v52  ;;  %v11504_v13 = vsub.s32 1, %v11501_v12  ;;  %v11507_v15 = vsub.s32 2, %v11501_v12  ;;  %v11510_v16 = vsub.s32 0, %v11501_v12 }
  0xd5   :  { %490 = vmatmul.mubr.bf16.gmra.mrb[12].mxu0 %v10257_v36  ;;  %563 = vmatmul.mubr.bf16.gmra.mrb[12].mxu1 %v10257_v36  ;;  %v9841_v36 = vpack.c.bf16 %v809_v34, %v808_v33 }
  0xd6   :  { %9836 = vmatpush3.bf16.msra.mxu0 %v9835_v17  ;;  %15389 = vst [vmem:[#allocation25_spill] sm:$0xff] %v11504_v13  ;;  %15390 = vst [vmem:[#allocation26_spill] sm:$0xff] %v11507_v15  ;;  %v11513_v17 = vsub.s32 3, %v11501_v12  ;;  %v11516_v20 = vrot.slane %v221_v14, %v11504_v13  ;;  %v11519_v21 = vrot.slane %v221_v14, %v11507_v15 }
  0xd7   :  { %9838 = vmatprep.subr.bf16.mxu0 %v9837_v24  ;;  %9880 = vmatpush3.bf16.msra.mxu1 %v9879_v56  ;;  %15391 = vst [vmem:[#allocation27_spill] sm:$0xff] %v11510_v16  ;;  %v11522_v24 = vrot.slane %v221_v14, %v11510_v16 }
  0xd8   :  { %9882 = vmatprep.subr.bf16.mxu1 %v9881_v0  ;;  %15392 = vst [vmem:[#allocation28_spill] sm:$0xff] %v11513_v17  ;;  %v11525_v25 = vrot.slane %v221_v14, %v11513_v17 }
  0xda   :  { %9840 = vmatpush3.bf16.msra.mxu0 %v9839_v29 }
  0xdb   :  { %9842 = vmatprep.subr.bf16.mxu0 %v9841_v36  ;;  %9884 = vmatpush3.bf16.msra.mxu1 %v9883_v4 }
  0xdc   :  { %9918 = vmatprep.subr.bf16.mxu1 %v9917_v10 }
  0xde   :  { %9844 = vmatpush3.bf16.msra.mxu0 %v9843_v41 }
  0xdf   :  { %9846 = vmatprep.subr.bf16.mxu0 %v9845_v48 }
  0xe2   :  { %9848 = vmatpush3.bf16.msra.mxu0 %v9847_v53 }
  0xe3   :  { %9850 = vmatprep.subr.bf16.mxu0 %v9849_v60 }
  0xe6   :  { %9852 = vmatpush3.bf16.msra.mxu0 %v9851_v1 }
  0xe7   :  { %9886 = vmatprep.subr.bf16.mxu0 %v9885_v8 }
 0x190   :  { %v461_v18 = vpop.f32.mrb[0].mxu0  ;;  %v534_v19 = vpop.f32.mrb[0].mxu1 }
 0x191   :  { %v463_v22 = vpop.f32.mrb[1].mxu0  ;;  %v536_v23 = vpop.f32.mrb[1].mxu1  ;;  %v11534_v32 = vadd.f32 %v534_v19, %v11519_v21  ;;  %v11543_v35 = vadd.f32 %v461_v18, %v11522_v24 }
 0x192   :  { %v465_v26 = vpop.f32.mrb[2].mxu0  ;;  %v538_v27 = vpop.f32.mrb[2].mxu1  ;;  %v11528_v30 = vadd.f32 %v463_v22, %v11516_v20  ;;  %v11546_v36 = vadd.f32 %v536_v23, %v11525_v25  ;;  %v11610_v22 = vld [vmem:[%s15302_s3 + $0x200] sm:$0xff] }
 0x193   :  { %v467_v28 = vpop.f32.mrb[3].mxu0  ;;  %v540_v29 = vpop.f32.mrb[3].mxu1  ;;  %v11531_v31 = vadd.f32 %v465_v26, %v11522_v24  ;;  %15395 = vst [vmem:[#allocation31_spill] sm:$0xff] %v11534_v32  ;;  %v11537_v33 = vadd.f32 %v538_v27, %v11519_v21  ;;  %15398 = vst [vmem:[#allocation34_spill] sm:$0xff] %v11543_v35 }
 0x194   :  { %15393 = vst [vmem:[#allocation29_spill] sm:$0xff] %v11528_v30  ;;  %v11540_v34 = vadd.f32 %v467_v28, %v11516_v20  ;;  %15399 = vst [vmem:[#allocation35_spill] sm:$0xff] %v11546_v36  ;;  %v11549_v37 = vadd.f32 %v540_v29, %v11525_v25  ;;  %v646_v38 = vmul.f32 %v11528_v30, %v11528_v30 }
 0x195   :  { %15394 = vst [vmem:[#allocation30_spill] sm:$0xff] %v11531_v31  ;;  %15396 = vst [vmem:[#allocation32_spill] sm:$0xff] %v11537_v33  ;;  %v573_v39 = vadd.f32 %v11531_v31, %v11543_v35  ;;  %v591_v42 = vadd.f32 %v11537_v33, %v11534_v32  ;;  %v648_v54 = vmul.f32 %v11546_v36, %v11546_v36 }
 0x196   :  { %15397 = vst [vmem:[#allocation33_spill] sm:$0xff] %v11540_v34  ;;  %15400 = vst [vmem:[#allocation36_spill] sm:$0xff] %v11549_v37  ;;  %v650_v43 = vmul.f32 %v11540_v34, %v11540_v34  ;;  %v582_v48 = vadd.f32 %v11540_v34, %v11528_v30  ;;  %v600_v49 = vadd.f32 %v11549_v37, %v11546_v36 }
 0x197   :  { %v652_v55 = vmul.f32 %v11549_v37, %v11549_v37 }
 0x198   :  { %v471_v40 = vpop.f32.mrb[4].mxu0  ;;  %v544_v41 = vpop.f32.mrb[4].mxu1  ;;  %v686_v63 = vadd.f32 %v650_v43, %v646_v38  ;;  %v651_v43 = vmul.f32 %v11537_v33, %v11537_v33 }
 0x199   :  { %v11560_v44 = vadd.f32 %v471_v40, %v11522_v24  ;;  %v11563_v45 = vadd.f32 %v544_v41, %v11519_v21  ;;  %v473_v46 = vpop.f32.mrb[5].mxu0  ;;  %v546_v47 = vpop.f32.mrb[5].mxu1  ;;  %v704_v5 = vadd.f32 %v652_v55, %v648_v54  ;;  %v11622_v40 = vld [vmem:[%s15302_s3 + $0x300] sm:$0xff]  ;;  %v647_v41 = vmul.f32 %v11534_v32, %v11534_v32 }
 0x19a   :  { %v11570_v50 = vadd.f32 %v473_v46, %v11516_v20  ;;  %v11573_v51 = vadd.f32 %v546_v47, %v11525_v25  ;;  %v475_v52 = vpop.f32.mrb[6].mxu0  ;;  %v548_v53 = vpop.f32.mrb[6].mxu1 }
 0x19b   :  { %15401 = vst [vmem:[#allocation37_spill] sm:$0xff] %v11560_v44  ;;  %15402 = vst [vmem:[#allocation38_spill] sm:$0xff] %v11563_v45  ;;  %v574_v56 = vadd.f32 %v573_v39, %v11560_v44  ;;  %v592_v57 = vadd.f32 %v591_v42, %v11563_v45  ;;  %v477_v58 = vpop.f32.mrb[7].mxu0  ;;  %v550_v59 = vpop.f32.mrb[7].mxu1  ;;  %v11588_v1 = vadd.f32 %v475_v52, %v11522_v24  ;;  %v11617_v39 = vld [vmem:[%s15302_s3 + $0x208] sm:$0xff]  ;;  %v11638_v52 = vld [vmem:[%s15302_s3 + $0x290] sm:$0xff] }
 0x19c   :  { %15403 = vst [vmem:[#allocation39_spill] sm:$0xff] %v11570_v50  ;;  %15404 = vst [vmem:[#allocation40_spill] sm:$0xff] %v11573_v51  ;;  %v583_v60 = vadd.f32 %v582_v48, %v11570_v50  ;;  %v654_v61 = vmul.f32 %v11570_v50, %v11570_v50  ;;  %v601_v62 = vadd.f32 %v600_v49, %v11573_v51  ;;  %v11633_v49 = vld [vmem:[%s15302_s3 + $0x308] sm:$0xff] }
 0x19d   :  { %v656_v0 = vmul.f32 %v11573_v51, %v11573_v51  ;;  %v11591_v2 = vadd.f32 %v548_v53, %v11519_v21  ;;  %v11594_v3 = vadd.f32 %v477_v58, %v11516_v20  ;;  %v11597_v4 = vadd.f32 %v550_v59, %v11525_v25  ;;  %v11643_v53 = vld [vmem:[%s15302_s3 + $0x298] sm:$0xff]  ;;  %v11648_v59 = vld [vmem:[%s15302_s3 + $0x390] sm:$0xff] }
 0x19e   :  { %v687_v6 = vadd.f32 %v686_v63, %v654_v61  ;;  %v575_v7 = vadd.f32 %v574_v56, %v11588_v1  ;;  %v649_v42 = vmul.f32 %v11531_v31, %v11531_v31  ;;  %v645_v61 = vmul.f32 %v11543_v35, %v11543_v35 }
 0x19f   :  { %15405 = vst [vmem:[#allocation41_spill] sm:$0xff] %v11594_v3  ;;  %15406 = vst [vmem:[#allocation42_spill] sm:$0xff] %v11597_v4  ;;  %v593_v8 = vadd.f32 %v592_v57, %v11591_v2  ;;  %v584_v9 = vadd.f32 %v583_v60, %v11594_v3  ;;  %v658_v10 = vmul.f32 %v11594_v3, %v11594_v3  ;;  %v11653_v60 = vld [vmem:[%s15302_s3 + $0x398] sm:$0xff]  ;;  %v11690_v3 = vld [vmem:[%s15302_s3 + $0x2a0] sm:$0xff] }
 0x1a0   :  { %v602_v14 = vadd.f32 %v601_v62, %v11597_v4  ;;  %v11605_v18 = vpop.f32.mrb[8].mxu0  ;;  %v554_v19 = vpop.f32.mrb[8].mxu1  ;;  %v705_v23 = vadd.f32 %v704_v5, %v656_v0  ;;  %v576_v26 = vrot.slane %v575_v7, 4  ;;  %v660_v28 = vmul.f32 %v11597_v4, %v11597_v4  ;;  %v11666_v5 = vld [vmem:[%s15302_s3 + $0x210] sm:$0xff]  ;;  %v11685_v4 = vld [vmem:[%s15302_s3 + $0x318] sm:$0xff] }
 0x1a1   :  { %v594_v27 = vrot.slane %v593_v8, 4  ;;  %v483_v29 = vpop.f32.mrb[9].mxu0  ;;  %v556_v38 = vpop.f32.mrb[9].mxu1  ;;  %v585_v46 = vrot.slane %v584_v9, 4  ;;  %v688_v55 = vadd.f32 %v687_v6, %v658_v10  ;;  %v653_v62 = vmul.f32 %v11560_v44, %v11560_v44  ;;  %v11671_v6 = vld [vmem:[%s15302_s3 + $0x218] sm:$0xff] }
 0x1a2   :  { %v485_v47 = vpop.f32.mrb[10].mxu0  ;;  %v558_v48 = vpop.f32.mrb[10].mxu1  ;;  %v577_v54 = vadd.f32 %v576_v26, %v575_v7  ;;  %v603_v56 = vrot.slane %v602_v14, 4  ;;  %v655_v63 = vmul.f32 %v11563_v45, %v11563_v45  ;;  %v11676_v7 = vld [vmem:[%s15302_s3 + $0x310] sm:$0xff]  ;;  %v706_v26 = vadd.f32 %v705_v23, %v660_v28 }
 0x1a3   :  { %v487_v57 = vpop.f32.mrb[11].mxu0  ;;  %v560_v58 = vpop.f32.mrb[11].mxu1  ;;  %v595_v10 = vadd.f32 %v594_v27, %v593_v8  ;;  %v11695_v8 = vld [vmem:[%s15302_s3 + $0x2a8] sm:$0xff]  ;;  %v677_v23 = vadd.f32 %v649_v42, %v645_v61  ;;  %v695_v27 = vadd.f32 %v651_v43, %v647_v41  ;;  %v11697_v28 = vadd.f32 %v585_v46, %v584_v9 }
 0x1a4   :  { %v578_v11 = vrot.slane %v577_v54, 2  ;;  %v689_v51 = vrot.slane %v688_v55, 4  ;;  %v11701_v45 = vadd.f32 %v603_v56, %v602_v14  ;;  %v707_v43 = vrot.slane %v706_v26, 4 }
 0x1a5   :  { %v11705_v44 = vadd.f32 %v677_v23, %v653_v62  ;;  %v11707_v37 = vadd.f32 %v695_v27, %v655_v63  ;;  %v596_v42 = vrot.slane %v595_v10, 2  ;;  %v11714_v14 = vadd.f32 %v483_v29, %v11516_v20 }
 0x1a6   :  { %v11717_v46 = vadd.f32 %v556_v38, %v11525_v25  ;;  %v587_v62 = vrot.slane %v11697_v28, 2  ;;  %v11721_v63 = vadd.f32 %v554_v19, %v11519_v21  ;;  %v11724_v23 = vadd.f32 %v485_v47, %v11522_v24 }
 0x1a7   :  { %v11727_v27 = vadd.f32 %v558_v48, %v11519_v21  ;;  %v11729_v29 = vadd.f32 %v578_v11, %v577_v54  ;;  %v11731_v50 = vadd.f32 %v689_v51, %v688_v55  ;;  %v605_v38 = vrot.slane %v11701_v45, 2 }
 0x1a8   :  { %v491_v33 = vpop.f32.mrb[12].mxu0  ;;  %v564_v34 = vpop.f32.mrb[12].mxu1  ;;  %15407 = vst [vmem:[#allocation43_spill] sm:$0xff] %v11717_v46  ;;  %15408 = vst [vmem:[#allocation44_spill] sm:$0xff] %v11721_v63  ;;  %v11736_v0 = vadd.f32 %v11605_v18, %v11522_v24  ;;  %v11739_v47 = vadd.f32 %v487_v57, %v11516_v20  ;;  %v11742_v48 = vadd.f32 %v560_v58, %v11525_v25 }
 0x1a9   :  { %v493_v56 = vpop.f32.mrb[13].mxu0  ;;  %v566_v61 = vpop.f32.mrb[13].mxu1  ;;  %15409 = vst [vmem:[#allocation45_spill] sm:$0xff] %v11724_v23  ;;  %15410 = vst [vmem:[#allocation46_spill] sm:$0xff] %v11727_v27  ;;  %v11745_v36 = vadd.f32 %v491_v33, %v11522_v24  ;;  %v11748_v11 = vadd.f32 %v564_v34, %v11519_v21  ;;  %v662_v51 = vmul.f32 %v11714_v14, %v11714_v14 }
 0x1aa   :  { %v495_v41 = vpop.f32.mrb[14].mxu0  ;;  %v568_v9 = vpop.f32.mrb[14].mxu1  ;;  %15411 = vst [vmem:[#allocation47_spill] sm:$0xff] %v11739_v47  ;;  %15412 = vst [vmem:[#allocation48_spill] sm:$0xff] %v11742_v48  ;;  %v664_v18 = vmul.f32 %v11717_v46, %v11717_v46  ;;  %v11755_v54 = vadd.f32 %v493_v56, %v11516_v20  ;;  %v11758_v55 = vadd.f32 %v566_v61, %v11525_v25 }
 0x1ab   :  { %v497_v19 = vpop.f32.mrb[15].mxu0  ;;  %v570_v31 = vpop.f32.mrb[15].mxu1  ;;  %15413 = vst [vmem:[#allocation49_spill] sm:$0xff] %v11745_v36  ;;  %15414 = vst [vmem:[#allocation50_spill] sm:$0xff] %v11748_v11  ;;  %v609_v57 = vadd.f32 %v11724_v23, %v11736_v0  ;;  %v627_v33 = vadd.f32 %v11727_v27, %v11721_v63  ;;  %v666_v34 = vmul.f32 %v11739_v47, %v11739_v47 }
 0x1ac   :  { %15415 = vst [vmem:[#allocation51_spill] sm:$0xff] %v11755_v54  ;;  %15416 = vst [vmem:[#allocation52_spill] sm:$0xff] %v11758_v55  ;;  %v668_v58 = vmul.f32 %v11742_v48, %v11742_v48  ;;  %v11768_v32 = vadd.f32 %v596_v42, %v595_v10  ;;  %v11770_v30 = vadd.f32 %v707_v43, %v706_v26 }
 0x1ad   :  { %v618_v56 = vadd.f32 %v11739_v47, %v11714_v14  ;;  %v636_v61 = vadd.f32 %v11742_v48, %v11717_v46  ;;  %v722_v35 = vadd.f32 %v666_v34, %v662_v51  ;;  %v610_v17 = vadd.f32 %v609_v57, %v11745_v36 }
 0x1ae   :  { %v628_v15 = vadd.f32 %v627_v33, %v11748_v11  ;;  %v670_v13 = vmul.f32 %v11755_v54, %v11755_v54  ;;  %v740_v16 = vadd.f32 %v668_v58, %v664_v18  ;;  %v672_v42 = vmul.f32 %v11758_v55, %v11758_v55 }
 0x1af   :  { %v619_v10 = vadd.f32 %v618_v56, %v11755_v54  ;;  %v637_v26 = vadd.f32 %v636_v61, %v11758_v55  ;;  %v11786_v48 = vadd.f32 %v495_v41, %v11522_v24  ;;  %v11789_v51 = vadd.f32 %v568_v9, %v11519_v21 }
 0x1b0   :  { %v11792_v57 = vadd.f32 %v497_v19, %v11516_v20  ;;  %v598_v18 = vrot.slane %v11768_v32, 1  ;;  %v723_v33 = vadd.f32 %v722_v35, %v670_v13  ;;  %v741_v34 = vadd.f32 %v740_v16, %v672_v42 }
 0x1b1   :  { %v11796_v58 = vadd.f32 %v570_v31, %v11525_v25  ;;  %v661_v56 = vmul.f32 %v11736_v0, %v11736_v0  ;;  %v663_v24 = vmul.f32 %v11721_v63, %v11721_v63  ;;  %v611_v41 = vadd.f32 %v610_v17, %v11786_v48 }
 0x1b2   :  { %15417 = vst [vmem:[#allocation53_spill] sm:$0xff] %v11792_v57  ;;  %v629_v21 = vadd.f32 %v628_v15, %v11789_v51  ;;  %v620_v20 = vadd.f32 %v619_v10, %v11792_v57  ;;  %v674_v9 = vmul.f32 %v11792_v57, %v11792_v57  ;;  %v665_v25 = vmul.f32 %v11724_v23, %v11724_v23 }
 0x1b3   :  { %15418 = vst [vmem:[#allocation54_spill] sm:$0xff] %v11796_v58  ;;  %v638_v13 = vadd.f32 %v637_v26, %v11796_v58  ;;  %v676_v16 = vmul.f32 %v11796_v58, %v11796_v58  ;;  %v667_v31 = vmul.f32 %v11727_v27, %v11727_v27  ;;  %v612_v35 = vrot.slane %v611_v41, 4 }
 0x1b4   :  { %v630_v17 = vrot.slane %v629_v21, 4  ;;  %v621_v19 = vrot.slane %v620_v20, 4  ;;  %v724_v15 = vadd.f32 %v723_v33, %v674_v9  ;;  %v588_v57 = vadd.f32 %v587_v62, %v11697_v28 }
 0x1b5   :  { %v639_v61 = vrot.slane %v638_v13, 4  ;;  %v742_v10 = vadd.f32 %v741_v34, %v676_v16  ;;  %v613_v42 = vadd.f32 %v612_v35, %v611_v41  ;;  %v606_v26 = vadd.f32 %v605_v38, %v11701_v45 }
 0x1b6   :  { %v631_v43 = vadd.f32 %v630_v17, %v629_v21  ;;  %v622_v58 = vadd.f32 %v621_v19, %v620_v20  ;;  %v725_v55 = vrot.slane %v724_v15, 4  ;;  %v713_v23 = vadd.f32 %v665_v25, %v661_v56 }
 0x1b7   :  { %v640_v54 = vadd.f32 %v639_v61, %v638_v13  ;;  %v743_v47 = vrot.slane %v742_v10, 4  ;;  %v669_v27 = vmul.f32 %v11745_v36, %v11745_v36  ;;  %v614_v46 = vrot.slane %v613_v42, 2 }
 0x1b8   :  { %v632_v63 = vrot.slane %v631_v43, 2  ;;  %v731_v33 = vadd.f32 %v667_v31, %v663_v24  ;;  %v671_v34 = vmul.f32 %v11748_v11, %v11748_v11  ;;  %v623_v41 = vrot.slane %v622_v58, 2 }
 0x1b9   :  { %v641_v21 = vrot.slane %v640_v54, 2  ;;  %v615_v28 = vadd.f32 %v614_v46, %v613_v42  ;;  %v726_v9 = vadd.f32 %v725_v55, %v724_v15  ;;  %v744_v45 = vadd.f32 %v743_v47, %v742_v10 }
 0x1ba   :  { %v633_v62 = vadd.f32 %v632_v63, %v631_v43  ;;  %v589_v38 = vrot.slane %v588_v57, 1  ;;  %v624_v20 = vadd.f32 %v623_v41, %v622_v58  ;;  %v607_v13 = vrot.slane %v606_v26, 1 }
 0x1bb   :  { %v642_v16 = vadd.f32 %v641_v21, %v640_v54  ;;  %v714_v56 = vadd.f32 %v713_v23, %v669_v27  ;;  %v616_v25 = vrot.slane %v615_v28, 1  ;;  %v673_v35 = vmul.f32 %v11786_v48, %v11786_v48 }
 0x1bc   :  { %v634_v17 = vrot.slane %v633_v62, 1  ;;  %v590_v24 = vadd.f32 %v589_v38, %v588_v57  ;;  %v625_v31 = vrot.slane %v624_v20, 1  ;;  %v608_v19 = vadd.f32 %v607_v13, %v606_v26 }
 0x1bd   :  { %v643_v61 = vrot.slane %v642_v16, 1  ;;  %v617_v11 = vadd.f32 %v616_v25, %v615_v28  ;;  %v691_v46 = vrot.slane %v11731_v50, 2  ;;  %v727_v63 = vrot.slane %v726_v9, 2 }
 0x1be   :  { %v635_v36 = vadd.f32 %v634_v17, %v633_v62  ;;  %v626_v47 = vadd.f32 %v625_v31, %v624_v20  ;;  %v709_v43 = vrot.slane %v11770_v30, 2  ;;  %v745_v54 = vrot.slane %v744_v45, 2 }
 0x1bf   :  { %v644_v55 = vadd.f32 %v643_v61, %v642_v16  ;;  %v15419_v23 = vrot.slane %v11729_v29, 1  ;;  %v599_v58 = vadd.f32 %v598_v18, %v11768_v32  ;;  %v692_v57 = vadd.f32 %v691_v46, %v11731_v50 }
 0x1c0   :  { %v728_v15 = vadd.f32 %v727_v63, %v726_v9  ;;  %v759_v10 = vsel %vm757_vm0, %v626_v47, %v590_v24  ;;  %v710_v26 = vadd.f32 %v709_v43, %v11770_v30  ;;  %v746_v41 = vadd.f32 %v745_v54, %v744_v45  ;;  %v898_v30 = vld [vmem:[%s15302_s3 + $0x3a0] sm:$0xff]  ;;  %v869_v24 = vld [vmem:[%s15302_s3 + $0x2b8] sm:$0xff] }
 0x1c1   :  { %v581_v27 = vadd.f32 %v15419_v23, %v11729_v29  ;;  %v761_v42 = vsel %vm757_vm0, %v644_v55, %v608_v19  ;;  %974 = vmatprep.mubr.f32.mxu0 %v759_v10  ;;  %v760_v28 = vsel %vm757_vm0, %v635_v36, %v599_v58  ;;  %v693_v62 = vrot.slane %v692_v57, 1  ;;  %v902_v58 = vld [vmem:[%s15302_s3 + $0x3c0] sm:$0xff] }
 0x1c2   :  { %1044 = vmatprep.mubr.f32.mxu1 %v761_v42  ;;  %v729_v29 = vrot.slane %v728_v15, 1  ;;  %v732_v38 = vadd.f32 %v731_v33, %v671_v34  ;;  %v675_v32 = vmul.f32 %v11789_v51, %v11789_v51  ;;  %v711_v50 = vrot.slane %v710_v26, 1 }
 0x1c3   :  { %v758_v21 = vsel %vm757_vm0, %v617_v11, %v581_v27  ;;  %1045 = vmatmul.mubr.f32.vlgmr.msra.gmra.mrb[16].mxu1 %v760_v28  ;;  %v747_v18 = vrot.slane %v746_v41, 1  ;;  %v899_v11 = vld [vmem:[%s15302_s3 + $0x3a8] sm:$0xff]  ;;  %v657_v36 = vmul.f32 %v11588_v1, %v11588_v1  ;;  %v15420_v33 = vpack.c.bf16 %v11617_v39, %v11610_v22  ;;  %v850_v22 = vld [vmem:[%s15302_s3 + $0x220] sm:$0xff] }
 0x1c4   :  { %975 = vmatmul.mubr.f32.vlgmr.msra.gmra.mrb[16].mxu0 %v758_v21  ;;  %v15421_v34 = vpack.c.bf16 %v11633_v49, %v11622_v40  ;;  %v694_v9 = vadd.f32 %v693_v62, %v692_v57  ;;  %v730_v45 = vadd.f32 %v729_v29, %v728_v15  ;;  %v659_v20 = vmul.f32 %v11591_v2, %v11591_v2  ;;  %v851_v39 = vld [vmem:[%s15302_s3 + $0x228] sm:$0xff]  ;;  %v882_v40 = vld [vmem:[%s15302_s3 + $0x320] sm:$0xff] }
 0x1c5   :  { %9888 = vmatpush3.bf16.msra.mxu0 %v15420_v33  ;;  %v712_v13 = vadd.f32 %v711_v50, %v710_v26  ;;  %v748_v16 = vadd.f32 %v747_v18, %v746_v41  ;;  %v15422_v25 = vpack.c.bf16 %v11643_v53, %v11638_v52  ;;  %v15423_v17 = vpack.c.bf16 %v11653_v60, %v11648_v59  ;;  %v883_v59 = vld [vmem:[%s15302_s3 + $0x328] sm:$0xff]  ;;  %v868_v60 = vld [vmem:[%s15302_s3 + $0x2b0] sm:$0xff]  ;;  %v854_v21 = vld [vmem:[%s15302_s3 + $0x240] sm:$0xff] }
 0x1c6   :  { %9920 = vmatpush3.bf16.msra.mxu1 %v15421_v34  ;;  %v715_v49 = vadd.f32 %v714_v56, %v673_v35  ;;  %v775_v52 = vsel %vm757_vm0, %v730_v45, %v694_v9  ;;  %v9925_v53 = vpack.c.bf16 %v899_v11, %v898_v30  ;;  %v733_v31 = vadd.f32 %v732_v38, %v675_v32  ;;  %v900_v56 = vld [vmem:[%s15302_s3 + $0x3b0] sm:$0xff]  ;;  %v901_v35 = vld [vmem:[%s15302_s3 + $0x3b8] sm:$0xff]  ;;  %v903_v57 = vld [vmem:[%s15302_s3 + $0x3c8] sm:$0xff] }
 0x1c7   :  { %9890 = vmatprep.subr.bf16.mxu0 %v15422_v25  ;;  %9922 = vmatprep.subr.bf16.mxu1 %v15423_v17  ;;  %v777_v19 = vsel %vm757_vm0, %v748_v16, %v712_v13  ;;  %v679_v61 = vadd.f32 %v11705_v44, %v657_v36  ;;  %v15424_v46 = vpack.c.bf16 %v11671_v6, %v11666_v5  ;;  %v852_v44 = vld [vmem:[%s15302_s3 + $0x230] sm:$0xff]  ;;  %v853_v5 = vld [vmem:[%s15302_s3 + $0x238] sm:$0xff]  ;;  %v855_v28 = vld [vmem:[%s15302_s3 + $0x248] sm:$0xff] }
 0x1c8   :  { %1114 = vmatprep.mubr.f32.mxu0 %v775_v52  ;;  %1184 = vmatprep.mubr.f32.mxu1 %v777_v19  ;;  %v9895_v63 = vpack.c.bf16 %v851_v39, %v850_v22  ;;  %v697_v47 = vadd.f32 %v11707_v37, %v659_v20  ;;  %v15425_v55 = vpack.c.bf16 %v11685_v4, %v11676_v7  ;;  %v884_v37 = vld [vmem:[%s15302_s3 + $0x330] sm:$0xff]  ;;  %v716_v4 = vrot.slane %v715_v49, 4  ;;  %v870_v7 = vld [vmem:[%s15302_s3 + $0x2c0] sm:$0xff]  ;;  %v887_v32 = vld [vmem:[%s15302_s3 + $0x348] sm:$0xff] }
 0x1c9   :  { %9892 = vmatpush3.bf16.msra.mxu0 %v15424_v46  ;;  %v15426_v43 = vpack.c.bf16 %v11695_v8, %v11690_v3  ;;  %v9927_v54 = vpack.c.bf16 %v883_v59, %v882_v40  ;;  %v9897_v23 = vpack.c.bf16 %v869_v24, %v868_v60  ;;  %v9929_v6 = vpack.c.bf16 %v901_v35, %v900_v56  ;;  %v885_v3 = vld [vmem:[%s15302_s3 + $0x338] sm:$0xff]  ;;  %v871_v8 = vld [vmem:[%s15302_s3 + $0x2c8] sm:$0xff]  ;;  %v886_v62 = vld [vmem:[%s15302_s3 + $0x340] sm:$0xff] }
 0x1ca   :  { %9924 = vmatpush3.bf16.msra.mxu1 %v15425_v55  ;;  %v734_v27 = vrot.slane %v733_v31, 4  ;;  %v680_v15 = vrot.slane %v679_v61, 4  ;;  %v9899_v10 = vpack.c.bf16 %v853_v5, %v852_v44  ;;  %v698_v42 = vrot.slane %v697_v47, 4  ;;  %v872_v50 = vld [vmem:[%s15302_s3 + $0x2d0] sm:$0xff]  ;;  %v873_v18 = vld [vmem:[%s15302_s3 + $0x2d8] sm:$0xff]  ;;  %v874_v40 = vld [vmem:[%s15302_s3 + $0x2e0] sm:$0xff] }
 0x1cb   :  { %9894 = vmatprep.subr.bf16.mxu0 %v15426_v43  ;;  %9926 = vmatprep.subr.bf16.mxu1 %v9925_v53  ;;  %v9931_v26 = vpack.c.bf16 %v885_v3, %v884_v37  ;;  %v9901_v41 = vpack.c.bf16 %v871_v8, %v870_v7  ;;  %v717_v29 = vadd.f32 %v716_v4, %v715_v49  ;;  %v904_v11 = vld [vmem:[%s15302_s3 + $0x3d0] sm:$0xff]  ;;  %v905_v36 = vld [vmem:[%s15302_s3 + $0x3d8] sm:$0xff]  ;;  %v875_v49 = vld [vmem:[%s15302_s3 + $0x2e8] sm:$0xff] }
 0x1cc   :  { %v9933_v38 = vpack.c.bf16 %v903_v57, %v902_v58  ;;  %v735_v30 = vadd.f32 %v734_v27, %v733_v31  ;;  %v681_v33 = vadd.f32 %v680_v15, %v679_v61  ;;  %v9903_v34 = vpack.c.bf16 %v855_v28, %v854_v21  ;;  %v856_v13 = vld [vmem:[%s15302_s3 + $0x250] sm:$0xff]  ;;  %v857_v16 = vld [vmem:[%s15302_s3 + $0x258] sm:$0xff]  ;;  %v906_v53 = vld [vmem:[%s15302_s3 + $0x3e0] sm:$0xff] }
 0x1cd   :  { %9896 = vmatpush3.bf16.msra.mxu0 %v9895_v63  ;;  %v699_v9 = vadd.f32 %v698_v42, %v697_v47  ;;  %v9935_v45 = vpack.c.bf16 %v887_v32, %v886_v62  ;;  %v9905_v20 = vpack.c.bf16 %v873_v18, %v872_v50  ;;  %v888_v25 = vld [vmem:[%s15302_s3 + $0x350] sm:$0xff]  ;;  %v718_v17 = vrot.slane %v717_v29, 2  ;;  %v889_v39 = vld [vmem:[%s15302_s3 + $0x358] sm:$0xff]  ;;  %v907_v59 = vld [vmem:[%s15302_s3 + $0x3e8] sm:$0xff] }
 0x1ce   :  { %9928 = vmatpush3.bf16.msra.mxu1 %v9927_v54  ;;  %9898 = vmatprep.subr.bf16.mxu0 %v9897_v23  ;;  %v9937_v22 = vpack.c.bf16 %v905_v36, %v904_v11  ;;  %v736_v52 = vrot.slane %v735_v30, 2  ;;  %v682_v60 = vrot.slane %v681_v33, 2  ;;  %v9907_v24 = vpack.c.bf16 %v857_v16, %v856_v13  ;;  %v858_v35 = vld [vmem:[%s15302_s3 + $0x260] sm:$0xff]  ;;  %v859_v61 = vld [vmem:[%s15302_s3 + $0x268] sm:$0xff]  ;;  %v876_v55 = vld [vmem:[%s15302_s3 + $0x2f0] sm:$0xff] }
 0x1cf   :  { %9930 = vmatprep.subr.bf16.mxu1 %v9929_v6  ;;  %v700_v31 = vrot.slane %v699_v9, 2  ;;  %v9939_v19 = vpack.c.bf16 %v889_v39, %v888_v25  ;;  %v9909_v56 = vpack.c.bf16 %v875_v49, %v874_v40  ;;  %v890_v46 = vld [vmem:[%s15302_s3 + $0x360] sm:$0xff]  ;;  %v9941_v63 = vpack.c.bf16 %v907_v59, %v906_v53  ;;  %v891_v47 = vld [vmem:[%s15302_s3 + $0x368] sm:$0xff]  ;;  %v877_v43 = vld [vmem:[%s15302_s3 + $0x2f8] sm:$0xff] }
 0x1d0   :  { %v719_v54 = vadd.f32 %v718_v17, %v717_v29  ;;  %v908_v23 = vld [vmem:[%s15302_s3 + $0x3f0] sm:$0xff]  ;;  %v909_v44 = vld [vmem:[%s15302_s3 + $0x3f8] sm:$0xff]  ;;  %v737_v5 = vadd.f32 %v736_v52, %v735_v30  ;;  %v9911_v37 = vpack.c.bf16 %v859_v61, %v858_v35  ;;  %v683_v4 = vadd.f32 %v682_v60, %v681_v33  ;;  %v1205_v53 = vld [vmem:[#allocation9] sm:$0xff] }
 0x1d1   :  { %9900 = vmatpush3.bf16.msra.mxu0 %v9899_v10  ;;  %v9943_v6 = vpack.c.bf16 %v891_v47, %v890_v46  ;;  %v9913_v3 = vpack.c.bf16 %v877_v43, %v876_v55  ;;  %v860_v7 = vld [vmem:[%s15302_s3 + $0x270] sm:$0xff]  ;;  %v861_v8 = vld [vmem:[%s15302_s3 + $0x278] sm:$0xff]  ;;  %v701_v27 = vadd.f32 %v700_v31, %v699_v9  ;;  %v9945_v58 = vpack.c.bf16 %v909_v44, %v908_v23 }
 0x1d2   :  { %9932 = vmatpush3.bf16.msra.mxu1 %v9931_v26  ;;  %9902 = vmatprep.subr.bf16.mxu0 %v9901_v41  ;;  %v892_v57 = vld [vmem:[%s15302_s3 + $0x370] sm:$0xff]  ;;  %v893_v15 = vld [vmem:[%s15302_s3 + $0x378] sm:$0xff]  ;;  %v720_v10 = vrot.slane %v719_v54, 1  ;;  %v738_v42 = vrot.slane %v737_v5, 1  ;;  %v9915_v26 = vpack.c.bf16 %v861_v8, %v860_v7  ;;  %v684_v41 = vrot.slane %v683_v4, 1  ;;  %s11077_s3 = smov 124  }
 0x1d3   :  { %9934 = vmatprep.subr.bf16.mxu1 %v9933_v38  ;;  %v9947_v21 = vpack.c.bf16 %v893_v15, %v892_v57  ;;  %v702_v28 = vrot.slane %v701_v27, 1  ;;  %v1206_v59 = vld [vmem:[#allocation9 + $0x8] sm:$0xff]  ;;  %v1209_v60 = vcombine.high %v1205_v53, %v1205_v53  ;;  %v10262_v43 = vld [vmem:[%s15304_s5 + $0x204] ss:$16 sps:$4 sm:$0xff]   ;;  %v11078_v44 = vmov 1966171168  }
 0x1d4   :  { %v721_v62 = vadd.f32 %v720_v10, %v719_v54  ;;  %v739_v29 = vadd.f32 %v738_v42, %v737_v5  ;;  %v685_v38 = vadd.f32 %v684_v41, %v683_v4  ;;  %v1210_v31 = vcombine.high %v1206_v59, %v1206_v59  ;;  %v10260_v55 = vld [vmem:[%s15304_s5 + $0x200] ss:$16 sps:$4 sm:$0xff]   ;;  %v10263_v54 = vld [vmem:[%s15304_s5 + $0x208] ss:$16 sps:$4 sm:$0xff]   ;;  %v10265_v23 = vld [vmem:[%s15304_s5 + $0x20c] ss:$16 sps:$4 sm:$0xff]  }
 0x1d5   :  { %9904 = vmatpush3.bf16.msra.mxu0 %v9903_v34  ;;  %v703_v32 = vadd.f32 %v702_v28, %v701_v27  ;;  %v1517_v5 = vunpack.c.l.s4 %v11078_v44  ;;  %v11079_v28 = vmov 1983009808  }
 0x1d6   :  { %9936 = vmatpush3.bf16.msra.mxu1 %v9935_v45  ;;  %9906 = vmatprep.subr.bf16.mxu0 %v9905_v20  ;;  %v774_v50 = vsel %vm757_vm0, %v721_v62, %v685_v38  ;;  %v1793_v62 = vunpack.c.l.s4 %v11079_v28 }
 0x1d7   :  { %9938 = vmatprep.subr.bf16.mxu1 %v9937_v22  ;;  %v776_v18 = vsel %vm757_vm0, %v739_v29, %v703_v32  ;;  %v1518_v4 = vunpack.c.0.s8 %v1517_v5  ;;  %v15442_v5 = vld [vmem:[#allocation39_spill] sm:$0xff] }
 0x1d9   :  { %9908 = vmatpush3.bf16.msra.mxu0 %v9907_v24  ;;  %v15354_v24 = vmov 0.0   ;;  %v12036_v27 = vsub.s32 %v1518_v4, %v11501_v12  ;;  %v15443_v4 = vld [vmem:[#allocation38_spill] sm:$0xff] }
 0x1da   :  { %9940 = vmatpush3.bf16.msra.mxu1 %v9939_v19  ;;  %9910 = vmatprep.subr.bf16.mxu0 %v9909_v56 }
 0x1db   :  { %9942 = vmatprep.subr.bf16.mxu1 %v9941_v63  ;;  %15427 = vst [vmem:[#allocation55_spill] sm:$0xff] %v12036_v27 }
 0x1dd   :  { %9912 = vmatpush3.bf16.msra.mxu0 %v9911_v37 }
 0x1de   :  { %9944 = vmatpush3.bf16.msra.mxu1 %v9943_v6  ;;  %9914 = vmatprep.subr.bf16.mxu0 %v9913_v3 }
 0x1df   :  { %9946 = vmatprep.subr.bf16.mxu1 %v9945_v58 }
 0x1e1   :  { %9916 = vmatpush3.bf16.msra.mxu0 %v9915_v26 }
 0x1e2   :  { %9948 = vmatpush3.bf16.msra.mxu1 %v9947_v21  ;;  %8745 = vmatprep.subr.msk.mxu0 %vm1214_vm1, %v1209_v60 }
 0x1e3   :  { %8754 = vmatprep.subr.msk.mxu1 %vm1214_vm1, %v1210_v31 }
 0x1e4   :  { %1115 = vmatmul.mubr.f32.vlgmr.msra.gmra.mrb[18].mxu0 %v774_v50 }
 0x1e5   :  { %1185 = vmatmul.mubr.f32.vlgmr.msra.gmra.mrb[18].mxu1 %v776_v18  ;;  %1287 = vmatprep.mubr.f32.mxu0 %v15354_v24  ;;  %v1794_v18 = vunpack.c.0.s8 %v1793_v62  ;;  %v15448_v62 = vld [vmem:[#allocation43_spill] sm:$0xff] }
 0x1e6   :  { %1503 = vmatprep.mubr.f32.mxu1 %v15354_v24  ;;  %8746 = vmatpush1.msk.msra.mxu0 %vm1214_vm1, %v1205_v53 }
 0x1e7   :  { %8755 = vmatpush1.msk.msra.mxu1 %vm1214_vm1, %v1206_v59  ;;  %8748 = vmatprep.subr.msk.mxu0 %vm1214_vm1, %v1210_v31  ;;  %v15435_v31 = vld [vmem:[#allocation31_spill] sm:$0xff] }
 0x1e8   :  { %3416 = vmatprep.subr.bf16.mxu1 %v10265_v23  ;;  %v15441_v23 = vld [vmem:[#allocation37_spill] sm:$0xff] }
 0x296   :  { %v9443_v11 = vpop.f32.mrb[16].mxu1 }
 0x297   :  { %v9408_v30 = vpop.f32.mrb[16].mxu0  ;;  %v9444_v33 = vpop.f32.mrb[17].mxu1 }
 0x298   :  { %v9409_v36 = vpop.f32.mrb[17].mxu0  ;;  %v9445_v9 = vadd.f32 %v9444_v33, %v9443_v11  ;;  %v15428_v11 = vld [vmem:[#allocation27_spill] sm:$0xff]  ;;  %v15429_v33 = vld [vmem:[#allocation25_spill] sm:$0xff] }
 0x299   :  { %v9410_v34 = vadd.f32 %v9409_v36, %v9408_v30 }
 0x29b   :  { %v1047_v45 = vadd.f32 %v9445_v9, %v9410_v34  ;;  %v15430_v9 = vld [vmem:[#allocation26_spill] sm:$0xff] }
 0x2b7   :  { %v9478_v20 = vpop.f32.mrb[18].mxu0 }
 0x2b8   :  { %v9513_v13 = vpop.f32.mrb[18].mxu1  ;;  %v9479_v16 = vpop.f32.mrb[19].mxu0 }
 0x2b9   :  { %v9480_v25 = vadd.f32 %v9479_v16, %v9478_v20  ;;  %v9514_v17 = vpop.f32.mrb[19].mxu1  ;;  %v15431_v20 = vld [vmem:[#allocation28_spill] sm:$0xff] }
 0x2ba   :  { %v9515_v22 = vadd.f32 %v9514_v17, %v9513_v13  ;;  %v12049_v17 = vsub.s32 %v1794_v18, %v11501_v12  ;;  %v15438_v12 = vld [vmem:[#allocation33_spill] sm:$0xff] }
 0x2bb   :  { %v1117_v39 = vadd.f32 %v9480_v25, %v1047_v45 }
 0x2bc   :  { %15432 = vst [vmem:[#allocation56_spill] sm:$0xff] %v12049_v17 }
 0x2bd   :  { %v1187_v40 = vadd.f32 %v9515_v22, %v1117_v39 }
 0x2bf   :  { %v1190_v49 = vmul.f32 0.00024414063, %v1187_v40 }
 0x2c1   :  { %v1191_v52 = vmul.f32 %v1190_v49, %v1190_v49  ;;  %v1199_v46 = vsub.f32 0.0, %v1190_v49 }
 0x2c3   :  { %1193 = vrot.lane.b32.xlu0 %v1191_v52, %s11073_s18  ;;  %v15433_v52 = vld [vmem:[#allocation34_spill] sm:$0xff] }
 0x335   :  { %v1194_v19 = vpop.permute.xlu0 %1193 }
 0x336   :  { %v1196_v56 = vsub.f32 %v1190_v49, %v1194_v19 }
 0x338   :  { %v1197_v35 = vadd.f32 1e-05, %v1196_v56  ;;  %v15436_v56 = vld [vmem:[#allocation35_spill] sm:$0xff] }
 0x33a   :  { %10847 = vrsqrt.f32 %v1197_v35 }
 0x344   :  { %v10848_v61 = vpop.eup %10847 }
 0x345   :  { %1201 = vrot.lane.b32.xlu0 %v10848_v61, %s11077_s3  ;;  %v15437_v61 = vld [vmem:[#allocation30_spill] sm:$0xff] }
 0x3b7   :  { %v1202_v63 = vpop.permute.xlu0 %1201 }
 0x3b8   :  { %v1204_v47 = vmul.f32 %v1202_v63, %v1199_v46  ;;  %8747 = vmatmul.mubr.msk.f32.vlgmr.msra.gmra.mrb[20].mxu0 %vm1211_vm2, %v1202_v63 }
 0x3b9   :  { %8749 = vmatpush1.msk.msra.mxu0 %vm1214_vm1, %v1206_v59  ;;  %1358 = vmatprep.mubr.f32.mxu0 %v15354_v24  ;;  %v15434_v59 = vld [vmem:[#allocation29_spill] sm:$0xff] }
 0x3ba   :  { %8756 = vmatmul.mubr.msk.f32.vlgmr.msra.gmra.mrb[20].mxu1 %vm1211_vm2, %v1204_v47  ;;  %8751 = vmatprep.subr.msk.mxu0 %vm1214_vm1, %v1209_v60 }
 0x3bb   :  { %3417 = vmatpush1.bf16.msra.mxu1 %v10263_v54 }
 0x3bc   :  { %8750 = vmatmul.mubr.msk.f32.vlgmr.msra.gmra.mrb[22].mxu0 %vm1211_vm2, %v1202_v63 }
 0x3bd   :  { %8752 = vmatpush1.msk.msra.mxu0 %vm1214_vm1, %v1205_v53  ;;  %1432 = vmatprep.mubr.f32.mxu0 %v15354_v24 }
 0x3be   :  { %3363 = vmatprep.subr.bf16.mxu0 %v10262_v43  ;;  %v15440_v43 = vld [vmem:[#allocation36_spill] sm:$0xff] }
 0x3c0   :  { %8753 = vmatmul.mubr.msk.f32.vlgmr.msra.gmra.mrb[24].mxu0 %vm1211_vm2, %v1204_v47  ;;  %v15439_v47 = vld [vmem:[#allocation32_spill] sm:$0xff] }
 0x3c1   :  { %3364 = vmatpush1.bf16.msra.mxu0 %v10260_v55 }
 0x48b   :  { %v1289_v37 = vpop.f32.mrb[20].mxu0 }
 0x48c   :  { %v1291_v6 = vpop.f32.mrb[21].mxu0 }
 0x48d   :  { %v1514_v3 = vcombine.low %v1289_v37, %v1291_v6  ;;  %v1505_v7 = vpop.f32.mrb[20].mxu1 }
 0x48e   :  { %v1507_v8 = vpop.f32.mrb[21].mxu1 }
 0x48f   :  { %v1623_v58 = vcombine.low %v1505_v7, %v1507_v8  ;;  %v1360_v57 = vpop.f32.mrb[22].mxu0  ;;  %v1522_v42 = vrot.slane %v1514_v3, %v12036_v27  ;;  %v15444_v3 = vld [vmem:[#allocation40_spill] sm:$0xff] }
 0x490   :  { %v1362_v15 = vpop.f32.mrb[23].mxu0 }
 0x491   :  { %v1515_v10 = vcombine.low %v1360_v57, %v1362_v15  ;;  %v1637_v16 = vrot.slane %v1623_v58, %v12036_v27  ;;  %v15445_v58 = vld [vmem:[#allocation41_spill] sm:$0xff] }
 0x493   :  { %v1529_v26 = vrot.slane %v1515_v10, %v12036_v27  ;;  %v1434_v41 = vpop.f32.mrb[24].mxu0  ;;  %v15446_v10 = vld [vmem:[#allocation42_spill] sm:$0xff] }
 0x494   :  { %v1436_v21 = vpop.f32.mrb[25].mxu0 }
 0x495   :  { %v1530_v29 = vcombine.low %v1522_v42, %v1529_v26  ;;  %v1531_v38 = vcombine.high %v1522_v42, %v1529_v26  ;;  %v1622_v32 = vcombine.low %v1434_v41, %v1436_v21  ;;  %v15447_v21 = vld [vmem:[#allocation44_spill] sm:$0xff] }
 0x497   :  { %v1538_v50 = vrot.slane %v1530_v29, %v12036_v27  ;;  %v1545_v30 = vrot.slane %v1531_v38, %v12036_v27  ;;  %v1630_v25 = vrot.slane %v1622_v32, %v12036_v27  ;;  %v15449_v38 = vld [vmem:[#allocation45_spill] sm:$0xff] }
 0x499   :  { %v1549_v36 = vrot.slane %v1538_v50, %v15428_v11  ;;  %v1553_v34 = vrot.slane %v1538_v50, %v15429_v33  ;;  %v1557_v45 = vrot.slane %v1538_v50, %v15430_v9  ;;  %v1561_v13 = vrot.slane %v1538_v50, %v15431_v20  ;;  %v15450_v50 = vld [vmem:[#allocation47_spill] sm:$0xff] }
 0x49a   :  { %v1565_v22 = vrot.slane %v1545_v30, %v15428_v11  ;;  %v1569_v39 = vrot.slane %v1545_v30, %v15429_v33  ;;  %v1573_v40 = vrot.slane %v1545_v30, %v15430_v9  ;;  %v1577_v49 = vrot.slane %v1545_v30, %v15431_v20 }
 0x49b   :  { %v1586_v53 = vmul.f32 %v1549_v36, %v15433_v52  ;;  %v1587_v60 = vmul.f32 %v1553_v34, %v15434_v59  ;;  %v1588_v19 = vmul.f32 %v1557_v45, %v15435_v31  ;;  %v1589_v35 = vmul.f32 %v1561_v13, %v15436_v56  ;;  %v15452_v52 = vld [vmem:[#allocation48_spill] sm:$0xff]  ;;  %v15454_v59 = vld [vmem:[#allocation51_spill] sm:$0xff]  ;;  %v15455_v31 = vld [vmem:[#allocation50_spill] sm:$0xff] }
 0x49c   :  { %v1590_v46 = vmul.f32 %v1549_v36, %v15437_v61  ;;  %v1591_v63 = vmul.f32 %v1553_v34, %v15438_v12  ;;  %v1592_v55 = vmul.f32 %v1557_v45, %v15439_v47  ;;  %v1593_v54 = vmul.f32 %v1561_v13, %v15440_v43  ;;  %v15456_v56 = vld [vmem:[#allocation52_spill] sm:$0xff] }
 0x49d   :  { %v1594_v44 = vmul.f32 %v1549_v36, %v15441_v23  ;;  %v1595_v37 = vmul.f32 %v1553_v34, %v15442_v5  ;;  %v1596_v6 = vmul.f32 %v1557_v45, %v15443_v4  ;;  %v1597_v7 = vmul.f32 %v1561_v13, %v15444_v3  ;;  %v15457_v23 = vld [vmem:[#allocation53_spill] sm:$0xff]  ;;  %v15458_v5 = vld [vmem:[#allocation54_spill] sm:$0xff] }
 0x49e   :  { %v1598_v8 = vmul.f32 %v1549_v36, %v11588_v1  ;;  %v1599_v57 = vmul.f32 %v1553_v34, %v15445_v58  ;;  %v1600_v15 = vmul.f32 %v1557_v45, %v11591_v2  ;;  %v1601_v42 = vmul.f32 %v1561_v13, %v15446_v10  ;;  %v15451_v36 = vld [vmem:[#allocation46_spill] sm:$0xff]  ;;  %v15453_v45 = vld [vmem:[#allocation49_spill] sm:$0xff] }
 0x49f   :  { %v1602_v26 = vmul.f32 %v1565_v22, %v11736_v0  ;;  %v1603_v41 = vmul.f32 %v1569_v39, %v11714_v14  ;;  %v1604_v28 = vmul.f32 %v1573_v40, %v15447_v21  ;;  %v1605_v29 = vmul.f32 %v1577_v49, %v15448_v62 }
 0x4a0   :  { %v1606_v32 = vmul.f32 %v1565_v22, %v15449_v38  ;;  %v1607_v18 = vmul.f32 %v1569_v39, %v15450_v50  ;;  %v1638_v30 = vcombine.low %v1630_v25, %v1637_v16  ;;  %v1639_v1 = vcombine.high %v1630_v25, %v1637_v16  ;;  %v10268_v50 = vld [vmem:[%s15304_s5 + $0x224] ss:$16 sps:$4 sm:$0xff]  }
 0x4a1   :  { %v1608_v34 = vmul.f32 %v1573_v40, %v15451_v36  ;;  %v1609_v2 = vmul.f32 %v1577_v49, %v15452_v52  ;;  %v1610_v13 = vmul.f32 %v1565_v22, %v15453_v45  ;;  %v1611_v0 = vmul.f32 %v1569_v39, %v15454_v59  ;;  %3365 = vmatprep.subr.bf16.mxu0 %v10268_v50 }
 0x4a2   :  { %v1612_v14 = vmul.f32 %v1573_v40, %v15455_v31  ;;  %v1613_v61 = vmul.f32 %v1577_v49, %v15456_v56  ;;  %v1646_v12 = vrot.slane %v1638_v30, %v12036_v27  ;;  %v1653_v47 = vrot.slane %v1639_v1, %v12036_v27  ;;  %v10271_v30 = vld [vmem:[%s15304_s5 + $0x22c] ss:$16 sps:$4 sm:$0xff]  }
 0x4a3   :  { %v1614_v43 = vmul.f32 %v1565_v22, %v11786_v48  ;;  %v1615_v16 = vmul.f32 %v1569_v39, %v15457_v23  ;;  %v1616_v25 = vmul.f32 %v1573_v40, %v11789_v51  ;;  %v1617_v4 = vmul.f32 %v1577_v49, %v15458_v5  ;;  %3418 = vmatprep.subr.bf16.mxu1 %v10271_v30 }
 0x4a4   :  { %v1657_v3 = vrot.slane %v1646_v12, %v15428_v11  ;;  %v1661_v58 = vrot.slane %v1646_v12, %v15429_v33  ;;  %v1665_v10 = vrot.slane %v1646_v12, %v15430_v9  ;;  %v1669_v21 = vrot.slane %v1646_v12, %v15431_v20 }
 0x4a5   :  { %v1673_v62 = vrot.slane %v1653_v47, %v15428_v11  ;;  %v1677_v38 = vrot.slane %v1653_v47, %v15429_v33  ;;  %v1681_v48 = vrot.slane %v1653_v47, %v15430_v9  ;;  %v1685_v22 = vrot.slane %v1653_v47, %v15431_v20 }
 0x4a6   :  { %v12097_v39 = vadd.f32 %v1657_v3, %v1586_v53  ;;  %v12099_v51 = vadd.f32 %v1661_v58, %v1587_v60  ;;  %v12101_v40 = vadd.f32 %v1665_v10, %v1588_v19  ;;  %v12103_v49 = vadd.f32 %v1669_v21, %v1589_v35  ;;  %v10266_v19 = vld [vmem:[%s15304_s5 + $0x220] ss:$16 sps:$4 sm:$0xff]   ;;  %v10269_v35 = vld [vmem:[%s15304_s5 + $0x228] ss:$16 sps:$4 sm:$0xff]  }
 0x4a7   :  { %v12111_v1 = vadd.f32 %v1657_v3, %v1590_v46  ;;  %v12113_v36 = vadd.f32 %v1661_v58, %v1591_v63  ;;  %v12115_v53 = vadd.f32 %v1665_v10, %v1592_v55  ;;  %v12117_v60 = vadd.f32 %v1669_v21, %v1593_v54  ;;  %3366 = vmatpush1.bf16.msra.mxu0 %v10266_v19 }
 0x4a8   :  { %v12125_v52 = vadd.f32 %v1657_v3, %v1594_v44  ;;  %v12127_v45 = vadd.f32 %v1661_v58, %v1595_v37  ;;  %v12129_v46 = vadd.f32 %v1665_v10, %v1596_v6  ;;  %v12131_v63 = vadd.f32 %v1669_v21, %v1597_v7  ;;  %v10274_v7 = vld [vmem:[%s15304_s5 + $0x244] ss:$16 sps:$4 sm:$0xff]   ;;  %3419 = vmatpush1.bf16.msra.mxu1 %v10269_v35 }
 0x4a9   :  { %v12133_v55 = vadd.f32 %v1657_v3, %v1598_v8  ;;  %v12135_v54 = vadd.f32 %v1661_v58, %v1599_v57  ;;  %v12137_v59 = vadd.f32 %v1665_v10, %v1600_v15  ;;  %v12139_v31 = vadd.f32 %v1669_v21, %v1601_v42  ;;  %v10277_v8 = vld [vmem:[%s15304_s5 + $0x24c] ss:$16 sps:$4 sm:$0xff]   ;;  %3367 = vmatprep.subr.bf16.mxu0 %v10274_v7  ;;  %v10278_v3 = vld [vmem:[%s15304_s5 + $0x260] ss:$16 sps:$4 sm:$0xff]  }
 0x4aa   :  { %v12141_v56 = vadd.f32 %v1673_v62, %v1602_v26  ;;  %v12143_v44 = vadd.f32 %v1677_v38, %v1603_v41  ;;  %v12145_v37 = vadd.f32 %v1681_v48, %v1604_v28  ;;  %v12147_v6 = vadd.f32 %v1685_v22, %v1605_v29  ;;  %v10272_v41 = vld [vmem:[%s15304_s5 + $0x240] ss:$16 sps:$4 sm:$0xff]   ;;  %v10275_v28 = vld [vmem:[%s15304_s5 + $0x248] ss:$16 sps:$4 sm:$0xff]   ;;  %3420 = vmatprep.subr.bf16.mxu1 %v10277_v8 }
 0x4ab   :  { %v12155_v57 = vadd.f32 %v1673_v62, %v1606_v32  ;;  %v12157_v15 = vadd.f32 %v1677_v38, %v1607_v18  ;;  %v12159_v42 = vadd.f32 %v1681_v48, %v1608_v34  ;;  %v12161_v26 = vadd.f32 %v1685_v22, %v1609_v2  ;;  %3368 = vmatpush1.bf16.msra.mxu0 %v10272_v41 }
 0x4ac   :  { %v12169_v29 = vadd.f32 %v1673_v62, %v1610_v13  ;;  %v12171_v12 = vadd.f32 %v1677_v38, %v1611_v0  ;;  %v12173_v32 = vadd.f32 %v1681_v48, %v1612_v14  ;;  %v12175_v18 = vadd.f32 %v1685_v22, %v1613_v61  ;;  %v10280_v61 = vld [vmem:[%s15304_s5 + $0x264] ss:$16 sps:$4 sm:$0xff]   ;;  %3421 = vmatpush1.bf16.msra.mxu1 %v10275_v28 }
 0x4ad   :  { %v12177_v34 = vadd.f32 %v1673_v62, %v1614_v43  ;;  %v12179_v2 = vadd.f32 %v1677_v38, %v1615_v16  ;;  %v12181_v47 = vadd.f32 %v1681_v48, %v1616_v25  ;;  %v12183_v23 = vadd.f32 %v1685_v22, %v1617_v4  ;;  %3369 = vmatprep.subr.bf16.mxu0 %v10280_v61  ;;  %v10281_v38 = vld [vmem:[%s15304_s5 + $0x268] ss:$16 sps:$4 sm:$0xff]  }
 0x4ae   :  { %v1726_v5 = vmax.f32 %v12097_v39, 0.0  ;;  %v1727_v13 = vmax.f32 %v12099_v51, 0.0  ;;  %v1728_v0 = vmax.f32 %v12101_v40, 0.0  ;;  %v1729_v14 = vmax.f32 %v12103_v49, 0.0  ;;  %v10283_v40 = vld [vmem:[%s15304_s5 + $0x26c] ss:$16 sps:$4 sm:$0xff]  }
 0x4af   :  { %v1730_v43 = vmax.f32 %v12111_v1, 0.0  ;;  %v1731_v16 = vmax.f32 %v12113_v36, 0.0  ;;  %v1732_v25 = vmax.f32 %v12115_v53, 0.0  ;;  %v1733_v4 = vmax.f32 %v12117_v60, 0.0  ;;  %3370 = vmatpush1.bf16.msra.mxu0 %v10278_v3  ;;  %v10286_v36 = vld [vmem:[%s15304_s5 + $0x284] ss:$16 sps:$4 sm:$0xff]   ;;  %3422 = vmatprep.subr.bf16.mxu1 %v10283_v40 }
 0x4b0   :  { %v1734_v58 = vmax.f32 %v12125_v52, 0.0  ;;  %v1735_v10 = vmax.f32 %v12127_v45, 0.0  ;;  %v1736_v21 = vmax.f32 %v12129_v46, 0.0  ;;  %v1737_v62 = vmax.f32 %v12131_v63, 0.0  ;;  %v10284_v52 = vld [vmem:[%s15304_s5 + $0x280] ss:$16 sps:$4 sm:$0xff]   ;;  %3423 = vmatpush1.bf16.msra.mxu1 %v10281_v38  ;;  %3371 = vmatprep.subr.bf16.mxu0 %v10286_v36 }
 0x4b1   :  { %v1738_v48 = vmax.f32 %v12133_v55, 0.0  ;;  %v1739_v22 = vmax.f32 %v12135_v54, 0.0  ;;  %v1740_v39 = vmax.f32 %v12137_v59, 0.0  ;;  %v1741_v51 = vmax.f32 %v12139_v31, 0.0  ;;  %v10287_v54 = vld [vmem:[%s15304_s5 + $0x288] ss:$16 sps:$4 sm:$0xff]  }
 0x4b2   :  { %v1742_v49 = vmax.f32 %v12141_v56, 0.0  ;;  %v1743_v50 = vmax.f32 %v12143_v44, 0.0  ;;  %v1744_v30 = vmax.f32 %v12145_v37, 0.0  ;;  %v1745_v1 = vmax.f32 %v12147_v6, 0.0  ;;  %v10289_v37 = vld [vmem:[%s15304_s5 + $0x28c] ss:$16 sps:$4 sm:$0xff]  }
 0x4b3   :  { %v1746_v53 = vmax.f32 %v12155_v57, 0.0  ;;  %v1747_v60 = vmax.f32 %v12157_v15, 0.0  ;;  %v1748_v19 = vmax.f32 %v12159_v42, 0.0  ;;  %v1749_v35 = vmax.f32 %v12161_v26, 0.0  ;;  %3372 = vmatpush1.bf16.msra.mxu0 %v10284_v52  ;;  %v10292_v15 = vld [vmem:[%s15304_s5 + $0x2a4] ss:$16 sps:$4 sm:$0xff]   ;;  %3424 = vmatprep.subr.bf16.mxu1 %v10289_v37 }
 0x4b4   :  { %v1750_v45 = vmax.f32 %v12169_v29, 0.0  ;;  %v1751_v46 = vmax.f32 %v12171_v12, 0.0  ;;  %v1752_v63 = vmax.f32 %v12173_v32, 0.0  ;;  %v1753_v55 = vmax.f32 %v12175_v18, 0.0  ;;  %v10295_v42 = vld [vmem:[%s15304_s5 + $0x2ac] ss:$16 sps:$4 sm:$0xff]   ;;  %3425 = vmatpush1.bf16.msra.mxu1 %v10287_v54  ;;  %3373 = vmatprep.subr.bf16.mxu0 %v10292_v15 }
 0x4b5   :  { %v1754_v59 = vmax.f32 %v12177_v34, 0.0  ;;  %v1755_v31 = vmax.f32 %v12179_v2, 0.0  ;;  %v1756_v56 = vmax.f32 %v12181_v47, 0.0  ;;  %v1757_v44 = vmax.f32 %v12183_v23, 0.0  ;;  %v10290_v12 = vld [vmem:[%s15304_s5 + $0x2a0] ss:$16 sps:$4 sm:$0xff]   ;;  %3426 = vmatprep.subr.bf16.mxu1 %v10295_v42 }
 0x4b6   :  { %v1758_v6 = vmax.f32 %v1726_v5, %v1728_v0  ;;  %v1759_v7 = vmax.f32 %v1727_v13, %v1729_v14  ;;  %v1760_v8 = vmax.f32 %v1730_v43, %v1732_v25  ;;  %v1761_v57 = vmax.f32 %v1731_v16, %v1733_v4  ;;  %v10293_v47 = vld [vmem:[%s15304_s5 + $0x2a8] ss:$16 sps:$4 sm:$0xff]   ;;  %v10298_v25 = vld [vmem:[%s15304_s5 + $0x2c4] ss:$16 sps:$4 sm:$0xff]   ;;  %v10301_v4 = vld [vmem:[%s15304_s5 + $0x2cc] ss:$16 sps:$4 sm:$0xff]  }
 0x4b7   :  { %v1762_v26 = vmax.f32 %v1734_v58, %v1736_v21  ;;  %v1763_v41 = vmax.f32 %v1735_v10, %v1737_v62  ;;  %v1764_v28 = vmax.f32 %v1738_v48, %v1740_v39  ;;  %v1765_v29 = vmax.f32 %v1739_v22, %v1741_v51  ;;  %3374 = vmatpush1.bf16.msra.mxu0 %v10290_v12  ;;  %v10296_v62 = vld [vmem:[%s15304_s5 + $0x2c0] ss:$16 sps:$4 sm:$0xff]   ;;  %v10299_v39 = vld [vmem:[%s15304_s5 + $0x2c8] ss:$16 sps:$4 sm:$0xff]  }
 0x4b8   :  { %v1766_v32 = vmax.f32 %v1742_v49, %v1744_v30  ;;  %v1767_v18 = vmax.f32 %v1743_v50, %v1745_v1  ;;  %v12250_v34 = vmax.f32 %v1746_v53, %v1748_v19  ;;  %v12252_v2 = vmax.f32 %v1747_v60, %v1749_v35  ;;  %3427 = vmatpush1.bf16.msra.mxu1 %v10293_v47  ;;  %v10304_v30 = vld [vmem:[%s15304_s5 + $0x2e4] ss:$16 sps:$4 sm:$0xff]   ;;  %v10307_v1 = vld [vmem:[%s15304_s5 + $0x2ec] ss:$16 sps:$4 sm:$0xff]   ;;  %v10302_v35 = vld [vmem:[%s15304_s5 + $0x2e0] ss:$16 sps:$4 sm:$0xff]  }
 0x4b9   :  { %v12257_v23 = vmax.f32 %v1750_v45, %v1752_v63  ;;  %v12259_v5 = vmax.f32 %v1751_v46, %v1753_v55  ;;  %v12261_v13 = vmax.f32 %v1754_v59, %v1756_v56  ;;  %v12263_v0 = vmax.f32 %v1755_v31, %v1757_v44  ;;  %3375 = vmatprep.subr.bf16.mxu0 %v10298_v25  ;;  %v10305_v55 = vld [vmem:[%s15304_s5 + $0x2e8] ss:$16 sps:$4 sm:$0xff]  }
 0x4ba   :  { %v1790_v14 = vcombine.low %v1758_v6, %v1759_v7  ;;  %v1791_v61 = vcombine.high %v1758_v6, %v1759_v7  ;;  %v1808_v43 = vcombine.low %v1760_v8, %v1761_v57  ;;  %v1809_v16 = vcombine.high %v1760_v8, %v1761_v57  ;;  %3428 = vmatprep.subr.bf16.mxu1 %v10301_v4  ;;  %v10310_v8 = vld [vmem:[%s15304_s5 + $0x304] ss:$16 sps:$4 sm:$0xff]   ;;  %v10313_v57 = vld [vmem:[%s15304_s5 + $0x30c] ss:$16 sps:$4 sm:$0xff]  }
 0x4bb   :  { %v1826_v3 = vcombine.low %v1762_v26, %v1763_v41  ;;  %v1827_v58 = vcombine.high %v1762_v26, %v1763_v41  ;;  %v1844_v10 = vcombine.low %v1764_v28, %v1765_v29  ;;  %v1845_v21 = vcombine.high %v1764_v28, %v1765_v29  ;;  %3376 = vmatpush1.bf16.msra.mxu0 %v10296_v62  ;;  %v10308_v28 = vld [vmem:[%s15304_s5 + $0x300] ss:$16 sps:$4 sm:$0xff]  }
 0x4bc   :  { %v1798_v38 = vrot.slane %v1790_v14, %v12049_v17  ;;  %v1805_v48 = vrot.slane %v1791_v61, %v12049_v17  ;;  %v1816_v22 = vrot.slane %v1808_v43, %v12049_v17  ;;  %v1823_v51 = vrot.slane %v1809_v16, %v12049_v17  ;;  %3429 = vmatpush1.bf16.msra.mxu1 %v10299_v39  ;;  %v10316_v43 = vld [vmem:[%s15304_s5 + $0x324] ss:$16 sps:$4 sm:$0xff]   ;;  %v10319_v16 = vld [vmem:[%s15304_s5 + $0x32c] ss:$16 sps:$4 sm:$0xff]  }
 0x4bd   :  { %v12282_v40 = vrot.slane %v1826_v3, %v12049_v17  ;;  %v12285_v49 = vrot.slane %v1827_v58, %v12049_v17  ;;  %v12288_v50 = vrot.slane %v1844_v10, %v12049_v17  ;;  %v12297_v19 = vrot.slane %v1845_v21, %v12049_v17  ;;  %3377 = vmatprep.subr.bf16.mxu0 %v10304_v30  ;;  %v10314_v10 = vld [vmem:[%s15304_s5 + $0x320] ss:$16 sps:$4 sm:$0xff]  }
 0x4be   :  { %v1806_v36 = vcombine.high %v1798_v38, %v1798_v38  ;;  %v1807_v53 = vcombine.high %v1805_v48, %v1805_v48  ;;  %v1824_v60 = vcombine.high %v1816_v22, %v1816_v22  ;;  %v1862_v52 = vcombine.low %v1766_v32, %v1767_v18  ;;  %3430 = vmatprep.subr.bf16.mxu1 %v10307_v1 }
 0x4bf   :  { %v1863_v45 = vcombine.high %v1766_v32, %v1767_v18  ;;  %v1880_v46 = vcombine.low %v12250_v34, %v12252_v2  ;;  %v1881_v63 = vcombine.high %v12250_v34, %v12252_v2  ;;  %v1898_v54 = vcombine.low %v12257_v23, %v12259_v5  ;;  %3378 = vmatpush1.bf16.msra.mxu0 %v10302_v35  ;;  %v10311_v34 = vld [vmem:[%s15304_s5 + $0x308] ss:$16 sps:$4 sm:$0xff]  }
 0x4c0   :  { %v1899_v59 = vcombine.high %v12257_v23, %v12259_v5  ;;  %v1916_v31 = vcombine.low %v12261_v13, %v12263_v0  ;;  %v1917_v56 = vcombine.high %v12261_v13, %v12263_v0  ;;  %v1825_v44 = vcombine.high %v1823_v51, %v1823_v51  ;;  %3431 = vmatpush1.bf16.msra.mxu1 %v10305_v55  ;;  %v10320_v55 = vld [vmem:[%s15304_s5 + $0x340] ss:$16 sps:$4 sm:$0xff]  }
 0x4c1   :  { %v12318_v37 = vrot.slane %v1862_v52, %v12049_v17  ;;  %v12321_v6 = vrot.slane %v1863_v45, %v12049_v17  ;;  %v12324_v7 = vrot.slane %v1880_v46, %v12049_v17  ;;  %v1842_v15 = vcombine.high %v12282_v40, %v12282_v40  ;;  %3379 = vmatprep.subr.bf16.mxu0 %v10310_v8  ;;  %v10322_v52 = vld [vmem:[%s15304_s5 + $0x344] ss:$16 sps:$4 sm:$0xff]   ;;  %v10325_v45 = vld [vmem:[%s15304_s5 + $0x34c] ss:$16 sps:$4 sm:$0xff]  }
 0x4c2   :  { %v1843_v42 = vcombine.high %v12285_v49, %v12285_v49  ;;  %v1860_v26 = vcombine.high %v12288_v50, %v12288_v50  ;;  %v1861_v41 = vcombine.high %v12297_v19, %v12297_v19  ;;  %v12344_v29 = vrot.slane %v1881_v63, %v12049_v17  ;;  %3432 = vmatprep.subr.bf16.mxu1 %v10313_v57 }
 0x4c3   :  { %v12347_v12 = vrot.slane %v1898_v54, %v12049_v17  ;;  %v12350_v32 = vrot.slane %v1899_v59, %v12049_v17  ;;  %v12353_v18 = vrot.slane %v1916_v31, %v12049_v17  ;;  %v1878_v2 = vcombine.high %v12318_v37, %v12318_v37  ;;  %3380 = vmatpush1.bf16.msra.mxu0 %v10308_v28 }
 0x4c4   :  { %v1879_v47 = vcombine.high %v12321_v6, %v12321_v6  ;;  %v1896_v23 = vcombine.high %v12324_v7, %v12324_v7  ;;  %v12365_v5 = vrot.slane %v1917_v56, %v12049_v17  ;;  %v12368_v13 = vrot.slane %v1798_v38, %v12049_v17  ;;  %3433 = vmatpush1.bf16.msra.mxu1 %v10311_v34 }
 0x4c5   :  { %v12371_v0 = vrot.slane %v1806_v36, %v12049_v17  ;;  %v12374_v14 = vrot.slane %v1805_v48, %v12049_v17  ;;  %v12377_v61 = vrot.slane %v1807_v53, %v12049_v17  ;;  %v12386_v25 = vrot.slane %v1816_v22, %v12049_v17  ;;  %v10317_v22 = vld [vmem:[%s15304_s5 + $0x328] ss:$16 sps:$4 sm:$0xff]   ;;  %3381 = vmatprep.subr.bf16.mxu0 %v10316_v43  ;;  %v10326_v43 = vld [vmem:[%s15304_s5 + $0x360] ss:$16 sps:$4 sm:$0xff]  }
 0x4c6   :  { %v12389_v4 = vrot.slane %v1824_v60, %v12049_v17  ;;  %v12392_v3 = vrot.slane %v1823_v51, %v12049_v17  ;;  %v12395_v58 = vrot.slane %v1825_v44, %v12049_v17  ;;  %v1897_v21 = vcombine.high %v12344_v29, %v12344_v29  ;;  %3434 = vmatprep.subr.bf16.mxu1 %v10319_v16  ;;  %v10323_v44 = vld [vmem:[%s15304_s5 + $0x348] ss:$16 sps:$4 sm:$0xff]  }
 0x4c7   :  { %v1914_v62 = vcombine.high %v12347_v12, %v12347_v12  ;;  %v1915_v38 = vcombine.high %v12350_v32, %v12350_v32  ;;  %v1932_v48 = vcombine.high %v12353_v18, %v12353_v18  ;;  %v1933_v39 = vcombine.high %v12365_v5, %v12365_v5  ;;  %3382 = vmatpush1.bf16.msra.mxu0 %v10314_v10  ;;  %v10329_v10 = vld [vmem:[%s15304_s5 + $0x368] ss:$16 sps:$4 sm:$0xff]  }
 0x4c8   :  { %v1941_v51 = vcombine.high %v12368_v13, %v12368_v13  ;;  %v1949_v30 = vcombine.high %v12371_v0, %v12371_v0  ;;  %v1957_v1 = vcombine.high %v12374_v14, %v12374_v14  ;;  %v1965_v36 = vcombine.high %v12377_v61, %v12377_v61  ;;  %3435 = vmatpush1.bf16.msra.mxu1 %v10317_v22 }
 0x4c9   :  { %v12423_v53 = vrot.slane %v12282_v40, %v12049_v17  ;;  %v12426_v60 = vrot.slane %v1842_v15, %v12049_v17  ;;  %v12430_v35 = vrot.slane %v12285_v49, %v12049_v17  ;;  %v12450_v54 = vrot.slane %v1843_v42, %v12049_v17  ;;  %3383 = vmatprep.subr.bf16.mxu0 %v10322_v52  ;;  %v10332_v52 = vld [vmem:[%s15304_s5 + $0x380] ss:$16 sps:$4 sm:$0xff]   ;;  %v10347_v49 = vld [vmem:[%s15304_s5 + $0x3c8] ss:$16 sps:$4 sm:$0xff]  }
 0x4ca   :  { %v12454_v59 = vrot.slane %v12288_v50, %v12049_v17  ;;  %v12457_v31 = vrot.slane %v1860_v26, %v12049_v17  ;;  %v12461_v56 = vrot.slane %v12297_v19, %v12049_v17  ;;  %v12473_v15 = vrot.slane %v1861_v41, %v12049_v17  ;;  %3436 = vmatprep.subr.bf16.mxu1 %v10325_v45  ;;  %v10328_v41 = vld [vmem:[%s15304_s5 + $0x364] ss:$16 sps:$4 sm:$0xff]  }
 0x4cb   :  { %v12477_v19 = vrot.slane %v12318_v37, %v12049_v17  ;;  %v12480_v42 = vrot.slane %v1878_v2, %v12049_v17  ;;  %v12484_v26 = vrot.slane %v12321_v6, %v12049_v17  ;;  %v12487_v28 = vrot.slane %v1879_v47, %v12049_v17  ;;  %v10331_v37 = vld [vmem:[%s15304_s5 + $0x36c] ss:$16 sps:$4 sm:$0xff]   ;;  %3384 = vmatpush1.bf16.msra.mxu0 %v10320_v55  ;;  %v10334_v45 = vld [vmem:[%s15304_s5 + $0x384] ss:$16 sps:$4 sm:$0xff]  }
 0x4cc   :  { %v12497_v34 = vrot.slane %v12324_v7, %v12049_v17  ;;  %v12500_v2 = vrot.slane %v1896_v23, %v12049_v17  ;;  %v12504_v6 = vrot.slane %v12344_v29, %v12049_v17  ;;  %v12507_v47 = vrot.slane %v1897_v21, %v12049_v17  ;;  %3437 = vmatpush1.bf16.msra.mxu1 %v10323_v44 }
 0x4cd   :  { %3385 = vmatprep.subr.bf16.mxu0 %v10328_v41  ;;  %v12535_v44 = vrot.slane %v12347_v12, %v12049_v17  ;;  %v12538_v24 = vrot.slane %v1914_v62, %v12049_v17  ;;  %v12542_v22 = vrot.slane %v12350_v32, %v12049_v17  ;;  %3438 = vmatprep.subr.bf16.mxu1 %v10331_v37  ;;  %v10337_v41 = vld [vmem:[%s15304_s5 + $0x38c] ss:$16 sps:$4 sm:$0xff]   ;;  %v10335_v32 = vld [vmem:[%s15304_s5 + $0x388] ss:$16 sps:$4 sm:$0xff]   ;;  %v2269_v55 = vsel %vm2254_vm3, %v12371_v0, -inf }
 0x4ce   :  { %v12565_v21 = vrot.slane %v1915_v38, %v12049_v17  ;;  %v12569_v62 = vrot.slane %v12353_v18, %v12049_v17  ;;  %v12575_v37 = vrot.slane %v1932_v48, %v12049_v17  ;;  %v12594_v48 = vrot.slane %v1933_v39, %v12049_v17 }
 0x4cf   :  { %3386 = vmatpush1.bf16.msra.mxu0 %v10326_v43  ;;  %v12579_v43 = vrot.slane %v12365_v5, %v12049_v17  ;;  %v2262_v38 = vsel %vm2254_vm3, %v1941_v51, -inf  ;;  %v2276_v18 = vsel %vm2254_vm3, %v1949_v30, -inf  ;;  %v10338_v5 = vld [vmem:[%s15304_s5 + $0x3a0] ss:$16 sps:$4 sm:$0xff]   ;;  %v2270_v12 = vrot.slane %v2269_v55, 4 }
 0x4d0   :  { %15459 = vst [vmem:[#allocation34_spill] sm:$0xff] %v12569_v62  ;;  %15460 = vst [vmem:[#allocation29_spill] sm:$0xff] %v12575_v37  ;;  %3439 = vmatpush1.bf16.msra.mxu1 %v10329_v10  ;;  %3387 = vmatprep.subr.bf16.mxu0 %v10334_v45  ;;  %v2255_v10 = vsel %vm2254_vm3, %v12368_v13, -inf  ;;  %v2263_v45 = vrot.slane %v2262_v38, 4  ;;  %v2277_v29 = vrot.slane %v2276_v18, 4  ;;  %v2283_v51 = vsel %vm2254_vm3, %v12374_v14, -inf }
 0x4d1   :  { %15461 = vst [vmem:[#allocation31_spill] sm:$0xff] %v12579_v43  ;;  %15462 = vst [vmem:[#allocation35_spill] sm:$0xff] %v12594_v48  ;;  %3440 = vmatprep.subr.bf16.mxu1 %v10337_v41  ;;  %v2256_v39 = vrot.slane %v2255_v10, 4  ;;  %v10340_v13 = vld [vmem:[%s15304_s5 + $0x3a4] ss:$16 sps:$4 sm:$0xff]   ;;  %v2290_v0 = vsel %vm2254_vm3, %v1957_v1, -inf  ;;  %v2271_v16 = vmax.f32 %v2269_v55, %v2270_v12 }
 0x4d2   :  { %v2297_v30 = vsel %vm2254_vm3, %v12377_v61, -inf  ;;  %v10341_v41 = vld [vmem:[%s15304_s5 + $0x3a8] ss:$16 sps:$4 sm:$0xff]   ;;  %v2264_v7 = vmax.f32 %v2262_v38, %v2263_v45  ;;  %v2278_v50 = vmax.f32 %v2276_v18, %v2277_v29  ;;  %v10343_v14 = vld [vmem:[%s15304_s5 + $0x3ac] ss:$16 sps:$4 sm:$0xff]   ;;  %v2284_v1 = vrot.slane %v2283_v51, 4 }
 0x4d3   :  { %3388 = vmatpush1.bf16.msra.mxu0 %v10332_v52  ;;  %v2304_v52 = vsel %vm2254_vm3, %v1965_v36, -inf  ;;  %v2257_v23 = vmax.f32 %v2255_v10, %v2256_v39  ;;  %v10346_v61 = vld [vmem:[%s15304_s5 + $0x3c4] ss:$16 sps:$4 sm:$0xff]   ;;  %v2291_v36 = vrot.slane %v2290_v0, 4  ;;  %v10344_v10 = vld [vmem:[%s15304_s5 + $0x3c0] ss:$16 sps:$4 sm:$0xff]  }
 0x4d4   :  { %3441 = vmatpush1.bf16.msra.mxu1 %v10335_v32  ;;  %3389 = vmatprep.subr.bf16.mxu0 %v10340_v13  ;;  %v2298_v32 = vrot.slane %v2297_v30, 4  ;;  %v2305_v57 = vrot.slane %v2304_v52, 4  ;;  %v2265_v55 = vrot.slane %v2264_v7, 2  ;;  %v2272_v29 = vrot.slane %v2271_v16, 2  ;;  %v10349_v18 = vld [vmem:[%s15304_s5 + $0x3cc] ss:$16 sps:$4 sm:$0xff]  }
 0x4d5   :  { %v2258_v38 = vrot.slane %v2257_v23, 2  ;;  %v2279_v12 = vrot.slane %v2278_v50, 2  ;;  %3442 = vmatprep.subr.bf16.mxu1 %v10343_v14  ;;  %v2285_v39 = vmax.f32 %v2283_v51, %v2284_v1  ;;  %v2292_v45 = vmax.f32 %v2290_v0, %v2291_v36 }
 0x4d6   :  { %v2299_v13 = vmax.f32 %v2297_v30, %v2298_v32  ;;  %v2306_v8 = vmax.f32 %v2304_v52, %v2305_v57  ;;  %v2266_v46 = vmax.f32 %v2264_v7, %v2265_v55  ;;  %v2273_v40 = vmax.f32 %v2271_v16, %v2272_v29  ;;  %v10355_v57 = vld [vmem:[%s15304_s5 + $0x3ec] ss:$16 sps:$4 sm:$0xff]   ;;  %v10350_v52 = vld [vmem:[%s15304_s5 + $0x3e0] ss:$16 sps:$4 sm:$0xff]   ;;  %v10353_v32 = vld [vmem:[%s15304_s5 + $0x3e8] ss:$16 sps:$4 sm:$0xff]  }
 0x4d7   :  { %3390 = vmatpush1.bf16.msra.mxu0 %v10338_v5  ;;  %v2259_v63 = vmax.f32 %v2257_v23, %v2258_v38  ;;  %v12644_v17 = vmax.f32 %v2278_v50, %v2279_v12  ;;  %v10352_v5 = vld [vmem:[%s15304_s5 + $0x3e4] ss:$16 sps:$4 sm:$0xff]   ;;  %v2286_v14 = vrot.slane %v2285_v39, 2  ;;  %v2293_v51 = vrot.slane %v2292_v45, 2 }
 0x4d8   :  { %3443 = vmatpush1.bf16.msra.mxu1 %v10341_v41  ;;  %3391 = vmatprep.subr.bf16.mxu0 %v10346_v61  ;;  %v2300_v0 = vrot.slane %v2299_v13, 2  ;;  %v2307_v30 = vrot.slane %v2306_v8, 2  ;;  %v2267_v50 = vrot.slane %v2266_v46, 1  ;;  %v2274_v23 = vrot.slane %v2273_v40, 1 }
 0x4d9   :  { %3444 = vmatprep.subr.bf16.mxu1 %v10349_v18  ;;  %v2260_v16 = vrot.slane %v2259_v63, 1  ;;  %v12657_v41 = vmax.f32 %v2285_v39, %v2286_v14  ;;  %v12659_v61 = vmax.f32 %v2292_v45, %v2293_v51  ;;  %v2281_v45 = vrot.slane %v12644_v17, 1 }
 0x4da   :  { %v12661_v1 = vmax.f32 %v2299_v13, %v2300_v0  ;;  %v12663_v36 = vmax.f32 %v2306_v8, %v2307_v30  ;;  %v10361_v8 = vld [vmem:[%s15304_s5 + $0xc] ss:$16 sps:$4 sm:$0xff]   ;;  %v12684_v18 = vmax.f32 %v2266_v46, %v2267_v50  ;;  %v12686_v39 = vmax.f32 %v2273_v40, %v2274_v23 }
 0x4db   :  { %3392 = vmatpush1.bf16.msra.mxu0 %v10344_v10  ;;  %v12682_v12 = vmax.f32 %v2259_v63, %v2260_v16  ;;  %v2311_v13 = vsel %vm2254_vm3, %v12386_v25, -inf  ;;  %v2325_v51 = vsel %vm2254_vm3, %v12389_v4, -inf  ;;  %v15467_v46 = vcombine.high %v12389_v4, %v12389_v4 }
 0x4dc   :  { %3445 = vmatpush1.bf16.msra.mxu1 %v10347_v49  ;;  %3393 = vmatprep.subr.bf16.mxu0 %v10352_v5  ;;  %v10358_v49 = vld [vmem:[%s15304_s5 + $0x4] ss:$16 sps:$4 sm:$0xff]   ;;  %15464 = vst [vmem:[#allocation33_spill] sm:$0xff] %v12684_v18  ;;  %15465 = vst [vmem:[#allocation32_spill] sm:$0xff] %v12686_v39  ;;  %v15466_v5 = vcombine.high %v12386_v25, %v12386_v25  ;;  %v2288_v63 = vrot.slane %v12657_v41, 1  ;;  %v2295_v0 = vrot.slane %v12659_v61, 1 }
 0x4dd   :  { %15463 = vst [vmem:[#allocation30_spill] sm:$0xff] %v12682_v12  ;;  %3446 = vmatprep.subr.bf16.mxu1 %v10355_v57  ;;  %v2332_v40 = vsel %vm2254_vm3, %v15467_v46, -inf  ;;  %v2302_v30 = vrot.slane %v12661_v1, 1  ;;  %v2309_v57 = vrot.slane %v12663_v36, 1  ;;  %v2312_v25 = vrot.slane %v2311_v13, 4 }
 0x4de   :  { %v2318_v14 = vsel %vm2254_vm3, %v15466_v5, -inf  ;;  %v2326_v50 = vrot.slane %v2325_v51, 4  ;;  %v2333_v23 = vrot.slane %v2332_v40, 4  ;;  %v2339_v4 = vsel %vm2254_vm3, %v12392_v3, -inf }
 0x4df   :  { %3394 = vmatpush1.bf16.msra.mxu0 %v10350_v52  ;;  %v2319_v16 = vrot.slane %v2318_v14, 4  ;;  %v15468_v52 = vcombine.high %v12392_v3, %v12392_v3  ;;  %v2353_v46 = vsel %vm2254_vm3, %v12395_v58, -inf  ;;  %v2313_v55 = vmax.f32 %v2311_v13, %v2312_v25 }
 0x4e0   :  { %3447 = vmatpush1.bf16.msra.mxu1 %v10353_v32  ;;  %3789 = vmatprep.subr.bf16.mxu0 %v10358_v49  ;;  %v15469_v32 = vcombine.high %v12395_v58, %v12395_v58  ;;  %v2327_v49 = vmax.f32 %v2325_v51, %v2326_v50  ;;  %v2340_v10 = vrot.slane %v2339_v4, 4  ;;  %v2354_v27 = vrot.slane %v2353_v46, 4 }
 0x4e1   :  { %3842 = vmatprep.subr.bf16.mxu1 %v10361_v8  ;;  %v2346_v5 = vsel %vm2254_vm3, %v15468_v52, -inf  ;;  %v2320_v38 = vmax.f32 %v2318_v14, %v2319_v16  ;;  %v2334_v8 = vmax.f32 %v2332_v40, %v2333_v23  ;;  %v2314_v33 = vrot.slane %v2313_v55, 2 }
 0x4e2   :  { %v2360_v29 = vsel %vm2254_vm3, %v15469_v32, -inf  ;;  %v2347_v7 = vrot.slane %v2346_v5, 4  ;;  %v2328_v9 = vrot.slane %v2327_v49, 2  ;;  %v2341_v11 = vmax.f32 %v2339_v4, %v2340_v10 }
 0x4e3   :  { %v2361_v20 = vrot.slane %v2360_v29, 4  ;;  %v2321_v3 = vrot.slane %v2320_v38, 2  ;;  %v2335_v52 = vrot.slane %v2334_v8, 2  ;;  %v2355_v39 = vmax.f32 %v2353_v46, %v2354_v27 }
 0x4e4   :  { %v2348_v18 = vmax.f32 %v2346_v5, %v2347_v7  ;;  %v2315_v48 = vmax.f32 %v2313_v55, %v2314_v33  ;;  %v2329_v43 = vmax.f32 %v2327_v49, %v2328_v9  ;;  %v2342_v13 = vrot.slane %v2341_v11, 2 }
 0x4e5   :  { %v2362_v12 = vmax.f32 %v2360_v29, %v2361_v20  ;;  %v2322_v58 = vmax.f32 %v2320_v38, %v2321_v3  ;;  %v2336_v32 = vmax.f32 %v2334_v8, %v2335_v52  ;;  %v2356_v51 = vrot.slane %v2355_v39, 2 }
 0x4e6   :  { %v2349_v14 = vrot.slane %v2348_v18, 2  ;;  %v12718_v25 = vmax.f32 %v12644_v17, %v2281_v45  ;;  %v2316_v16 = vrot.slane %v2315_v48, 1  ;;  %v2330_v23 = vrot.slane %v2329_v43, 1 }
 0x4e7   :  { %v2363_v40 = vrot.slane %v2362_v12, 2  ;;  %v2323_v50 = vrot.slane %v2322_v58, 1  ;;  %v2343_v37 = vmax.f32 %v2341_v11, %v2342_v13  ;;  %v2357_v10 = vmax.f32 %v2355_v39, %v2356_v51 }
 0x4e8   :  { %v2350_v62 = vmax.f32 %v2348_v18, %v2349_v14  ;;  %v12721_v27 = vmax.f32 %v12657_v41, %v2288_v63  ;;  %v12724_v33 = vmax.f32 %v12659_v61, %v2295_v0  ;;  %v12727_v9 = vmax.f32 %v12661_v1, %v2302_v30 }
 0x4e9   :  { %v2364_v7 = vmax.f32 %v2362_v12, %v2363_v40  ;;  %v12730_v20 = vmax.f32 %v12663_v36, %v2309_v57  ;;  %v12732_v17 = vmax.f32 %v2315_v48, %v2316_v16  ;;  %v12734_v38 = vmax.f32 %v2322_v58, %v2323_v50 }
 0x4ea   :  { %15470 = vst [vmem:[#allocation36_spill] sm:$0xff] %v12727_v9  ;;  %v12736_v11 = vmax.f32 %v2329_v43, %v2330_v23  ;;  %v2337_v55 = vrot.slane %v2336_v32, 1  ;;  %v2367_v41 = vsel %vm2254_vm3, %v12423_v53, -inf  ;;  %v15475_v61 = vcombine.high %v12423_v53, %v12423_v53 }
 0x4eb   :  { %15471 = vst [vmem:[#allocation37_spill] sm:$0xff] %v12730_v20  ;;  %15472 = vst [vmem:[#allocation39_spill] sm:$0xff] %v12732_v17  ;;  %v2381_v1 = vsel %vm2254_vm3, %v12426_v60, -inf  ;;  %v15476_v48 = vcombine.high %v12426_v60, %v12426_v60  ;;  %v2344_v12 = vrot.slane %v2343_v37, 1  ;;  %v2351_v43 = vrot.slane %v2350_v62, 1 }
 0x4ec   :  { %15473 = vst [vmem:[#allocation38_spill] sm:$0xff] %v12734_v38  ;;  %15474 = vst [vmem:[#allocation40_spill] sm:$0xff] %v12736_v11  ;;  %v2374_v29 = vsel %vm2254_vm3, %v15475_v61, -inf  ;;  %v2358_v18 = vrot.slane %v2357_v10, 1  ;;  %v2365_v39 = vrot.slane %v2364_v7, 1  ;;  %v2368_v45 = vrot.slane %v2367_v41, 4 }
 0x4ed   :  { %v2388_v36 = vsel %vm2254_vm3, %v15476_v48, -inf  ;;  %v2375_v63 = vrot.slane %v2374_v29, 4  ;;  %v2382_v0 = vrot.slane %v2381_v1, 4  ;;  %v2395_v53 = vsel %vm2254_vm3, %v12430_v35, -inf }
 0x4ee   :  { %v2389_v30 = vrot.slane %v2388_v36, 4  ;;  %v15477_v57 = vcombine.high %v12430_v35, %v12430_v35  ;;  %v2409_v60 = vsel %vm2254_vm3, %v12450_v54, -inf  ;;  %v15478_v5 = vcombine.high %v12450_v54, %v12450_v54 }
 0x4ef   :  { %v2369_v49 = vmax.f32 %v2367_v41, %v2368_v45  ;;  %v2376_v8 = vmax.f32 %v2374_v29, %v2375_v63  ;;  %v2383_v3 = vmax.f32 %v2381_v1, %v2382_v0  ;;  %v2396_v58 = vrot.slane %v2395_v53, 4 }
 0x4f0   :  { %v2402_v4 = vsel %vm2254_vm3, %v15477_v57, -inf  ;;  %v2416_v46 = vsel %vm2254_vm3, %v15478_v5, -inf  ;;  %v2390_v52 = vmax.f32 %v2388_v36, %v2389_v30  ;;  %v2410_v14 = vrot.slane %v2409_v60, 4 }
 0x4f1   :  { %v2403_v13 = vrot.slane %v2402_v4, 4  ;;  %v2417_v51 = vrot.slane %v2416_v46, 4  ;;  %v2370_v40 = vrot.slane %v2369_v49, 2  ;;  %v2377_v35 = vrot.slane %v2376_v8, 2 }
 0x4f2   :  { %v2384_v16 = vrot.slane %v2383_v3, 2  ;;  %v2391_v50 = vrot.slane %v2390_v52, 2  ;;  %v2397_v23 = vmax.f32 %v2395_v53, %v2396_v58  ;;  %v2411_v48 = vmax.f32 %v2409_v60, %v2410_v14 }
 0x4f3   :  { %v2404_v61 = vmax.f32 %v2402_v4, %v2403_v13  ;;  %v2418_v57 = vmax.f32 %v2416_v46, %v2417_v51  ;;  %v2371_v11 = vmax.f32 %v2369_v49, %v2370_v40  ;;  %v2378_v54 = vmax.f32 %v2376_v8, %v2377_v35 }
 0x4f4   :  { %v2385_v38 = vmax.f32 %v2383_v3, %v2384_v16  ;;  %v2392_v5 = vmax.f32 %v2390_v52, %v2391_v50  ;;  %v2398_v41 = vrot.slane %v2397_v23, 2  ;;  %v2412_v1 = vrot.slane %v2411_v48, 2 }
 0x4f5   :  { %v2405_v29 = vrot.slane %v2404_v61, 2  ;;  %v2419_v36 = vrot.slane %v2418_v57, 2  ;;  %v12762_v45 = vmax.f32 %v2336_v32, %v2337_v55  ;;  %v2372_v63 = vrot.slane %v2371_v11, 1 }
 0x4f6   :  { %v2379_v0 = vrot.slane %v2378_v54, 1  ;;  %v2386_v30 = vrot.slane %v2385_v38, 1  ;;  %v2399_v17 = vmax.f32 %v2397_v23, %v2398_v41  ;;  %v2413_v9 = vmax.f32 %v2411_v48, %v2412_v1 }
 0x4f7   :  { %15479 = vst [vmem:[#allocation41_spill] sm:$0xff] %v12762_v45  ;;  %v2406_v20 = vmax.f32 %v2404_v61, %v2405_v29  ;;  %v2420_v53 = vmax.f32 %v2418_v57, %v2419_v36  ;;  %v12764_v4 = vmax.f32 %v2343_v37, %v2344_v12  ;;  %v12766_v60 = vmax.f32 %v2350_v62, %v2351_v43 }
 0x4f8   :  { %v12768_v46 = vmax.f32 %v2357_v10, %v2358_v18  ;;  %v12770_v49 = vmax.f32 %v2364_v7, %v2365_v39  ;;  %v12772_v8 = vmax.f32 %v2371_v11, %v2372_v63  ;;  %v12774_v3 = vmax.f32 %v2378_v54, %v2379_v0 }
 0x4f9   :  { %15480 = vst [vmem:[#allocation42_spill] sm:$0xff] %v12764_v4  ;;  %15481 = vst [vmem:[#allocation44_spill] sm:$0xff] %v12766_v60  ;;  %v12776_v32 = vmax.f32 %v2385_v38, %v2386_v30  ;;  %v2393_v55 = vrot.slane %v2392_v5, 1  ;;  %v2423_v52 = vsel %vm2254_vm3, %v12454_v59, -inf  ;;  %v15482_v37 = vcombine.high %v12454_v59, %v12454_v59 }
 0x4fa   :  { %v2437_v10 = vsel %vm2254_vm3, %v12457_v31, -inf  ;;  %v15483_v7 = vcombine.high %v12457_v31, %v12457_v31  ;;  %v2400_v12 = vrot.slane %v2399_v17, 1  ;;  %v2407_v38 = vrot.slane %v2406_v20, 1 }
 0x4fb   :  { %v2430_v62 = vsel %vm2254_vm3, %v15482_v37, -inf  ;;  %v2414_v43 = vrot.slane %v2413_v9, 1  ;;  %v2421_v18 = vrot.slane %v2420_v53, 1  ;;  %v2424_v39 = vrot.slane %v2423_v52, 4 }
 0x4fc   :  { %v2444_v11 = vsel %vm2254_vm3, %v15483_v7, -inf  ;;  %v2431_v58 = vrot.slane %v2430_v62, 4  ;;  %v2438_v13 = vrot.slane %v2437_v10, 4  ;;  %v2451_v59 = vsel %vm2254_vm3, %v12461_v56, -inf }
 0x4fd   :  { %v2445_v14 = vrot.slane %v2444_v11, 4  ;;  %v15484_v51 = vcombine.high %v12461_v56, %v12461_v56  ;;  %v2465_v31 = vsel %vm2254_vm3, %v12473_v15, -inf  ;;  %v15485_v35 = vcombine.high %v12473_v15, %v12473_v15 }
 0x4fe   :  { %v2425_v50 = vmax.f32 %v2423_v52, %v2424_v39  ;;  %v2432_v23 = vmax.f32 %v2430_v62, %v2431_v58  ;;  %v2439_v61 = vmax.f32 %v2437_v10, %v2438_v13  ;;  %v2452_v57 = vrot.slane %v2451_v59, 4 }
 0x4ff   :  { %v2458_v40 = vsel %vm2254_vm3, %v15484_v51, -inf  ;;  %v2472_v16 = vsel %vm2254_vm3, %v15485_v35, -inf  ;;  %v2446_v48 = vmax.f32 %v2444_v11, %v2445_v14  ;;  %v2466_v41 = vrot.slane %v2465_v31, 4 }
 0x500   :  { %v2459_v54 = vrot.slane %v2458_v40, 4  ;;  %v2473_v29 = vrot.slane %v2472_v16, 4  ;;  %v2426_v1 = vrot.slane %v2425_v50, 2  ;;  %v2433_v56 = vrot.slane %v2432_v23, 2 }
 0x501   :  { %v2440_v36 = vrot.slane %v2439_v61, 2  ;;  %v2447_v63 = vrot.slane %v2446_v48, 2  ;;  %v2453_v0 = vmax.f32 %v2451_v59, %v2452_v57  ;;  %v2467_v37 = vmax.f32 %v2465_v31, %v2466_v41 }
 0x502   :  { %v2460_v30 = vmax.f32 %v2458_v40, %v2459_v54  ;;  %v2474_v7 = vmax.f32 %v2472_v16, %v2473_v29  ;;  %v2427_v51 = vmax.f32 %v2425_v50, %v2426_v1  ;;  %v12802_v15 = vmax.f32 %v2432_v23, %v2433_v56 }
 0x503   :  { %v12804_v35 = vmax.f32 %v2439_v61, %v2440_v36  ;;  %v12806_v52 = vmax.f32 %v2446_v48, %v2447_v63  ;;  %v2454_v62 = vrot.slane %v2453_v0, 2  ;;  %v2468_v11 = vrot.slane %v2467_v37, 2 }
 0x504   :  { %v2461_v10 = vrot.slane %v2460_v30, 2  ;;  %v2475_v39 = vrot.slane %v2474_v7, 2  ;;  %v12808_v58 = vmax.f32 %v2392_v5, %v2393_v55  ;;  %v12810_v13 = vmax.f32 %v2399_v17, %v2400_v12 }
 0x505   :  { %v12812_v14 = vmax.f32 %v2406_v20, %v2407_v38  ;;  %v2428_v59 = vrot.slane %v2427_v51, 1  ;;  %v12814_v40 = vmax.f32 %v2453_v0, %v2454_v62  ;;  %v2469_v16 = vmax.f32 %v2467_v37, %v2468_v11 }
 0x506   :  { %v12816_v31 = vmax.f32 %v2460_v30, %v2461_v10  ;;  %v2476_v50 = vmax.f32 %v2474_v7, %v2475_v39  ;;  %v12818_v23 = vmax.f32 %v2413_v9, %v2414_v43  ;;  %v12820_v61 = vmax.f32 %v2420_v53, %v2421_v18 }
 0x507   :  { %v2435_v48 = vrot.slane %v12802_v15, 1  ;;  %v2442_v5 = vrot.slane %v12804_v35, 1  ;;  %v12824_v55 = vmax.f32 %v2427_v51, %v2428_v59  ;;  %v2449_v20 = vrot.slane %v12806_v52, 1 }
 0x508   :  { %15486 = vst [vmem:[#allocation43_spill] sm:$0xff] %v12820_v61  ;;  %v2470_v17 = vrot.slane %v2469_v16, 1  ;;  %v2477_v12 = vrot.slane %v2476_v50, 1  ;;  %v2479_v38 = vsel %vm2254_vm3, %v12477_v19, -inf  ;;  %v15488_v57 = vcombine.high %v12477_v19, %v12477_v19 }
 0x509   :  { %15487 = vst [vmem:[#allocation45_spill] sm:$0xff] %v12824_v55  ;;  %v2493_v53 = vsel %vm2254_vm3, %v12480_v42, -inf  ;;  %v15489_v43 = vcombine.high %v12480_v42, %v12480_v42  ;;  %v2456_v54 = vrot.slane %v12814_v40, 1  ;;  %v2463_v41 = vrot.slane %v12816_v31, 1 }
 0x50a   :  { %v2486_v9 = vsel %vm2254_vm3, %v15488_v57, -inf  ;;  %v2471_v29 = vmax.f32 %v2469_v16, %v2470_v17  ;;  %v2478_v1 = vmax.f32 %v2476_v50, %v2477_v12  ;;  %v2480_v56 = vrot.slane %v2479_v38, 4 }
 0x50b   :  { %v2500_v18 = vsel %vm2254_vm3, %v15489_v43, -inf  ;;  %v2487_v36 = vrot.slane %v2486_v9, 4  ;;  %v2494_v63 = vrot.slane %v2493_v53, 4  ;;  %v2507_v0 = vsel %vm2254_vm3, %v12484_v26, -inf }
 0x50c   :  { %v2501_v19 = vrot.slane %v2500_v18, 4  ;;  %v15490_v30 = vcombine.high %v12484_v26, %v12484_v26  ;;  %v2521_v37 = vsel %vm2254_vm3, %v12487_v28, -inf  ;;  %v15491_v7 = vcombine.high %v12487_v28, %v12487_v28  ;;  %2841 = vst [vmem:[#allocation2 + $0x20] sm:$0x1] %v2471_v29  ;;  %2842 = vst [vmem:[#allocation2 + $0x28] sm:$0x1] %v2478_v1 }
 0x50d   :  { %v2481_v62 = vmax.f32 %v2479_v38, %v2480_v56  ;;  %v2488_v10 = vmax.f32 %v2486_v9, %v2487_v36  ;;  %v2495_v11 = vmax.f32 %v2493_v53, %v2494_v63  ;;  %v2508_v59 = vrot.slane %v2507_v0, 4 }
 0x50e   :  { %v2514_v42 = vsel %vm2254_vm3, %v15490_v30, -inf  ;;  %v2528_v51 = vsel %vm2254_vm3, %v15491_v7, -inf  ;;  %v2502_v39 = vmax.f32 %v2500_v18, %v2501_v19  ;;  %v2522_v50 = vrot.slane %v2521_v37, 4 }
 0x50f   :  { %v2515_v16 = vrot.slane %v2514_v42, 4  ;;  %v2529_v26 = vrot.slane %v2528_v51, 4  ;;  %v2482_v17 = vrot.slane %v2481_v62, 2  ;;  %v2489_v12 = vrot.slane %v2488_v10, 2 }
 0x510   :  { %v2496_v57 = vrot.slane %v2495_v11, 2  ;;  %v2503_v43 = vrot.slane %v2502_v39, 2  ;;  %v2509_v30 = vmax.f32 %v2507_v0, %v2508_v59  ;;  %v2523_v45 = vmax.f32 %v2521_v37, %v2522_v50 }
 0x511   :  { %v2516_v60 = vmax.f32 %v2514_v42, %v2515_v16  ;;  %v2530_v28 = vmax.f32 %v2528_v51, %v2529_v26  ;;  %v2483_v55 = vmax.f32 %v2481_v62, %v2482_v17  ;;  %v2490_v7 = vmax.f32 %v2488_v10, %v2489_v12 }
 0x512   :  { %v2497_v29 = vmax.f32 %v2495_v11, %v2496_v57  ;;  %v2504_v1 = vmax.f32 %v2502_v39, %v2503_v43  ;;  %v2510_v38 = vrot.slane %v2509_v30, 2  ;;  %v2524_v53 = vrot.slane %v2523_v45, 2 }
 0x513   :  { %v2517_v9 = vrot.slane %v2516_v60, 2  ;;  %v2531_v18 = vrot.slane %v2530_v28, 2  ;;  %v12854_v56 = vmax.f32 %v12802_v15, %v2435_v48  ;;  %v2484_v36 = vrot.slane %v2483_v55, 1 }
 0x514   :  { %v2491_v63 = vrot.slane %v2490_v7, 1  ;;  %v2498_v19 = vrot.slane %v2497_v29, 1  ;;  %v2511_v4 = vmax.f32 %v2509_v30, %v2510_v38  ;;  %v2525_v0 = vmax.f32 %v2523_v45, %v2524_v53 }
 0x515   :  { %v2518_v61 = vmax.f32 %v2516_v60, %v2517_v9  ;;  %v2532_v42 = vmax.f32 %v2530_v28, %v2531_v18  ;;  %v12857_v37 = vmax.f32 %v12804_v35, %v2442_v5  ;;  %v12860_v51 = vmax.f32 %v12806_v52, %v2449_v20 }
 0x516   :  { %v12863_v62 = vmax.f32 %v12814_v40, %v2456_v54  ;;  %v12866_v10 = vmax.f32 %v12816_v31, %v2463_v41  ;;  %v12868_v15 = vmax.f32 %v2483_v55, %v2484_v36  ;;  %v12870_v48 = vmax.f32 %v2490_v7, %v2491_v63 }
 0x517   :  { %15492 = vst [vmem:[#allocation47_spill] sm:$0xff] %v12857_v37  ;;  %15493 = vst [vmem:[#allocation46_spill] sm:$0xff] %v12860_v51  ;;  %v12872_v11 = vmax.f32 %v2497_v29, %v2498_v19  ;;  %v2505_v45 = vrot.slane %v2504_v1, 1  ;;  %v2535_v60 = vsel %vm2254_vm3, %v12497_v34, -inf  ;;  %v15497_v35 = vcombine.high %v12497_v34, %v12497_v34 }
 0x518   :  { %15494 = vst [vmem:[#allocation48_spill] sm:$0xff] %v12863_v62  ;;  %15495 = vst [vmem:[#allocation49_spill] sm:$0xff] %v12866_v10  ;;  %v2549_v40 = vsel %vm2254_vm3, %v12500_v2, -inf  ;;  %v15498_v31 = vcombine.high %v12500_v2, %v12500_v2  ;;  %v2512_v55 = vrot.slane %v2511_v4, 1  ;;  %v2519_v20 = vrot.slane %v2518_v61, 1 }
 0x519   :  { %15496 = vst [vmem:[#allocation51_spill] sm:$0xff] %v12870_v48  ;;  %v2542_v52 = vsel %vm2254_vm3, %v15497_v35, -inf  ;;  %v2526_v54 = vrot.slane %v2525_v0, 1  ;;  %v2533_v41 = vrot.slane %v2532_v42, 1  ;;  %v2536_v39 = vrot.slane %v2535_v60, 4 }
 0x51a   :  { %v2556_v5 = vsel %vm2254_vm3, %v15498_v31, -inf  ;;  %v2543_v59 = vrot.slane %v2542_v52, 4  ;;  %v2550_v16 = vrot.slane %v2549_v40, 4  ;;  %v2563_v34 = vsel %vm2254_vm3, %v12504_v6, -inf }
 0x51b   :  { %v2557_v50 = vrot.slane %v2556_v5, 4  ;;  %v15499_v26 = vcombine.high %v12504_v6, %v12504_v6  ;;  %v2577_v2 = vsel %vm2254_vm3, %v12507_v47, -inf  ;;  %v15500_v12 = vcombine.high %v12507_v47, %v12507_v47 }
 0x51c   :  { %v2537_v43 = vmax.f32 %v2535_v60, %v2536_v39  ;;  %v2544_v30 = vmax.f32 %v2542_v52, %v2543_v59  ;;  %v2551_v28 = vmax.f32 %v2549_v40, %v2550_v16  ;;  %v2564_v29 = vrot.slane %v2563_v34, 4 }
 0x51d   :  { %v2570_v17 = vsel %vm2254_vm3, %v15499_v26, -inf  ;;  %v2584_v57 = vsel %vm2254_vm3, %v15500_v12, -inf  ;;  %v2558_v7 = vmax.f32 %v2556_v5, %v2557_v50  ;;  %v2578_v9 = vrot.slane %v2577_v2, 4 }
 0x51e   :  { %v2571_v38 = vrot.slane %v2570_v17, 4  ;;  %v2585_v53 = vrot.slane %v2584_v57, 4  ;;  %v2538_v18 = vrot.slane %v2537_v43, 2  ;;  %v2545_v6 = vrot.slane %v2544_v30, 2 }
 0x51f   :  { %v2552_v36 = vrot.slane %v2551_v28, 2  ;;  %v2559_v63 = vrot.slane %v2558_v7, 2  ;;  %v2565_v19 = vmax.f32 %v2563_v34, %v2564_v29  ;;  %v2579_v31 = vmax.f32 %v2577_v2, %v2578_v9 }
 0x520   :  { %v2572_v35 = vmax.f32 %v2570_v17, %v2571_v38  ;;  %v2586_v26 = vmax.f32 %v2584_v57, %v2585_v53  ;;  %v2539_v10 = vmax.f32 %v2537_v43, %v2538_v18  ;;  %v2546_v47 = vmax.f32 %v2544_v30, %v2545_v6 }
 0x521   :  { %v2553_v62 = vmax.f32 %v2551_v28, %v2552_v36  ;;  %v2560_v12 = vmax.f32 %v2558_v7, %v2559_v63  ;;  %v2566_v60 = vrot.slane %v2565_v19, 2  ;;  %v2580_v40 = vrot.slane %v2579_v31, 2 }
 0x522   :  { %v2573_v52 = vrot.slane %v2572_v35, 2  ;;  %v2587_v5 = vrot.slane %v2586_v26, 2  ;;  %v12898_v39 = vmax.f32 %v2504_v1, %v2505_v45  ;;  %v2540_v59 = vrot.slane %v2539_v10, 1 }
 0x523   :  { %v2547_v16 = vrot.slane %v2546_v47, 1  ;;  %v2554_v50 = vrot.slane %v2553_v62, 1  ;;  %v2561_v48 = vrot.slane %v2560_v12, 1  ;;  %v2567_v51 = vmax.f32 %v2565_v19, %v2566_v60 }
 0x524   :  { %v2581_v37 = vmax.f32 %v2579_v31, %v2580_v40  ;;  %v2588_v34 = vmax.f32 %v2586_v26, %v2587_v5  ;;  %v12900_v17 = vmax.f32 %v2511_v4, %v2512_v55  ;;  %v12902_v2 = vmax.f32 %v2518_v61, %v2519_v20 }
 0x525   :  { %v12904_v57 = vmax.f32 %v2525_v0, %v2526_v54  ;;  %v12906_v43 = vmax.f32 %v2532_v42, %v2533_v41  ;;  %v12908_v30 = vmax.f32 %v2539_v10, %v2540_v59  ;;  %v12910_v28 = vmax.f32 %v2546_v47, %v2547_v16 }
 0x526   :  { %v12912_v1 = vmax.f32 %v2553_v62, %v2554_v50  ;;  %v12914_v45 = vmax.f32 %v2572_v35, %v2573_v52  ;;  %v2591_v7 = vsel %vm2254_vm3, %v12535_v44, -inf  ;;  %v15504_v4 = vcombine.high %v12535_v44, %v12535_v44 }
 0x527   :  { %15501 = vst [vmem:[#allocation50_spill] sm:$0xff] %v12906_v43  ;;  %15502 = vst [vmem:[#allocation52_spill] sm:$0xff] %v12910_v28  ;;  %v2605_v0 = vsel %vm2254_vm3, %v12538_v24, -inf  ;;  %v15505_v42 = vcombine.high %v12538_v24, %v12538_v24  ;;  %v12928_v62 = vmax.f32 %v2560_v12, %v2561_v48  ;;  %v2568_v55 = vrot.slane %v2567_v51, 1 }
 0x528   :  { %15503 = vst [vmem:[#allocation53_spill] sm:$0xff] %v12914_v45  ;;  %v2598_v61 = vsel %vm2254_vm3, %v15504_v4, -inf  ;;  %v2582_v20 = vrot.slane %v2581_v37, 1  ;;  %v2589_v54 = vrot.slane %v2588_v34, 1  ;;  %v2592_v41 = vrot.slane %v2591_v7, 4 }
 0x529   :  { %v2612_v10 = vsel %vm2254_vm3, %v15505_v42, -inf  ;;  %15506 = vst [vmem:[#allocation54_spill] sm:$0xff] %v12928_v62  ;;  %v2599_v29 = vrot.slane %v2598_v61, 4  ;;  %v2606_v38 = vrot.slane %v2605_v0, 4  ;;  %v2619_v44 = vsel %vm2254_vm3, %v12542_v22, -inf }
 0x52a   :  { %v2613_v9 = vrot.slane %v2612_v10, 4  ;;  %v15507_v53 = vcombine.high %v12542_v22, %v12542_v22  ;;  %v2633_v24 = vsel %vm2254_vm3, %v12565_v21, -inf  ;;  %v15508_v48 = vcombine.high %v12565_v21, %v12565_v21 }
 0x52b   :  { %v2593_v36 = vmax.f32 %v2591_v7, %v2592_v41  ;;  %v2600_v63 = vmax.f32 %v2598_v61, %v2599_v29  ;;  %v2607_v19 = vmax.f32 %v2605_v0, %v2606_v38  ;;  %v2620_v31 = vrot.slane %v2619_v44, 4 }
 0x52c   :  { %v2626_v18 = vsel %vm2254_vm3, %v15507_v53, -inf  ;;  %v2640_v6 = vsel %vm2254_vm3, %v15508_v48, -inf  ;;  %v2614_v35 = vmax.f32 %v2612_v10, %v2613_v9  ;;  %v2634_v47 = vrot.slane %v2633_v24, 4 }
 0x52d   :  { %v2627_v26 = vrot.slane %v2626_v18, 4  ;;  %v2641_v12 = vrot.slane %v2640_v6, 4  ;;  %v2594_v60 = vrot.slane %v2593_v36, 2  ;;  %v2601_v22 = vrot.slane %v2600_v63, 2 }
 0x52e   :  { %v2608_v52 = vrot.slane %v2607_v19, 2  ;;  %v2615_v40 = vrot.slane %v2614_v35, 2  ;;  %v2621_v5 = vmax.f32 %v2619_v44, %v2620_v31  ;;  %v2635_v16 = vmax.f32 %v2633_v24, %v2634_v47  ;;  %v15513_v31 = vld [vmem:[#allocation34_spill] sm:$0xff] }
 0x52f   :  { %v2628_v59 = vmax.f32 %v2626_v18, %v2627_v26  ;;  %v2642_v50 = vmax.f32 %v2640_v6, %v2641_v12  ;;  %v2595_v4 = vmax.f32 %v2593_v36, %v2594_v60  ;;  %v2602_v21 = vmax.f32 %v2600_v63, %v2601_v22 }
 0x530   :  { %v2609_v42 = vmax.f32 %v2607_v19, %v2608_v52  ;;  %v2616_v53 = vmax.f32 %v2614_v35, %v2615_v40  ;;  %v2622_v7 = vrot.slane %v2621_v5, 2  ;;  %v2636_v0 = vrot.slane %v2635_v16, 2 }
 0x531   :  { %v2629_v61 = vrot.slane %v2628_v59, 2  ;;  %v2643_v10 = vrot.slane %v2642_v50, 2  ;;  %v2596_v41 = vrot.slane %v2595_v4, 1  ;;  %v2603_v29 = vrot.slane %v2602_v21, 1 }
 0x532   :  { %v2610_v38 = vrot.slane %v2609_v42, 1  ;;  %v2617_v9 = vrot.slane %v2616_v53, 1  ;;  %v2623_v48 = vmax.f32 %v2621_v5, %v2622_v7  ;;  %v2637_v28 = vmax.f32 %v2635_v16, %v2636_v0  ;;  %v15517_v16 = vld [vmem:[#allocation31_spill] sm:$0xff] }
 0x533   :  { %v2630_v62 = vmax.f32 %v2628_v59, %v2629_v61  ;;  %v2644_v43 = vmax.f32 %v2642_v50, %v2643_v10  ;;  %v12942_v44 = vmax.f32 %v2567_v51, %v2568_v55  ;;  %v12945_v24 = vmax.f32 %v2581_v37, %v2582_v20  ;;  %v15515_v37 = vld [vmem:[#allocation29_spill] sm:$0xff] }
 0x534   :  { %v12947_v6 = vmax.f32 %v2588_v34, %v2589_v54  ;;  %v12949_v36 = vmax.f32 %v2595_v4, %v2596_v41  ;;  %v12951_v63 = vmax.f32 %v2602_v21, %v2603_v29  ;;  %v12953_v19 = vmax.f32 %v2609_v42, %v2610_v38  ;;  %v15519_v42 = vld [vmem:[#allocation35_spill] sm:$0xff] }
 0x535   :  { %15509 = vst [vmem:[#allocation57_spill] sm:$0xff] %v12942_v44  ;;  %v12955_v35 = vmax.f32 %v2616_v53, %v2617_v9  ;;  %v2647_v26 = vsel %vm2254_vm3, %v15513_v31, -inf  ;;  %v15514_v51 = vcombine.high %v15513_v31, %v15513_v31  ;;  %v2661_v34 = vsel %vm2254_vm3, %v15515_v37, -inf }
 0x536   :  { %15510 = vst [vmem:[#allocation58_spill] sm:$0xff] %v12951_v63  ;;  %15511 = vst [vmem:[#allocation59_spill] sm:$0xff] %v12953_v19  ;;  %v15516_v20 = vcombine.high %v15515_v37, %v15515_v37  ;;  %v2624_v47 = vrot.slane %v2623_v48, 1  ;;  %v2631_v12 = vrot.slane %v2630_v62, 1  ;;  %v2638_v60 = vrot.slane %v2637_v28, 1 }
 0x537   :  { %15512 = vst [vmem:[#allocation60_spill] sm:$0xff] %v12955_v35  ;;  %v2654_v55 = vsel %vm2254_vm3, %v15514_v51, -inf  ;;  %v2645_v22 = vrot.slane %v2644_v43, 1  ;;  %v2648_v52 = vrot.slane %v2647_v26, 4  ;;  %v2662_v5 = vrot.slane %v2661_v34, 4 }
 0x538   :  { %v2668_v54 = vsel %vm2254_vm3, %v15516_v20, -inf  ;;  %v2655_v40 = vrot.slane %v2654_v55, 4  ;;  %v2675_v50 = vsel %vm2254_vm3, %v15517_v16, -inf  ;;  %v15518_v4 = vcombine.high %v15517_v16, %v15517_v16 }
 0x539   :  { %v2669_v59 = vrot.slane %v2668_v54, 4  ;;  %v2689_v53 = vsel %vm2254_vm3, %v15519_v42, -inf  ;;  %v15520_v7 = vcombine.high %v15519_v42, %v15519_v42  ;;  %v2649_v0 = vmax.f32 %v2647_v26, %v2648_v52 }
 0x53a   :  { %v2682_v21 = vsel %vm2254_vm3, %v15518_v4, -inf  ;;  %v2656_v10 = vmax.f32 %v2654_v55, %v2655_v40  ;;  %v2663_v41 = vmax.f32 %v2661_v34, %v2662_v5  ;;  %v2676_v38 = vrot.slane %v2675_v50, 4 }
 0x53b   :  { %v2696_v61 = vsel %vm2254_vm3, %v15520_v7, -inf  ;;  %v2670_v29 = vmax.f32 %v2668_v54, %v2669_v59  ;;  %v2683_v9 = vrot.slane %v2682_v21, 4  ;;  %v2690_v31 = vrot.slane %v2689_v53, 4 }
 0x53c   :  { %v2697_v51 = vrot.slane %v2696_v61, 4  ;;  %v2650_v37 = vrot.slane %v2649_v0, 2  ;;  %v2657_v20 = vrot.slane %v2656_v10, 2  ;;  %v2664_v16 = vrot.slane %v2663_v41, 2 }
 0x53d   :  { %v2671_v4 = vrot.slane %v2670_v29, 2  ;;  %v2677_v18 = vmax.f32 %v2675_v50, %v2676_v38  ;;  %v2684_v45 = vmax.f32 %v2682_v21, %v2683_v9  ;;  %v2691_v35 = vmax.f32 %v2689_v53, %v2690_v31 }
 0x53e   :  { %v2698_v19 = vmax.f32 %v2696_v61, %v2697_v51  ;;  %v2651_v44 = vmax.f32 %v2649_v0, %v2650_v37  ;;  %v2658_v42 = vmax.f32 %v2656_v10, %v2657_v20  ;;  %v12981_v63 = vmax.f32 %v2663_v41, %v2664_v16  ;;  %v15524_v37 = vld [vmem:[#allocation36_spill] sm:$0xff] }
 0x53f   :  { %v12983_v26 = vmax.f32 %v2670_v29, %v2671_v4  ;;  %v2678_v55 = vrot.slane %v2677_v18, 2  ;;  %v2685_v34 = vrot.slane %v2684_v45, 2  ;;  %v2692_v54 = vrot.slane %v2691_v35, 2  ;;  %v15526_v4 = vld [vmem:[#allocation39_spill] sm:$0xff] }
 0x540   :  { %v2699_v52 = vrot.slane %v2698_v19, 2  ;;  %v12985_v40 = vmax.f32 %v2623_v48, %v2624_v47  ;;  %v12987_v5 = vmax.f32 %v2630_v62, %v2631_v12  ;;  %v2652_v59 = vrot.slane %v2651_v44, 1 }
 0x541   :  { %v2659_v7 = vrot.slane %v2658_v42, 1  ;;  %v12989_v50 = vmax.f32 %v2677_v18, %v2678_v55  ;;  %v12991_v21 = vmax.f32 %v2684_v45, %v2685_v34  ;;  %v2693_v53 = vmax.f32 %v2691_v35, %v2692_v54  ;;  %v15522_v35 = vld [vmem:[#allocation32_spill] sm:$0xff]  ;;  %v15529_v54 = vld [vmem:[#allocation43_spill] sm:$0xff] }
 0x542   :  { %v2700_v61 = vmax.f32 %v2698_v19, %v2699_v52  ;;  %v12993_v0 = vmax.f32 %v2637_v28, %v2638_v60  ;;  %v12995_v10 = vmax.f32 %v2644_v43, %v2645_v22  ;;  %v2666_v41 = vrot.slane %v12981_v63, 1  ;;  %v15521_v43 = vld [vmem:[#allocation30_spill] sm:$0xff]  ;;  %v15528_v55 = vld [vmem:[#allocation40_spill] sm:$0xff] }
 0x543   :  { %v2673_v29 = vrot.slane %v12983_v26, 1  ;;  %v12999_v48 = vmax.f32 %v2651_v44, %v2652_v59  ;;  %v13001_v62 = vmax.f32 %v2658_v42, %v2659_v7  ;;  %v2694_v47 = vrot.slane %v2693_v53, 1  ;;  %v15523_v44 = vld [vmem:[#allocation33_spill] sm:$0xff]  ;;  %v15530_v59 = vld [vmem:[#allocation42_spill] sm:$0xff] }
 0x544   :  { %v2701_v12 = vrot.slane %v2700_v61, 1  ;;  %v2680_v18 = vrot.slane %v12989_v50, 1  ;;  %v2687_v45 = vrot.slane %v12991_v21, 1  ;;  %v2768_v60 = vsel %vm2767_vm4, %v15522_v35, %v15521_v43  ;;  %v15535_v43 = vld [vmem:[#allocation48_spill] sm:$0xff]  ;;  %v15536_v35 = vld [vmem:[#allocation49_spill] sm:$0xff] }
 0x545   :  { %v2695_v28 = vmax.f32 %v2693_v53, %v2694_v47  ;;  %v2779_v22 = vsel %vm2767_vm4, %v12718_v25, %v15523_v44  ;;  %v2770_v38 = vsel %vm2769_vm5, %v12721_v27, %v2768_v60  ;;  %v2785_v31 = vsel %vm757_vm0, %v12772_v8, %v12768_v46  ;;  %v15525_v25 = vld [vmem:[#allocation37_spill] sm:$0xff]  ;;  %v15527_v8 = vld [vmem:[#allocation38_spill] sm:$0xff] }
 0x546   :  { %v2702_v19 = vmax.f32 %v2700_v61, %v2701_v12  ;;  %v2780_v9 = vsel %vm2769_vm5, %v12724_v33, %v2779_v22  ;;  %v2792_v51 = vsel %vm757_vm0, %v12774_v3, %v12770_v49  ;;  %v2772_v20 = vsel %vm2771_vm6, %v15524_v37, %v2770_v38  ;;  %v15533_v12 = vld [vmem:[#allocation46_spill] sm:$0xff]  ;;  %v15540_v37 = vld [vmem:[#allocation52_spill] sm:$0xff] }
 0x547   :  { %2847 = vst [vmem:[#allocation2 + $0x50] sm:$0x1] %v2695_v28  ;;  %v2781_v16 = vsel %vm2771_vm6, %v15525_v25, %v2780_v9  ;;  %v2786_v27 = vsel %vm2767_vm4, %v12776_v32, %v2785_v31  ;;  %v2793_v33 = vsel %vm2767_vm4, %v12808_v58, %v2792_v51  ;;  %v2774_v46 = vsel %vm2773_vm7, %v15526_v4, %v2772_v20  ;;  %v15537_v22 = vld [vmem:[#allocation50_spill] sm:$0xff]  ;;  %v15539_v51 = vld [vmem:[#allocation57_spill] sm:$0xff]  ;;  %v15541_v20 = vld [vmem:[#allocation59_spill] sm:$0xff] }
 0x548   :  { %2848 = vst [vmem:[#allocation2 + $0x58] sm:$0x1] %v2702_v19  ;;  %v2782_v49 = vsel %vm2773_vm7, %v15527_v8, %v2781_v16  ;;  %v2787_v3 = vsel %vm2769_vm5, %v12810_v13, %v2786_v27  ;;  %v2794_v42 = vsel %vm2769_vm5, %v12812_v14, %v2793_v33  ;;  %v2776_v34 = vsel %vm2775_vm8, %v15528_v55, %v2774_v46  ;;  %v15531_v13 = vld [vmem:[#allocation45_spill] sm:$0xff]  ;;  %v15538_v9 = vld [vmem:[#allocation58_spill] sm:$0xff]  ;;  %v15542_v25 = vld [vmem:[#allocation60_spill] sm:$0xff] }
 0x549   :  { %v2788_v32 = vsel %vm2771_vm6, %v12818_v23, %v2787_v3  ;;  %v2795_v58 = vsel %vm2771_vm6, %v15529_v54, %v2794_v42  ;;  %v2799_v52 = vsel %vm2767_vm4, %v12872_v11, %v12868_v15  ;;  %v2778_v7 = vsel %vm2777_vm9, %v15530_v59, %v2776_v34  ;;  %v15532_v23 = vld [vmem:[#allocation47_spill] sm:$0xff]  ;;  %v15544_v3 = vld [vmem:[#allocation44_spill] sm:$0xff]  ;;  %v15547_v55 = vld [vmem:[#allocation54_spill] sm:$0xff] }
 0x54a   :  { %v2789_v53 = vsel %vm2773_vm7, %v15531_v13, %v2788_v32  ;;  %v2796_v14 = vsel %vm2773_vm7, %v12854_v56, %v2795_v58  ;;  %v2800_v61 = vsel %vm2769_vm5, %v12900_v17, %v2799_v52  ;;  %v15534_v11 = vld [vmem:[#allocation51_spill] sm:$0xff]  ;;  %2837 = vst [vmem:[#allocation2] sm:$0xfe] %v2778_v7  ;;  %v2811_v38 = vsel %vm757_vm0, %v12949_v36, %v12945_v24  ;;  %v15543_v36 = vld [vmem:[#allocation41_spill] sm:$0xff] }
 0x54b   :  { %v2790_v47 = vsel %vm2775_vm8, %v15532_v23, %v2789_v53  ;;  %v2797_v28 = vsel %vm2775_vm8, %v15533_v12, %v2796_v14  ;;  %v2801_v15 = vsel %vm2771_vm6, %v12904_v57, %v2800_v61  ;;  %v2805_v19 = vsel %vm2767_vm4, %v12898_v39, %v15534_v11  ;;  %v2927_v34 = vld [vmem:[#allocation2 + $0x20] sm:$0x1] }
 0x54c   :  { %v13065_v56 = vsel %vm2777_vm9, %v15535_v43, %v2790_v47  ;;  %v13069_v17 = vsel %vm2777_vm9, %v15536_v35, %v2797_v28  ;;  %v2802_v60 = vsel %vm2773_vm7, %v12908_v30, %v2801_v15  ;;  %v2806_v44 = vsel %vm2769_vm5, %v12902_v2, %v2805_v19  ;;  %v10356_v28 = vld [vmem:[%s15304_s5] ss:$16 sps:$4 sm:$0xff]   ;;  %v10359_v35 = vld [vmem:[%s15304_s5 + $0x8] ss:$16 sps:$4 sm:$0xff]  }
 0x54d   :  { %v2803_v57 = vsel %vm2775_vm8, %v12912_v1, %v2802_v60  ;;  %v2807_v39 = vsel %vm2771_vm6, %v15537_v22, %v2806_v44  ;;  %v2818_v31 = vsel %vm757_vm0, %v15538_v9, %v12947_v6  ;;  %v2812_v1 = vsel %vm2767_vm4, %v15541_v20, %v2811_v38  ;;  %v10367_v38 = vld [vmem:[%s15304_s5 + $0x2c] ss:$16 sps:$4 sm:$0xff]   ;;  %v10365_v20 = vld [vmem:[%s15304_s5 + $0x28] ss:$16 sps:$4 sm:$0xff]  }
 0x54e   :  { %v2804_v30 = vsel %vm2777_vm9, %v15539_v51, %v2803_v57  ;;  %v2808_v2 = vsel %vm2773_vm7, %v15540_v37, %v2807_v39  ;;  %v2819_v16 = vsel %vm2767_vm4, %v15542_v25, %v2818_v31  ;;  %v2667_v27 = vmax.f32 %v12981_v63, %v2666_v41  ;;  %v10364_v57 = vld [vmem:[%s15304_s5 + $0x24] ss:$16 sps:$4 sm:$0xff]   ;;  %v2931_v9 = vld [vmem:[#allocation2 + $0x50] sm:$0x1] }
 0x54f   :  { %v2813_v24 = vsel %vm2769_vm5, %v12985_v40, %v2812_v1  ;;  %v2820_v6 = vsel %vm2769_vm5, %v12987_v5, %v2819_v16  ;;  %2843 = vst [vmem:[#allocation2 + $0x30] sm:$0xfe] %v2804_v30  ;;  %v2783_v33 = vsel %vm2775_vm8, %v15543_v36, %v2782_v49  ;;  %v2674_v4 = vmax.f32 %v12983_v26, %v2673_v29  ;;  %v15545_v26 = vld [vmem:[#allocation53_spill] sm:$0xff]  ;;  %v2932_v14 = vld [vmem:[#allocation2 + $0x58] sm:$0x1] }
 0x550   :  { %v2814_v46 = vsel %vm2771_vm6, %v12993_v0, %v2813_v24  ;;  %v2821_v8 = vsel %vm2771_vm6, %v12995_v10, %v2820_v6  ;;  %v2784_v63 = vsel %vm2777_vm9, %v15544_v3, %v2783_v33  ;;  %v2681_v40 = vmax.f32 %v12989_v50, %v2680_v18  ;;  %v10370_v16 = vld [vmem:[%s15304_s5 + $0x44] ss:$16 sps:$4 sm:$0xff]   ;;  %v10368_v6 = vld [vmem:[%s15304_s5 + $0x40] ss:$16 sps:$4 sm:$0xff]   ;;  %v10371_v36 = vld [vmem:[%s15304_s5 + $0x48] ss:$16 sps:$4 sm:$0xff]  }
 0x551   :  { %v2688_v41 = vmax.f32 %v12991_v21, %v2687_v45  ;;  %v2815_v5 = vsel %vm2773_vm7, %v12999_v48, %v2814_v46  ;;  %v2822_v49 = vsel %vm2773_vm7, %v13001_v62, %v2821_v8  ;;  %2838 = vst [vmem:[#allocation2 + $0x8] sm:$0xfe] %v2784_v63  ;;  %v15546_v29 = vrot.slane %v15545_v26, 1  ;;  %v2925_v18 = vld [vmem:[#allocation2] sm:$0xfe] }
 0x552   :  { %v2816_v10 = vsel %vm2775_vm8, %v2667_v27, %v2815_v5  ;;  %v2823_v42 = vsel %vm2775_vm8, %v2674_v4, %v2822_v49  ;;  %v2809_v50 = vsel %vm2775_vm8, %v15547_v55, %v2808_v2  ;;  %v2928_v62 = vld [vmem:[#allocation2 + $0x28] sm:$0x1]  ;;  %v15548_v32 = vlaneseq  ;;  %v10362_v2 = vld [vmem:[%s15304_s5 + $0x20] ss:$16 sps:$4 sm:$0xff]   ;;  %v10373_v27 = vld [vmem:[%s15304_s5 + $0x4c] ss:$16 sps:$4 sm:$0xff]  }
 0x553   :  { %v2576_v0 = vmax.f32 %v15545_v26, %v15546_v29  ;;  %v13121_v21 = vsel %vm2777_vm9, %v2681_v40, %v2816_v10  ;;  %v13124_v48 = vsel %vm2777_vm9, %v2688_v41, %v2823_v42  ;;  %v2946_v54 = vrot.slane %v2925_v18, 1  ;;  %v10376_v8 = vld [vmem:[%s15304_s5 + $0x64] ss:$16 sps:$4 sm:$0xff]   ;;  %v10379_v3 = vld [vmem:[%s15304_s5 + $0x6c] ss:$16 sps:$4 sm:$0xff]  }
 0x554   :  { %vm157_vm10 = vcmp.lt.s32.totalorder %v15548_v32, 256  ;;  %v15549_v58 = vmov 0.0   ;;  %v2950_v52 = vrot.slane %v13069_v17, 1  ;;  %v2954_v59 = vrot.slane %v2928_v62, 1  ;;  %v10374_v40 = vld [vmem:[%s15304_s5 + $0x60] ss:$16 sps:$4 sm:$0xff]  }
 0x555   :  { %v2810_v45 = vsel %vm2777_vm9, %v2576_v0, %v2809_v50  ;;  %159 = vst.msk [vmem:[#allocation2] ss:$8 sm:$0x3] %vm157_vm10, %v15549_v58  ;;  %162 = vst.msk [vmem:[#allocation2 + $0x30] ss:$8 sm:$0x3] %vm157_vm10, %v15549_v58 }
 0x556   :  { %2844 = vst [vmem:[#allocation2 + $0x38] sm:$0xfe] %v2810_v45  ;;  %165 = vst.msk [vmem:[#allocation2 + $0x21] ss:$8 sm:$0x3] %vm157_vm10, %v15549_v58  ;;  %v2947_v13 = vrot.slane %v13065_v56, 1  ;;  %v2955_v12 = vsel %vm2945_vm11, %v2950_v52, %v2954_v59 }
 0x557   :  { %168 = vst.msk [vmem:[#allocation2 + $0x51] ss:$8 sm:$0x3] %vm157_vm10, %v15549_v58  ;;  %170 = vst.msk [vmem:[#allocation3] ss:$8 sm:$0x3] %vm157_vm10, %v15549_v58 }
 0x558   :  { %173 = vst.msk [vmem:[#allocation3 + $0x20] ss:$8 sm:$0x3] %vm157_vm10, %v15549_v58  ;;  %176 = vst.msk [vmem:[#allocation3 + $0x11] ss:$8 sm:$0x3] %vm157_vm10, %v15549_v58  ;;  %v2948_v23 = vsel %vm2945_vm11, %v2946_v54, %v2947_v13 }
 0x559   :  { %179 = vst.msk [vmem:[#allocation3 + $0x31] ss:$8 sm:$0x3] %vm157_vm10, %v15549_v58  ;;  %v2926_v7 = vld [vmem:[#allocation2 + $0x8] sm:$0xfe]  ;;  %v2952_v53 = vrot.slane %v2927_v34, 1 }
 0x55a   :  { %v2949_v61 = vrot.slane %v2926_v7, 1  ;;  %v2960_v15 = vrot.slane %v13124_v48, 1  ;;  %v2964_v11 = vrot.slane %v2932_v14, 1  ;;  %v2929_v19 = vld [vmem:[#allocation2 + $0x30] sm:$0xfe]  ;;  %v2957_v1 = vrot.slane %v13121_v21, 1 }
 0x55b   :  { %v2953_v60 = vsel %vm2945_vm11, %v2947_v13, %v2952_v53  ;;  %v2956_v31 = vrot.slane %v2929_v19, 1  ;;  %v2962_v25 = vrot.slane %v2931_v9, 1  ;;  %v10377_v41 = vld [vmem:[%s15304_s5 + $0x68] ss:$16 sps:$4 sm:$0xff]   ;;  %v10382_v5 = vld [vmem:[%s15304_s5 + $0x84] ss:$16 sps:$4 sm:$0xff]  }
 0x55c   :  { %v2951_v47 = vsel %vm2945_vm11, %v2949_v61, %v2950_v52  ;;  %v2974_v22 = vpack.c.bf16 %v2953_v60, %v2948_v23  ;;  %v2965_v30 = vsel %vm2945_vm11, %v2960_v15, %v2964_v11  ;;  %v2850_v4 = vld [vmem:[#allocation2 + $0x8] sm:$0xff]  ;;  %v10380_v26 = vld [vmem:[%s15304_s5 + $0x80] ss:$16 sps:$4 sm:$0xff]   ;;  %v10388_v0 = vld [vmem:[%s15304_s5 + $0xa4] ss:$16 sps:$4 sm:$0xff]  }
 0x55d   :  { %v2975_v43 = vpack.c.bf16 %v2955_v12, %v2951_v47  ;;  %v2930_v44 = vld [vmem:[#allocation2 + $0x38] sm:$0xfe]  ;;  %v2958_v24 = vsel %vm2945_vm11, %v2956_v31, %v2957_v1  ;;  %v2963_v33 = vsel %vm2945_vm11, %v2957_v1, %v2962_v25  ;;  %v2858_v63 = vpack.c.bf16 %v13069_v17, %v2850_v4  ;;  %v10386_v42 = vld [vmem:[%s15304_s5 + $0xa0] ss:$16 sps:$4 sm:$0xff]   ;;  %v10394_v50 = vld [vmem:[%s15304_s5 + $0xc4] ss:$16 sps:$4 sm:$0xff]  }
 0x55e   :  { %v2959_v39 = vrot.slane %v2930_v44, 1  ;;  %v2976_v46 = vpack.c.bf16 %v2963_v33, %v2958_v24  ;;  %v10385_v49 = vld [vmem:[%s15304_s5 + $0x8c] ss:$16 sps:$4 sm:$0xff]   ;;  %v10383_v29 = vld [vmem:[%s15304_s5 + $0x88] ss:$16 sps:$4 sm:$0xff]  }
 0x55f   :  { %3395 = vmatprep.mubr.bf16.mxu0 %v2975_v43  ;;  %3448 = vmatprep.mubr.bf16.mxu1 %v2975_v43  ;;  %v10391_v10 = vld [vmem:[%s15304_s5 + $0xac] ss:$16 sps:$4 sm:$0xff]   ;;  %v10389_v55 = vld [vmem:[%s15304_s5 + $0xa8] ss:$16 sps:$4 sm:$0xff]   ;;  %v10392_v62 = vld [vmem:[%s15304_s5 + $0xc0] ss:$16 sps:$4 sm:$0xff]  }
 0x560   :  { %3396 = vmatmul.mubr.bf16.vlgmr.msra.gmra.mrb[28].mxu0 %v2974_v22  ;;  %3449 = vmatmul.mubr.bf16.vlgmr.msra.gmra.mrb[24].mxu1 %v2974_v22  ;;  %v2961_v51 = vsel %vm2945_vm11, %v2959_v39, %v2960_v15  ;;  %v10397_v18 = vld [vmem:[%s15304_s5 + $0xcc] ss:$16 sps:$4 sm:$0xff]   ;;  %v10395_v45 = vld [vmem:[%s15304_s5 + $0xc8] ss:$16 sps:$4 sm:$0xff]   ;;  %v10400_v34 = vld [vmem:[%s15304_s5 + $0xe4] ss:$16 sps:$4 sm:$0xff]  }
 0x561   :  { %3790 = vmatpush1.bf16.msra.mxu0 %v10356_v28  ;;  %3843 = vmatpush1.bf16.msra.mxu1 %v10359_v35  ;;  %v2977_v37 = vpack.c.bf16 %v2965_v30, %v2961_v51  ;;  %v10403_v32 = vld [vmem:[%s15304_s5 + $0xec] ss:$16 sps:$4 sm:$0xff]   ;;  %v10398_v54 = vld [vmem:[%s15304_s5 + $0xe0] ss:$16 sps:$4 sm:$0xff]   ;;  %v10401_v52 = vld [vmem:[%s15304_s5 + $0xe8] ss:$16 sps:$4 sm:$0xff]  }
 0x562   :  { %3791 = vmatprep.subr.bf16.mxu0 %v10364_v57  ;;  %3844 = vmatprep.subr.bf16.mxu1 %v10367_v38  ;;  %v10406_v59 = vld [vmem:[%s15304_s5 + $0x104] ss:$16 sps:$4 sm:$0xff]   ;;  %v10409_v7 = vld [vmem:[%s15304_s5 + $0x10c] ss:$16 sps:$4 sm:$0xff]   ;;  %v10404_v13 = vld [vmem:[%s15304_s5 + $0x100] ss:$16 sps:$4 sm:$0xff]  }
 0x563   :  { %3405 = vmatprep.mubr.bf16.mxu0 %v2977_v37  ;;  %3458 = vmatprep.mubr.bf16.mxu1 %v2977_v37  ;;  %v10407_v53 = vld [vmem:[%s15304_s5 + $0x108] ss:$16 sps:$4 sm:$0xff]   ;;  %v10412_v14 = vld [vmem:[%s15304_s5 + $0x124] ss:$16 sps:$4 sm:$0xff]   ;;  %v10415_v61 = vld [vmem:[%s15304_s5 + $0x12c] ss:$16 sps:$4 sm:$0xff]  }
 0x564   :  { %v10410_v23 = vld [vmem:[%s15304_s5 + $0x120] ss:$16 sps:$4 sm:$0xff]   ;;  %v10413_v47 = vld [vmem:[%s15304_s5 + $0x128] ss:$16 sps:$4 sm:$0xff]   ;;  %v10418_v12 = vld [vmem:[%s15304_s5 + $0x144] ss:$16 sps:$4 sm:$0xff]  }
 0x565   :  { %3792 = vmatpush1.bf16.msra.mxu0 %v10362_v2  ;;  %3845 = vmatpush1.bf16.msra.mxu1 %v10365_v20  ;;  %v10421_v28 = vld [vmem:[%s15304_s5 + $0x14c] ss:$16 sps:$4 sm:$0xff]   ;;  %v10416_v15 = vld [vmem:[%s15304_s5 + $0x140] ss:$16 sps:$4 sm:$0xff]   ;;  %v10419_v11 = vld [vmem:[%s15304_s5 + $0x148] ss:$16 sps:$4 sm:$0xff]  }
 0x566   :  { %3793 = vmatprep.subr.bf16.mxu0 %v10370_v16  ;;  %3846 = vmatprep.subr.bf16.mxu1 %v10373_v27  ;;  %v10424_v19 = vld [vmem:[%s15304_s5 + $0x164] ss:$16 sps:$4 sm:$0xff]   ;;  %v10427_v43 = vld [vmem:[%s15304_s5 + $0x16c] ss:$16 sps:$4 sm:$0xff]   ;;  %v10422_v35 = vld [vmem:[%s15304_s5 + $0x160] ss:$16 sps:$4 sm:$0xff]  }
 0x567   :  { %v10425_v60 = vld [vmem:[%s15304_s5 + $0x168] ss:$16 sps:$4 sm:$0xff]   ;;  %v10430_v44 = vld [vmem:[%s15304_s5 + $0x184] ss:$16 sps:$4 sm:$0xff]   ;;  %v10433_v57 = vld [vmem:[%s15304_s5 + $0x18c] ss:$16 sps:$4 sm:$0xff]  }
 0x568   :  { %3406 = vmatmul.mubr.bf16.gmra.mrb[32].mxu0 %v2976_v46  ;;  %3459 = vmatmul.mubr.bf16.gmra.mrb[28].mxu1 %v2976_v46  ;;  %v10428_v22 = vld [vmem:[%s15304_s5 + $0x180] ss:$16 sps:$4 sm:$0xff]   ;;  %v10431_v39 = vld [vmem:[%s15304_s5 + $0x188] ss:$16 sps:$4 sm:$0xff]   ;;  %v10436_v38 = vld [vmem:[%s15304_s5 + $0x1a4] ss:$16 sps:$4 sm:$0xff]  }
 0x569   :  { %3794 = vmatpush1.bf16.msra.mxu0 %v10368_v6  ;;  %3847 = vmatpush1.bf16.msra.mxu1 %v10371_v36  ;;  %v10439_v9 = vld [vmem:[%s15304_s5 + $0x1ac] ss:$16 sps:$4 sm:$0xff]   ;;  %v10434_v31 = vld [vmem:[%s15304_s5 + $0x1a0] ss:$16 sps:$4 sm:$0xff]   ;;  %v10437_v51 = vld [vmem:[%s15304_s5 + $0x1a8] ss:$16 sps:$4 sm:$0xff]  }
 0x56a   :  { %3821 = vmatprep.mubr.bf16.mxu0 %v2858_v63  ;;  %3874 = vmatprep.mubr.bf16.mxu1 %v2858_v63  ;;  %v10442_v30 = vld [vmem:[%s15304_s5 + $0x1c4] ss:$16 sps:$4 sm:$0xff]   ;;  %v10445_v37 = vld [vmem:[%s15304_s5 + $0x1cc] ss:$16 sps:$4 sm:$0xff]   ;;  %v10440_v2 = vld [vmem:[%s15304_s5 + $0x1c0] ss:$16 sps:$4 sm:$0xff]  }
 0x56b   :  { %3795 = vmatprep.subr.bf16.mxu0 %v10376_v8  ;;  %3848 = vmatprep.subr.bf16.mxu1 %v10379_v3  ;;  %v10443_v20 = vld [vmem:[%s15304_s5 + $0x1c8] ss:$16 sps:$4 sm:$0xff]   ;;  %v10448_v1 = vld [vmem:[%s15304_s5 + $0x1e4] ss:$16 sps:$4 sm:$0xff]   ;;  %v10451_v25 = vld [vmem:[%s15304_s5 + $0x1ec] ss:$16 sps:$4 sm:$0xff]  }
 0x56c   :  { %v10446_v16 = vld [vmem:[%s15304_s5 + $0x1e0] ss:$16 sps:$4 sm:$0xff]   ;;  %v10449_v27 = vld [vmem:[%s15304_s5 + $0x1e8] ss:$16 sps:$4 sm:$0xff]   ;;  %v10454_v24 = vld [vmem:[%s15304_s5 + $0x404] ss:$16 sps:$4 sm:$0xff]  }
 0x56d   :  { %3796 = vmatpush1.bf16.msra.mxu0 %v10374_v40  ;;  %3849 = vmatpush1.bf16.msra.mxu1 %v10377_v41  ;;  %v10457_v6 = vld [vmem:[%s15304_s5 + $0x40c] ss:$16 sps:$4 sm:$0xff]   ;;  %v2849_v36 = vld [vmem:[#allocation2] sm:$0xff]  ;;  %v10455_v3 = vld [vmem:[%s15304_s5 + $0x408] ss:$16 sps:$4 sm:$0xff]  }
 0x56e   :  { %3797 = vmatprep.subr.bf16.mxu0 %v10382_v5  ;;  %3850 = vmatprep.subr.bf16.mxu1 %v10385_v49  ;;  %v2854_v33 = vld [vmem:[#allocation2 + $0x38] sm:$0xff]  ;;  %v3896_v4 = vld [vmem:[#allocation2 + $0x8] sm:$0xfc]  ;;  %v2857_v46 = vpack.c.bf16 %v13065_v56, %v2849_v36  ;;  %v10452_v8 = vld [vmem:[%s15304_s5 + $0x400] ss:$16 sps:$4 sm:$0xff]  }
 0x56f   :  { %v2860_v63 = vpack.c.bf16 %v13124_v48, %v2854_v33  ;;  %v10460_v40 = vld [vmem:[%s15304_s5 + $0x424] ss:$16 sps:$4 sm:$0xff]   ;;  %v10463_v41 = vld [vmem:[%s15304_s5 + $0x42c] ss:$16 sps:$4 sm:$0xff]   ;;  %v3898_v5 = vld [vmem:[#allocation2 + $0x28] sm:$0x3] }
 0x570   :  { %v3915_v49 = vrot.slane %v3896_v4, 2  ;;  %v10526_v36 = vld [vmem:[%s15304_s5 + $0x584] ss:$16 sps:$4 sm:$0xff]   ;;  %v10529_v33 = vld [vmem:[%s15304_s5 + $0x58c] ss:$16 sps:$4 sm:$0xff]  }
 0x571   :  { %3798 = vmatpush1.bf16.msra.mxu0 %v10380_v26  ;;  %3851 = vmatpush1.bf16.msra.mxu1 %v10383_v29  ;;  %v10458_v26 = vld [vmem:[%s15304_s5 + $0x420] ss:$16 sps:$4 sm:$0xff]   ;;  %v10461_v29 = vld [vmem:[%s15304_s5 + $0x428] ss:$16 sps:$4 sm:$0xff]  }
 0x572   :  { %3799 = vmatprep.subr.bf16.mxu0 %v10388_v0  ;;  %3852 = vmatprep.subr.bf16.mxu1 %v10391_v10  ;;  %v3916_v0 = vrot.slane %v13069_v17, 2  ;;  %v3920_v10 = vrot.slane %v3898_v5, 2  ;;  %v10464_v17 = vld [vmem:[%s15304_s5 + $0x440] ss:$16 sps:$4 sm:$0xff]   ;;  %v10541_v5 = vld [vmem:[%s15304_s5 + $0x5cc] ss:$16 sps:$4 sm:$0xff]  }
 0x573   :  { %v10524_v4 = vld [vmem:[%s15304_s5 + $0x580] ss:$16 sps:$4 sm:$0xff]  }
 0x575   :  { %3800 = vmatpush1.bf16.msra.mxu0 %v10386_v42  ;;  %3853 = vmatpush1.bf16.msra.mxu1 %v10389_v55  ;;  %v2853_v42 = vld [vmem:[#allocation2 + $0x30] sm:$0xff] }
 0x576   :  { %3801 = vmatprep.subr.bf16.mxu0 %v10394_v50  ;;  %3854 = vmatprep.subr.bf16.mxu1 %v10397_v18  ;;  %v10466_v55 = vld [vmem:[%s15304_s5 + $0x444] ss:$16 sps:$4 sm:$0xff]   ;;  %v10469_v50 = vld [vmem:[%s15304_s5 + $0x44c] ss:$16 sps:$4 sm:$0xff]   ;;  %v3917_v18 = vsel %vm3911_vm12, %v3915_v49, %v3916_v0 }
 0x577   :  { %v3895_v49 = vld [vmem:[#allocation2] sm:$0xfc] }
 0x579   :  { %3802 = vmatpush1.bf16.msra.mxu0 %v10392_v62  ;;  %3855 = vmatpush1.bf16.msra.mxu1 %v10395_v45  ;;  %v2859_v62 = vpack.c.bf16 %v13121_v21, %v2853_v42  ;;  %v10467_v45 = vld [vmem:[%s15304_s5 + $0x448] ss:$16 sps:$4 sm:$0xff]  }
 0x57a   :  { %3803 = vmatprep.subr.bf16.mxu0 %v10400_v34  ;;  %3856 = vmatprep.subr.bf16.mxu1 %v10403_v32  ;;  %v3921_v34 = vsel %vm3911_vm12, %v3916_v0, %v3920_v10  ;;  %v10544_v0 = vld [vmem:[%s15304_s5 + $0x5e4] ss:$16 sps:$4 sm:$0xff]   ;;  %v3897_v10 = vld [vmem:[#allocation2 + $0x20] sm:$0x3]  ;;  %v3900_v42 = vld [vmem:[#allocation2 + $0x38] sm:$0xfc] }
 0x57b   :  { %v3941_v32 = vpack.c.bf16 %v3921_v34, %v3917_v18  ;;  %v3902_v18 = vld [vmem:[#allocation2 + $0x58] sm:$0x3]  ;;  %v4698_v34 = vld [vmem:[%s15306_s7 + $0x188] sm:$0xff] }
 0x57d   :  { %3804 = vmatpush1.bf16.msra.mxu0 %v10398_v54  ;;  %3857 = vmatpush1.bf16.msra.mxu1 %v10401_v52  ;;  %v10472_v54 = vld [vmem:[%s15304_s5 + $0x464] ss:$16 sps:$4 sm:$0xff]   ;;  %v10475_v52 = vld [vmem:[%s15304_s5 + $0x46c] ss:$16 sps:$4 sm:$0xff]  }
 0x57e   :  { %3805 = vmatprep.subr.bf16.mxu0 %v10406_v59  ;;  %3858 = vmatprep.subr.bf16.mxu1 %v10409_v7  ;;  %v10470_v59 = vld [vmem:[%s15304_s5 + $0x460] ss:$16 sps:$4 sm:$0xff]   ;;  %v10473_v7 = vld [vmem:[%s15304_s5 + $0x468] ss:$16 sps:$4 sm:$0xff]  }
 0x581   :  { %3806 = vmatpush1.bf16.msra.mxu0 %v10404_v13  ;;  %3859 = vmatpush1.bf16.msra.mxu1 %v10407_v53  ;;  %v10478_v13 = vld [vmem:[%s15304_s5 + $0x484] ss:$16 sps:$4 sm:$0xff]   ;;  %v10481_v53 = vld [vmem:[%s15304_s5 + $0x48c] ss:$16 sps:$4 sm:$0xff]  }
 0x582   :  { %3807 = vmatprep.subr.bf16.mxu0 %v10412_v14  ;;  %3860 = vmatprep.subr.bf16.mxu1 %v10415_v61  ;;  %v10476_v14 = vld [vmem:[%s15304_s5 + $0x480] ss:$16 sps:$4 sm:$0xff]   ;;  %v10479_v61 = vld [vmem:[%s15304_s5 + $0x488] ss:$16 sps:$4 sm:$0xff]  }
 0x585   :  { %3808 = vmatpush1.bf16.msra.mxu0 %v10410_v23  ;;  %3861 = vmatpush1.bf16.msra.mxu1 %v10413_v47  ;;  %v10484_v23 = vld [vmem:[%s15304_s5 + $0x4a4] ss:$16 sps:$4 sm:$0xff]   ;;  %v10487_v47 = vld [vmem:[%s15304_s5 + $0x4ac] ss:$16 sps:$4 sm:$0xff]  }
 0x586   :  { %3809 = vmatprep.subr.bf16.mxu0 %v10418_v12  ;;  %3862 = vmatprep.subr.bf16.mxu1 %v10421_v28  ;;  %v10482_v12 = vld [vmem:[%s15304_s5 + $0x4a0] ss:$16 sps:$4 sm:$0xff]   ;;  %v10485_v28 = vld [vmem:[%s15304_s5 + $0x4a8] ss:$16 sps:$4 sm:$0xff]  }
 0x589   :  { %3810 = vmatpush1.bf16.msra.mxu0 %v10416_v15  ;;  %3863 = vmatpush1.bf16.msra.mxu1 %v10419_v11  ;;  %v10490_v15 = vld [vmem:[%s15304_s5 + $0x4c4] ss:$16 sps:$4 sm:$0xff]   ;;  %v10493_v11 = vld [vmem:[%s15304_s5 + $0x4cc] ss:$16 sps:$4 sm:$0xff]  }
 0x58a   :  { %3811 = vmatprep.subr.bf16.mxu0 %v10424_v19  ;;  %3864 = vmatprep.subr.bf16.mxu1 %v10427_v43  ;;  %v10488_v19 = vld [vmem:[%s15304_s5 + $0x4c0] ss:$16 sps:$4 sm:$0xff]   ;;  %v10491_v43 = vld [vmem:[%s15304_s5 + $0x4c8] ss:$16 sps:$4 sm:$0xff]  }
 0x58d   :  { %3812 = vmatpush1.bf16.msra.mxu0 %v10422_v35  ;;  %3865 = vmatpush1.bf16.msra.mxu1 %v10425_v60  ;;  %v10496_v35 = vld [vmem:[%s15304_s5 + $0x4e4] ss:$16 sps:$4 sm:$0xff]   ;;  %v10499_v60 = vld [vmem:[%s15304_s5 + $0x4ec] ss:$16 sps:$4 sm:$0xff]  }
 0x58e   :  { %3813 = vmatprep.subr.bf16.mxu0 %v10430_v44  ;;  %3866 = vmatprep.subr.bf16.mxu1 %v10433_v57  ;;  %v10494_v44 = vld [vmem:[%s15304_s5 + $0x4e0] ss:$16 sps:$4 sm:$0xff]   ;;  %v10497_v57 = vld [vmem:[%s15304_s5 + $0x4e8] ss:$16 sps:$4 sm:$0xff]  }
 0x591   :  { %3814 = vmatpush1.bf16.msra.mxu0 %v10428_v22  ;;  %3867 = vmatpush1.bf16.msra.mxu1 %v10431_v39  ;;  %v10502_v22 = vld [vmem:[%s15304_s5 + $0x504] ss:$16 sps:$4 sm:$0xff]   ;;  %v10505_v39 = vld [vmem:[%s15304_s5 + $0x50c] ss:$16 sps:$4 sm:$0xff]  }
 0x592   :  { %3815 = vmatprep.subr.bf16.mxu0 %v10436_v38  ;;  %3868 = vmatprep.subr.bf16.mxu1 %v10439_v9  ;;  %v10500_v38 = vld [vmem:[%s15304_s5 + $0x500] ss:$16 sps:$4 sm:$0xff]   ;;  %v10503_v9 = vld [vmem:[%s15304_s5 + $0x508] ss:$16 sps:$4 sm:$0xff]  }
 0x595   :  { %3816 = vmatpush1.bf16.msra.mxu0 %v10434_v31  ;;  %3869 = vmatpush1.bf16.msra.mxu1 %v10437_v51  ;;  %v10508_v31 = vld [vmem:[%s15304_s5 + $0x524] ss:$16 sps:$4 sm:$0xff]   ;;  %v10511_v51 = vld [vmem:[%s15304_s5 + $0x52c] ss:$16 sps:$4 sm:$0xff]  }
 0x596   :  { %3817 = vmatprep.subr.bf16.mxu0 %v10442_v30  ;;  %3870 = vmatprep.subr.bf16.mxu1 %v10445_v37  ;;  %v10506_v30 = vld [vmem:[%s15304_s5 + $0x520] ss:$16 sps:$4 sm:$0xff]   ;;  %v10509_v37 = vld [vmem:[%s15304_s5 + $0x528] ss:$16 sps:$4 sm:$0xff]  }
 0x599   :  { %3818 = vmatpush1.bf16.msra.mxu0 %v10440_v2  ;;  %3871 = vmatpush1.bf16.msra.mxu1 %v10443_v20  ;;  %v10514_v2 = vld [vmem:[%s15304_s5 + $0x544] ss:$16 sps:$4 sm:$0xff]   ;;  %v10517_v20 = vld [vmem:[%s15304_s5 + $0x54c] ss:$16 sps:$4 sm:$0xff]  }
 0x59a   :  { %3819 = vmatprep.subr.bf16.mxu0 %v10448_v1  ;;  %3872 = vmatprep.subr.bf16.mxu1 %v10451_v25  ;;  %v10512_v1 = vld [vmem:[%s15304_s5 + $0x540] ss:$16 sps:$4 sm:$0xff]   ;;  %v10515_v25 = vld [vmem:[%s15304_s5 + $0x548] ss:$16 sps:$4 sm:$0xff]  }
 0x59d   :  { %3820 = vmatpush1.bf16.msra.mxu0 %v10446_v16  ;;  %3873 = vmatpush1.bf16.msra.mxu1 %v10449_v27  ;;  %v10520_v16 = vld [vmem:[%s15304_s5 + $0x564] ss:$16 sps:$4 sm:$0xff]   ;;  %v10523_v27 = vld [vmem:[%s15304_s5 + $0x56c] ss:$16 sps:$4 sm:$0xff]  }
 0x59e   :  { %4329 = vmatprep.subr.bf16.mxu0 %v10454_v24  ;;  %4382 = vmatprep.subr.bf16.mxu1 %v10457_v6  ;;  %v10518_v24 = vld [vmem:[%s15304_s5 + $0x560] ss:$16 sps:$4 sm:$0xff]   ;;  %v10521_v6 = vld [vmem:[%s15304_s5 + $0x568] ss:$16 sps:$4 sm:$0xff]  }
 0x5a0   :  { %3822 = vmatmul.mubr.bf16.vlgmr.msra.gmra.mrb[28].mxu0 %v2857_v46  ;;  %3875 = vmatmul.mubr.bf16.vlgmr.msra.gmra.mrb[24].mxu1 %v2857_v46  ;;  %v10527_v46 = vld [vmem:[%s15304_s5 + $0x588] ss:$16 sps:$4 sm:$0xff]  }
 0x5a1   :  { %3831 = vmatprep.mubr.bf16.mxu0 %v2860_v63  ;;  %3884 = vmatprep.mubr.bf16.mxu1 %v2860_v63  ;;  %v10530_v63 = vld [vmem:[%s15304_s5 + $0x5a0] ss:$16 sps:$4 sm:$0xff]  }
 0x5a2   :  { %4330 = vmatpush1.bf16.msra.mxu0 %v10452_v8  ;;  %4383 = vmatpush1.bf16.msra.mxu1 %v10455_v3  ;;  %v10532_v8 = vld [vmem:[%s15304_s5 + $0x5a4] ss:$16 sps:$4 sm:$0xff]   ;;  %v10535_v3 = vld [vmem:[%s15304_s5 + $0x5ac] ss:$16 sps:$4 sm:$0xff]  }
 0x5a3   :  { %4331 = vmatprep.subr.bf16.mxu0 %v10460_v40  ;;  %4384 = vmatprep.subr.bf16.mxu1 %v10463_v41  ;;  %v10533_v40 = vld [vmem:[%s15304_s5 + $0x5a8] ss:$16 sps:$4 sm:$0xff]   ;;  %v10538_v41 = vld [vmem:[%s15304_s5 + $0x5c4] ss:$16 sps:$4 sm:$0xff]  }
 0x5a6   :  { %4332 = vmatpush1.bf16.msra.mxu0 %v10458_v26  ;;  %4385 = vmatpush1.bf16.msra.mxu1 %v10461_v29  ;;  %v10536_v26 = vld [vmem:[%s15304_s5 + $0x5c0] ss:$16 sps:$4 sm:$0xff]   ;;  %v10539_v29 = vld [vmem:[%s15304_s5 + $0x5c8] ss:$16 sps:$4 sm:$0xff]  }
 0x5a7   :  { %4333 = vmatprep.subr.bf16.mxu0 %v10466_v55  ;;  %4386 = vmatprep.subr.bf16.mxu1 %v10469_v50  ;;  %v10547_v55 = vld [vmem:[%s15304_s5 + $0x5ec] ss:$16 sps:$4 sm:$0xff]   ;;  %v3912_v50 = vrot.slane %v3895_v49, 2  ;;  %v4685_v49 = vld [vmem:[%s15306_s7 + $0x120] sm:$0xff] }
 0x5a8   :  { %3832 = vmatmul.mubr.bf16.gmra.mrb[32].mxu0 %v2859_v62  ;;  %3885 = vmatmul.mubr.bf16.gmra.mrb[28].mxu1 %v2859_v62  ;;  %v4665_v62 = vld [vmem:[%s15306_s7 + $0x80] sm:$0xff] }
 0x5a9   :  { %4361 = vmatprep.mubr.bf16.mxu0 %v3941_v32  ;;  %4414 = vmatprep.mubr.bf16.mxu1 %v3941_v32  ;;  %v3913_v32 = vrot.slane %v13065_v56, 2 }
 0x5aa   :  { %4334 = vmatpush1.bf16.msra.mxu0 %v10464_v17  ;;  %4387 = vmatpush1.bf16.msra.mxu1 %v10467_v45  ;;  %v4666_v17 = vld [vmem:[%s15306_s7 + $0x88] sm:$0xff]  ;;  %v4697_v45 = vld [vmem:[%s15306_s7 + $0x180] sm:$0xff] }
 0x5ab   :  { %4335 = vmatprep.subr.bf16.mxu0 %v10472_v54  ;;  %4388 = vmatprep.subr.bf16.mxu1 %v10475_v52  ;;  %v3918_v54 = vrot.slane %v3897_v10, 2  ;;  %v3925_v52 = vrot.slane %v3900_v42, 2  ;;  %v9949_v56 = vpack.c.bf16 %v4666_v17, %v4665_v62  ;;  %v4672_v10 = vld [vmem:[%s15306_s7 + $0xb8] sm:$0xff]  ;;  %v4703_v42 = vld [vmem:[%s15306_s7 + $0x1b0] sm:$0xff] }
 0x5ac   :  { %v4655_v62 = vld [vmem:[%s15306_s7 + $0x30] sm:$0xff]  ;;  %v4656_v17 = vld [vmem:[%s15306_s7 + $0x38] sm:$0xff] }
 0x5ae   :  { %4336 = vmatpush1.bf16.msra.mxu0 %v10470_v59  ;;  %4389 = vmatpush1.bf16.msra.mxu1 %v10473_v7  ;;  %v10542_v59 = vld [vmem:[%s15304_s5 + $0x5e0] ss:$16 sps:$4 sm:$0xff]   ;;  %v10545_v7 = vld [vmem:[%s15304_s5 + $0x5e8] ss:$16 sps:$4 sm:$0xff]  }
 0x5af   :  { %4337 = vmatprep.subr.bf16.mxu0 %v10478_v13  ;;  %4390 = vmatprep.subr.bf16.mxu1 %v10481_v53  ;;  %v3926_v13 = vrot.slane %v13124_v48, 2  ;;  %v3914_v53 = vsel %vm3911_vm12, %v3912_v50, %v3913_v32  ;;  %v4682_v48 = vld [vmem:[%s15306_s7 + $0x108] sm:$0xff] }
 0x5b2   :  { %4338 = vmatpush1.bf16.msra.mxu0 %v10476_v14  ;;  %4391 = vmatpush1.bf16.msra.mxu1 %v10479_v61  ;;  %v3930_v14 = vrot.slane %v3902_v18, 2  ;;  %v9981_v61 = vpack.c.bf16 %v4698_v34, %v4697_v45  ;;  %v4687_v45 = vld [vmem:[%s15306_s7 + $0x130] sm:$0xff]  ;;  %v9963_v34 = vpack.c.bf16 %v4656_v17, %v4655_v62  ;;  %v15551_v62 = vld [vmem:[#allocation26_spill] sm:$0xff] }
 0x5b3   :  { %4339 = vmatprep.subr.bf16.mxu0 %v10484_v23  ;;  %4392 = vmatprep.subr.bf16.mxu1 %v10487_v47  ;;  %v4649_v23 = vld [vmem:[%s15306_s7] sm:$0xff]  ;;  %v4650_v47 = vld [vmem:[%s15306_s7 + $0x8] sm:$0xff] }
 0x5b6   :  { %4340 = vmatpush1.bf16.msra.mxu0 %v10482_v12  ;;  %4393 = vmatpush1.bf16.msra.mxu1 %v10485_v28  ;;  %v4681_v12 = vld [vmem:[%s15306_s7 + $0x100] sm:$0xff]  ;;  %v3919_v28 = vsel %vm3911_vm12, %v3913_v32, %v3918_v54  ;;  %v4688_v32 = vld [vmem:[%s15306_s7 + $0x138] sm:$0xff] }
 0x5b7   :  { %4341 = vmatprep.subr.bf16.mxu0 %v10490_v15  ;;  %4394 = vmatprep.subr.bf16.mxu1 %v10493_v11  ;;  %v3927_v15 = vsel %vm3911_vm12, %v3925_v52, %v3926_v13  ;;  %v3899_v11 = vld [vmem:[#allocation2 + $0x30] sm:$0xfc]  ;;  %v9995_v54 = vpack.c.bf16 %v4688_v32, %v4687_v45  ;;  %v4673_v52 = vld [vmem:[%s15306_s7 + $0xc0] sm:$0xff] }
 0x5b8   :  { %v15552_v32 = vld [vmem:[#allocation25_spill] sm:$0xff] }
 0x5ba   :  { %4342 = vmatpush1.bf16.msra.mxu0 %v10488_v19  ;;  %4395 = vmatpush1.bf16.msra.mxu1 %v10491_v43  ;;  %v3940_v19 = vpack.c.bf16 %v3919_v28, %v3914_v53  ;;  %v3931_v43 = vsel %vm3911_vm12, %v3926_v13, %v3930_v14  ;;  %v4706_v53 = vld [vmem:[%s15306_s7 + $0x1c8] sm:$0xff]  ;;  %v4657_v14 = vld [vmem:[%s15306_s7 + $0x40] sm:$0xff]  ;;  %v4675_v28 = vld [vmem:[%s15306_s7 + $0xd0] sm:$0xff] }
 0x5bb   :  { %4343 = vmatprep.subr.bf16.mxu0 %v10496_v35  ;;  %4396 = vmatprep.subr.bf16.mxu1 %v10499_v60  ;;  %v3901_v35 = vld [vmem:[#allocation2 + $0x50] sm:$0x3]  ;;  %v9951_v60 = vpack.c.bf16 %v4650_v47, %v4649_v23  ;;  %v4689_v47 = vld [vmem:[%s15306_s7 + $0x140] sm:$0xff] }
 0x5be   :  { %4344 = vmatpush1.bf16.msra.mxu0 %v10494_v44  ;;  %4397 = vmatpush1.bf16.msra.mxu1 %v10497_v57  ;;  %v9983_v44 = vpack.c.bf16 %v4682_v48, %v4681_v12  ;;  %v3943_v57 = vpack.c.bf16 %v3931_v43, %v3927_v15  ;;  %v4690_v12 = vld [vmem:[%s15306_s7 + $0x148] sm:$0xff]  ;;  %v4676_v15 = vld [vmem:[%s15306_s7 + $0xd8] sm:$0xff] }
 0x5bf   :  { %4345 = vmatprep.subr.bf16.mxu0 %v10502_v22  ;;  %4398 = vmatprep.subr.bf16.mxu1 %v10505_v39  ;;  %v3922_v22 = vrot.slane %v3899_v11, 2  ;;  %v3923_v39 = vrot.slane %v13121_v21, 2  ;;  %v4699_v21 = vld [vmem:[%s15306_s7 + $0x190] sm:$0xff]  ;;  %v9999_v48 = vpack.c.bf16 %v4690_v12, %v4689_v47  ;;  %v4708_v43 = vld [vmem:[%s15306_s7 + $0x1d8] sm:$0xff] }
 0x5c0   :  { %v4707_v11 = vld [vmem:[%s15306_s7 + $0x1d0] sm:$0xff] }
 0x5c2   :  { %4346 = vmatpush1.bf16.msra.mxu0 %v10500_v38  ;;  %4399 = vmatpush1.bf16.msra.mxu1 %v10503_v9  ;;  %v3928_v38 = vrot.slane %v3901_v35, 2  ;;  %v3924_v9 = vsel %vm3911_vm12, %v3922_v22, %v3923_v39  ;;  %v4659_v35 = vld [vmem:[%s15306_s7 + $0x50] sm:$0xff] }
 0x5c3   :  { %4347 = vmatprep.subr.bf16.mxu0 %v10508_v31  ;;  %4400 = vmatprep.subr.bf16.mxu1 %v10511_v51  ;;  %v4691_v22 = vld [vmem:[%s15306_s7 + $0x150] sm:$0xff] }
 0x5c4   :  { %v3929_v31 = vsel %vm3911_vm12, %v3923_v39, %v3928_v38  ;;  %v4692_v39 = vld [vmem:[%s15306_s7 + $0x158] sm:$0xff]  ;;  %v4677_v38 = vld [vmem:[%s15306_s7 + $0xe0] sm:$0xff] }
 0x5c5   :  { %v3942_v51 = vpack.c.bf16 %v3929_v31, %v3924_v9  ;;  %v10003_v9 = vpack.c.bf16 %v4692_v39, %v4691_v22  ;;  %v4678_v31 = vld [vmem:[%s15306_s7 + $0xe8] sm:$0xff]  ;;  %v13803_v39 = vld [vmem:[%s15306_s7 + $0x300] sm:$0xff] }
 0x5c6   :  { %4348 = vmatpush1.bf16.msra.mxu0 %v10506_v30  ;;  %4401 = vmatpush1.bf16.msra.mxu1 %v10509_v37  ;;  %v4667_v30 = vld [vmem:[%s15306_s7 + $0x90] sm:$0xff]  ;;  %v4668_v37 = vld [vmem:[%s15306_s7 + $0x98] sm:$0xff]  ;;  %v13798_v22 = vld [vmem:[%s15306_s7 + $0x208] sm:$0xff] }
 0x5c7   :  { %4349 = vmatprep.subr.bf16.mxu0 %v10514_v2  ;;  %4402 = vmatprep.subr.bf16.mxu1 %v10517_v20  ;;  %v9953_v2 = vpack.c.bf16 %v4668_v37, %v4667_v30  ;;  %v4700_v20 = vld [vmem:[%s15306_s7 + $0x198] sm:$0xff]  ;;  %v4710_v30 = vld [vmem:[%s15306_s7 + $0x1e8] sm:$0xff]  ;;  %v9973_v37 = vpack.c.bf16 %v4678_v31, %v4677_v38 }
 0x5c8   :  { %v13808_v38 = vld [vmem:[%s15306_s7 + $0x308] sm:$0xff]  ;;  %v13818_v31 = vld [vmem:[%s15306_s7 + $0x298] sm:$0xff] }
 0x5ca   :  { %4350 = vmatpush1.bf16.msra.mxu0 %v10512_v1  ;;  %4403 = vmatpush1.bf16.msra.mxu1 %v10515_v25  ;;  %v9985_v1 = vpack.c.bf16 %v4700_v20, %v4699_v21  ;;  %v4651_v25 = vld [vmem:[%s15306_s7 + $0x10] sm:$0xff]  ;;  %v4662_v20 = vld [vmem:[%s15306_s7 + $0x68] sm:$0xff] }
 0x5cb   :  { %4351 = vmatprep.subr.bf16.mxu0 %v10520_v16  ;;  %4404 = vmatprep.subr.bf16.mxu1 %v10523_v27  ;;  %v4652_v16 = vld [vmem:[%s15306_s7 + $0x18] sm:$0xff]  ;;  %v4683_v27 = vld [vmem:[%s15306_s7 + $0x110] sm:$0xff] }
 0x5ce   :  { %4352 = vmatpush1.bf16.msra.mxu0 %v10518_v24  ;;  %4405 = vmatpush1.bf16.msra.mxu1 %v10521_v6  ;;  %v9955_v24 = vpack.c.bf16 %v4652_v16, %v4651_v25  ;;  %v4684_v6 = vld [vmem:[%s15306_s7 + $0x118] sm:$0xff]  ;;  %v4694_v16 = vld [vmem:[%s15306_s7 + $0x168] sm:$0xff] }
 0x5cf   :  { %4353 = vmatprep.subr.bf16.mxu0 %v10526_v36  ;;  %4406 = vmatprep.subr.bf16.mxu1 %v10529_v33  ;;  %v9987_v36 = vpack.c.bf16 %v4684_v6, %v4683_v27  ;;  %v4669_v33 = vld [vmem:[%s15306_s7 + $0xa0] sm:$0xff]  ;;  %v4679_v27 = vld [vmem:[%s15306_s7 + $0xf0] sm:$0xff] }
 0x5d2   :  { %4354 = vmatpush1.bf16.msra.mxu0 %v10524_v4  ;;  %4407 = vmatpush1.bf16.msra.mxu1 %v10527_v46  ;;  %v4670_v4 = vld [vmem:[%s15306_s7 + $0xa8] sm:$0xff]  ;;  %v4701_v46 = vld [vmem:[%s15306_s7 + $0x1a0] sm:$0xff] }
 0x5d3   :  { %4355 = vmatprep.subr.bf16.mxu0 %v10532_v8  ;;  %4408 = vmatprep.subr.bf16.mxu1 %v10535_v3  ;;  %v9957_v8 = vpack.c.bf16 %v4670_v4, %v4669_v33  ;;  %v4702_v3 = vld [vmem:[%s15306_s7 + $0x1a8] sm:$0xff]  ;;  %v4711_v33 = vld [vmem:[%s15306_s7 + $0x1f0] sm:$0xff]  ;;  %v4712_v4 = vld [vmem:[%s15306_s7 + $0x1f8] sm:$0xff] }
 0x5d6   :  { %4356 = vmatpush1.bf16.msra.mxu0 %v10530_v63  ;;  %4409 = vmatpush1.bf16.msra.mxu1 %v10533_v40  ;;  %v4653_v63 = vld [vmem:[%s15306_s7 + $0x20] sm:$0xff]  ;;  %v4654_v40 = vld [vmem:[%s15306_s7 + $0x28] sm:$0xff] }
 0x5d7   :  { %4357 = vmatprep.subr.bf16.mxu0 %v10538_v41  ;;  %4410 = vmatprep.subr.bf16.mxu1 %v10541_v5  ;;  %v9989_v41 = vpack.c.bf16 %v4702_v3, %v4701_v46  ;;  %v9959_v5 = vpack.c.bf16 %v4654_v40, %v4653_v63  ;;  %v4663_v46 = vld [vmem:[%s15306_s7 + $0x70] sm:$0xff]  ;;  %v4664_v3 = vld [vmem:[%s15306_s7 + $0x78] sm:$0xff] }
 0x5d8   :  { %v4695_v63 = vld [vmem:[%s15306_s7 + $0x170] sm:$0xff]  ;;  %v4696_v40 = vld [vmem:[%s15306_s7 + $0x178] sm:$0xff] }
 0x5da   :  { %4358 = vmatpush1.bf16.msra.mxu0 %v10536_v26  ;;  %4411 = vmatpush1.bf16.msra.mxu1 %v10539_v29  ;;  %v4686_v26 = vld [vmem:[%s15306_s7 + $0x128] sm:$0xff]  ;;  %v4671_v29 = vld [vmem:[%s15306_s7 + $0xb0] sm:$0xff] }
 0x5db   :  { %4359 = vmatprep.subr.bf16.mxu0 %v10544_v0  ;;  %4412 = vmatprep.subr.bf16.mxu1 %v10547_v55  ;;  %v9991_v0 = vpack.c.bf16 %v4686_v26, %v4685_v49  ;;  %v4704_v55 = vld [vmem:[%s15306_s7 + $0x1b8] sm:$0xff]  ;;  %v9961_v50 = vpack.c.bf16 %v4672_v10, %v4671_v29  ;;  %v4761_v49 = vld [vmem:[%s15306_s7 + $0x380] sm:$0xff]  ;;  %v9979_v26 = vpack.c.bf16 %v4664_v3, %v4663_v46  ;;  %v4762_v29 = vld [vmem:[%s15306_s7 + $0x388] sm:$0xff] }
 0x5dc   :  { %v9993_v18 = vpack.c.bf16 %v4704_v55, %v4703_v42  ;;  %v10045_v42 = vpack.c.bf16 %v4762_v29, %v4761_v49  ;;  %v4451_v55 = vld [vmem:[#allocation10] sm:$0xf] }
 0x5dd   :  { %v13750_v17 = vrot.slane %v4451_v55, %v15551_v62 }
 0x5de   :  { %4360 = vmatpush1.bf16.msra.mxu0 %v10542_v59  ;;  %4413 = vmatpush1.bf16.msra.mxu1 %v10545_v7  ;;  %v4674_v59 = vld [vmem:[%s15306_s7 + $0xc8] sm:$0xff]  ;;  %v4705_v7 = vld [vmem:[%s15306_s7 + $0x1c0] sm:$0xff] }
 0x5df   :  { %9950 = vmatprep.subr.bf16.mxu0 %v9949_v56  ;;  %9982 = vmatprep.subr.bf16.mxu1 %v9981_v61  ;;  %v9965_v13 = vpack.c.bf16 %v4674_v59, %v4673_v52  ;;  %v4658_v56 = vld [vmem:[%s15306_s7 + $0x48] sm:$0xff]  ;;  %v9997_v61 = vpack.c.bf16 %v4706_v53, %v4705_v7 }
 0x5e0   :  { %v9967_v23 = vpack.c.bf16 %v4658_v56, %v4657_v14  ;;  %v15553_v52 = vld [vmem:[#allocation28_spill] sm:$0xff] }
 0x5e1   :  { %4362 = vmatmul.mubr.bf16.vlgmr.msra.gmra.mrb[28].mxu0 %v3940_v19  ;;  %4415 = vmatmul.mubr.bf16.vlgmr.msra.gmra.mrb[24].mxu1 %v3940_v19  ;;  %v9969_v19 = vpack.c.bf16 %v4676_v15, %v4675_v28  ;;  %v13756_v59 = vrot.slane %v4451_v55, %v15553_v52 }
 0x5e2   :  { %4371 = vmatprep.mubr.bf16.mxu0 %v3943_v57  ;;  %4424 = vmatprep.mubr.bf16.mxu1 %v3943_v57 }
 0x5e3   :  { %9952 = vmatpush3.bf16.msra.mxu0 %v9951_v60  ;;  %9984 = vmatpush3.bf16.msra.mxu1 %v9983_v44  ;;  %v4660_v60 = vld [vmem:[%s15306_s7 + $0x58] sm:$0xff]  ;;  %v10001_v44 = vpack.c.bf16 %v4708_v43, %v4707_v11 }
 0x5e4   :  { %9954 = vmatprep.subr.bf16.mxu0 %v9953_v2  ;;  %9986 = vmatprep.subr.bf16.mxu1 %v9985_v1  ;;  %v9971_v57 = vpack.c.bf16 %v4660_v60, %v4659_v35  ;;  %v4661_v2 = vld [vmem:[%s15306_s7 + $0x60] sm:$0xff] }
 0x5e5   :  { %v4693_v1 = vld [vmem:[%s15306_s7 + $0x160] sm:$0xff]  ;;  %v9975_v25 = vpack.c.bf16 %v4662_v20, %v4661_v2  ;;  %v13832_v20 = vld [vmem:[%s15306_s7 + $0x398] sm:$0xff] }
 0x5e6   :  { %v10007_v6 = vpack.c.bf16 %v4694_v16, %v4693_v1  ;;  %v13837_v1 = vld [vmem:[%s15306_s7 + $0x210] sm:$0xff] }
 0x5e7   :  { %9956 = vmatpush3.bf16.msra.mxu0 %v9955_v24  ;;  %9988 = vmatpush3.bf16.msra.mxu1 %v9987_v36  ;;  %v4680_v24 = vld [vmem:[%s15306_s7 + $0xf8] sm:$0xff] }
 0x5e8   :  { %9958 = vmatprep.subr.bf16.mxu0 %v9957_v8  ;;  %9990 = vmatprep.subr.bf16.mxu1 %v9989_v41  ;;  %v9977_v36 = vpack.c.bf16 %v4680_v24, %v4679_v27  ;;  %v10009_v8 = vpack.c.bf16 %v4712_v4, %v4711_v33  ;;  %v4729_v41 = vld [vmem:[%s15306_s7 + $0x280] sm:$0xff]  ;;  %v13852_v33 = vld [vmem:[%s15306_s7 + $0x318] sm:$0xff] }
 0x5e9   :  { %4372 = vmatmul.mubr.bf16.gmra.mrb[32].mxu0 %v3942_v51  ;;  %4425 = vmatmul.mubr.bf16.gmra.mrb[28].mxu1 %v3942_v51  ;;  %v4709_v51 = vld [vmem:[%s15306_s7 + $0x1e0] sm:$0xff] }
 0x5ea   :  { %v10005_v21 = vpack.c.bf16 %v4710_v30, %v4709_v51  ;;  %v13823_v51 = vld [vmem:[%s15306_s7 + $0x390] sm:$0xff] }
 0x5eb   :  { %9960 = vmatpush3.bf16.msra.mxu0 %v9959_v5  ;;  %9992 = vmatpush3.bf16.msra.mxu1 %v9991_v0  ;;  %v4730_v5 = vld [vmem:[%s15306_s7 + $0x288] sm:$0xff]  ;;  %v10011_v0 = vpack.c.bf16 %v4696_v40, %v4695_v63 }
 0x5ec   :  { %9962 = vmatprep.subr.bf16.mxu0 %v9961_v50  ;;  %9994 = vmatprep.subr.bf16.mxu1 %v9993_v18  ;;  %v10013_v10 = vpack.c.bf16 %v4730_v5, %v4729_v41  ;;  %v15550_v50 = vld [vmem:[#allocation27_spill] sm:$0xff]  ;;  %v13866_v5 = vld [vmem:[%s15306_s7 + $0x2a8] sm:$0xff] }
 0x5ed   :  { %v13747_v18 = vrot.slane %v4451_v55, %v15550_v50  ;;  %v13861_v41 = vld [vmem:[%s15306_s7 + $0x2a0] sm:$0xff] }
 0x5ef   :  { %9964 = vmatpush3.bf16.msra.mxu0 %v9963_v34  ;;  %9996 = vmatpush3.bf16.msra.mxu1 %v9995_v54  ;;  %v13753_v54 = vrot.slane %v4451_v55, %v15552_v32 }
 0x5f0   :  { %9966 = vmatprep.subr.bf16.mxu0 %v9965_v13  ;;  %9998 = vmatprep.subr.bf16.mxu1 %v9997_v61 }
 0x5f3   :  { %9968 = vmatpush3.bf16.msra.mxu0 %v9967_v23  ;;  %10000 = vmatpush3.bf16.msra.mxu1 %v9999_v48 }
 0x5f4   :  { %9970 = vmatprep.subr.bf16.mxu0 %v9969_v19  ;;  %10002 = vmatprep.subr.bf16.mxu1 %v10001_v44 }
 0x5f7   :  { %9972 = vmatpush3.bf16.msra.mxu0 %v9971_v57  ;;  %10004 = vmatpush3.bf16.msra.mxu1 %v10003_v9  ;;  %v13793_v57 = vld [vmem:[%s15306_s7 + $0x200] sm:$0xff]  ;;  %v13813_v9 = vld [vmem:[%s15306_s7 + $0x290] sm:$0xff] }
 0x5f8   :  { %9974 = vmatprep.subr.bf16.mxu0 %v9973_v37  ;;  %10006 = vmatprep.subr.bf16.mxu1 %v10005_v21 }
 0x5fb   :  { %9976 = vmatpush3.bf16.msra.mxu0 %v9975_v25  ;;  %10008 = vmatpush3.bf16.msra.mxu1 %v10007_v6  ;;  %v13842_v25 = vld [vmem:[%s15306_s7 + $0x218] sm:$0xff] }
 0x5fc   :  { %9978 = vmatprep.subr.bf16.mxu0 %v9977_v36  ;;  %10010 = vmatprep.subr.bf16.mxu1 %v10009_v8  ;;  %v13847_v36 = vld [vmem:[%s15306_s7 + $0x310] sm:$0xff] }
 0x5ff   :  { %9980 = vmatpush3.bf16.msra.mxu0 %v9979_v26  ;;  %10012 = vmatpush3.bf16.msra.mxu1 %v10011_v0 }
 0x600   :  { %10014 = vmatprep.subr.bf16.mxu0 %v10013_v10  ;;  %10046 = vmatprep.subr.bf16.mxu1 %v10045_v42 }
 0x6b4   :  { %v4363_v45 = vpop.f32.mrb[28].mxu0  ;;  %v4416_v34 = vpop.f32.mrb[24].mxu1 }
 0x6b5   :  { %v4365_v7 = vpop.f32.mrb[29].mxu0  ;;  %v4418_v13 = vpop.f32.mrb[25].mxu1  ;;  %v13759_v56 = vadd.f32 %v13747_v18, %v4363_v45  ;;  %v13762_v61 = vadd.f32 %v13750_v17, %v4416_v34 }
 0x6b6   :  { %v4367_v53 = vpop.f32.mrb[30].mxu0  ;;  %v4420_v14 = vpop.f32.mrb[26].mxu1  ;;  %v13771_v28 = vadd.f32 %v13753_v54, %v4365_v7  ;;  %v13774_v15 = vadd.f32 %v13756_v59, %v4418_v13 }
 0x6b7   :  { %v13765_v23 = vadd.f32 %v13747_v18, %v4367_v53  ;;  %v13768_v47 = vadd.f32 %v13750_v17, %v4420_v14  ;;  %v4369_v12 = vpop.f32.mrb[31].mxu0  ;;  %v4422_v48 = vpop.f32.mrb[27].mxu1 }
 0x6b8   :  { %15556 = vst [vmem:[#allocation31_spill] sm:$0xff] %v13771_v28  ;;  %15557 = vst [vmem:[#allocation35_spill] sm:$0xff] %v13774_v15  ;;  %v13777_v11 = vadd.f32 %v13753_v54, %v4369_v12  ;;  %v13780_v19 = vadd.f32 %v13756_v59, %v4422_v48  ;;  %v4546_v4 = vmul.f32 %v13771_v28, %v13771_v28 }
 0x6b9   :  { %15554 = vst [vmem:[#allocation34_spill] sm:$0xff] %v13765_v23  ;;  %15555 = vst [vmem:[#allocation29_spill] sm:$0xff] %v13768_v47  ;;  %v4489_v43 = vadd.f32 %v13765_v23, %v13759_v56  ;;  %v4503_v35 = vadd.f32 %v13768_v47, %v13762_v61  ;;  %v4548_v46 = vmul.f32 %v13774_v15, %v13774_v15 }
 0x6ba   :  { %15558 = vst [vmem:[#allocation30_spill] sm:$0xff] %v13777_v11  ;;  %15559 = vst [vmem:[#allocation32_spill] sm:$0xff] %v13780_v19  ;;  %v4496_v60 = vadd.f32 %v13777_v11, %v13771_v28  ;;  %v4510_v44 = vadd.f32 %v13780_v19, %v13774_v15  ;;  %v4550_v30 = vmul.f32 %v13777_v11, %v13777_v11 }
 0x6bb   :  { %v4552_v37 = vmul.f32 %v13780_v19, %v13780_v19  ;;  %v4490_v16 = vrot.slane %v4489_v43, 4  ;;  %v4504_v27 = vrot.slane %v4503_v35, 4 }
 0x6bc   :  { %v4373_v21 = vpop.f32.mrb[32].mxu0  ;;  %v4426_v2 = vpop.f32.mrb[28].mxu1  ;;  %v4497_v8 = vrot.slane %v4496_v60, 4  ;;  %v4511_v3 = vrot.slane %v4510_v44, 4  ;;  %v4568_v42 = vadd.f32 %v4550_v30, %v4546_v4 }
 0x6bd   :  { %v4375_v24 = vpop.f32.mrb[33].mxu0  ;;  %v4428_v6 = vpop.f32.mrb[29].mxu1  ;;  %v4582_v55 = vadd.f32 %v4552_v37, %v4548_v46  ;;  %v4491_v7 = vadd.f32 %v4490_v16, %v4489_v43  ;;  %v4505_v13 = vadd.f32 %v4504_v27, %v4503_v35  ;;  %v13883_v10 = vadd.f32 %v13747_v18, %v4373_v21 }
 0x6be   :  { %v4377_v63 = vpop.f32.mrb[34].mxu0  ;;  %v4430_v40 = vpop.f32.mrb[30].mxu1  ;;  %v4498_v12 = vadd.f32 %v4497_v8, %v4496_v60  ;;  %v4512_v48 = vadd.f32 %v4511_v3, %v4510_v44  ;;  %v13886_v30 = vadd.f32 %v13750_v17, %v4426_v2  ;;  %v13889_v37 = vadd.f32 %v13753_v54, %v4375_v24 }
 0x6bf   :  { %v4379_v49 = vpop.f32.mrb[35].mxu0  ;;  %v4432_v26 = vpop.f32.mrb[31].mxu1  ;;  %v13892_v43 = vadd.f32 %v13756_v59, %v4428_v6  ;;  %v13895_v35 = vadd.f32 %v13747_v18, %v4377_v63  ;;  %v13898_v16 = vadd.f32 %v13750_v17, %v4430_v40  ;;  %v13902_v60 = vmul.f32 %v13765_v23, %v13765_v23 }
 0x6c0   :  { %15560 = vst [vmem:[#allocation33_spill] sm:$0xff] %v13889_v37  ;;  %v13906_v44 = vmul.f32 %v13768_v47, %v13768_v47  ;;  %v4569_v21 = vrot.slane %v4568_v42, 4  ;;  %v4583_v2 = vrot.slane %v4582_v55, 4  ;;  %v4492_v27 = vrot.slane %v4491_v7, 2 }
 0x6c1   :  { %15561 = vst [vmem:[#allocation36_spill] sm:$0xff] %v13892_v43  ;;  %v4506_v24 = vrot.slane %v4505_v13, 2  ;;  %v4517_v6 = vadd.f32 %v13895_v35, %v13883_v10  ;;  %v4531_v18 = vadd.f32 %v13898_v16, %v13886_v30  ;;  %v4499_v17 = vrot.slane %v4498_v12, 2 }
 0x6c2   :  { %v4513_v4 = vrot.slane %v4512_v48, 2  ;;  %v13913_v46 = vadd.f32 %v13753_v54, %v4379_v49  ;;  %v13916_v8 = vadd.f32 %v13756_v59, %v4432_v26  ;;  %v4554_v3 = vmul.f32 %v13889_v37, %v13889_v37 }
 0x6c3   :  { %v4556_v63 = vmul.f32 %v13892_v43, %v13892_v43  ;;  %v4518_v40 = vrot.slane %v4517_v6, 4  ;;  %v4532_v14 = vrot.slane %v4531_v18, 4  ;;  %v4493_v49 = vadd.f32 %v4492_v27, %v4491_v7 }
 0x6c4   :  { %15562 = vst [vmem:[#allocation37_spill] sm:$0xff] %v13913_v46  ;;  %15563 = vst [vmem:[#allocation39_spill] sm:$0xff] %v13916_v8  ;;  %v4524_v53 = vadd.f32 %v13913_v46, %v13889_v37  ;;  %v4558_v34 = vmul.f32 %v13913_v46, %v13913_v46  ;;  %v4538_v54 = vadd.f32 %v13916_v8, %v13892_v43 }
 0x6c5   :  { %v4560_v59 = vmul.f32 %v13916_v8, %v13916_v8  ;;  %v4507_v26 = vadd.f32 %v4506_v24, %v4505_v13  ;;  %v4519_v45 = vadd.f32 %v4518_v40, %v4517_v6  ;;  %v4533_v0 = vadd.f32 %v4532_v14, %v4531_v18 }
 0x6c6   :  { %v4525_v29 = vrot.slane %v4524_v53, 4  ;;  %v4596_v19 = vadd.f32 %v4558_v34, %v4554_v3  ;;  %v4539_v47 = vrot.slane %v4538_v54, 4  ;;  %v4500_v37 = vadd.f32 %v4499_v17, %v4498_v12 }
 0x6c7   :  { %v4610_v11 = vadd.f32 %v4560_v59, %v4556_v63  ;;  %v4520_v23 = vrot.slane %v4519_v45, 2  ;;  %v4534_v15 = vrot.slane %v4533_v0, 2  ;;  %v4514_v28 = vadd.f32 %v4513_v4, %v4512_v48 }
 0x6c8   :  { %v4526_v52 = vadd.f32 %v4525_v29, %v4524_v53  ;;  %v4597_v46 = vrot.slane %v4596_v19, 4  ;;  %v4540_v62 = vadd.f32 %v4539_v47, %v4538_v54  ;;  %v4570_v43 = vadd.f32 %v4569_v21, %v4568_v42 }
 0x6c9   :  { %v4611_v32 = vrot.slane %v4610_v11, 4  ;;  %v4584_v50 = vadd.f32 %v4583_v2, %v4582_v55  ;;  %v4521_v58 = vadd.f32 %v4520_v23, %v4519_v45  ;;  %v4535_v8 = vadd.f32 %v4534_v15, %v4533_v0 }
 0x6ca   :  { %v4527_v7 = vrot.slane %v4526_v52, 2  ;;  %v4598_v13 = vadd.f32 %v4597_v46, %v4596_v19  ;;  %v4541_v27 = vrot.slane %v4540_v62, 2  ;;  %v4501_v6 = vrot.slane %v4500_v37, 1 }
 0x6cb   :  { %v4612_v14 = vadd.f32 %v4611_v32, %v4610_v11  ;;  %v4522_v24 = vrot.slane %v4521_v58, 1  ;;  %v4536_v34 = vrot.slane %v4535_v8, 1  ;;  %v4515_v18 = vrot.slane %v4514_v28, 1 }
 0x6cc   :  { %v4494_v3 = vrot.slane %v4493_v49, 1  ;;  %v4508_v63 = vrot.slane %v4507_v26, 1  ;;  %v4528_v12 = vadd.f32 %v4527_v7, %v4526_v52  ;;  %v4542_v48 = vadd.f32 %v4541_v27, %v4540_v62 }
 0x6cd   :  { %v4557_v47 = vmul.f32 %v13895_v35, %v13895_v35  ;;  %v4559_v29 = vmul.f32 %v13898_v16, %v13898_v16  ;;  %v4502_v23 = vadd.f32 %v4501_v6, %v4500_v37  ;;  %v4516_v15 = vadd.f32 %v4515_v18, %v4514_v28 }
 0x6ce   :  { %v4529_v0 = vrot.slane %v4528_v12, 1  ;;  %v4543_v19 = vrot.slane %v4542_v48, 1  ;;  %v4571_v42 = vrot.slane %v4570_v43, 2  ;;  %v4599_v32 = vrot.slane %v4598_v13, 2 }
 0x6cf   :  { %v4523_v11 = vadd.f32 %v4522_v24, %v4521_v58  ;;  %v4537_v55 = vadd.f32 %v4536_v34, %v4535_v8  ;;  %v4585_v45 = vrot.slane %v4584_v50, 2  ;;  %v4613_v53 = vrot.slane %v4612_v14, 2 }
 0x6d0   :  { %v4530_v21 = vadd.f32 %v4529_v0, %v4528_v12  ;;  %v4544_v2 = vadd.f32 %v4543_v19, %v4542_v48  ;;  %v4572_v52 = vadd.f32 %v4571_v42, %v4570_v43  ;;  %v4600_v62 = vadd.f32 %v4599_v32, %v4598_v13  ;;  %v4765_v43 = vld [vmem:[%s15306_s7 + $0x3a0] sm:$0xff]  ;;  %v4767_v19 = vld [vmem:[%s15306_s7 + $0x3b0] sm:$0xff]  ;;  %v4768_v42 = vld [vmem:[%s15306_s7 + $0x3b8] sm:$0xff] }
 0x6d1   :  { %v4495_v17 = vadd.f32 %v4494_v3, %v4493_v49  ;;  %v4509_v4 = vadd.f32 %v4508_v63, %v4507_v26  ;;  %v4586_v46 = vadd.f32 %v4585_v45, %v4584_v50  ;;  %v4614_v40 = vadd.f32 %v4613_v53, %v4612_v14  ;;  %v4766_v50 = vld [vmem:[%s15306_s7 + $0x3a8] sm:$0xff]  ;;  %v4717_v3 = vld [vmem:[%s15306_s7 + $0x220] sm:$0xff]  ;;  %v4719_v53 = vld [vmem:[%s15306_s7 + $0x230] sm:$0xff] }
 0x6d2   :  { %v4626_v54 = vsel %vm757_vm0, %v4530_v21, %v4502_v23  ;;  %v4628_v28 = vsel %vm757_vm0, %v4544_v2, %v4516_v15  ;;  %v4573_v37 = vrot.slane %v4572_v52, 1  ;;  %v4601_v59 = vrot.slane %v4600_v62, 1  ;;  %v4718_v63 = vld [vmem:[%s15306_s7 + $0x228] sm:$0xff]  ;;  %v4749_v48 = vld [vmem:[%s15306_s7 + $0x320] sm:$0xff]  ;;  %v4735_v15 = vld [vmem:[%s15306_s7 + $0x2b0] sm:$0xff] }
 0x6d3   :  { %4841 = vmatprep.mubr.f32.mxu0 %v4626_v54  ;;  %4911 = vmatprep.mubr.f32.mxu1 %v4628_v28  ;;  %v4625_v58 = vsel %vm757_vm0, %v4523_v11, %v4495_v17  ;;  %v4627_v8 = vsel %vm757_vm0, %v4537_v55, %v4509_v4  ;;  %v4587_v7 = vrot.slane %v4586_v46, 1  ;;  %v4615_v27 = vrot.slane %v4614_v40, 1  ;;  %v4750_v23 = vld [vmem:[%s15306_s7 + $0x328] sm:$0xff]  ;;  %v4720_v21 = vld [vmem:[%s15306_s7 + $0x238] sm:$0xff]  ;;  %v4721_v54 = vld [vmem:[%s15306_s7 + $0x240] sm:$0xff] }
 0x6d4   :  { %v4553_v49 = vmul.f32 %v13883_v10, %v13883_v10  ;;  %4842 = vmatmul.mubr.f32.vlgmr.msra.gmra.mrb[26].mxu0 %v4625_v58  ;;  %4912 = vmatmul.mubr.f32.vlgmr.msra.gmra.mrb[22].mxu1 %v4627_v8  ;;  %v4574_v26 = vadd.f32 %v4573_v37, %v4572_v52  ;;  %v4602_v13 = vadd.f32 %v4601_v59, %v4600_v62  ;;  %v4770_v62 = vld [vmem:[%s15306_s7 + $0x3c8] sm:$0xff]  ;;  %v4753_v58 = vld [vmem:[%s15306_s7 + $0x340] sm:$0xff] }
 0x6d5   :  { %v4555_v14 = vmul.f32 %v13886_v30, %v13886_v30  ;;  %v15564_v24 = vpack.c.bf16 %v13798_v22, %v13793_v57  ;;  %v15565_v34 = vpack.c.bf16 %v13808_v38, %v13803_v39  ;;  %v4588_v6 = vadd.f32 %v4587_v7, %v4586_v46  ;;  %v4722_v28 = vld [vmem:[%s15306_s7 + $0x248] sm:$0xff]  ;;  %v4739_v7 = vld [vmem:[%s15306_s7 + $0x2d0] sm:$0xff] }
 0x6d6   :  { %v4616_v18 = vadd.f32 %v4615_v27, %v4614_v40  ;;  %v4545_v12 = vmul.f32 %v13759_v56, %v13759_v56  ;;  %v4642_v57 = vsel %vm757_vm0, %v4602_v13, %v4574_v26  ;;  %v15566_v22 = vpack.c.bf16 %v13818_v31, %v13813_v9  ;;  %v4754_v8 = vld [vmem:[%s15306_s7 + $0x348] sm:$0xff]  ;;  %v4772_v26 = vld [vmem:[%s15306_s7 + $0x3d8] sm:$0xff] }
 0x6d7   :  { %10016 = vmatpush3.bf16.msra.mxu0 %v15564_v24  ;;  %10048 = vmatpush3.bf16.msra.mxu1 %v15565_v34  ;;  %v15567_v39 = vpack.c.bf16 %v13832_v20, %v13823_v51  ;;  %v10053_v38 = vpack.c.bf16 %v4766_v50, %v4765_v43  ;;  %v4547_v9 = vmul.f32 %v13762_v61, %v13762_v61  ;;  %v4736_v20 = vld [vmem:[%s15306_s7 + $0x2b8] sm:$0xff] }
 0x6d8   :  { %10018 = vmatprep.subr.bf16.mxu0 %v15566_v22  ;;  %v4589_v31 = vadd.f32 %v4557_v47, %v4553_v49  ;;  %v4603_v0 = vadd.f32 %v4559_v29, %v4555_v14  ;;  %4981 = vmatprep.mubr.f32.mxu0 %v4642_v57  ;;  %v4644_v51 = vsel %vm757_vm0, %v4616_v18, %v4588_v6  ;;  %v4740_v50 = vld [vmem:[%s15306_s7 + $0x2d8] sm:$0xff]  ;;  %v4771_v49 = vld [vmem:[%s15306_s7 + $0x3d0] sm:$0xff]  ;;  %v4741_v22 = vld [vmem:[%s15306_s7 + $0x2e0] sm:$0xff] }
 0x6d9   :  { %10050 = vmatprep.subr.bf16.mxu1 %v15567_v39  ;;  %5051 = vmatprep.mubr.f32.mxu1 %v4644_v51  ;;  %v10023_v32 = vpack.c.bf16 %v4718_v63, %v4717_v3  ;;  %v4561_v47 = vadd.f32 %v13902_v60, %v4545_v12  ;;  %v4575_v29 = vadd.f32 %v13906_v44, %v4547_v9  ;;  %v4737_v44 = vld [vmem:[%s15306_s7 + $0x2c0] sm:$0xff]  ;;  %v4723_v6 = vld [vmem:[%s15306_s7 + $0x250] sm:$0xff]  ;;  %v4724_v18 = vld [vmem:[%s15306_s7 + $0x258] sm:$0xff] }
 0x6da   :  { %v15568_v11 = vpack.c.bf16 %v13842_v25, %v13837_v1  ;;  %v15569_v55 = vpack.c.bf16 %v13852_v33, %v13847_v36  ;;  %v10055_v45 = vpack.c.bf16 %v4750_v23, %v4749_v48  ;;  %v15570_v60 = vpack.c.bf16 %v13866_v5, %v13861_v41  ;;  %v4751_v36 = vld [vmem:[%s15306_s7 + $0x330] sm:$0xff]  ;;  %v4752_v33 = vld [vmem:[%s15306_s7 + $0x338] sm:$0xff]  ;;  %v4738_v41 = vld [vmem:[%s15306_s7 + $0x2c8] sm:$0xff] }
 0x6db   :  { %v10025_v1 = vpack.c.bf16 %v4736_v20, %v4735_v15  ;;  %v10057_v25 = vpack.c.bf16 %v4768_v42, %v4767_v19  ;;  %v4590_v2 = vrot.slane %v4589_v31, 4  ;;  %v4604_v52 = vrot.slane %v4603_v0, 4  ;;  %v4769_v5 = vld [vmem:[%s15306_s7 + $0x3c0] sm:$0xff]  ;;  %v4755_v12 = vld [vmem:[%s15306_s7 + $0x350] sm:$0xff]  ;;  %v4756_v57 = vld [vmem:[%s15306_s7 + $0x358] sm:$0xff] }
 0x6dc   :  { %10020 = vmatpush3.bf16.msra.mxu0 %v15568_v11  ;;  %10052 = vmatpush3.bf16.msra.mxu1 %v15569_v55  ;;  %v4562_v17 = vrot.slane %v4561_v47, 4  ;;  %v4576_v4 = vrot.slane %v4575_v29, 4  ;;  %v10027_v46 = vpack.c.bf16 %v4720_v21, %v4719_v53  ;;  %v10059_v40 = vpack.c.bf16 %v4752_v33, %v4751_v36  ;;  %v4742_v48 = vld [vmem:[%s15306_s7 + $0x2e8] sm:$0xff]  ;;  %v4773_v23 = vld [vmem:[%s15306_s7 + $0x3e0] sm:$0xff]  ;;  %v4743_v11 = vld [vmem:[%s15306_s7 + $0x2f0] sm:$0xff] }
 0x6dd   :  { %10022 = vmatprep.subr.bf16.mxu0 %v15570_v60  ;;  %10054 = vmatprep.subr.bf16.mxu1 %v10053_v38  ;;  %v10029_v37 = vpack.c.bf16 %v4738_v41, %v4737_v44  ;;  %v10061_v59 = vpack.c.bf16 %v4770_v62, %v4769_v5  ;;  %v4591_v27 = vadd.f32 %v4590_v2, %v4589_v31  ;;  %v4774_v15 = vld [vmem:[%s15306_s7 + $0x3e8] sm:$0xff]  ;;  %v4725_v20 = vld [vmem:[%s15306_s7 + $0x260] sm:$0xff]  ;;  %v4744_v55 = vld [vmem:[%s15306_s7 + $0x2f8] sm:$0xff] }
 0x6de   :  { %v4605_v43 = vadd.f32 %v4604_v52, %v4603_v0  ;;  %v10031_v13 = vpack.c.bf16 %v4722_v28, %v4721_v54  ;;  %v4563_v14 = vadd.f32 %v4562_v17, %v4561_v47  ;;  %v4577_v24 = vadd.f32 %v4576_v4, %v4575_v29  ;;  %v4726_v19 = vld [vmem:[%s15306_s7 + $0x268] sm:$0xff]  ;;  %v4757_v47 = vld [vmem:[%s15306_s7 + $0x360] sm:$0xff]  ;;  %v4776_v53 = vld [vmem:[%s15306_s7 + $0x3f8] sm:$0xff] }
 0x6df   :  { %v10063_v34 = vpack.c.bf16 %v4754_v8, %v4753_v58  ;;  %v10033_v3 = vpack.c.bf16 %v4740_v50, %v4739_v7  ;;  %v10065_v63 = vpack.c.bf16 %v4772_v26, %v4771_v49  ;;  %v4592_v39 = vrot.slane %v4591_v27, 2  ;;  %v4758_v29 = vld [vmem:[%s15306_s7 + $0x368] sm:$0xff]  ;;  %v4727_v36 = vld [vmem:[%s15306_s7 + $0x270] sm:$0xff]  ;;  %v4728_v41 = vld [vmem:[%s15306_s7 + $0x278] sm:$0xff] }
 0x6e0   :  { %10024 = vmatpush3.bf16.msra.mxu0 %v10023_v32  ;;  %10056 = vmatpush3.bf16.msra.mxu1 %v10055_v45  ;;  %v4606_v38 = vrot.slane %v4605_v43, 2  ;;  %v4564_v9 = vrot.slane %v4563_v14, 2  ;;  %v4578_v31 = vrot.slane %v4577_v24, 2  ;;  %v10035_v0 = vpack.c.bf16 %v4724_v18, %v4723_v6  ;;  %v4775_v45 = vld [vmem:[%s15306_s7 + $0x3f0] sm:$0xff]  ;;  %v4760_v62 = vld [vmem:[%s15306_s7 + $0x378] sm:$0xff] }
 0x6e1   :  { %10026 = vmatprep.subr.bf16.mxu0 %v10025_v1  ;;  %10058 = vmatprep.subr.bf16.mxu1 %v10057_v25  ;;  %v10067_v51 = vpack.c.bf16 %v4756_v57, %v4755_v12  ;;  %v10037_v42 = vpack.c.bf16 %v4742_v48, %v4741_v22  ;;  %v10069_v32 = vpack.c.bf16 %v4774_v15, %v4773_v23  ;;  %v4759_v5 = vld [vmem:[%s15306_s7 + $0x370] sm:$0xff]  ;;  %v5072_v23 = vld [vmem:[#allocation12] sm:$0xff]  ;;  %v5073_v15 = vld [vmem:[#allocation12 + $0x8] sm:$0xff] }
 0x6e2   :  { %v4593_v21 = vadd.f32 %v4592_v39, %v4591_v27  ;;  %v4607_v60 = vadd.f32 %v4606_v38, %v4605_v43  ;;  %v10039_v1 = vpack.c.bf16 %v4726_v19, %v4725_v20  ;;  %v10071_v25 = vpack.c.bf16 %v4758_v29, %v4757_v47  ;;  %v10550_v29 = vld [vmem:[%s15308_s9 + $0x100] ss:$8 sps:$4 sm:$0xff]  }
 0x6e3   :  { %v4565_v33 = vadd.f32 %v4564_v9, %v4563_v14  ;;  %v4579_v44 = vadd.f32 %v4578_v31, %v4577_v24  ;;  %v10041_v2 = vpack.c.bf16 %v4744_v55, %v4743_v11  ;;  %v10073_v52 = vpack.c.bf16 %v4776_v53, %v4775_v45  ;;  %v10552_v11 = vld [vmem:[%s15308_s9 + $0x104] ss:$8 sps:$4 sm:$0xff]   ;;  %v10553_v55 = vld [vmem:[%s15308_s9 + $0x110] ss:$8 sps:$4 sm:$0xff]   ;;  %v10555_v45 = vld [vmem:[%s15308_s9 + $0x114] ss:$8 sps:$4 sm:$0xff]  }
 0x6e4   :  { %10028 = vmatpush3.bf16.msra.mxu0 %v10027_v46  ;;  %10060 = vmatpush3.bf16.msra.mxu1 %v10059_v40  ;;  %v4594_v17 = vrot.slane %v4593_v21, 1  ;;  %v4608_v4 = vrot.slane %v4607_v60, 1  ;;  %v10043_v46 = vpack.c.bf16 %v4728_v41, %v4727_v36  ;;  %v10075_v40 = vpack.c.bf16 %v4760_v62, %v4759_v5  ;;  %v10558_v53 = vld [vmem:[%s15308_s9 + $0x124] ss:$8 sps:$4 sm:$0xff]   ;;  %v10562_v36 = vld [vmem:[%s15308_s9 + $0x140] ss:$8 sps:$4 sm:$0xff]  }
 0x6e5   :  { %10030 = vmatprep.subr.bf16.mxu0 %v10029_v37  ;;  %10062 = vmatprep.subr.bf16.mxu1 %v10061_v59  ;;  %v4566_v54 = vrot.slane %v4565_v33, 1  ;;  %v4580_v28 = vrot.slane %v4579_v44, 1  ;;  %v15571_v43 = vmov 0.0   ;;  %v5076_v9 = vcombine.high %v5072_v23, %v5072_v23  ;;  %v10573_v41 = vld [vmem:[%s15308_s9 + $0x174] ss:$8 sps:$4 sm:$0xff]  }
 0x6e6   :  { %v4595_v37 = vadd.f32 %v4594_v17, %v4593_v21  ;;  %v4609_v59 = vadd.f32 %v4608_v4, %v4607_v60  ;;  %v5077_v31 = vcombine.high %v5073_v15, %v5073_v15  ;;  %v10556_v21 = vld [vmem:[%s15308_s9 + $0x120] ss:$8 sps:$4 sm:$0xff]   ;;  %v10561_v60 = vld [vmem:[%s15308_s9 + $0x134] ss:$8 sps:$4 sm:$0xff]   ;;  %v10571_v5 = vld [vmem:[%s15308_s9 + $0x170] ss:$8 sps:$4 sm:$0xff]  }
 0x6e7   :  { %v4567_v58 = vadd.f32 %v4566_v54, %v4565_v33  ;;  %v4581_v8 = vadd.f32 %v4580_v28, %v4579_v44  ;;  %v10567_v33 = vld [vmem:[%s15308_s9 + $0x154] ss:$8 sps:$4 sm:$0xff]   ;;  %v10565_v44 = vld [vmem:[%s15308_s9 + $0x150] ss:$8 sps:$4 sm:$0xff]   ;;  %v10576_v62 = vld [vmem:[%s15308_s9 + $0x184] ss:$8 sps:$4 sm:$0xff]  }
 0x6e8   :  { %10032 = vmatpush3.bf16.msra.mxu0 %v10031_v13  ;;  %10064 = vmatpush3.bf16.msra.mxu1 %v10063_v34  ;;  %v10574_v17 = vld [vmem:[%s15308_s9 + $0x180] ss:$8 sps:$4 sm:$0xff]   ;;  %v10579_v4 = vld [vmem:[%s15308_s9 + $0x194] ss:$8 sps:$4 sm:$0xff]  }
 0x6e9   :  { %10034 = vmatprep.subr.bf16.mxu0 %v10033_v3  ;;  %10066 = vmatprep.subr.bf16.mxu1 %v10065_v63  ;;  %v4641_v7 = vsel %vm757_vm0, %v4595_v37, %v4567_v58  ;;  %v4643_v27 = vsel %vm757_vm0, %v4609_v59, %v4581_v8  ;;  %v10580_v54 = vld [vmem:[%s15308_s9 + $0x1a0] ss:$8 sps:$4 sm:$0xff]   ;;  %v10585_v28 = vld [vmem:[%s15308_s9 + $0x1b4] ss:$8 sps:$4 sm:$0xff]   ;;  %v10583_v37 = vld [vmem:[%s15308_s9 + $0x1b0] ss:$8 sps:$4 sm:$0xff]  }
 0x6ea   :  { %v10586_v59 = vld [vmem:[%s15308_s9 + $0x1c0] ss:$8 sps:$4 sm:$0xff]   ;;  %v10588_v58 = vld [vmem:[%s15308_s9 + $0x1c4] ss:$8 sps:$4 sm:$0xff]   ;;  %v10591_v8 = vld [vmem:[%s15308_s9 + $0x1d4] ss:$8 sps:$4 sm:$0xff]  }
 0x6ec   :  { %10036 = vmatpush3.bf16.msra.mxu0 %v10035_v0  ;;  %10068 = vmatpush3.bf16.msra.mxu1 %v10067_v51 }
 0x6ed   :  { %10038 = vmatprep.subr.bf16.mxu0 %v10037_v42  ;;  %10070 = vmatprep.subr.bf16.mxu1 %v10069_v32 }
 0x6f0   :  { %10040 = vmatpush3.bf16.msra.mxu0 %v10039_v1  ;;  %10072 = vmatpush3.bf16.msra.mxu1 %v10071_v25  ;;  %v10559_v1 = vld [vmem:[%s15308_s9 + $0x130] ss:$8 sps:$4 sm:$0xff]   ;;  %v10564_v25 = vld [vmem:[%s15308_s9 + $0x144] ss:$8 sps:$4 sm:$0xff]  }
 0x6f1   :  { %10042 = vmatprep.subr.bf16.mxu0 %v10041_v2  ;;  %10074 = vmatprep.subr.bf16.mxu1 %v10073_v52  ;;  %v10570_v2 = vld [vmem:[%s15308_s9 + $0x164] ss:$8 sps:$4 sm:$0xff]   ;;  %v10568_v52 = vld [vmem:[%s15308_s9 + $0x160] ss:$8 sps:$4 sm:$0xff]  }
 0x6f4   :  { %10044 = vmatpush3.bf16.msra.mxu0 %v10043_v46  ;;  %10076 = vmatpush3.bf16.msra.mxu1 %v10075_v40  ;;  %v10577_v46 = vld [vmem:[%s15308_s9 + $0x190] ss:$8 sps:$4 sm:$0xff]   ;;  %v10582_v40 = vld [vmem:[%s15308_s9 + $0x1a4] ss:$8 sps:$4 sm:$0xff]  }
 0x6f5   :  { %9077 = vmatprep.subr.msk.mxu0 %vm1214_vm1, %v5076_v9  ;;  %9080 = vmatprep.subr.msk.mxu1 %vm1214_vm1, %v5077_v31 }
 0x6f7   :  { %4982 = vmatmul.mubr.f32.vlgmr.msra.gmra.mrb[36].mxu0 %v4641_v7  ;;  %5052 = vmatmul.mubr.f32.vlgmr.msra.gmra.mrb[32].mxu1 %v4643_v27  ;;  %v10589_v7 = vld [vmem:[%s15308_s9 + $0x1d0] ss:$8 sps:$4 sm:$0xff]   ;;  %v10594_v27 = vld [vmem:[%s15308_s9 + $0x1e4] ss:$8 sps:$4 sm:$0xff]  }
 0x6f8   :  { %5152 = vmatprep.mubr.f32.mxu0 %v15571_v43  ;;  %5223 = vmatprep.mubr.f32.mxu1 %v15571_v43 }
 0x6f9   :  { %9078 = vmatpush1.msk.msra.mxu0 %vm1214_vm1, %v5072_v23  ;;  %9081 = vmatpush1.msk.msra.mxu1 %vm1214_vm1, %v5073_v15 }
 0x6fa   :  { %9083 = vmatprep.subr.msk.mxu0 %vm1214_vm1, %v5076_v9  ;;  %9086 = vmatprep.subr.msk.mxu1 %vm1214_vm1, %v5077_v31 }
 0x7a7   :  { %v9548_v50 = vpop.f32.mrb[26].mxu0  ;;  %v9583_v49 = vpop.f32.mrb[22].mxu1 }
 0x7a8   :  { %v9549_v26 = vpop.f32.mrb[27].mxu0  ;;  %v9584_v13 = vpop.f32.mrb[23].mxu1 }
 0x7a9   :  { %v9550_v14 = vadd.f32 %v9549_v26, %v9548_v50  ;;  %v9585_v24 = vadd.f32 %v9584_v13, %v9583_v49  ;;  %v10592_v50 = vld [vmem:[%s15308_s9 + $0x1e0] ss:$8 sps:$4 sm:$0xff]   ;;  %v10597_v49 = vld [vmem:[%s15308_s9 + $0x1f4] ss:$8 sps:$4 sm:$0xff]   ;;  %v10595_v26 = vld [vmem:[%s15308_s9 + $0x1f0] ss:$8 sps:$4 sm:$0xff]  }
 0x7aa   :  { %v10600_v13 = vld [vmem:[%s15308_s9 + $0x4] ss:$8 sps:$4 sm:$0xff]  }
 0x7ab   :  { %v4914_v34 = vadd.f32 %v9585_v24, %v9550_v14 }
 0x7ca   :  { %v9618_v6 = vpop.f32.mrb[36].mxu0  ;;  %v9653_v18 = vpop.f32.mrb[32].mxu1 }
 0x7cb   :  { %v9619_v3 = vpop.f32.mrb[37].mxu0  ;;  %v9654_v63 = vpop.f32.mrb[33].mxu1 }
 0x7cc   :  { %v9620_v12 = vadd.f32 %v9619_v3, %v9618_v6  ;;  %v9655_v57 = vadd.f32 %v9654_v63, %v9653_v18  ;;  %v15572_v63 = vld [vmem:[#allocation55_spill] sm:$0xff] }
 0x7ce   :  { %v4984_v22 = vadd.f32 %v9620_v12, %v4914_v34 }
 0x7d0   :  { %v5054_v39 = vadd.f32 %v9655_v57, %v4984_v22 }
 0x7d2   :  { %v5057_v38 = vmul.f32 0.00048828125, %v5054_v39 }
 0x7d4   :  { %v5058_v48 = vmul.f32 %v5057_v38, %v5057_v38  ;;  %v5066_v32 = vsub.f32 0.0, %v5057_v38 }
 0x7d6   :  { %5060 = vrot.lane.b32.xlu1 %v5058_v48, %s11073_s18 }
 0x848   :  { %v5061_v0 = vpop.permute.xlu1 %5060 }
 0x849   :  { %v5063_v51 = vsub.f32 %v5057_v38, %v5061_v0 }
 0x84b   :  { %v5064_v20 = vadd.f32 1e-05, %v5063_v51 }
 0x84d   :  { %10849 = vrsqrt.f32 %v5064_v20  ;;  %v15573_v20 = vld [vmem:[#allocation27_spill] sm:$0xff] }
 0x857   :  { %v10850_v19 = vpop.eup %10849 }
 0x858   :  { %5068 = vrot.lane.b32.xlu1 %v10850_v19, %s11077_s3 }
 0x8ca   :  { %v5069_v42 = vpop.permute.xlu1 %5068 }
 0x8cb   :  { %9079 = vmatmul.mubr.msk.f32.vlgmr.msra.gmra.mrb[38].mxu0 %vm1211_vm2, %v5069_v42  ;;  %9082 = vmatmul.mubr.msk.f32.vlgmr.msra.gmra.mrb[34].mxu1 %vm1211_vm2, %v5069_v42  ;;  %v5071_v47 = vmul.f32 %v5069_v42, %v5066_v32  ;;  %v15574_v42 = vld [vmem:[#allocation25_spill] sm:$0xff] }
 0x8cc   :  { %9084 = vmatpush1.msk.msra.mxu0 %vm1214_vm1, %v5072_v23  ;;  %9087 = vmatpush1.msk.msra.mxu1 %vm1214_vm1, %v5073_v15 }
 0x8cd   :  { %5297 = vmatprep.mubr.f32.mxu0 %v15571_v43  ;;  %5368 = vmatprep.mubr.f32.mxu1 %v15571_v43 }
 0x8ce   :  { %6384 = vmatprep.subr.bf16.mxu0 %v10552_v11  ;;  %v15576_v11 = vld [vmem:[#allocation28_spill] sm:$0xff] }
 0x8cf   :  { %9085 = vmatmul.mubr.msk.f32.vlgmr.msra.gmra.mrb[40].mxu0 %vm1211_vm2, %v5071_v47  ;;  %9088 = vmatmul.mubr.msk.f32.vlgmr.msra.gmra.mrb[36].mxu1 %vm1211_vm2, %v5071_v47  ;;  %v15575_v47 = vld [vmem:[#allocation26_spill] sm:$0xff] }
 0x8d0   :  { %6385 = vmatpush1.bf16.msra.mxu0 %v10550_v29 }
 0x8d1   :  { %6386 = vmatprep.subr.bf16.mxu0 %v10555_v45 }
 0x8d4   :  { %6387 = vmatpush1.bf16.msra.mxu0 %v10553_v55 }
 0x8d5   :  { %6388 = vmatprep.subr.bf16.mxu0 %v10558_v53 }
 0x8d8   :  { %6389 = vmatpush1.bf16.msra.mxu0 %v10556_v21 }
 0x8d9   :  { %6390 = vmatprep.subr.bf16.mxu0 %v10561_v60 }
 0x8dc   :  { %6391 = vmatpush1.bf16.msra.mxu0 %v10559_v1 }
 0x8dd   :  { %6392 = vmatprep.subr.bf16.mxu0 %v10564_v25 }
 0x8e0   :  { %6393 = vmatpush1.bf16.msra.mxu0 %v10562_v36 }
 0x8e1   :  { %6394 = vmatprep.subr.bf16.mxu0 %v10567_v33  ;;  %v15577_v33 = vld [vmem:[#allocation31_spill] sm:$0xff] }
 0x8e4   :  { %6395 = vmatpush1.bf16.msra.mxu0 %v10565_v44 }
 0x8e5   :  { %6396 = vmatprep.subr.bf16.mxu0 %v10570_v2 }
 0x8e8   :  { %6397 = vmatpush1.bf16.msra.mxu0 %v10568_v52  ;;  %v15578_v52 = vld [vmem:[#allocation35_spill] sm:$0xff] }
 0x8e9   :  { %6398 = vmatprep.subr.bf16.mxu0 %v10573_v41 }
 0x8ec   :  { %6399 = vmatpush1.bf16.msra.mxu0 %v10571_v5  ;;  %v15579_v5 = vld [vmem:[#allocation34_spill] sm:$0xff] }
 0x8ed   :  { %6400 = vmatprep.subr.bf16.mxu0 %v10576_v62 }
 0x8f0   :  { %6401 = vmatpush1.bf16.msra.mxu0 %v10574_v17  ;;  %v15580_v17 = vld [vmem:[#allocation30_spill] sm:$0xff] }
 0x8f1   :  { %6402 = vmatprep.subr.bf16.mxu0 %v10579_v4 }
 0x8f4   :  { %6403 = vmatpush1.bf16.msra.mxu0 %v10577_v46 }
 0x8f5   :  { %6404 = vmatprep.subr.bf16.mxu0 %v10582_v40 }
 0x8f8   :  { %6405 = vmatpush1.bf16.msra.mxu0 %v10580_v54  ;;  %v15581_v54 = vld [vmem:[#allocation29_spill] sm:$0xff] }
 0x8f9   :  { %6406 = vmatprep.subr.bf16.mxu0 %v10585_v28 }
 0x8fc   :  { %6407 = vmatpush1.bf16.msra.mxu0 %v10583_v37  ;;  %v15582_v37 = vld [vmem:[#allocation32_spill] sm:$0xff] }
 0x8fd   :  { %6408 = vmatprep.subr.bf16.mxu0 %v10588_v58 }
 0x900   :  { %6409 = vmatpush1.bf16.msra.mxu0 %v10586_v59 }
 0x901   :  { %6410 = vmatprep.subr.bf16.mxu0 %v10591_v8  ;;  %v15583_v8 = vld [vmem:[#allocation33_spill] sm:$0xff] }
 0x904   :  { %6411 = vmatpush1.bf16.msra.mxu0 %v10589_v7 }
 0x905   :  { %6412 = vmatprep.subr.bf16.mxu0 %v10594_v27  ;;  %v15584_v27 = vld [vmem:[#allocation36_spill] sm:$0xff] }
 0x908   :  { %6413 = vmatpush1.bf16.msra.mxu0 %v10592_v50 }
 0x909   :  { %6414 = vmatprep.subr.bf16.mxu0 %v10597_v49 }
 0x90c   :  { %6415 = vmatpush1.bf16.msra.mxu0 %v10595_v26 }
 0x90d   :  { %6587 = vmatprep.subr.bf16.mxu0 %v10600_v13  ;;  %v15585_v13 = vld [vmem:[#allocation37_spill] sm:$0xff] }
 0x99e   :  { %v5154_v14 = vpop.f32.mrb[38].mxu0  ;;  %v5225_v24 = vpop.f32.mrb[34].mxu1 }
 0x99f   :  { %v5156_v34 = vpop.f32.mrb[39].mxu0  ;;  %v5227_v6 = vpop.f32.mrb[35].mxu1 }
 0x9a0   :  { %v5379_v18 = vcombine.low %v5154_v14, %v5156_v34  ;;  %v5380_v3 = vcombine.low %v5225_v24, %v5227_v6  ;;  %v15586_v34 = vld [vmem:[#allocation39_spill] sm:$0xff] }
 0x9a2   :  { %v5387_v12 = vrot.slane %v5379_v18, %v15572_v63  ;;  %v5394_v57 = vrot.slane %v5380_v3, %v15572_v63  ;;  %v5299_v22 = vpop.f32.mrb[40].mxu0  ;;  %v5370_v39 = vpop.f32.mrb[36].mxu1 }
 0x9a3   :  { %v5301_v38 = vpop.f32.mrb[41].mxu0  ;;  %v5372_v48 = vpop.f32.mrb[37].mxu1 }
 0x9a4   :  { %v5395_v23 = vcombine.low %v5387_v12, %v5394_v57  ;;  %v5396_v15 = vcombine.high %v5387_v12, %v5394_v57  ;;  %v5471_v9 = vcombine.low %v5299_v22, %v5301_v38  ;;  %v5472_v31 = vcombine.low %v5370_v39, %v5372_v48 }
 0x9a6   :  { %v5403_v0 = vrot.slane %v5395_v23, %v15572_v63  ;;  %v5410_v51 = vrot.slane %v5396_v15, %v15572_v63  ;;  %v5479_v45 = vrot.slane %v5471_v9, %v15572_v63  ;;  %v5486_v53 = vrot.slane %v5472_v31, %v15572_v63 }
 0x9a8   :  { %v5414_v19 = vrot.slane %v5403_v0, %v15573_v20  ;;  %v5418_v32 = vrot.slane %v5403_v0, %v15574_v42  ;;  %v5422_v29 = vrot.slane %v5403_v0, %v15575_v47  ;;  %v5426_v55 = vrot.slane %v5403_v0, %v15576_v11 }
 0x9a9   :  { %v5430_v21 = vrot.slane %v5410_v51, %v15573_v20  ;;  %v5434_v60 = vrot.slane %v5410_v51, %v15574_v42  ;;  %v5438_v1 = vrot.slane %v5410_v51, %v15575_v47  ;;  %v5442_v25 = vrot.slane %v5410_v51, %v15576_v11 }
 0x9aa   :  { %v5451_v36 = vmul.f32 %v5414_v19, %v13759_v56  ;;  %v5452_v44 = vmul.f32 %v5418_v32, %v15577_v33  ;;  %v5453_v2 = vmul.f32 %v5422_v29, %v13762_v61  ;;  %v5454_v41 = vmul.f32 %v5426_v55, %v15578_v52 }
 0x9ab   :  { %v5455_v62 = vmul.f32 %v5414_v19, %v15579_v5  ;;  %v5456_v4 = vmul.f32 %v5418_v32, %v15580_v17  ;;  %v5487_v46 = vcombine.low %v5479_v45, %v5486_v53  ;;  %v5488_v40 = vcombine.high %v5479_v45, %v5486_v53 }
 0x9ac   :  { %v5457_v28 = vmul.f32 %v5422_v29, %v15581_v54  ;;  %v5458_v59 = vmul.f32 %v5426_v55, %v15582_v37  ;;  %v5459_v58 = vmul.f32 %v5430_v21, %v13883_v10  ;;  %v5460_v56 = vmul.f32 %v5434_v60, %v15583_v8 }
 0x9ad   :  { %v5461_v7 = vmul.f32 %v5438_v1, %v13886_v30  ;;  %v5462_v61 = vmul.f32 %v5442_v25, %v15584_v27  ;;  %v5495_v50 = vrot.slane %v5487_v46, %v15572_v63  ;;  %v5502_v49 = vrot.slane %v5488_v40, %v15572_v63 }
 0x9ae   :  { %v5463_v26 = vmul.f32 %v5430_v21, %v13895_v35  ;;  %v5464_v14 = vmul.f32 %v5434_v60, %v15585_v13  ;;  %v5465_v24 = vmul.f32 %v5438_v1, %v13898_v16  ;;  %v5466_v6 = vmul.f32 %v5442_v25, %v15586_v34 }
 0x9af   :  { %v5506_v10 = vrot.slane %v5495_v50, %v15573_v20  ;;  %v5510_v18 = vrot.slane %v5495_v50, %v15574_v42  ;;  %v5514_v30 = vrot.slane %v5495_v50, %v15575_v47  ;;  %v5518_v3 = vrot.slane %v5495_v50, %v15576_v11 }
 0x9b0   :  { %v5522_v12 = vrot.slane %v5502_v49, %v15573_v20  ;;  %v5526_v57 = vrot.slane %v5502_v49, %v15574_v42  ;;  %v5530_v35 = vrot.slane %v5502_v49, %v15575_v47  ;;  %v5534_v22 = vrot.slane %v5502_v49, %v15576_v11 }
 0x9b1   :  { %v5543_v39 = vadd.f32 %v5506_v10, %v5451_v36  ;;  %v5544_v16 = vadd.f32 %v5510_v18, %v5452_v44  ;;  %v5545_v38 = vadd.f32 %v5514_v30, %v5453_v2  ;;  %v5546_v48 = vadd.f32 %v5518_v3, %v5454_v41 }
 0x9b2   :  { %v5547_v23 = vadd.f32 %v5506_v10, %v5455_v62  ;;  %v5548_v15 = vadd.f32 %v5510_v18, %v5456_v4  ;;  %v5549_v9 = vadd.f32 %v5514_v30, %v5457_v28  ;;  %v5550_v31 = vadd.f32 %v5518_v3, %v5458_v59 }
 0x9b3   :  { %v5551_v0 = vadd.f32 %v5522_v12, %v5459_v58  ;;  %v5552_v51 = vadd.f32 %v5526_v57, %v5460_v56  ;;  %v5553_v19 = vadd.f32 %v5530_v35, %v5461_v7  ;;  %v5554_v32 = vadd.f32 %v5534_v22, %v5462_v61 }
 0x9b4   :  { %v5555_v29 = vadd.f32 %v5522_v12, %v5463_v26  ;;  %v5556_v55 = vadd.f32 %v5526_v57, %v5464_v14  ;;  %v5557_v45 = vadd.f32 %v5530_v35, %v5465_v24  ;;  %v5558_v53 = vadd.f32 %v5534_v22, %v5466_v6  ;;  %v15587_v24 = vld [vmem:[#allocation56_spill] sm:$0xff] }
 0x9b5   :  { %v5559_v21 = vmax.f32 %v5543_v39, 0.0  ;;  %v5560_v60 = vmax.f32 %v5544_v16, 0.0  ;;  %v5561_v1 = vmax.f32 %v5545_v38, 0.0  ;;  %v5562_v11 = vmax.f32 %v5546_v48, 0.0 }
 0x9b6   :  { %v5563_v25 = vmax.f32 %v5547_v23, 0.0  ;;  %v5564_v36 = vmax.f32 %v5548_v15, 0.0  ;;  %v5565_v33 = vmax.f32 %v5549_v9, 0.0  ;;  %v5566_v44 = vmax.f32 %v5550_v31, 0.0 }
 0x9b7   :  { %v5567_v2 = vmax.f32 %v5551_v0, 0.0  ;;  %v5568_v52 = vmax.f32 %v5552_v51, 0.0  ;;  %v5569_v41 = vmax.f32 %v5553_v19, 0.0  ;;  %v5570_v5 = vmax.f32 %v5554_v32, 0.0 }
 0x9b8   :  { %v5571_v62 = vmax.f32 %v5555_v29, 0.0  ;;  %v5572_v17 = vmax.f32 %v5556_v55, 0.0  ;;  %v5573_v4 = vmax.f32 %v5557_v45, 0.0  ;;  %v5574_v46 = vmax.f32 %v5558_v53, 0.0 }
 0x9b9   :  { %v5575_v40 = vmax.f32 %v5559_v21, %v5561_v1  ;;  %v5576_v54 = vmax.f32 %v5560_v60, %v5562_v11  ;;  %v5577_v28 = vmax.f32 %v5563_v25, %v5565_v33  ;;  %v5578_v37 = vmax.f32 %v5564_v36, %v5566_v44 }
 0x9ba   :  { %v5579_v59 = vmax.f32 %v5567_v2, %v5569_v41  ;;  %v5580_v58 = vmax.f32 %v5568_v52, %v5570_v5  ;;  %v5581_v8 = vmax.f32 %v5571_v62, %v5573_v4  ;;  %v5582_v56 = vmax.f32 %v5572_v17, %v5574_v46 }
 0x9bb   :  { %v5591_v7 = vcombine.low %v5575_v40, %v5576_v54  ;;  %v5592_v27 = vcombine.high %v5575_v40, %v5576_v54  ;;  %v5609_v61 = vcombine.low %v5577_v28, %v5578_v37  ;;  %v5610_v50 = vcombine.high %v5577_v28, %v5578_v37 }
 0x9bc   :  { %v5627_v49 = vcombine.low %v5579_v59, %v5580_v58  ;;  %v5628_v26 = vcombine.high %v5579_v59, %v5580_v58  ;;  %v5645_v13 = vcombine.low %v5581_v8, %v5582_v56  ;;  %v5646_v14 = vcombine.high %v5581_v8, %v5582_v56 }
 0x9bd   :  { %v5599_v34 = vrot.slane %v5591_v7, %v15587_v24  ;;  %v5606_v6 = vrot.slane %v5592_v27, %v15587_v24  ;;  %v5617_v10 = vrot.slane %v5609_v61, %v15587_v24  ;;  %v5624_v18 = vrot.slane %v5610_v50, %v15587_v24 }
 0x9be   :  { %v5635_v30 = vrot.slane %v5627_v49, %v15587_v24  ;;  %v5642_v3 = vrot.slane %v5628_v26, %v15587_v24  ;;  %v5653_v12 = vrot.slane %v5645_v13, %v15587_v24  ;;  %v5660_v57 = vrot.slane %v5646_v14, %v15587_v24 }
 0x9bf   :  { %v5607_v35 = vcombine.high %v5599_v34, %v5599_v34  ;;  %v5608_v22 = vcombine.high %v5606_v6, %v5606_v6  ;;  %v5625_v39 = vcombine.high %v5617_v10, %v5617_v10  ;;  %v5626_v16 = vcombine.high %v5624_v18, %v5624_v18 }
 0x9c0   :  { %v5643_v38 = vcombine.high %v5635_v30, %v5635_v30  ;;  %v5644_v48 = vcombine.high %v5642_v3, %v5642_v3  ;;  %v5661_v23 = vcombine.high %v5653_v12, %v5653_v12  ;;  %v5662_v15 = vcombine.high %v5660_v57, %v5660_v57 }
 0x9c1   :  { %v5669_v9 = vrot.slane %v5599_v34, %v15587_v24  ;;  %v5677_v31 = vrot.slane %v5607_v35, %v15587_v24  ;;  %v5685_v0 = vrot.slane %v5606_v6, %v15587_v24  ;;  %v5693_v51 = vrot.slane %v5608_v22, %v15587_v24 }
 0x9c2   :  { %v14281_v19 = vrot.slane %v5617_v10, %v15587_v24  ;;  %v14284_v32 = vrot.slane %v5625_v39, %v15587_v24  ;;  %v14287_v29 = vrot.slane %v5624_v18, %v15587_v24  ;;  %v14290_v55 = vrot.slane %v5626_v16, %v15587_v24 }
 0x9c3   :  { %v5670_v45 = vcombine.high %v5669_v9, %v5669_v9  ;;  %v5678_v53 = vcombine.high %v5677_v31, %v5677_v31  ;;  %v5686_v21 = vcombine.high %v5685_v0, %v5685_v0  ;;  %v5694_v60 = vcombine.high %v5693_v51, %v5693_v51 }
 0x9c4   :  { %v5702_v1 = vcombine.high %v14281_v19, %v14281_v19  ;;  %v5710_v11 = vcombine.high %v14284_v32, %v14284_v32  ;;  %v5718_v25 = vcombine.high %v14287_v29, %v14287_v29  ;;  %v5726_v36 = vcombine.high %v14290_v55, %v14290_v55 }
 0x9c5   :  { %v14301_v33 = vrot.slane %v5635_v30, %v15587_v24  ;;  %v14304_v44 = vrot.slane %v5643_v38, %v15587_v24  ;;  %v14307_v2 = vrot.slane %v5642_v3, %v15587_v24  ;;  %v14310_v52 = vrot.slane %v5644_v48, %v15587_v24 }
 0x9c6   :  { %v14313_v41 = vrot.slane %v5653_v12, %v15587_v24  ;;  %v14316_v5 = vrot.slane %v5661_v23, %v15587_v24  ;;  %v14319_v62 = vrot.slane %v5660_v57, %v15587_v24  ;;  %v14322_v17 = vrot.slane %v5662_v15, %v15587_v24 }
 0x9c7   :  { %v5734_v4 = vcombine.high %v14301_v33, %v14301_v33  ;;  %v5742_v46 = vcombine.high %v14304_v44, %v14304_v44  ;;  %v5750_v40 = vcombine.high %v14307_v2, %v14307_v2  ;;  %v5758_v54 = vcombine.high %v14310_v52, %v14310_v52 }
 0x9c8   :  { %v5766_v28 = vcombine.high %v14313_v41, %v14313_v41  ;;  %v5774_v37 = vcombine.high %v14316_v5, %v14316_v5  ;;  %v5823_v8 = vsel %vm2254_vm3, %v5669_v9, -inf  ;;  %v5830_v56 = vsel %vm2254_vm3, %v5670_v45, -inf }
 0x9c9   :  { %v5837_v7 = vsel %vm2254_vm3, %v5677_v31, -inf  ;;  %v5844_v27 = vsel %vm2254_vm3, %v5678_v53, -inf  ;;  %v5824_v61 = vrot.slane %v5823_v8, 4  ;;  %v5831_v50 = vrot.slane %v5830_v56, 4 }
 0x9ca   :  { %v5838_v49 = vrot.slane %v5837_v7, 4  ;;  %v5845_v26 = vrot.slane %v5844_v27, 4  ;;  %v5851_v13 = vsel %vm2254_vm3, %v5685_v0, -inf  ;;  %v5858_v14 = vsel %vm2254_vm3, %v5686_v21, -inf }
 0x9cb   :  { %v5865_v34 = vsel %vm2254_vm3, %v5693_v51, -inf  ;;  %v5872_v6 = vsel %vm2254_vm3, %v5694_v60, -inf  ;;  %v5825_v10 = vmax.f32 %v5823_v8, %v5824_v61  ;;  %v5832_v18 = vmax.f32 %v5830_v56, %v5831_v50 }
 0x9cc   :  { %v5839_v30 = vmax.f32 %v5837_v7, %v5838_v49  ;;  %v5846_v3 = vmax.f32 %v5844_v27, %v5845_v26  ;;  %v5852_v12 = vrot.slane %v5851_v13, 4  ;;  %v5859_v57 = vrot.slane %v5858_v14, 4 }
 0x9cd   :  { %v5866_v35 = vrot.slane %v5865_v34, 4  ;;  %v5873_v22 = vrot.slane %v5872_v6, 4  ;;  %v5826_v39 = vrot.slane %v5825_v10, 2  ;;  %v5833_v16 = vrot.slane %v5832_v18, 2 }
 0x9ce   :  { %v5840_v38 = vrot.slane %v5839_v30, 2  ;;  %v5847_v48 = vrot.slane %v5846_v3, 2  ;;  %v5853_v23 = vmax.f32 %v5851_v13, %v5852_v12  ;;  %v5860_v15 = vmax.f32 %v5858_v14, %v5859_v57 }
 0x9cf   :  { %v5867_v9 = vmax.f32 %v5865_v34, %v5866_v35  ;;  %v5874_v31 = vmax.f32 %v5872_v6, %v5873_v22  ;;  %v5827_v0 = vmax.f32 %v5825_v10, %v5826_v39  ;;  %v5834_v51 = vmax.f32 %v5832_v18, %v5833_v16 }
 0x9d0   :  { %v5841_v45 = vmax.f32 %v5839_v30, %v5840_v38  ;;  %v5848_v53 = vmax.f32 %v5846_v3, %v5847_v48  ;;  %v5854_v21 = vrot.slane %v5853_v23, 2  ;;  %v5861_v60 = vrot.slane %v5860_v15, 2 }
 0x9d1   :  { %v5868_v8 = vrot.slane %v5867_v9, 2  ;;  %v5875_v56 = vrot.slane %v5874_v31, 2  ;;  %v5828_v7 = vrot.slane %v5827_v0, 1  ;;  %v5835_v27 = vrot.slane %v5834_v51, 1 }
 0x9d2   :  { %v5842_v61 = vrot.slane %v5841_v45, 1  ;;  %v5849_v50 = vrot.slane %v5848_v53, 1  ;;  %v5855_v49 = vmax.f32 %v5853_v23, %v5854_v21  ;;  %v5862_v26 = vmax.f32 %v5860_v15, %v5861_v60 }
 0x9d3   :  { %v5869_v58 = vmax.f32 %v5867_v9, %v5868_v8  ;;  %v5876_v59 = vmax.f32 %v5874_v31, %v5875_v56  ;;  %v14348_v13 = vmax.f32 %v5827_v0, %v5828_v7  ;;  %v14350_v14 = vmax.f32 %v5834_v51, %v5835_v27 }
 0x9d4   :  { %v14352_v34 = vmax.f32 %v5841_v45, %v5842_v61  ;;  %v14354_v6 = vmax.f32 %v5848_v53, %v5849_v50  ;;  %v5856_v10 = vrot.slane %v5855_v49, 1  ;;  %v5863_v18 = vrot.slane %v5862_v26, 1 }
 0x9d5   :  { %v5870_v30 = vrot.slane %v5869_v58, 1  ;;  %v5877_v3 = vrot.slane %v5876_v59, 1  ;;  %v5879_v12 = vsel %vm2254_vm3, %v14281_v19, -inf  ;;  %v5886_v57 = vsel %vm2254_vm3, %v5702_v1, -inf }
 0x9d6   :  { %v5893_v35 = vsel %vm2254_vm3, %v14284_v32, -inf  ;;  %v5900_v22 = vsel %vm2254_vm3, %v5710_v11, -inf  ;;  %v14368_v39 = vmax.f32 %v5855_v49, %v5856_v10  ;;  %v14370_v16 = vmax.f32 %v5862_v26, %v5863_v18 }
 0x9d7   :  { %v14372_v38 = vmax.f32 %v5869_v58, %v5870_v30  ;;  %v14374_v48 = vmax.f32 %v5876_v59, %v5877_v3  ;;  %v5880_v23 = vrot.slane %v5879_v12, 4  ;;  %v5887_v19 = vrot.slane %v5886_v57, 4 }
 0x9d8   :  { %v5894_v15 = vrot.slane %v5893_v35, 4  ;;  %v5901_v1 = vrot.slane %v5900_v22, 4  ;;  %v5907_v9 = vsel %vm2254_vm3, %v14287_v29, -inf  ;;  %v5914_v32 = vsel %vm2254_vm3, %v5718_v25, -inf }
 0x9d9   :  { %v5921_v11 = vsel %vm2254_vm3, %v14290_v55, -inf  ;;  %v5928_v59 = vsel %vm2254_vm3, %v5726_v36, -inf  ;;  %v5881_v58 = vmax.f32 %v5879_v12, %v5880_v23  ;;  %v5888_v31 = vmax.f32 %v5886_v57, %v5887_v19 }
 0x9da   :  { %v5895_v0 = vmax.f32 %v5893_v35, %v5894_v15  ;;  %v5902_v51 = vmax.f32 %v5900_v22, %v5901_v1  ;;  %v5908_v45 = vrot.slane %v5907_v9, 4  ;;  %v5915_v53 = vrot.slane %v5914_v32, 4 }
 0x9db   :  { %v5922_v21 = vrot.slane %v5921_v11, 4  ;;  %v5929_v60 = vrot.slane %v5928_v59, 4  ;;  %v5882_v8 = vrot.slane %v5881_v58, 2  ;;  %v5889_v29 = vrot.slane %v5888_v31, 2 }
 0x9dc   :  { %v5896_v56 = vrot.slane %v5895_v0, 2  ;;  %v5903_v25 = vrot.slane %v5902_v51, 2  ;;  %v5909_v7 = vmax.f32 %v5907_v9, %v5908_v45  ;;  %v5916_v27 = vmax.f32 %v5914_v32, %v5915_v53 }
 0x9dd   :  { %v5923_v61 = vmax.f32 %v5921_v11, %v5922_v21  ;;  %v5930_v50 = vmax.f32 %v5928_v59, %v5929_v60  ;;  %v5883_v49 = vmax.f32 %v5881_v58, %v5882_v8  ;;  %v5890_v55 = vmax.f32 %v5888_v31, %v5889_v29 }
 0x9de   :  { %v5897_v26 = vmax.f32 %v5895_v0, %v5896_v56  ;;  %v5904_v36 = vmax.f32 %v5902_v51, %v5903_v25  ;;  %v5910_v10 = vrot.slane %v5909_v7, 2  ;;  %v5917_v18 = vrot.slane %v5916_v27, 2 }
 0x9df   :  { %v5924_v30 = vrot.slane %v5923_v61, 2  ;;  %v5931_v3 = vrot.slane %v5930_v50, 2  ;;  %v5884_v12 = vrot.slane %v5883_v49, 1  ;;  %v5891_v57 = vrot.slane %v5890_v55, 1 }
 0x9e0   :  { %v5898_v35 = vrot.slane %v5897_v26, 1  ;;  %v5905_v22 = vrot.slane %v5904_v36, 1  ;;  %v5911_v23 = vmax.f32 %v5909_v7, %v5910_v10  ;;  %v5918_v19 = vmax.f32 %v5916_v27, %v5917_v18 }
 0x9e1   :  { %v5925_v15 = vmax.f32 %v5923_v61, %v5924_v30  ;;  %v5932_v1 = vmax.f32 %v5930_v50, %v5931_v3  ;;  %v14388_v9 = vmax.f32 %v5883_v49, %v5884_v12  ;;  %v14390_v32 = vmax.f32 %v5890_v55, %v5891_v57 }
 0x9e2   :  { %v14392_v11 = vmax.f32 %v5897_v26, %v5898_v35  ;;  %v14394_v59 = vmax.f32 %v5904_v36, %v5905_v22  ;;  %v5912_v58 = vrot.slane %v5911_v23, 1  ;;  %v5919_v31 = vrot.slane %v5918_v19, 1 }
 0x9e3   :  { %v5926_v0 = vrot.slane %v5925_v15, 1  ;;  %v5933_v51 = vrot.slane %v5932_v1, 1  ;;  %v5935_v45 = vsel %vm2254_vm3, %v14301_v33, -inf  ;;  %v5942_v53 = vsel %vm2254_vm3, %v5734_v4, -inf }
 0x9e4   :  { %v5949_v21 = vsel %vm2254_vm3, %v14304_v44, -inf  ;;  %v5956_v60 = vsel %vm2254_vm3, %v5742_v46, -inf  ;;  %v14408_v8 = vmax.f32 %v5911_v23, %v5912_v58  ;;  %v14410_v29 = vmax.f32 %v5918_v19, %v5919_v31 }
 0x9e5   :  { %v5927_v56 = vmax.f32 %v5925_v15, %v5926_v0  ;;  %v5934_v25 = vmax.f32 %v5932_v1, %v5933_v51  ;;  %v5936_v7 = vrot.slane %v5935_v45, 4  ;;  %v5943_v27 = vrot.slane %v5942_v53, 4 }
 0x9e6   :  { %v5950_v61 = vrot.slane %v5949_v21, 4  ;;  %v5957_v33 = vrot.slane %v5956_v60, 4  ;;  %v5963_v4 = vsel %vm2254_vm3, %v14307_v2, -inf  ;;  %v5970_v44 = vsel %vm2254_vm3, %v5750_v40, -inf }
 0x9e7   :  { %v5977_v46 = vsel %vm2254_vm3, %v14310_v52, -inf  ;;  %v5984_v50 = vsel %vm2254_vm3, %v5758_v54, -inf  ;;  %6113 = vst [vmem:[#allocation3 + $0x10] sm:$0x1] %v5927_v56  ;;  %6114 = vst [vmem:[#allocation3 + $0x18] sm:$0x1] %v5934_v25  ;;  %v5937_v49 = vmax.f32 %v5935_v45, %v5936_v7  ;;  %v5944_v55 = vmax.f32 %v5942_v53, %v5943_v27 }
 0x9e8   :  { %v5951_v26 = vmax.f32 %v5949_v21, %v5950_v61  ;;  %v5958_v36 = vmax.f32 %v5956_v60, %v5957_v33  ;;  %v5964_v10 = vrot.slane %v5963_v4, 4  ;;  %v5971_v18 = vrot.slane %v5970_v44, 4 }
 0x9e9   :  { %v5978_v30 = vrot.slane %v5977_v46, 4  ;;  %v5985_v2 = vrot.slane %v5984_v50, 4  ;;  %v5938_v3 = vrot.slane %v5937_v49, 2  ;;  %v5945_v40 = vrot.slane %v5944_v55, 2 }
 0x9ea   :  { %v5952_v12 = vrot.slane %v5951_v26, 2  ;;  %v5959_v57 = vrot.slane %v5958_v36, 2  ;;  %v5965_v35 = vmax.f32 %v5963_v4, %v5964_v10  ;;  %v5972_v22 = vmax.f32 %v5970_v44, %v5971_v18 }
 0x9eb   :  { %v5979_v23 = vmax.f32 %v5977_v46, %v5978_v30  ;;  %v5986_v52 = vmax.f32 %v5984_v50, %v5985_v2  ;;  %v5939_v19 = vmax.f32 %v5937_v49, %v5938_v3  ;;  %v5946_v54 = vmax.f32 %v5944_v55, %v5945_v40 }
 0x9ec   :  { %v5953_v15 = vmax.f32 %v5951_v26, %v5952_v12  ;;  %v5960_v1 = vmax.f32 %v5958_v36, %v5959_v57  ;;  %v5966_v58 = vrot.slane %v5965_v35, 2  ;;  %v5973_v31 = vrot.slane %v5972_v22, 2 }
 0x9ed   :  { %v5980_v0 = vrot.slane %v5979_v23, 2  ;;  %v5987_v51 = vrot.slane %v5986_v52, 2  ;;  %v5940_v45 = vrot.slane %v5939_v19, 1  ;;  %v5947_v53 = vrot.slane %v5946_v54, 1 }
 0x9ee   :  { %v5954_v21 = vrot.slane %v5953_v15, 1  ;;  %v5961_v60 = vrot.slane %v5960_v1, 1  ;;  %v5967_v56 = vmax.f32 %v5965_v35, %v5966_v58  ;;  %v5974_v25 = vmax.f32 %v5972_v22, %v5973_v31 }
 0x9ef   :  { %v5981_v7 = vmax.f32 %v5979_v23, %v5980_v0  ;;  %v5988_v27 = vmax.f32 %v5986_v52, %v5987_v51  ;;  %v14424_v61 = vmax.f32 %v5939_v19, %v5940_v45  ;;  %v14426_v33 = vmax.f32 %v5946_v54, %v5947_v53 }
 0x9f0   :  { %v14428_v4 = vmax.f32 %v5953_v15, %v5954_v21  ;;  %v14430_v44 = vmax.f32 %v5960_v1, %v5961_v60  ;;  %v5968_v46 = vrot.slane %v5967_v56, 1  ;;  %v5975_v50 = vrot.slane %v5974_v25, 1 }
 0x9f1   :  { %v5982_v49 = vrot.slane %v5981_v7, 1  ;;  %v5989_v55 = vrot.slane %v5988_v27, 1  ;;  %v5991_v26 = vsel %vm2254_vm3, %v14313_v41, -inf  ;;  %v5998_v36 = vsel %vm2254_vm3, %v5766_v28, -inf }
 0x9f2   :  { %v6005_v10 = vsel %vm2254_vm3, %v14316_v5, -inf  ;;  %v6012_v18 = vsel %vm2254_vm3, %v5774_v37, -inf  ;;  %v14444_v30 = vmax.f32 %v5967_v56, %v5968_v46  ;;  %v14446_v2 = vmax.f32 %v5974_v25, %v5975_v50 }
 0x9f3   :  { %v14448_v3 = vmax.f32 %v5981_v7, %v5982_v49  ;;  %v14450_v40 = vmax.f32 %v5988_v27, %v5989_v55  ;;  %v5992_v12 = vrot.slane %v5991_v26, 4  ;;  %v5999_v41 = vrot.slane %v5998_v36, 4 }
 0x9f4   :  { %v6006_v57 = vrot.slane %v6005_v10, 4  ;;  %v6013_v28 = vrot.slane %v6012_v18, 4  ;;  %v6019_v35 = vsel %vm2254_vm3, %v14319_v62, -inf  ;;  %v15588_v5 = vcombine.high %v14319_v62, %v14319_v62 }
 0x9f5   :  { %v6033_v22 = vsel %vm2254_vm3, %v14322_v17, -inf  ;;  %v15589_v23 = vcombine.high %v14322_v17, %v14322_v17  ;;  %v5993_v19 = vmax.f32 %v5991_v26, %v5992_v12  ;;  %v6000_v54 = vmax.f32 %v5998_v36, %v5999_v41 }
 0x9f6   :  { %v6026_v37 = vsel %vm2254_vm3, %v15588_v5, -inf  ;;  %v6007_v15 = vmax.f32 %v6005_v10, %v6006_v57  ;;  %v6014_v1 = vmax.f32 %v6012_v18, %v6013_v28  ;;  %v6020_v58 = vrot.slane %v6019_v35, 4 }
 0x9f7   :  { %v6040_v52 = vsel %vm2254_vm3, %v15589_v23, -inf  ;;  %v6027_v31 = vrot.slane %v6026_v37, 4  ;;  %v6034_v0 = vrot.slane %v6033_v22, 4  ;;  %v5994_v45 = vrot.slane %v5993_v19, 2 }
 0x9f8   :  { %v6041_v51 = vrot.slane %v6040_v52, 4  ;;  %v6001_v62 = vrot.slane %v6000_v54, 2  ;;  %v6008_v53 = vrot.slane %v6007_v15, 2  ;;  %v6015_v21 = vrot.slane %v6014_v1, 2 }
 0x9f9   :  { %v6021_v60 = vmax.f32 %v6019_v35, %v6020_v58  ;;  %v6028_v56 = vmax.f32 %v6026_v37, %v6027_v31  ;;  %v6035_v25 = vmax.f32 %v6033_v22, %v6034_v0  ;;  %v5995_v27 = vmax.f32 %v5993_v19, %v5994_v45 }
 0x9fa   :  { %v6042_v7 = vmax.f32 %v6040_v52, %v6041_v51  ;;  %v6002_v17 = vmax.f32 %v6000_v54, %v6001_v62  ;;  %v6009_v46 = vmax.f32 %v6007_v15, %v6008_v53  ;;  %v6016_v50 = vmax.f32 %v6014_v1, %v6015_v21 }
 0x9fb   :  { %v6022_v49 = vrot.slane %v6021_v60, 2  ;;  %v6029_v55 = vrot.slane %v6028_v56, 2  ;;  %v6036_v26 = vrot.slane %v6035_v25, 2  ;;  %v5996_v10 = vrot.slane %v5995_v27, 1 }
 0x9fc   :  { %v6043_v36 = vrot.slane %v6042_v7, 2  ;;  %v6003_v18 = vrot.slane %v6002_v17, 1  ;;  %v6010_v12 = vrot.slane %v6009_v46, 1  ;;  %v6017_v41 = vrot.slane %v6016_v50, 1 }
 0x9fd   :  { %v6023_v57 = vmax.f32 %v6021_v60, %v6022_v49  ;;  %v6030_v28 = vmax.f32 %v6028_v56, %v6029_v55  ;;  %v6037_v5 = vmax.f32 %v6035_v25, %v6036_v26  ;;  %v5997_v35 = vmax.f32 %v5995_v27, %v5996_v10 }
 0x9fe   :  { %v6044_v23 = vmax.f32 %v6042_v7, %v6043_v36  ;;  %v6004_v37 = vmax.f32 %v6002_v17, %v6003_v18  ;;  %v6011_v22 = vmax.f32 %v6009_v46, %v6010_v12  ;;  %v6018_v52 = vmax.f32 %v6016_v50, %v6017_v41 }
 0x9ff   :  { %v6024_v19 = vrot.slane %v6023_v57, 1  ;;  %v6031_v54 = vrot.slane %v6030_v28, 1  ;;  %v6038_v15 = vrot.slane %v6037_v5, 1  ;;  %v6079_v58 = vsel %vm2767_vm4, %v14352_v34, %v14348_v13 }
 0xa00   :  { %v6045_v1 = vrot.slane %v6044_v23, 1  ;;  %v6085_v31 = vsel %vm2767_vm4, %v14354_v6, %v14350_v14  ;;  %v6091_v0 = vsel %vm2767_vm4, %v14428_v4, %v14424_v61  ;;  %v6097_v51 = vsel %vm2767_vm4, %v14430_v44, %v14426_v33 }
 0xa01   :  { %v6025_v45 = vmax.f32 %v6023_v57, %v6024_v19  ;;  %v6032_v62 = vmax.f32 %v6030_v28, %v6031_v54  ;;  %v6039_v53 = vmax.f32 %v6037_v5, %v6038_v15  ;;  %v6080_v60 = vsel %vm2769_vm5, %v14368_v39, %v6079_v58  ;;  %v10601_v54 = vld [vmem:[%s15308_s9 + $0x10] ss:$8 sps:$4 sm:$0xff]   ;;  %v10606_v15 = vld [vmem:[%s15308_s9 + $0x24] ss:$8 sps:$4 sm:$0xff]  }
 0xa02   :  { %v6046_v21 = vmax.f32 %v6044_v23, %v6045_v1  ;;  %v6086_v13 = vsel %vm2769_vm5, %v14370_v16, %v6085_v31  ;;  %v6092_v14 = vsel %vm2769_vm5, %v14444_v30, %v6091_v0  ;;  %v6098_v34 = vsel %vm2769_vm5, %v14446_v2, %v6097_v51  ;;  %v7004_v1 = vld [vmem:[%s15310_s11 + $0x80] sm:$0xff]  ;;  %v7005_v58 = vld [vmem:[%s15310_s11 + $0x88] sm:$0xff] }
 0xa03   :  { %v6081_v6 = vsel %vm2771_vm6, %v14372_v38, %v6080_v60  ;;  %v6087_v61 = vsel %vm2771_vm6, %v14374_v48, %v6086_v13  ;;  %v6093_v33 = vsel %vm2771_vm6, %v14448_v3, %v6092_v14  ;;  %v6099_v39 = vsel %vm2771_vm6, %v14450_v40, %v6098_v34  ;;  %6117 = vst [vmem:[#allocation3 + $0x30] sm:$0x1] %v6039_v53  ;;  %v6988_v31 = vld [vmem:[%s15310_s11] sm:$0xff]  ;;  %v6989_v51 = vld [vmem:[%s15310_s11 + $0x8] sm:$0xff]  ;;  %v6990_v60 = vld [vmem:[%s15310_s11 + $0x10] sm:$0xff] }
 0xa04   :  { %6118 = vst [vmem:[#allocation3 + $0x38] sm:$0x1] %v6046_v21  ;;  %v6082_v16 = vsel %vm2773_vm7, %v14388_v9, %v6081_v6  ;;  %v6088_v4 = vsel %vm2773_vm7, %v14390_v32, %v6087_v61  ;;  %v6094_v44 = vsel %vm2773_vm7, %v5997_v35, %v6093_v33  ;;  %v6100_v38 = vsel %vm2773_vm7, %v6004_v37, %v6099_v39  ;;  %v10598_v35 = vld [vmem:[%s15308_s9] ss:$8 sps:$4 sm:$0xff]   ;;  %v6991_v13 = vld [vmem:[%s15310_s11 + $0x18] sm:$0xff] }
 0xa05   :  { %v6083_v48 = vsel %vm2775_vm8, %v14392_v11, %v6082_v16  ;;  %v6089_v30 = vsel %vm2775_vm8, %v14394_v59, %v6088_v4  ;;  %v6095_v2 = vsel %vm2775_vm8, %v6011_v22, %v6094_v44  ;;  %v6101_v3 = vsel %vm2775_vm8, %v6018_v52, %v6100_v38  ;;  %v6160_v11 = vld [vmem:[#allocation3 + $0x18] sm:$0x1]  ;;  %v6159_v59 = vld [vmem:[#allocation3 + $0x10] sm:$0x1]  ;;  %v10603_v52 = vld [vmem:[%s15308_s9 + $0x14] ss:$8 sps:$4 sm:$0xff]  }
 0xa06   :  { %v6084_v9 = vsel %vm2777_vm9, %v14408_v8, %v6083_v48  ;;  %v6090_v32 = vsel %vm2777_vm9, %v14410_v29, %v6089_v30  ;;  %v6096_v40 = vsel %vm2777_vm9, %v6025_v45, %v6095_v2  ;;  %v6102_v56 = vsel %vm2777_vm9, %v6032_v62, %v6101_v3  ;;  %v7006_v45 = vld [vmem:[%s15310_s11 + $0x90] sm:$0xff]  ;;  %v7007_v62 = vld [vmem:[%s15310_s11 + $0x98] sm:$0xff]  ;;  %v7008_v14 = vld [vmem:[%s15310_s11 + $0xa0] sm:$0xff] }
 0xa07   :  { %6111 = vst [vmem:[#allocation3] sm:$0xfe] %v6084_v9  ;;  %6112 = vst [vmem:[#allocation3 + $0x8] sm:$0xfe] %v6090_v32  ;;  %v6177_v7 = vrot.slane %v6160_v11, 1  ;;  %v6174_v17 = vrot.slane %v6159_v59, 1  ;;  %v10077_v0 = vpack.c.bf16 %v7005_v58, %v7004_v1  ;;  %v10079_v53 = vpack.c.bf16 %v6989_v51, %v6988_v31 }
 0xa08   :  { %6115 = vst [vmem:[#allocation3 + $0x20] sm:$0xfe] %v6096_v40  ;;  %6116 = vst [vmem:[#allocation3 + $0x28] sm:$0xfe] %v6102_v56  ;;  %v10081_v21 = vpack.c.bf16 %v7007_v62, %v7006_v45  ;;  %v7009_v34 = vld [vmem:[%s15310_s11 + $0xa8] sm:$0xff]  ;;  %v10083_v6 = vpack.c.bf16 %v6991_v13, %v6990_v60  ;;  %v6992_v39 = vld [vmem:[%s15310_s11 + $0x20] sm:$0xff] }
 0xa09   :  { %10078 = vmatprep.subr.bf16.mxu1 %v10077_v0  ;;  %v10604_v61 = vld [vmem:[%s15308_s9 + $0x20] ss:$8 sps:$4 sm:$0xff]   ;;  %v10085_v33 = vpack.c.bf16 %v7009_v34, %v7008_v14  ;;  %v10609_v4 = vld [vmem:[%s15308_s9 + $0x34] ss:$8 sps:$4 sm:$0xff]   ;;  %v10607_v30 = vld [vmem:[%s15308_s9 + $0x30] ss:$8 sps:$4 sm:$0xff]  }
 0xa0a   :  { %v6163_v27 = vld [vmem:[#allocation3 + $0x30] sm:$0x1]  ;;  %10080 = vmatpush3.bf16.msra.mxu1 %v10079_v53  ;;  %v6993_v16 = vld [vmem:[%s15310_s11 + $0x28] sm:$0xff]  ;;  %v7011_v38 = vld [vmem:[%s15310_s11 + $0xb8] sm:$0xff] }
 0xa0b   :  { %v6164_v25 = vld [vmem:[#allocation3 + $0x38] sm:$0x1]  ;;  %v6180_v18 = vrot.slane %v6163_v27, 1  ;;  %10082 = vmatprep.subr.bf16.mxu1 %v10081_v21  ;;  %v7010_v44 = vld [vmem:[%s15310_s11 + $0xb0] sm:$0xff]  ;;  %v10087_v48 = vpack.c.bf16 %v6993_v16, %v6992_v39  ;;  %v10612_v3 = vld [vmem:[%s15308_s9 + $0x44] ss:$8 sps:$4 sm:$0xff]  }
 0xa0c   :  { %v6183_v29 = vrot.slane %v6164_v25, 1  ;;  %v10089_v2 = vpack.c.bf16 %v7011_v38, %v7010_v44  ;;  %v10610_v9 = vld [vmem:[%s15308_s9 + $0x40] ss:$8 sps:$4 sm:$0xff]   ;;  %v10615_v32 = vld [vmem:[%s15308_s9 + $0x54] ss:$8 sps:$4 sm:$0xff]  }
 0xa0d   :  { %v10613_v40 = vld [vmem:[%s15308_s9 + $0x50] ss:$8 sps:$4 sm:$0xff]   ;;  %v10618_v56 = vld [vmem:[%s15308_s9 + $0x64] ss:$8 sps:$4 sm:$0xff]   ;;  %v10616_v11 = vld [vmem:[%s15308_s9 + $0x60] ss:$8 sps:$4 sm:$0xff]  }
 0xa0e   :  { %v6158_v46 = vld [vmem:[#allocation3 + $0x8] sm:$0xfe]  ;;  %v6157_v8 = vld [vmem:[#allocation3] sm:$0xfe]  ;;  %10084 = vmatpush3.bf16.msra.mxu1 %v10083_v6  ;;  %v10621_v59 = vld [vmem:[%s15308_s9 + $0x74] ss:$8 sps:$4 sm:$0xff]  }
 0xa0f   :  { %v6162_v50 = vld [vmem:[#allocation3 + $0x28] sm:$0xfe]  ;;  %v6176_v49 = vrot.slane %v6158_v46, 1  ;;  %v6161_v26 = vld [vmem:[#allocation3 + $0x20] sm:$0xfe]  ;;  %v6173_v36 = vrot.slane %v6157_v8, 1  ;;  %10086 = vmatprep.subr.bf16.mxu1 %v10085_v33 }
 0xa10   :  { %v6182_v55 = vrot.slane %v6162_v50, 1  ;;  %v6179_v10 = vrot.slane %v6161_v26, 1  ;;  %v6120_v28 = vld [vmem:[#allocation3 + $0x8] sm:$0xff]  ;;  %v10619_v25 = vld [vmem:[%s15308_s9 + $0x70] ss:$8 sps:$4 sm:$0xff]   ;;  %v6121_v1 = vld [vmem:[#allocation3 + $0x20] sm:$0xff] }
 0xa11   :  { %v6178_v12 = vsel %vm2945_vm11, %v6176_v49, %v6177_v7  ;;  %v6175_v57 = vsel %vm2945_vm11, %v6173_v36, %v6174_v17  ;;  %v6122_v5 = vld [vmem:[#allocation3 + $0x28] sm:$0xff]  ;;  %v10627_v17 = vld [vmem:[%s15308_s9 + $0x94] ss:$8 sps:$4 sm:$0xff]   ;;  %v10625_v46 = vld [vmem:[%s15308_s9 + $0x90] ss:$8 sps:$4 sm:$0xff]  }
 0xa12   :  { %v6184_v41 = vsel %vm2945_vm11, %v6182_v55, %v6183_v29  ;;  %v6181_v37 = vsel %vm2945_vm11, %v6179_v10, %v6180_v18  ;;  %v6124_v19 = vpack.c.bf16 %v6122_v5, %v6120_v28  ;;  %10088 = vmatpush3.bf16.msra.mxu1 %v10087_v48  ;;  %v10624_v7 = vld [vmem:[%s15308_s9 + $0x84] ss:$8 sps:$4 sm:$0xff]   ;;  %v10622_v27 = vld [vmem:[%s15308_s9 + $0x80] ss:$8 sps:$4 sm:$0xff]   ;;  %v10633_v49 = vld [vmem:[%s15308_s9 + $0xb4] ss:$8 sps:$4 sm:$0xff]  }
 0xa13   :  { %v6190_v23 = vpack.c.bf16 %v6184_v41, %v6178_v12  ;;  %v6189_v22 = vpack.c.bf16 %v6181_v37, %v6175_v57  ;;  %10090 = vmatprep.subr.bf16.mxu1 %v10089_v2  ;;  %v10630_v50 = vld [vmem:[%s15308_s9 + $0xa4] ss:$8 sps:$4 sm:$0xff]   ;;  %v10628_v8 = vld [vmem:[%s15308_s9 + $0xa0] ss:$8 sps:$4 sm:$0xff]   ;;  %v10631_v55 = vld [vmem:[%s15308_s9 + $0xb0] ss:$8 sps:$4 sm:$0xff]  }
 0xa14   :  { %v10636_v29 = vld [vmem:[%s15308_s9 + $0xc4] ss:$8 sps:$4 sm:$0xff]   ;;  %v10634_v26 = vld [vmem:[%s15308_s9 + $0xc0] ss:$8 sps:$4 sm:$0xff]   ;;  %v10639_v36 = vld [vmem:[%s15308_s9 + $0xd4] ss:$8 sps:$4 sm:$0xff]  }
 0xa15   :  { %6416 = vmatprep.mubr.bf16.mxu0 %v6190_v23  ;;  %v10637_v10 = vld [vmem:[%s15308_s9 + $0xd0] ss:$8 sps:$4 sm:$0xff]   ;;  %v10642_v18 = vld [vmem:[%s15308_s9 + $0xe4] ss:$8 sps:$4 sm:$0xff]   ;;  %v10640_v12 = vld [vmem:[%s15308_s9 + $0xe0] ss:$8 sps:$4 sm:$0xff]  }
 0xa16   :  { %6417 = vmatmul.mubr.bf16.vlgmr.msra.gmra.mrb[44].mxu0 %v6189_v22  ;;  %v6631_v41 = vld [vmem:[#allocation3 + $0x8] sm:$0xfc]  ;;  %v10645_v28 = vld [vmem:[%s15308_s9 + $0xf4] ss:$8 sps:$4 sm:$0xff]   ;;  %v6633_v5 = vld [vmem:[#allocation3 + $0x18] sm:$0x3] }
 0xa17   :  { %6588 = vmatpush1.bf16.msra.mxu0 %v10598_v35  ;;  %6619 = vmatprep.mubr.bf16.mxu0 %v6124_v19  ;;  %v6635_v57 = vld [vmem:[#allocation3 + $0x28] sm:$0xfc]  ;;  %v6637_v23 = vld [vmem:[#allocation3 + $0x38] sm:$0x3]  ;;  %v6649_v35 = vrot.slane %v6631_v41, 2  ;;  %v6650_v19 = vrot.slane %v6633_v5, 2 }
 0xa18   :  { %6589 = vmatprep.subr.bf16.mxu0 %v10603_v52  ;;  %v6655_v37 = vrot.slane %v6635_v57, 2  ;;  %v10643_v22 = vld [vmem:[%s15308_s9 + $0xf0] ss:$8 sps:$4 sm:$0xff]   ;;  %v10648_v52 = vld [vmem:[%s15308_s9 + $0x204] ss:$8 sps:$4 sm:$0xff]  }
 0xa19   :  { %v6651_v58 = vsel %vm3911_vm12, %v6649_v35, %v6650_v19  ;;  %v10646_v0 = vld [vmem:[%s15308_s9 + $0x200] ss:$8 sps:$4 sm:$0xff]   ;;  %v10651_v45 = vld [vmem:[%s15308_s9 + $0x214] ss:$8 sps:$4 sm:$0xff]   ;;  %v10649_v53 = vld [vmem:[%s15308_s9 + $0x210] ss:$8 sps:$4 sm:$0xff]  }
 0xa1a   :  { %v10654_v21 = vld [vmem:[%s15308_s9 + $0x224] ss:$8 sps:$4 sm:$0xff]   ;;  %v10652_v60 = vld [vmem:[%s15308_s9 + $0x220] ss:$8 sps:$4 sm:$0xff]   ;;  %v10657_v13 = vld [vmem:[%s15308_s9 + $0x234] ss:$8 sps:$4 sm:$0xff]  }
 0xa1b   :  { %6590 = vmatpush1.bf16.msra.mxu0 %v10601_v54  ;;  %v6656_v54 = vrot.slane %v6637_v23, 2  ;;  %v10655_v14 = vld [vmem:[%s15308_s9 + $0x230] ss:$8 sps:$4 sm:$0xff]   ;;  %v10660_v34 = vld [vmem:[%s15308_s9 + $0x244] ss:$8 sps:$4 sm:$0xff]  }
 0xa1c   :  { %6591 = vmatprep.subr.bf16.mxu0 %v10606_v15  ;;  %v6119_v15 = vld [vmem:[#allocation3] sm:$0xff]  ;;  %v10661_v33 = vld [vmem:[%s15308_s9 + $0x250] ss:$8 sps:$4 sm:$0xff]   ;;  %v7013_v35 = vld [vmem:[%s15310_s11 + $0xc8] sm:$0xff] }
 0xa1d   :  { %v6657_v31 = vsel %vm3911_vm12, %v6655_v37, %v6656_v54  ;;  %v6123_v51 = vpack.c.bf16 %v6121_v1, %v6119_v15  ;;  %v10658_v6 = vld [vmem:[%s15308_s9 + $0x240] ss:$8 sps:$4 sm:$0xff]   ;;  %v10666_v39 = vld [vmem:[%s15308_s9 + $0x264] ss:$8 sps:$4 sm:$0xff]   ;;  %v10667_v44 = vld [vmem:[%s15308_s9 + $0x270] ss:$8 sps:$4 sm:$0xff]  }
 0xa1e   :  { %v6663_v62 = vpack.c.bf16 %v6657_v31, %v6651_v58  ;;  %v10664_v16 = vld [vmem:[%s15308_s9 + $0x260] ss:$8 sps:$4 sm:$0xff]   ;;  %v10672_v38 = vld [vmem:[%s15308_s9 + $0x284] ss:$8 sps:$4 sm:$0xff]   ;;  %v10673_v2 = vld [vmem:[%s15308_s9 + $0x290] ss:$8 sps:$4 sm:$0xff]  }
 0xa1f   :  { %6592 = vmatpush1.bf16.msra.mxu0 %v10604_v61  ;;  %v10663_v61 = vld [vmem:[%s15308_s9 + $0x254] ss:$8 sps:$4 sm:$0xff]   ;;  %v10670_v48 = vld [vmem:[%s15308_s9 + $0x280] ss:$8 sps:$4 sm:$0xff]  }
 0xa20   :  { %6593 = vmatprep.subr.bf16.mxu0 %v10609_v4  ;;  %v10669_v4 = vld [vmem:[%s15308_s9 + $0x274] ss:$8 sps:$4 sm:$0xff]   ;;  %v7012_v23 = vld [vmem:[%s15310_s11 + $0xc0] sm:$0xff] }
 0xa21   :  { %v6994_v57 = vld [vmem:[%s15310_s11 + $0x30] sm:$0xff]  ;;  %v10093_v37 = vpack.c.bf16 %v7013_v35, %v7012_v23  ;;  %v7015_v15 = vld [vmem:[%s15310_s11 + $0xd8] sm:$0xff] }
 0xa22   :  { %v7014_v54 = vld [vmem:[%s15310_s11 + $0xd0] sm:$0xff]  ;;  %v6999_v31 = vld [vmem:[%s15310_s11 + $0x58] sm:$0xff] }
 0xa23   :  { %6594 = vmatpush1.bf16.msra.mxu0 %v10607_v30  ;;  %v10675_v30 = vld [vmem:[%s15308_s9 + $0x294] ss:$8 sps:$4 sm:$0xff]   ;;  %v10097_v58 = vpack.c.bf16 %v7015_v15, %v7014_v54 }
 0xa24   :  { %6595 = vmatprep.subr.bf16.mxu0 %v10612_v3  ;;  %v10678_v3 = vld [vmem:[%s15308_s9 + $0x2a4] ss:$8 sps:$4 sm:$0xff]   ;;  %v6998_v1 = vld [vmem:[%s15310_s11 + $0x50] sm:$0xff] }
 0xa27   :  { %6596 = vmatpush1.bf16.msra.mxu0 %v10610_v9  ;;  %v10676_v9 = vld [vmem:[%s15308_s9 + $0x2a0] ss:$8 sps:$4 sm:$0xff]  }
 0xa28   :  { %6597 = vmatprep.subr.bf16.mxu0 %v10615_v32  ;;  %v10681_v32 = vld [vmem:[%s15308_s9 + $0x2b4] ss:$8 sps:$4 sm:$0xff]  }
 0xa2b   :  { %6598 = vmatpush1.bf16.msra.mxu0 %v10613_v40  ;;  %v10679_v40 = vld [vmem:[%s15308_s9 + $0x2b0] ss:$8 sps:$4 sm:$0xff]  }
 0xa2c   :  { %6599 = vmatprep.subr.bf16.mxu0 %v10618_v56  ;;  %v10684_v56 = vld [vmem:[%s15308_s9 + $0x2c4] ss:$8 sps:$4 sm:$0xff]  }
 0xa2f   :  { %6600 = vmatpush1.bf16.msra.mxu0 %v10616_v11  ;;  %v10682_v11 = vld [vmem:[%s15308_s9 + $0x2c0] ss:$8 sps:$4 sm:$0xff]  }
 0xa30   :  { %6601 = vmatprep.subr.bf16.mxu0 %v10621_v59  ;;  %v10687_v59 = vld [vmem:[%s15308_s9 + $0x2d4] ss:$8 sps:$4 sm:$0xff]  }
 0xa33   :  { %6602 = vmatpush1.bf16.msra.mxu0 %v10619_v25  ;;  %v10685_v25 = vld [vmem:[%s15308_s9 + $0x2d0] ss:$8 sps:$4 sm:$0xff]  }
 0xa34   :  { %6603 = vmatprep.subr.bf16.mxu0 %v10624_v7  ;;  %v10690_v7 = vld [vmem:[%s15308_s9 + $0x2e4] ss:$8 sps:$4 sm:$0xff]  }
 0xa37   :  { %6604 = vmatpush1.bf16.msra.mxu0 %v10622_v27  ;;  %v6630_v27 = vld [vmem:[#allocation3] sm:$0xfc] }
 0xa38   :  { %6605 = vmatprep.subr.bf16.mxu0 %v10627_v17  ;;  %v6634_v17 = vld [vmem:[#allocation3 + $0x20] sm:$0xfc] }
 0xa3b   :  { %6606 = vmatpush1.bf16.msra.mxu0 %v10625_v46  ;;  %v10688_v46 = vld [vmem:[%s15308_s9 + $0x2e0] ss:$8 sps:$4 sm:$0xff]  }
 0xa3c   :  { %6607 = vmatprep.subr.bf16.mxu0 %v10630_v50  ;;  %v10693_v50 = vld [vmem:[%s15308_s9 + $0x2f4] ss:$8 sps:$4 sm:$0xff]  }
 0xa3f   :  { %6608 = vmatpush1.bf16.msra.mxu0 %v10628_v8  ;;  %v6632_v8 = vld [vmem:[#allocation3 + $0x10] sm:$0x3] }
 0xa40   :  { %6609 = vmatprep.subr.bf16.mxu0 %v10633_v49  ;;  %v6636_v49 = vld [vmem:[#allocation3 + $0x30] sm:$0x3] }
 0xa43   :  { %6610 = vmatpush1.bf16.msra.mxu0 %v10631_v55  ;;  %v6646_v55 = vrot.slane %v6630_v27, 2 }
 0xa44   :  { %6611 = vmatprep.subr.bf16.mxu0 %v10636_v29  ;;  %v6652_v29 = vrot.slane %v6634_v17, 2 }
 0xa47   :  { %6612 = vmatpush1.bf16.msra.mxu0 %v10634_v26  ;;  %v10691_v26 = vld [vmem:[%s15308_s9 + $0x2f0] ss:$8 sps:$4 sm:$0xff]  }
 0xa48   :  { %6613 = vmatprep.subr.bf16.mxu0 %v10639_v36  ;;  %v6647_v36 = vrot.slane %v6632_v8, 2 }
 0xa4b   :  { %6614 = vmatpush1.bf16.msra.mxu0 %v10637_v10  ;;  %v6653_v10 = vrot.slane %v6636_v49, 2 }
 0xa4c   :  { %6615 = vmatprep.subr.bf16.mxu0 %v10642_v18  ;;  %v6648_v18 = vsel %vm3911_vm12, %v6646_v55, %v6647_v36 }
 0xa4f   :  { %6616 = vmatpush1.bf16.msra.mxu0 %v10640_v12  ;;  %v6654_v12 = vsel %vm3911_vm12, %v6652_v29, %v6653_v10 }
 0xa50   :  { %6617 = vmatprep.subr.bf16.mxu0 %v10645_v28  ;;  %v6662_v41 = vpack.c.bf16 %v6654_v12, %v6648_v18  ;;  %v6995_v28 = vld [vmem:[%s15310_s11 + $0x38] sm:$0xff] }
 0xa51   :  { %v10091_v5 = vpack.c.bf16 %v6995_v28, %v6994_v57 }
 0xa53   :  { %6618 = vmatpush1.bf16.msra.mxu0 %v10643_v22  ;;  %10092 = vmatpush3.bf16.msra.mxu1 %v10091_v5  ;;  %v6996_v22 = vld [vmem:[%s15310_s11 + $0x40] sm:$0xff] }
 0xa54   :  { %6857 = vmatprep.subr.bf16.mxu0 %v10648_v52  ;;  %v6997_v52 = vld [vmem:[%s15310_s11 + $0x48] sm:$0xff]  ;;  %10094 = vmatprep.subr.bf16.mxu1 %v10093_v37 }
 0xa55   :  { %v10095_v19 = vpack.c.bf16 %v6997_v52, %v6996_v22 }
 0xa56   :  { %6620 = vmatmul.mubr.bf16.vlgmr.msra.gmra.mrb[44].mxu0 %v6123_v51  ;;  %v7017_v51 = vld [vmem:[%s15310_s11 + $0xe8] sm:$0xff] }
 0xa57   :  { %6858 = vmatpush1.bf16.msra.mxu0 %v10646_v0  ;;  %6889 = vmatprep.mubr.bf16.mxu0 %v6663_v62  ;;  %v7016_v0 = vld [vmem:[%s15310_s11 + $0xe0] sm:$0xff] }
 0xa58   :  { %6859 = vmatprep.subr.bf16.mxu0 %v10651_v45  ;;  %10096 = vmatpush3.bf16.msra.mxu1 %v10095_v19  ;;  %v10099_v45 = vpack.c.bf16 %v6999_v31, %v6998_v1  ;;  %v10101_v62 = vpack.c.bf16 %v7017_v51, %v7016_v0  ;;  %v7021_v31 = vld [vmem:[%s15310_s11 + $0x108] sm:$0xff] }
 0xa59   :  { %10098 = vmatprep.subr.bf16.mxu1 %v10097_v58  ;;  %v7020_v58 = vld [vmem:[%s15310_s11 + $0x100] sm:$0xff] }
 0xa5b   :  { %6860 = vmatpush1.bf16.msra.mxu0 %v10649_v53  ;;  %v7000_v53 = vld [vmem:[%s15310_s11 + $0x60] sm:$0xff] }
 0xa5c   :  { %6861 = vmatprep.subr.bf16.mxu0 %v10654_v21  ;;  %v7001_v21 = vld [vmem:[%s15310_s11 + $0x68] sm:$0xff]  ;;  %10100 = vmatpush3.bf16.msra.mxu1 %v10099_v45 }
 0xa5d   :  { %10102 = vmatprep.subr.bf16.mxu1 %v10101_v62  ;;  %v7038_v62 = vld [vmem:[%s15310_s11 + $0x190] sm:$0xff] }
 0xa5f   :  { %6862 = vmatpush1.bf16.msra.mxu0 %v10652_v60  ;;  %v7018_v60 = vld [vmem:[%s15310_s11 + $0xf0] sm:$0xff] }
 0xa60   :  { %6863 = vmatprep.subr.bf16.mxu0 %v10657_v13  ;;  %v7019_v13 = vld [vmem:[%s15310_s11 + $0xf8] sm:$0xff] }
 0xa63   :  { %6864 = vmatpush1.bf16.msra.mxu0 %v10655_v14  ;;  %v10103_v14 = vpack.c.bf16 %v7001_v21, %v7000_v53  ;;  %v7039_v53 = vld [vmem:[%s15310_s11 + $0x198] sm:$0xff] }
 0xa64   :  { %6865 = vmatprep.subr.bf16.mxu0 %v10660_v34  ;;  %v10105_v34 = vpack.c.bf16 %v7019_v13, %v7018_v60 }
 0xa65   :  { %10104 = vmatpush3.bf16.msra.mxu1 %v10103_v14 }
 0xa66   :  { %10106 = vmatprep.subr.bf16.mxu1 %v10105_v34  ;;  %v10111_v34 = vpack.c.bf16 %v7021_v31, %v7020_v58 }
 0xa67   :  { %6866 = vmatpush1.bf16.msra.mxu0 %v10658_v6  ;;  %v7002_v6 = vld [vmem:[%s15310_s11 + $0x70] sm:$0xff] }
 0xa68   :  { %6867 = vmatprep.subr.bf16.mxu0 %v10663_v61  ;;  %v7003_v61 = vld [vmem:[%s15310_s11 + $0x78] sm:$0xff] }
 0xa6b   :  { %6868 = vmatpush1.bf16.msra.mxu0 %v10661_v33  ;;  %v10107_v33 = vpack.c.bf16 %v7003_v61, %v7002_v6 }
 0xa6c   :  { %6869 = vmatprep.subr.bf16.mxu0 %v10666_v39  ;;  %v7036_v39 = vld [vmem:[%s15310_s11 + $0x180] sm:$0xff] }
 0xa6d   :  { %10108 = vmatpush3.bf16.msra.mxu1 %v10107_v33 }
 0xa6f   :  { %6870 = vmatpush1.bf16.msra.mxu0 %v10664_v16  ;;  %v7037_v16 = vld [vmem:[%s15310_s11 + $0x188] sm:$0xff] }
 0xa70   :  { %6871 = vmatprep.subr.bf16.mxu0 %v10669_v4  ;;  %v10109_v4 = vpack.c.bf16 %v7037_v16, %v7036_v39  ;;  %v10113_v39 = vpack.c.bf16 %v7039_v53, %v7038_v62  ;;  %v7022_v16 = vld [vmem:[%s15310_s11 + $0x110] sm:$0xff]  ;;  %v7051_v62 = vld [vmem:[%s15310_s11 + $0x1f8] sm:$0xff] }
 0xa72   :  { %10110 = vmatprep.subr.bf16.mxu1 %v10109_v4  ;;  %v7023_v4 = vld [vmem:[%s15310_s11 + $0x118] sm:$0xff] }
 0xa73   :  { %6872 = vmatpush1.bf16.msra.mxu0 %v10667_v44  ;;  %v6904_v44 = vld [vmem:[%s15309_s10] sm:$0x3] }
 0xa74   :  { %6873 = vmatprep.subr.bf16.mxu0 %v10672_v38  ;;  %v6909_v38 = vrot.slane %v6904_v44, %v15573_v20 }
 0xa77   :  { %6874 = vmatpush1.bf16.msra.mxu0 %v10670_v48  ;;  %v6913_v48 = vrot.slane %v6904_v44, %v15574_v42 }
 0xa78   :  { %6875 = vmatprep.subr.bf16.mxu0 %v10675_v30 }
 0xa7b   :  { %6876 = vmatpush1.bf16.msra.mxu0 %v10673_v2 }
 0xa7c   :  { %6877 = vmatprep.subr.bf16.mxu0 %v10678_v3 }
 0xa7f   :  { %6878 = vmatpush1.bf16.msra.mxu0 %v10676_v9 }
 0xa80   :  { %6879 = vmatprep.subr.bf16.mxu0 %v10681_v32 }
 0xa83   :  { %6880 = vmatpush1.bf16.msra.mxu0 %v10679_v40 }
 0xa84   :  { %6881 = vmatprep.subr.bf16.mxu0 %v10684_v56 }
 0xa87   :  { %6882 = vmatpush1.bf16.msra.mxu0 %v10682_v11 }
 0xa88   :  { %6883 = vmatprep.subr.bf16.mxu0 %v10687_v59 }
 0xa8b   :  { %6884 = vmatpush1.bf16.msra.mxu0 %v10685_v25 }
 0xa8c   :  { %6885 = vmatprep.subr.bf16.mxu0 %v10690_v7 }
 0xa8f   :  { %6886 = vmatpush1.bf16.msra.mxu0 %v10688_v46 }
 0xa90   :  { %6887 = vmatprep.subr.bf16.mxu0 %v10693_v50 }
 0xa93   :  { %6888 = vmatpush1.bf16.msra.mxu0 %v10691_v26 }
 0xa96   :  { %6890 = vmatmul.mubr.bf16.vlgmr.msra.gmra.mrb[44].mxu0 %v6662_v41 }
 0xb69   :  { %v6891_v30 = vpop.f32.mrb[44].mxu0 }
 0xb6a   :  { %v14814_v2 = vadd.f32 %v6909_v38, %v6891_v30  ;;  %v6893_v3 = vpop.f32.mrb[45].mxu0 }
 0xb6b   :  { %v14816_v9 = vadd.f32 %v6913_v48, %v6893_v3  ;;  %v6895_v32 = vpop.f32.mrb[46].mxu0  ;;  %v10115_v3 = vpack.c.bf16 %v7023_v4, %v7022_v16 }
 0xb6c   :  { %v6920_v40 = vrot.slane %v14814_v2, 4  ;;  %v14819_v56 = vadd.f32 %v6909_v38, %v6895_v32  ;;  %v6897_v11 = vpop.f32.mrb[47].mxu0  ;;  %v7040_v38 = vld [vmem:[%s15310_s11 + $0x1a0] sm:$0xff] }
 0xb6d   :  { %v6926_v59 = vrot.slane %v14816_v9, 4  ;;  %v6945_v25 = vmul.f32 %v14816_v9, %v14816_v9  ;;  %v14824_v7 = vadd.f32 %v6913_v48, %v6897_v11  ;;  %v7041_v48 = vld [vmem:[%s15310_s11 + $0x1a8] sm:$0xff] }
 0xb6e   :  { %v6921_v27 = vadd.f32 %v6920_v40, %v14814_v2  ;;  %v6932_v17 = vrot.slane %v14819_v56, 4  ;;  %v10117_v32 = vpack.c.bf16 %v7041_v48, %v7040_v38  ;;  %v7024_v40 = vld [vmem:[%s15310_s11 + $0x120] sm:$0xff]  ;;  %v7025_v11 = vld [vmem:[%s15310_s11 + $0x128] sm:$0xff] }
 0xb6f   :  { %v6927_v46 = vadd.f32 %v6926_v59, %v14816_v9  ;;  %v6954_v50 = vrot.slane %v6945_v25, 4  ;;  %v6938_v8 = vrot.slane %v14824_v7, 4  ;;  %v6947_v49 = vmul.f32 %v14824_v7, %v14824_v7 }
 0xb70   :  { %v6922_v55 = vrot.slane %v6921_v27, 2  ;;  %v6933_v29 = vadd.f32 %v6932_v17, %v14819_v56  ;;  %v6946_v59 = vmul.f32 %v14819_v56, %v14819_v56  ;;  %v6944_v17 = vmul.f32 %v14814_v2, %v14814_v2 }
 0xb71   :  { %v6939_v26 = vadd.f32 %v6938_v8, %v14824_v7  ;;  %v6966_v36 = vrot.slane %v6947_v49, 4  ;;  %v6928_v10 = vrot.slane %v6927_v46, 2  ;;  %v6955_v18 = vadd.f32 %v6954_v50, %v6945_v25  ;;  %v7042_v25 = vld [vmem:[%s15310_s11 + $0x1b0] sm:$0xff] }
 0xb72   :  { %v6934_v12 = vrot.slane %v6933_v29, 2  ;;  %v6923_v41 = vadd.f32 %v6922_v55, %v6921_v27  ;;  %v7043_v27 = vld [vmem:[%s15310_s11 + $0x1b8] sm:$0xff]  ;;  %v7026_v8 = vld [vmem:[%s15310_s11 + $0x130] sm:$0xff]  ;;  %v6960_v55 = vrot.slane %v6946_v59, 4 }
 0xb73   :  { %v6929_v57 = vadd.f32 %v6928_v10, %v6927_v46  ;;  %v6940_v28 = vrot.slane %v6939_v26, 2  ;;  %v6956_v5 = vrot.slane %v6955_v18, 2  ;;  %v6967_v23 = vadd.f32 %v6966_v36, %v6947_v49  ;;  %v7027_v49 = vld [vmem:[%s15310_s11 + $0x138] sm:$0xff] }
 0xb74   :  { %v6935_v35 = vadd.f32 %v6934_v12, %v6933_v29  ;;  %v6924_v54 = vrot.slane %v6923_v41, 1  ;;  %v10119_v46 = vpack.c.bf16 %v7025_v11, %v7024_v40  ;;  %v10121_v50 = vpack.c.bf16 %v7043_v27, %v7042_v25  ;;  %v7044_v29 = vld [vmem:[%s15310_s11 + $0x1c0] sm:$0xff] }
 0xb75   :  { %v6930_v37 = vrot.slane %v6929_v57, 1  ;;  %v6941_v22 = vadd.f32 %v6940_v28, %v6939_v26  ;;  %v6957_v52 = vadd.f32 %v6956_v5, %v6955_v18  ;;  %v6968_v19 = vrot.slane %v6967_v23, 2  ;;  %v7045_v26 = vld [vmem:[%s15310_s11 + $0x1c8] sm:$0xff]  ;;  %v7028_v12 = vld [vmem:[%s15310_s11 + $0x140] sm:$0xff]  ;;  %v7046_v28 = vld [vmem:[%s15310_s11 + $0x1d0] sm:$0xff] }
 0xb76   :  { %v6936_v15 = vrot.slane %v6935_v35, 1  ;;  %v6925_v14 = vadd.f32 %v6924_v54, %v6923_v41  ;;  %v6948_v36 = vrot.slane %v6944_v17, 4  ;;  %v10123_v10 = vpack.c.bf16 %v7027_v49, %v7026_v8  ;;  %v7029_v41 = vld [vmem:[%s15310_s11 + $0x148] sm:$0xff]  ;;  %v7047_v5 = vld [vmem:[%s15310_s11 + $0x1d8] sm:$0xff]  ;;  %v7207_v25 = vld [vmem:[%s15311_s12] sm:$0xff] }
 0xb77   :  { %v6942_v1 = vrot.slane %v6941_v22, 1  ;;  %v6958_v0 = vrot.slane %v6957_v52, 1  ;;  %v6969_v51 = vadd.f32 %v6968_v19, %v6967_v23  ;;  %v6931_v21 = vadd.f32 %v6930_v37, %v6929_v57  ;;  %v7048_v19 = vld [vmem:[%s15310_s11 + $0x1e0] sm:$0xff]  ;;  %v7049_v54 = vld [vmem:[%s15310_s11 + $0x1e8] sm:$0xff] }
 0xb78   :  { %v6937_v45 = vadd.f32 %v6936_v15, %v6935_v35  ;;  %v10125_v18 = vpack.c.bf16 %v7045_v26, %v7044_v29  ;;  %v6961_v57 = vadd.f32 %v6960_v55, %v6946_v59  ;;  %v6949_v23 = vadd.f32 %v6948_v36, %v6944_v17  ;;  %v10697_v49 = vld [vmem:[%s15312_s13 + $0x4] ss:$12 sps:$4 sm:$0xff]   ;;  %v10695_v26 = vld [vmem:[%s15312_s13] ss:$12 sps:$4 sm:$0xff]  }
 0xb79   :  { %v6943_v60 = vadd.f32 %v6942_v1, %v6941_v22  ;;  %v6970_v13 = vrot.slane %v6969_v51, 1  ;;  %v6959_v61 = vadd.f32 %v6958_v0, %v6957_v52  ;;  %v10127_v35 = vpack.c.bf16 %v7029_v41, %v7028_v12  ;;  %v7030_v22 = vld [vmem:[%s15310_s11 + $0x150] sm:$0xff]  ;;  %v7031_v52 = vld [vmem:[%s15310_s11 + $0x158] sm:$0xff]  ;;  %v7032_v0 = vld [vmem:[%s15310_s11 + $0x160] sm:$0xff] }
 0xb7a   :  { %v6976_v44 = vsel %vm757_vm0, %v6937_v45, %v6925_v14  ;;  %v10129_v37 = vpack.c.bf16 %v7047_v5, %v7046_v28  ;;  %v6962_v15 = vrot.slane %v6961_v57, 2  ;;  %v10131_v1 = vpack.c.bf16 %v7031_v52, %v7030_v22  ;;  %v7050_v45 = vld [vmem:[%s15310_s11 + $0x1f0] sm:$0xff] }
 0xb7b   :  { %v6977_v6 = vsel %vm757_vm0, %v6943_v60, %v6931_v21  ;;  %v6971_v33 = vadd.f32 %v6970_v13, %v6969_v51  ;;  %v6950_v58 = vrot.slane %v6949_v23, 2  ;;  %v10133_v31 = vpack.c.bf16 %v7049_v54, %v7048_v19  ;;  %v7033_v51 = vld [vmem:[%s15310_s11 + $0x168] sm:$0xff]  ;;  %v7034_v14 = vld [vmem:[%s15310_s11 + $0x170] sm:$0xff] }
 0xb7c   :  { %7116 = vmatprep.mubr.f32.mxu1 %v6977_v6  ;;  %v6963_v53 = vadd.f32 %v6962_v15, %v6961_v57  ;;  %v10135_v21 = vpack.c.bf16 %v7033_v51, %v7032_v0  ;;  %v10137_v13 = vpack.c.bf16 %v7051_v62, %v7050_v45  ;;  %v7209_v27 = vcombine.high %v7207_v25, %v7207_v25  ;;  %v10703_v12 = vld [vmem:[%s15312_s13 + $0x34] ss:$12 sps:$4 sm:$0xff]   ;;  %v10701_v41 = vld [vmem:[%s15312_s13 + $0x30] ss:$12 sps:$4 sm:$0xff]   ;;  %v10706_v57 = vld [vmem:[%s15312_s13 + $0x4c] ss:$12 sps:$4 sm:$0xff]  }
 0xb7d   :  { %7117 = vmatmul.mubr.f32.vlgmr.msra.gmra.mrb[38].mxu1 %v6976_v44  ;;  %v6985_v30 = vsel %vm757_vm0, %v6971_v33, %v6959_v61  ;;  %v6951_v60 = vadd.f32 %v6950_v58, %v6949_v23  ;;  %v10704_v28 = vld [vmem:[%s15312_s13 + $0x48] ss:$12 sps:$4 sm:$0xff]   ;;  %v10709_v5 = vld [vmem:[%s15312_s13 + $0x64] ss:$12 sps:$4 sm:$0xff]   ;;  %v10707_v23 = vld [vmem:[%s15312_s13 + $0x60] ss:$12 sps:$4 sm:$0xff]  }
 0xb7e   :  { %10112 = vmatpush3.bf16.msra.mxu1 %v10111_v34  ;;  %7186 = vmatprep.mubr.f32.mxu1 %v6985_v30  ;;  %v7035_v34 = vld [vmem:[%s15310_s11 + $0x178] sm:$0xff]  ;;  %v6964_v6 = vrot.slane %v6963_v53, 1  ;;  %v10715_v22 = vld [vmem:[%s15312_s13 + $0x94] ss:$12 sps:$4 sm:$0xff]   ;;  %v10721_v15 = vld [vmem:[%s15312_s13 + $0xc4] ss:$12 sps:$4 sm:$0xff]  }
 0xb7f   :  { %10114 = vmatprep.subr.bf16.mxu1 %v10113_v39  ;;  %v10139_v61 = vpack.c.bf16 %v7035_v34, %v7034_v14  ;;  %v6952_v33 = vrot.slane %v6951_v60, 1  ;;  %v10713_v52 = vld [vmem:[%s15312_s13 + $0x90] ss:$12 sps:$4 sm:$0xff]   ;;  %v10718_v19 = vld [vmem:[%s15312_s13 + $0xac] ss:$12 sps:$4 sm:$0xff]  }
 0xb80   :  { %v6965_v39 = vadd.f32 %v6964_v6, %v6963_v53  ;;  %v10716_v54 = vld [vmem:[%s15312_s13 + $0xa8] ss:$12 sps:$4 sm:$0xff]   ;;  %v10724_v51 = vld [vmem:[%s15312_s13 + $0xd8] ss:$12 sps:$4 sm:$0xff]   ;;  %v10727_v45 = vld [vmem:[%s15312_s13 + $0xe0] ss:$12 sps:$4 sm:$0xff]  }
 0xb81   :  { %v6953_v16 = vadd.f32 %v6952_v33, %v6951_v60  ;;  %v10722_v58 = vld [vmem:[%s15312_s13 + $0xc8] ss:$12 sps:$4 sm:$0xff]   ;;  %v10728_v62 = vld [vmem:[%s15312_s13 + $0x20] ss:$12 sps:$4 sm:$0xff]   ;;  %v10732_v60 = vld [vmem:[%s15312_s13 + $0xf8] ss:$12 sps:$4 sm:$0xff]  }
 0xb82   :  { %10116 = vmatpush3.bf16.msra.mxu1 %v10115_v3  ;;  %9726 = vmatprep.subr.bf16.mxu0 %v10722_v58  ;;  %v10726_v0 = vld [vmem:[%s15312_s13 + $0xdc] ss:$12 sps:$4 sm:$0xff]   ;;  %v10731_v53 = vld [vmem:[%s15312_s13 + $0xf4] ss:$12 sps:$4 sm:$0xff]   ;;  %v10736_v14 = vld [vmem:[%s15312_s13 + $0x10c] ss:$12 sps:$4 sm:$0xff]  }
 0xb83   :  { %10118 = vmatprep.subr.bf16.mxu1 %v10117_v32  ;;  %v6984_v4 = vsel %vm757_vm0, %v6965_v39, %v6953_v16  ;;  %v10734_v34 = vld [vmem:[%s15312_s13 + $0x108] ss:$12 sps:$4 sm:$0xff]   ;;  %v10737_v6 = vld [vmem:[%s15312_s13 + $0x110] ss:$12 sps:$4 sm:$0xff]   ;;  %v10739_v39 = vld [vmem:[%s15312_s13 + $0x120] ss:$12 sps:$4 sm:$0xff]  }
 0xb84   :  { %v10741_v33 = vld [vmem:[%s15312_s13 + $0x124] ss:$12 sps:$4 sm:$0xff]   ;;  %v10742_v16 = vld [vmem:[%s15312_s13 + $0x128] ss:$12 sps:$4 sm:$0xff]  }
 0xb86   :  { %10120 = vmatpush3.bf16.msra.mxu1 %v10119_v46 }
 0xb87   :  { %10122 = vmatprep.subr.bf16.mxu1 %v10121_v50 }
 0xb8a   :  { %10124 = vmatpush3.bf16.msra.mxu1 %v10123_v10  ;;  %v10700_v10 = vld [vmem:[%s15312_s13 + $0x1c] ss:$12 sps:$4 sm:$0xff]  }
 0xb8b   :  { %10126 = vmatprep.subr.bf16.mxu1 %v10125_v18  ;;  %v10698_v18 = vld [vmem:[%s15312_s13 + $0x18] ss:$12 sps:$4 sm:$0xff]  }
 0xb8e   :  { %10128 = vmatpush3.bf16.msra.mxu1 %v10127_v35  ;;  %v10712_v35 = vld [vmem:[%s15312_s13 + $0x7c] ss:$12 sps:$4 sm:$0xff]  }
 0xb8f   :  { %10130 = vmatprep.subr.bf16.mxu1 %v10129_v37  ;;  %v10710_v37 = vld [vmem:[%s15312_s13 + $0x78] ss:$12 sps:$4 sm:$0xff]  }
 0xb92   :  { %10132 = vmatpush3.bf16.msra.mxu1 %v10131_v1  ;;  %v10719_v1 = vld [vmem:[%s15312_s13 + $0xc0] ss:$12 sps:$4 sm:$0xff]  }
 0xb93   :  { %10134 = vmatprep.subr.bf16.mxu1 %v10133_v31  ;;  %v10723_v31 = vld [vmem:[%s15312_s13 + $0x8] ss:$12 sps:$4 sm:$0xff]  }
 0xb94   :  { %9727 = vmatpush3.bf16.msra.mxu0 %v10723_v31 }
 0xb95   :  { %9728 = vmatprep.subr.bf16.mxu0 %v10727_v45 }
 0xb96   :  { %10136 = vmatpush3.bf16.msra.mxu1 %v10135_v21  ;;  %v10729_v21 = vld [vmem:[%s15312_s13 + $0xf0] ss:$12 sps:$4 sm:$0xff]  }
 0xb97   :  { %10138 = vmatprep.subr.bf16.mxu1 %v10137_v13  ;;  %v10733_v13 = vld [vmem:[%s15312_s13 + $0x38] ss:$12 sps:$4 sm:$0xff]  }
 0xb98   :  { %9729 = vmatpush3.bf16.msra.mxu0 %v10728_v62 }
 0xb99   :  { %9730 = vmatprep.subr.bf16.mxu0 %v10732_v60 }
 0xb9a   :  { %10140 = vmatpush3.bf16.msra.mxu1 %v10139_v61  ;;  %v10738_v61 = vld [vmem:[%s15312_s13 + $0x50] ss:$12 sps:$4 sm:$0xff]  }
 0xb9b   :  { %9249 = vmatprep.subr.msk.mxu1 %vm1214_vm1, %v7209_v27 }
 0xb9c   :  { %9731 = vmatpush3.bf16.msra.mxu0 %v10733_v13 }
 0xb9d   :  { %7187 = vmatmul.mubr.f32.vlgmr.msra.gmra.mrb[40].mxu1 %v6984_v4  ;;  %9732 = vmatprep.subr.bf16.mxu0 %v10737_v6  ;;  %v10743_v4 = vld [vmem:[%s15312_s13 + $0x68] ss:$12 sps:$4 sm:$0xff]  }
 0xb9e   :  { %7280 = vmatprep.mubr.f32.mxu1 %v15571_v43  ;;  %9250 = vmatpush1.msk.msra.mxu1 %vm1214_vm1, %v7207_v25 }
 0xb9f   :  { %9252 = vmatprep.subr.msk.mxu1 %vm1214_vm1, %v7209_v27  ;;  %v10754_v27 = vld [vmem:[%s15312_s13 + $0x168] ss:$12 sps:$4 sm:$0xff]  }
 0xba0   :  { %9733 = vmatpush3.bf16.msra.mxu0 %v10738_v61 }
 0xba1   :  { %9734 = vmatprep.subr.bf16.mxu0 %v10742_v16 }
 0xba4   :  { %9735 = vmatpush3.bf16.msra.mxu0 %v10743_v4 }
 0xc50   :  { %v9688_v44 = vpop.f32.mrb[38].mxu1 }
 0xc51   :  { %v9689_v38 = vpop.f32.mrb[39].mxu1 }
 0xc52   :  { %v9690_v48 = vadd.f32 %v9689_v38, %v9688_v44  ;;  %v10746_v44 = vld [vmem:[%s15312_s13 + $0x13c] ss:$12 sps:$4 sm:$0xff]   ;;  %v10747_v38 = vld [vmem:[%s15312_s13 + $0x140] ss:$12 sps:$4 sm:$0xff]  }
 0xc53   :  { %9736 = vmatprep.subr.bf16.mxu0 %v10747_v38 }
 0xc70   :  { %v9723_v30 = vpop.f32.mrb[40].mxu1 }
 0xc71   :  { %v9724_v3 = vpop.f32.mrb[41].mxu1 }
 0xc72   :  { %v9725_v32 = vadd.f32 %v9724_v3, %v9723_v30  ;;  %v10748_v30 = vld [vmem:[%s15312_s13 + $0x80] ss:$12 sps:$4 sm:$0xff]  }
 0xc73   :  { %v10751_v3 = vld [vmem:[%s15312_s13 + $0x154] ss:$12 sps:$4 sm:$0xff]   ;;  %9737 = vmatpush3.bf16.msra.mxu0 %v10748_v30 }
 0xc74   :  { %v7189_v40 = vadd.f32 %v9725_v32, %v9690_v48  ;;  %v10744_v48 = vld [vmem:[%s15312_s13 + $0x138] ss:$12 sps:$4 sm:$0xff]  }
 0xc75   :  { %v10752_v32 = vld [vmem:[%s15312_s13 + $0x158] ss:$12 sps:$4 sm:$0xff]  }
 0xc76   :  { %v7192_v11 = vmul.f32 0.001953125, %v7189_v40  ;;  %v10749_v40 = vld [vmem:[%s15312_s13 + $0x150] ss:$12 sps:$4 sm:$0xff]   ;;  %9738 = vmatprep.subr.bf16.mxu0 %v10752_v32 }
 0xc78   :  { %v7193_v59 = vmul.f32 %v7192_v11, %v7192_v11  ;;  %v7201_v29 = vsub.f32 0.0, %v7192_v11 }
 0xc7a   :  { %7195 = vrot.lane.b32.xlu0 %v7193_v59, %s11073_s18  ;;  %v10756_v59 = vld [vmem:[%s15312_s13 + $0x16c] ss:$12 sps:$4 sm:$0xff]  }
 0xcec   :  { %v7196_v17 = vpop.permute.xlu0 %7195 }
 0xced   :  { %v7198_v46 = vsub.f32 %v7192_v11, %v7196_v17  ;;  %v10753_v11 = vld [vmem:[%s15312_s13 + $0x98] ss:$12 sps:$4 sm:$0xff]   ;;  %v10758_v17 = vld [vmem:[%s15312_s13 + $0xb0] ss:$12 sps:$4 sm:$0xff]  }
 0xcee   :  { %9739 = vmatpush3.bf16.msra.mxu0 %v10753_v11 }
 0xcef   :  { %v7199_v50 = vadd.f32 1e-05, %v7198_v46  ;;  %v10761_v46 = vld [vmem:[%s15312_s13 + $0x184] ss:$12 sps:$4 sm:$0xff]  }
 0xcf1   :  { %10851 = vrsqrt.f32 %v7199_v50 }
 0xcfb   :  { %v10852_v8 = vpop.eup %10851 }
 0xcfc   :  { %7203 = vrot.lane.b32.xlu1 %v10852_v8, %s11077_s3 }
 0xd6e   :  { %v7204_v55 = vpop.permute.xlu1 %7203 }
 0xd6f   :  { %9251 = vmatmul.mubr.msk.f32.vlgmr.msra.gmra.mrb[42].mxu1 %vm1211_vm2, %v7204_v55  ;;  %v7206_v36 = vmul.f32 %v7204_v55, %v7201_v29 }
 0xd70   :  { %9253 = vmatpush1.msk.msra.mxu1 %vm1214_vm1, %v7207_v25  ;;  %7354 = vmatprep.mubr.f32.mxu1 %v15571_v43  ;;  %v10757_v25 = vld [vmem:[%s15312_s13 + $0x170] ss:$12 sps:$4 sm:$0xff]  }
 0xd71   :  { %8242 = vmatprep.subr.bf16.mxu1 %v10697_v49  ;;  %9740 = vmatprep.subr.bf16.mxu0 %v10757_v25 }
 0xd72   :  { %9741 = vmatpush3.bf16.msra.mxu0 %v10758_v17 }
 0xd73   :  { %9254 = vmatmul.mubr.msk.f32.vlgmr.msra.gmra.mrb[44].mxu1 %vm1211_vm2, %v7206_v36 }
 0xd74   :  { %8243 = vmatpush1.bf16.msra.mxu1 %v10695_v26 }
 0xd75   :  { %8244 = vmatprep.subr.bf16.mxu1 %v10700_v10 }
 0xd78   :  { %8245 = vmatpush1.bf16.msra.mxu1 %v10698_v18 }
 0xd79   :  { %8246 = vmatprep.subr.bf16.mxu1 %v10703_v12 }
 0xd7c   :  { %8247 = vmatpush1.bf16.msra.mxu1 %v10701_v41 }
 0xd7d   :  { %8248 = vmatprep.subr.bf16.mxu1 %v10706_v57 }
 0xd80   :  { %8249 = vmatpush1.bf16.msra.mxu1 %v10704_v28 }
 0xd81   :  { %8250 = vmatprep.subr.bf16.mxu1 %v10709_v5 }
 0xd84   :  { %8251 = vmatpush1.bf16.msra.mxu1 %v10707_v23 }
 0xd85   :  { %8252 = vmatprep.subr.bf16.mxu1 %v10712_v35 }
 0xd88   :  { %8253 = vmatpush1.bf16.msra.mxu1 %v10710_v37 }
 0xd89   :  { %8254 = vmatprep.subr.bf16.mxu1 %v10715_v22 }
 0xd8c   :  { %8255 = vmatpush1.bf16.msra.mxu1 %v10713_v52 }
 0xd8d   :  { %8256 = vmatprep.subr.bf16.mxu1 %v10718_v19 }
 0xd90   :  { %8257 = vmatpush1.bf16.msra.mxu1 %v10716_v54 }
 0xd91   :  { %8258 = vmatprep.subr.bf16.mxu1 %v10721_v15 }
 0xd94   :  { %8259 = vmatpush1.bf16.msra.mxu1 %v10719_v1 }
 0xd95   :  { %8260 = vmatprep.subr.bf16.mxu1 %v10726_v0 }
 0xd98   :  { %8261 = vmatpush1.bf16.msra.mxu1 %v10724_v51 }
 0xd99   :  { %8262 = vmatprep.subr.bf16.mxu1 %v10731_v53 }
 0xd9c   :  { %8263 = vmatpush1.bf16.msra.mxu1 %v10729_v21 }
 0xd9d   :  { %8264 = vmatprep.subr.bf16.mxu1 %v10736_v14 }
 0xda0   :  { %8265 = vmatpush1.bf16.msra.mxu1 %v10734_v34 }
 0xda1   :  { %8266 = vmatprep.subr.bf16.mxu1 %v10741_v33 }
 0xda4   :  { %8267 = vmatpush1.bf16.msra.mxu1 %v10739_v39 }
 0xda5   :  { %8268 = vmatprep.subr.bf16.mxu1 %v10746_v44 }
 0xda8   :  { %8269 = vmatpush1.bf16.msra.mxu1 %v10744_v48 }
 0xda9   :  { %8270 = vmatprep.subr.bf16.mxu1 %v10751_v3 }
 0xdac   :  { %8271 = vmatpush1.bf16.msra.mxu1 %v10749_v40 }
 0xdad   :  { %8272 = vmatprep.subr.bf16.mxu1 %v10756_v59 }
 0xdb0   :  { %8273 = vmatpush1.bf16.msra.mxu1 %v10754_v27 }
 0xdb1   :  { %8283 = vmatprep.subr.bf16.mxu1 %v10761_v46 }
 0xe42   :  { %v7282_v50 = vpop.f32.mrb[42].mxu1 }
 0xe43   :  { %v7284_v8 = vpop.f32.mrb[43].mxu1 }
 0xe44   :  { %v7363_v49 = vcombine.low %v7282_v50, %v7284_v8 }
 0xe46   :  { %v7370_v55 = vrot.slane %v7363_v49, %v15572_v63  ;;  %v7356_v29 = vpop.f32.mrb[44].mxu1 }
 0xe47   :  { %v7358_v26 = vpop.f32.mrb[45].mxu1 }
 0xe48   :  { %v7371_v36 = vcombine.high %v7370_v55, %v7370_v55  ;;  %v7378_v10 = vrot.slane %v7370_v55, %v15572_v63  ;;  %v7412_v18 = vcombine.low %v7356_v29, %v7358_v26 }
 0xe4a   :  { %v7385_v12 = vrot.slane %v7371_v36, %v15572_v63  ;;  %v7389_v41 = vrot.slane %v7378_v10, %v15573_v20  ;;  %v7419_v57 = vrot.slane %v7412_v18, %v15572_v63  ;;  %v7393_v28 = vrot.slane %v7378_v10, %v15574_v42 }
 0xe4c   :  { %v7397_v5 = vrot.slane %v7385_v12, %v15573_v20  ;;  %v7401_v23 = vrot.slane %v7385_v12, %v15574_v42  ;;  %v7420_v35 = vcombine.high %v7419_v57, %v7419_v57  ;;  %v7427_v37 = vrot.slane %v7419_v57, %v15572_v63 }
 0xe4d   :  { %v7406_v22 = vmul.f32 %v7389_v41, %v14814_v2  ;;  %v7407_v52 = vmul.f32 %v7393_v28, %v14816_v9 }
 0xe4e   :  { %v7434_v19 = vrot.slane %v7420_v35, %v15572_v63  ;;  %v7438_v54 = vrot.slane %v7427_v37, %v15573_v20  ;;  %v7442_v15 = vrot.slane %v7427_v37, %v15574_v42  ;;  %v7408_v1 = vmul.f32 %v7397_v5, %v14819_v56 }
 0xe4f   :  { %v7409_v58 = vmul.f32 %v7401_v23, %v14824_v7 }
 0xe50   :  { %v7446_v31 = vrot.slane %v7434_v19, %v15573_v20  ;;  %v7450_v0 = vrot.slane %v7434_v19, %v15574_v42  ;;  %v7455_v51 = vadd.f32 %v7438_v54, %v7406_v22  ;;  %v7456_v45 = vadd.f32 %v7442_v15, %v7407_v52 }
 0xe52   :  { %v7457_v62 = vadd.f32 %v7446_v31, %v7408_v1  ;;  %v7458_v2 = vadd.f32 %v7450_v0, %v7409_v58  ;;  %v7459_v53 = vmax.f32 %v7455_v51, 0.0  ;;  %v7460_v9 = vmax.f32 %v7456_v45, 0.0 }
 0xe54   :  { %v7461_v21 = vmax.f32 %v7457_v62, 0.0  ;;  %v7462_v63 = vmax.f32 %v7458_v2, 0.0  ;;  %v7463_v60 = vmax.f32 %v7459_v53, %v7460_v9 }
 0xe56   :  { %v7464_v13 = vmax.f32 %v7461_v21, %v7462_v63  ;;  %v7467_v14 = vcombine.high %v7463_v60, %v7463_v60  ;;  %v7474_v34 = vrot.slane %v7463_v60, %v15587_v24 }
 0xe58   :  { %v7481_v56 = vrot.slane %v7467_v14, %v15587_v24  ;;  %v7482_v7 = vcombine.high %v7474_v34, %v7474_v34  ;;  %v7484_v6 = vcombine.high %v7464_v13, %v7464_v13  ;;  %v7491_v61 = vrot.slane %v7464_v13, %v15587_v24 }
 0xe59   :  { %v7509_v33 = vsel %vm2254_vm3, %v7474_v34, -inf }
 0xe5a   :  { %v7498_v39 = vrot.slane %v7484_v6, %v15587_v24  ;;  %v7510_v16 = vrot.slane %v7509_v33, 4  ;;  %v7523_v4 = vsel %vm2254_vm3, %v7481_v56, -inf  ;;  %v7537_v44 = vsel %vm2254_vm3, %v7491_v61, -inf }
 0xe5b   :  { %v7524_v38 = vrot.slane %v7523_v4, 4  ;;  %v7538_v48 = vrot.slane %v7537_v44, 4  ;;  %v7499_v30 = vcombine.high %v7491_v61, %v7491_v61  ;;  %v7516_v3 = vsel %vm2254_vm3, %v7482_v7, -inf }
 0xe5c   :  { %v7511_v32 = vmax.f32 %v7509_v33, %v7510_v16  ;;  %v7517_v40 = vrot.slane %v7516_v3, 4  ;;  %v7483_v11 = vcombine.high %v7481_v56, %v7481_v56  ;;  %v7500_v59 = vcombine.high %v7498_v39, %v7498_v39 }
 0xe5d   :  { %v7544_v25 = vsel %vm2254_vm3, %v7499_v30, -inf  ;;  %v7539_v27 = vmax.f32 %v7537_v44, %v7538_v48  ;;  %v7525_v17 = vmax.f32 %v7523_v4, %v7524_v38  ;;  %v7551_v24 = vsel %vm2254_vm3, %v7498_v39, -inf  ;;  %v10759_v39 = vld [vmem:[%s15312_s13 + $0x180] ss:$12 sps:$4 sm:$0xff]   ;;  %v10764_v48 = vld [vmem:[%s15312_s13 + $0x19c] ss:$12 sps:$4 sm:$0xff]  }
 0xe5e   :  { %v7518_v46 = vmax.f32 %v7516_v3, %v7517_v40  ;;  %v7545_v50 = vrot.slane %v7544_v25, 4  ;;  %v7512_v8 = vrot.slane %v7511_v32, 2  ;;  %v7530_v49 = vsel %vm2254_vm3, %v7483_v11, -inf  ;;  %v10767_v40 = vld [vmem:[%s15312_s13 + $0x1b4] ss:$12 sps:$4 sm:$0xff]  }
 0xe5f   :  { %v7540_v55 = vrot.slane %v7539_v27, 2  ;;  %v7531_v29 = vrot.slane %v7530_v49, 4  ;;  %v7558_v26 = vsel %vm2254_vm3, %v7500_v59, -inf  ;;  %v7526_v36 = vrot.slane %v7525_v17, 2  ;;  %v10765_v11 = vld [vmem:[%s15312_s13 + $0x1b0] ss:$12 sps:$4 sm:$0xff]  }
 0xe60   :  { %v7519_v10 = vrot.slane %v7518_v46, 2  ;;  %v7546_v18 = vmax.f32 %v7544_v25, %v7545_v50  ;;  %v7513_v12 = vmax.f32 %v7511_v32, %v7512_v8  ;;  %v7559_v41 = vrot.slane %v7558_v26, 4  ;;  %v10762_v32 = vld [vmem:[%s15312_s13 + $0x198] ss:$12 sps:$4 sm:$0xff]   ;;  %v10768_v25 = vld [vmem:[%s15312_s13 + $0x1c8] ss:$12 sps:$4 sm:$0xff]  }
 0xe61   :  { %v7541_v57 = vmax.f32 %v7539_v27, %v7540_v55  ;;  %v7532_v28 = vmax.f32 %v7530_v49, %v7531_v29  ;;  %v7552_v5 = vrot.slane %v7551_v24, 4  ;;  %v7527_v54 = vmax.f32 %v7525_v17, %v7526_v36  ;;  %v10770_v59 = vld [vmem:[%s15312_s13 + $0x1cc] ss:$12 sps:$4 sm:$0xff]   ;;  %v10773_v27 = vld [vmem:[%s15312_s13 + $0x1e4] ss:$12 sps:$4 sm:$0xff]  }
 0xe62   :  { %v7520_v23 = vmax.f32 %v7518_v46, %v7519_v10  ;;  %v7547_v35 = vrot.slane %v7546_v18, 2  ;;  %v7514_v37 = vrot.slane %v7513_v12, 1  ;;  %v7560_v22 = vmax.f32 %v7558_v26, %v7559_v41  ;;  %v10771_v17 = vld [vmem:[%s15312_s13 + $0x1e0] ss:$12 sps:$4 sm:$0xff]   ;;  %v10774_v46 = vld [vmem:[%s15312_s13 + $0x1f8] ss:$12 sps:$4 sm:$0xff]  }
 0xe63   :  { %v7542_v52 = vrot.slane %v7541_v57, 1  ;;  %v7533_v19 = vrot.slane %v7532_v28, 2  ;;  %v7553_v15 = vmax.f32 %v7551_v24, %v7552_v5  ;;  %v7528_v63 = vrot.slane %v7527_v54, 1  ;;  %v10776_v24 = vld [vmem:[%s15312_s13 + $0x1fc] ss:$12 sps:$4 sm:$0xff]  }
 0xe64   :  { %v7521_v1 = vrot.slane %v7520_v23, 1  ;;  %v7548_v58 = vmax.f32 %v7546_v18, %v7547_v35  ;;  %v7561_v31 = vrot.slane %v7560_v22, 2  ;;  %v7515_v0 = vmax.f32 %v7513_v12, %v7514_v37  ;;  %v10779_v50 = vld [vmem:[%s15312_s13 + $0x214] ss:$12 sps:$4 sm:$0xff]   ;;  %v10777_v8 = vld [vmem:[%s15312_s13 + $0x210] ss:$12 sps:$4 sm:$0xff]  }
 0xe65   :  { %v7543_v51 = vmax.f32 %v7541_v57, %v7542_v52  ;;  %v7534_v45 = vmax.f32 %v7532_v28, %v7533_v19  ;;  %v7554_v62 = vrot.slane %v7553_v15, 2  ;;  %v7529_v16 = vmax.f32 %v7527_v54, %v7528_v63  ;;  %v10782_v49 = vld [vmem:[%s15312_s13 + $0x22c] ss:$12 sps:$4 sm:$0xff]   ;;  %v10780_v55 = vld [vmem:[%s15312_s13 + $0x228] ss:$12 sps:$4 sm:$0xff]  }
 0xe66   :  { %v7549_v2 = vrot.slane %v7548_v58, 1  ;;  %v7562_v53 = vmax.f32 %v7560_v22, %v7561_v31  ;;  %v7522_v13 = vmax.f32 %v7520_v23, %v7521_v1  ;;  %v10785_v29 = vld [vmem:[%s15312_s13 + $0x244] ss:$12 sps:$4 sm:$0xff]   ;;  %v10783_v26 = vld [vmem:[%s15312_s13 + $0x240] ss:$12 sps:$4 sm:$0xff]  }
 0xe67   :  { %v7567_v9 = vsel %vm757_vm0, %v7543_v51, %v7515_v0  ;;  %v7535_v21 = vrot.slane %v7534_v45, 1  ;;  %v7555_v60 = vmax.f32 %v7553_v15, %v7554_v62  ;;  %v10788_v36 = vld [vmem:[%s15312_s13 + $0x25c] ss:$12 sps:$4 sm:$0xff]   ;;  %v10786_v10 = vld [vmem:[%s15312_s13 + $0x258] ss:$12 sps:$4 sm:$0xff]  }
 0xe68   :  { %v7550_v14 = vmax.f32 %v7548_v58, %v7549_v2  ;;  %v7563_v34 = vrot.slane %v7562_v53, 1  ;;  %v7581_v44 = vpack.c.bf16 %v7567_v9, %v7567_v9  ;;  %v10791_v18 = vld [vmem:[%s15312_s13 + $0x274] ss:$12 sps:$4 sm:$0xff]   ;;  %v10789_v12 = vld [vmem:[%s15312_s13 + $0x270] ss:$12 sps:$4 sm:$0xff]  }
 0xe69   :  { %v7556_v56 = vrot.slane %v7555_v60, 1  ;;  %v7536_v6 = vmax.f32 %v7534_v45, %v7535_v21  ;;  %v10794_v41 = vld [vmem:[%s15312_s13 + $0x28c] ss:$12 sps:$4 sm:$0xff]   ;;  %v10792_v57 = vld [vmem:[%s15312_s13 + $0x288] ss:$12 sps:$4 sm:$0xff]  }
 0xe6a   :  { %v7571_v7 = vsel %vm757_vm0, %v7550_v14, %v7522_v13  ;;  %v7564_v61 = vmax.f32 %v7562_v53, %v7563_v34  ;;  %v10797_v28 = vld [vmem:[%s15312_s13 + $0x2a4] ss:$12 sps:$4 sm:$0xff]   ;;  %v10795_v5 = vld [vmem:[%s15312_s13 + $0x2a0] ss:$12 sps:$4 sm:$0xff]   ;;  %v10800_v23 = vld [vmem:[%s15312_s13 + $0x2bc] ss:$12 sps:$4 sm:$0xff]  }
 0xe6b   :  { %v7582_v33 = vpack.c.bf16 %v7571_v7, %v7571_v7  ;;  %v7557_v4 = vmax.f32 %v7555_v60, %v7556_v56  ;;  %v10798_v35 = vld [vmem:[%s15312_s13 + $0x2b8] ss:$12 sps:$4 sm:$0xff]   ;;  %v10803_v37 = vld [vmem:[%s15312_s13 + $0x2d4] ss:$12 sps:$4 sm:$0xff]   ;;  %v10801_v22 = vld [vmem:[%s15312_s13 + $0x2d0] ss:$12 sps:$4 sm:$0xff]  }
 0xe6c   :  { %v7579_v38 = vsel %vm757_vm0, %v7564_v61, %v7536_v6  ;;  %v10806_v52 = vld [vmem:[%s15312_s13 + $0x2ec] ss:$12 sps:$4 sm:$0xff]   ;;  %v10804_v19 = vld [vmem:[%s15312_s13 + $0x2e8] ss:$12 sps:$4 sm:$0xff]   ;;  %v10813_v45 = vld [vmem:[%s15312_s13 + $0x290] ss:$12 sps:$4 sm:$0xff]  }
 0xe6d   :  { %8274 = vmatprep.mubr.bf16.mxu1 %v7582_v33  ;;  %8356 = vmatprep.mubr.bf16.mxu0 %v7582_v33  ;;  %v15131_v30 = vpack.c.bf16 %v7579_v38, %v7579_v38  ;;  %v15134_v3 = vsel %vm757_vm0, %v7557_v4, %v7529_v16  ;;  %v10807_v54 = vld [vmem:[%s15312_s13 + $0x248] ss:$12 sps:$4 sm:$0xff]   ;;  %v10809_v58 = vld [vmem:[%s15312_s13 + $0x260] ss:$12 sps:$4 sm:$0xff]   ;;  %v10811_v0 = vld [vmem:[%s15312_s13 + $0x278] ss:$12 sps:$4 sm:$0xff]  }
 0xe6e   :  { %8275 = vmatmul.mubr.bf16.vlgmr.msra.gmra.mrb[48].mxu1 %v7581_v44  ;;  %8357 = vmatmul.mubr.bf16.vlgmr.msra.gmra.mrb[48].mxu0 %v7581_v44  ;;  %v10808_v15 = vld [vmem:[%s15312_s13 + $0x188] ss:$12 sps:$4 sm:$0xff]   ;;  %v7583_v1 = vpack.c.bf16 %v15134_v3, %v15134_v3  ;;  %v10810_v31 = vld [vmem:[%s15312_s13 + $0x1a0] ss:$12 sps:$4 sm:$0xff]   ;;  %v10812_v51 = vld [vmem:[%s15312_s13 + $0x1b8] ss:$12 sps:$4 sm:$0xff]  }
 0xe6f   :  { %8284 = vmatpush1.bf16.msra.mxu1 %v10759_v39  ;;  %8315 = vmatprep.mubr.bf16.mxu1 %v15131_v30  ;;  %v10814_v62 = vld [vmem:[%s15312_s13 + $0x1d0] ss:$12 sps:$4 sm:$0xff]   ;;  %v10815_v2 = vld [vmem:[%s15312_s13 + $0x2a8] ss:$12 sps:$4 sm:$0xff]   ;;  %v10817_v9 = vld [vmem:[%s15312_s13 + $0x2c0] ss:$12 sps:$4 sm:$0xff]  }
 0xe70   :  { %8285 = vmatprep.subr.bf16.mxu1 %v10764_v48  ;;  %v10816_v53 = vld [vmem:[%s15312_s13 + $0x1e8] ss:$12 sps:$4 sm:$0xff]   ;;  %v10818_v21 = vld [vmem:[%s15312_s13 + $0x200] ss:$12 sps:$4 sm:$0xff]   ;;  %v10819_v63 = vld [vmem:[%s15312_s13 + $0x2d8] ss:$12 sps:$4 sm:$0xff]  }
 0xe71   :  { %v10820_v60 = vld [vmem:[%s15312_s13 + $0x218] ss:$12 sps:$4 sm:$0xff]   ;;  %v10821_v13 = vld [vmem:[%s15312_s13 + $0x2f0] ss:$12 sps:$4 sm:$0xff]  }
 0xe72   :  { %v10823_v14 = vld [vmem:[#allocation15 + $0x40] sm:$0xff]   ;;  %v10825_v56 = vld [vmem:[#allocation15 + $0x48] sm:$0xff]   ;;  %v10827_v61 = vld [vmem:[#allocation15 + $0x50] sm:$0xff]  }
 0xe73   :  { %8286 = vmatpush1.bf16.msra.mxu1 %v10762_v32  ;;  %v10824_v34 = vld [vmem:[#allocation15] sm:$0xff]   ;;  %9770 = vmatprep.subr.bf16.mxu0 %v10823_v14  ;;  %v10826_v6 = vld [vmem:[#allocation15 + $0x8] sm:$0xff]   ;;  %v10828_v33 = vld [vmem:[#allocation15 + $0x10] sm:$0xff]  }
 0xe74   :  { %8287 = vmatprep.subr.bf16.mxu1 %v10767_v40  ;;  %v10822_v7 = vld [vmem:[%s15312_s13 + $0x230] ss:$12 sps:$4 sm:$0xff]   ;;  %9771 = vmatpush3.bf16.msra.mxu0 %v10824_v34  ;;  %v10829_v39 = vld [vmem:[#allocation15 + $0x58] sm:$0xff]   ;;  %v10833_v38 = vld [vmem:[#allocation15 + $0x68] sm:$0xff]   ;;  %s11081_s13 = smov [#allocation18]  }
 0xe75   :  { %9772 = vmatprep.subr.bf16.mxu0 %v10825_v56  ;;  %v10830_v16 = vld [vmem:[#allocation15 + $0x18] sm:$0xff]   ;;  %v10831_v4 = vld [vmem:[#allocation15 + $0x60] sm:$0xff]   ;;  %v10834_v48 = vld [vmem:[#allocation15 + $0x28] sm:$0xff]   ;;  %s8696_s26 = sshll.u32 %s11081_s13, 4  ;;  %s8697_s26 = int_to_ptr.vmem [resolvable:$true] %s8696_s26 }
 0xe76   :  { %v10832_v44 = vld [vmem:[#allocation15 + $0x20] sm:$0xff]   ;;  %v10836_v3 = vld [vmem:[#allocation15 + $0x30] sm:$0xff]   ;;  %v10837_v32 = vld [vmem:[#allocation15 + $0x78] sm:$0xff]   ;;  %s11029_s15 = scalar_lea.vmem %s8697_s26, 32  ;;  %p11034_p9 = scmp.lt.s32.totalorder %s8697_s26, %s8697_s26 }
 0xe77   :  { %8288 = vmatpush1.bf16.msra.mxu1 %v10765_v11  ;;  %v10838_v40 = vld [vmem:[#allocation15 + $0x38] sm:$0xff]   ;;  %v10839_v11 = vld [vmem:[#allocation15 + $0x80] sm:$0xff]   ;;  %p11030_p8 = scmp.ne.s32.totalorder %s8697_s26, %s11029_s15  ;;  %p11035_p10 = scmp.lt.s32.totalorder %s11029_s15, %s11029_s15 }
 0xe78   :  { %8289 = vmatprep.subr.bf16.mxu1 %v10770_v59  ;;  %9773 = vmatpush3.bf16.msra.mxu0 %v10826_v6  ;;  %v10840_v59 = vld [vmem:[#allocation15 + $0x88] sm:$0xff]  }
 0xe79   :  { %9774 = vmatprep.subr.bf16.mxu0 %v10827_v61  ;;  %p11036_p11 = por %p11035_p10, %p11034_p9 }
 0xe7b   :  { %8290 = vmatpush1.bf16.msra.mxu1 %v10768_v25  ;;  %v10841_v25 = vld [vmem:[#allocation15 + $0x90] sm:$0xff]   ;;  %p11037_p12 = pnand %p11036_p11, %p11030_p8 }
 0xe7c   :  { %8291 = vmatprep.subr.bf16.mxu1 %v10773_v27  ;;  %9775 = vmatpush3.bf16.msra.mxu0 %v10828_v33  ;;  %v10842_v27 = vld [vmem:[#allocation15 + $0x98] sm:$0xff]  }
 0xe7d   :  { %9776 = vmatprep.subr.bf16.mxu0 %v10829_v39 }
 0xe7f   :  { %8292 = vmatpush1.bf16.msra.mxu1 %v10771_v17  ;;  %v10843_v17 = vld [vmem:[#allocation15 + $0xa0] sm:$0xff]  }
 0xe80   :  { %8293 = vmatprep.subr.bf16.mxu1 %v10776_v24  ;;  %9777 = vmatpush3.bf16.msra.mxu0 %v10830_v16  ;;  %v10844_v24 = vld [vmem:[#allocation15 + $0xa8] sm:$0xff]  }
 0xe81   :  { %9778 = vmatprep.subr.bf16.mxu0 %v10831_v4 }
 0xe83   :  { %8294 = vmatpush1.bf16.msra.mxu1 %v10774_v46  ;;  %v10845_v46 = vld [vmem:[#allocation15 + $0xb0] sm:$0xff]  }
 0xe84   :  { %8295 = vmatprep.subr.bf16.mxu1 %v10779_v50  ;;  %9779 = vmatpush3.bf16.msra.mxu0 %v10832_v44  ;;  %v10846_v50 = vld [vmem:[#allocation15 + $0xb8] sm:$0xff]  }
 0xe85   :  { %9780 = vmatprep.subr.bf16.mxu0 %v10833_v38 }
 0xe87   :  { %8296 = vmatpush1.bf16.msra.mxu1 %v10777_v8 }
 0xe88   :  { %8297 = vmatprep.subr.bf16.mxu1 %v10782_v49  ;;  %9781 = vmatpush3.bf16.msra.mxu0 %v10834_v48 }
 0xe8b   :  { %8298 = vmatpush1.bf16.msra.mxu1 %v10780_v55 }
 0xe8c   :  { %8299 = vmatprep.subr.bf16.mxu1 %v10785_v29 }
 0xe8f   :  { %8300 = vmatpush1.bf16.msra.mxu1 %v10783_v26 }
 0xe90   :  { %8301 = vmatprep.subr.bf16.mxu1 %v10788_v36  ;;  %v7713_v36 = vld [vmem:[#allocation13] sm:$0x7] }
 0xe93   :  { %8302 = vmatpush1.bf16.msra.mxu1 %v10786_v10  ;;  %v7718_v10 = vrot.slane %v7713_v36, %v15573_v20 }
 0xe94   :  { %8303 = vmatprep.subr.bf16.mxu1 %v10791_v18  ;;  %v7722_v18 = vrot.slane %v7713_v36, %v15574_v42 }
 0xe97   :  { %8304 = vmatpush1.bf16.msra.mxu1 %v10789_v12 }
 0xe98   :  { %8305 = vmatprep.subr.bf16.mxu1 %v10794_v41 }
 0xe9b   :  { %8306 = vmatpush1.bf16.msra.mxu1 %v10792_v57 }
 0xe9c   :  { %8307 = vmatprep.subr.bf16.mxu1 %v10797_v28 }
 0xe9f   :  { %8308 = vmatpush1.bf16.msra.mxu1 %v10795_v5 }
 0xea0   :  { %8309 = vmatprep.subr.bf16.mxu1 %v10800_v23 }
 0xea3   :  { %8310 = vmatpush1.bf16.msra.mxu1 %v10798_v35 }
 0xea4   :  { %8311 = vmatprep.subr.bf16.mxu1 %v10803_v37 }
 0xea7   :  { %8312 = vmatpush1.bf16.msra.mxu1 %v10801_v22 }
 0xea8   :  { %8313 = vmatprep.subr.bf16.mxu1 %v10806_v52  ;;  %v7726_v52 = vrot.slane %v7713_v36, %v15575_v47 }
 0xeab   :  { %8314 = vmatpush1.bf16.msra.mxu1 %v10804_v19 }
 0xeac   :  { %9748 = vmatprep.subr.bf16.mxu1 %v10807_v54 }
 0xeae   :  { %8316 = vmatmul.mubr.bf16.vlgmr.msra.gmra.mrb[48].mxu1 %v7583_v1 }
 0xeaf   :  { %9749 = vmatpush3.bf16.msra.mxu1 %v10808_v15  ;;  %8396 = vmatprep.mubr.bf16.mxu1 %v15131_v30  ;;  %v10835_v30 = vld [vmem:[#allocation15 + $0x70] sm:$0xff]  }
 0xeb0   :  { %9750 = vmatprep.subr.bf16.mxu1 %v10809_v58  ;;  %9782 = vmatprep.subr.bf16.mxu0 %v10835_v30 }
 0xeb1   :  { %9783 = vmatpush3.bf16.msra.mxu0 %v10836_v3 }
 0xeb2   :  { %9784 = vmatprep.subr.bf16.mxu0 %v10837_v32 }
 0xeb3   :  { %9751 = vmatpush3.bf16.msra.mxu1 %v10810_v31 }
 0xeb4   :  { %9752 = vmatprep.subr.bf16.mxu1 %v10811_v0 }
 0xeb5   :  { %9785 = vmatpush3.bf16.msra.mxu0 %v10838_v40 }
 0xeb7   :  { %9753 = vmatpush3.bf16.msra.mxu1 %v10812_v51 }
 0xeb8   :  { %9754 = vmatprep.subr.bf16.mxu1 %v10813_v45 }
 0xebb   :  { %9755 = vmatpush3.bf16.msra.mxu1 %v10814_v62 }
 0xebc   :  { %9756 = vmatprep.subr.bf16.mxu1 %v10815_v2 }
 0xebf   :  { %9757 = vmatpush3.bf16.msra.mxu1 %v10816_v53 }
 0xec0   :  { %9758 = vmatprep.subr.bf16.mxu1 %v10817_v9  ;;  %v9351_v9 = vld [vmem:[#allocation16] ss:$0 sm:$0xff] }
 0xec3   :  { %9759 = vmatpush3.bf16.msra.mxu1 %v10818_v21 }
 0xec4   :  { %9760 = vmatprep.subr.bf16.mxu1 %v10819_v63 }
 0xec7   :  { %9761 = vmatpush3.bf16.msra.mxu1 %v10820_v60 }
 0xec8   :  { %9762 = vmatprep.subr.bf16.mxu1 %v10821_v13 }
 0xecb   :  { %9763 = vmatpush3.bf16.msra.mxu1 %v10822_v7 }
 0xecc   :  { %9801 = vmatprep.subr.bf16.mxu1 %v15571_v43 }
 0xece   :  { %8397 = vmatmul.mubr.bf16.vlgmr.msra.gmra.mrb[52].mxu1 %v7583_v1 }
 0xecf   :  { %9802 = vmatpush3.bf16.msra.mxu1 %v10839_v11  ;;  %9817 = vmatprep.mubr.msk.bf16.mxu1 %vm11080_vm13, %v15571_v43 }
 0xed0   :  { %9803 = vmatprep.subr.bf16.mxu1 %v15571_v43 }
 0xed3   :  { %9804 = vmatpush3.bf16.msra.mxu1 %v10840_v59 }
 0xed4   :  { %9805 = vmatprep.subr.bf16.mxu1 %v15571_v43 }
 0xed7   :  { %9806 = vmatpush3.bf16.msra.mxu1 %v10841_v25 }
 0xed8   :  { %9807 = vmatprep.subr.bf16.mxu1 %v15571_v43 }
 0xedb   :  { %9808 = vmatpush3.bf16.msra.mxu1 %v10842_v27 }
 0xedc   :  { %9809 = vmatprep.subr.bf16.mxu1 %v15571_v43 }
 0xedf   :  { %9810 = vmatpush3.bf16.msra.mxu1 %v10843_v17 }
 0xee0   :  { %9811 = vmatprep.subr.bf16.mxu1 %v15571_v43 }
 0xee3   :  { %9812 = vmatpush3.bf16.msra.mxu1 %v10844_v24 }
 0xee4   :  { %9813 = vmatprep.subr.bf16.mxu1 %v15571_v43 }
 0xee7   :  { %9814 = vmatpush3.bf16.msra.mxu1 %v10845_v46 }
 0xee8   :  { %9815 = vmatprep.subr.bf16.mxu1 %v15571_v43 }
 0xeeb   :  { %9816 = vmatpush3.bf16.msra.mxu1 %v10846_v50 }
 0xf41   :  { %v9742_v8 = vpop.f32.mrb[48].mxu0 }
 0xf42   :  { %v9743_v49 = vpop.f32.mrb[49].mxu0 }
 0xf43   :  { %v9744_v55 = vadd.f32 %v9743_v49, %v9742_v8  ;;  %v9745_v29 = vpop.f32.mrb[50].mxu0 }
 0xf44   :  { %v9746_v26 = vpop.f32.mrb[51].mxu0 }
 0xf45   :  { %v8359_v15 = vadd.f32 %v9744_v55, %v7726_v52 }
 0xf81   :  { %v8317_v12 = vpop.f32.mrb[48].mxu1 }
 0xf82   :  { %v10141_v41 = vadd.f32 %v8317_v12, %v7718_v10  ;;  %v8319_v57 = vpop.f32.mrb[49].mxu1 }
 0xf83   :  { %v10142_v28 = vadd.f32 %v8319_v57, %v7722_v18  ;;  %v8321_v5 = vpop.f32.mrb[50].mxu1 }
 0xf84   :  { %v8404_v23 = vmax.f32 %v10141_v41, 0.0  ;;  %v8322_v35 = vpop.f32.mrb[51].mxu1 }
 0xf85   :  { %v8405_v37 = vmax.f32 %v10142_v28, 0.0 }
 0xf86   :  { %v8407_v43 = vpack.c.bf16 %v8404_v23, %v8404_v23 }
 0xf87   :  { %v8408_v22 = vpack.c.bf16 %v8405_v37, %v8405_v37 }
 0xf89   :  { %8641 = vmatprep.mubr.bf16.mxu0 %v8408_v22 }
 0xf8a   :  { %8642 = vmatmul.mubr.bf16.vlgmr.msra.gmra.mrb[52].mxu0 %v8407_v43 }
 0xfa1   :  { %v9764_v19 = vpop.f32.mrb[52].mxu1 }
 0xfa2   :  { %v9765_v54 = vpop.f32.mrb[53].mxu1 }
 0xfa3   :  { %v9766_v20 = vadd.f32 %v9765_v54, %v9764_v19  ;;  %v9767_v1 = vpop.f32.mrb[54].mxu1 }
 0xfa4   :  { %v9768_v42 = vpop.f32.mrb[55].mxu1 }
 0xfa5   :  { %v8399_v58 = vadd.f32 %v9766_v20, %v8359_v15 }
 0xfa7   :  { %v8406_v31 = vmax.f32 %v8399_v58, 0.0 }
 0xfa9   :  { %v8409_v0 = vpack.c.bf16 %v8406_v31, %v8406_v31 }
 0xfab   :  { %9818 = vmatmul.mubr.bf16.vlgmr.msra.gmra.mrb[56].mxu1 %v8409_v0 }
0x105d   :  { %v9786_v51 = vpop.f32.mrb[52].mxu0 }
0x105e   :  { %v9787_v45 = vpop.f32.mrb[53].mxu0 }
0x105f   :  { %v9788_v62 = vadd.f32 %v9787_v45, %v9786_v51  ;;  %v9789_v2 = vpop.f32.mrb[54].mxu0 }
0x1060   :  { %v9790_v53 = vpop.f32.mrb[55].mxu0 }
0x1061   :  { %v8644_v21 = vadd.f32 %v9788_v62, %v9351_v9 }
0x107e   :  { %v8683_v47 = vpop.f32.mrb[56].mxu1 }
0x107f   :  { %v8684_v63 = vadd.f32 %v8683_v47, %v8644_v21  ;;  %v9819_v60 = vpop.f32.mrb[57].mxu1 }
0x1080   :  { %v8686_v13 = vpop.f32.mrb[58].mxu1 }
0x1081   :  { %8689 = vst [vmem:[#allocation18] sm:$0x3] %v8684_v63  ;;  %v9820_v14 = vpop.f32.mrb[59].mxu1 }
0x1082   :  { %11040 = shalt.err (!%p11037_p12)
}
0x1083   :  { %s11041_s16 = scalar_lea.hbm %s15316_s17, 32 }
0x1084   :  { %p11042_p13 = scmp.ne.s32.totalorder %s15316_s17, %s11041_s16  ;;  %p11045_p0 = scmp.lt.u32.totalorder %s11041_s16, %s15316_s17 }
0x1086   :  { %p11047_p1 = pnand %p11045_p0, %p11042_p13 }
0x1088   :  { %11050 = shalt.err (!%p11047_p1)
}
0x1089   :  { %8699 = dma.vmem_to_hbm [thread:$0]  %s8697_s26, 32, %s15316_s17, [#allocation6]  }
0x108a   :  { %11061 = dma.done.wait [#allocation6], 32  }
0x108b   :  { %11062 = vsyncadd [#allocation6], 4294967264 }
0x108c   :  { %8703 = vsyncpa [#allocation5], 1 }
0x108d   :  { %8704 = vsyncpa [#allocation8], 1 }
0x108e   :  { %8705 = vsyncpa [#allocation11], 1 }
0x108f   :  { %8706 = vsyncpa [#allocation14], 1 }
0x1090   :  { %8707 = vsyncpa [#allocation17], 1 }
0x1091   :  { %8708 = vsyncpa [#allocation6], 1 }

</bundles_post_ra>
